<compile_context>
chip_gen: v6e
topology: v6e:2x2x1
jax: 0.10.0
libtpu: 0.0.40
codegen_flags: <defaults>
</compile_context>

<pallas_src>
import math

import jax
import jax.numpy as jnp
import numpy as np
from jax.experimental import pallas as pl
from jax.experimental.pallas import tpu as pltpu

_BIG = 1e8  # same-label penalty; must dominate every real squared distance.


def _make_kernel(n_sub, msub):
    """Kernel for one (column-tile, row-tile) step of the masked pairwise-min EDT."""

    def kernel(a_ref, b_ref, tar_ref, inp_ref, out_ref, min_ref):
        i = pl.program_id(1)  # row / reduction index (last grid dim)

        @pl.when(i == 0)
        def _init():
            min_ref[...] = jnp.full(min_ref.shape, jnp.inf, dtype=min_ref.dtype)

        b = b_ref[...]  # [K, TILE]; resident across the reduction axis

        def body(m, carry):
            r0 = pl.multiple_of(m * msub, msub)
            # [MSUB, TILE] = squared distance + BIG*[same label] — one MXU matmul.
            s = jnp.dot(a_ref[pl.ds(r0, msub), :], b,
                        preferred_element_type=jnp.float32,
                        precision=jax.lax.Precision.HIGHEST)
            # Pure-VPU elementwise mins over 8-row groups -> (8, TILE); no XLU here.
            s8 = s[0:8, :]
            for r in range(1, msub // 8):
                s8 = jnp.minimum(s8, s[8 * r:8 * (r + 1), :])
            min_ref[...] = jnp.minimum(min_ref[...], s8)
            return carry

        jax.lax.fori_loop(0, n_sub, body, 0, unroll=True)

        @pl.when(i == pl.num_programs(1) - 1)
        def _finalize():
            # Single cross-sublane (XLU) reduce, once per column tile.
            dmin = jnp.min(min_ref[...], axis=0, keepdims=True)      # [1, TILE]
            d = jnp.sqrt(jnp.maximum(dmin, 0.0))                     # dist to opposite label
            t = tar_ref[...]
            signed = jnp.where(t != 0.0, 1.0 - d, d)                 # inside*(~t) - (outside-1)*t
            out_ref[...] = inp_ref[...] * signed                     # padded cols: inp == 0

    return kernel


def dist_loss(inp, tar, *, tile=512, msub=128):
    shape = inp.shape
    assert tar.shape == shape, "input and target must have the same shape"
    P = math.prod(shape)
    D = len(shape)

    # Contraction width: D coords + ||c||^2 + 1 + two penalty slots, padded to /8.
    K = max(8, pl.cdiv(D + 4, 8) * 8)

    # The penalty must dominate any legitimate squared distance (review concern #3).
    max_sq = float(sum((s - 1) ** 2 for s in shape))
    assert max_sq * 10.0 < _BIG, "spatial extent too large for the _BIG penalty margin"

    # Lane-aligned tiles, clamped for small problems.
    assert tile % 128 == 0 and msub % 8 == 0
    tile = max(128, min(tile, pl.cdiv(P, 128) * 128))
    if tile % msub != 0:
        msub = 128
    msub = min(msub, tile)
    n_sub = tile // msub

    P_pad = pl.cdiv(P, tile) * tile
    pad = P_pad - P
    n_blk = P_pad // tile

    # ---- O(P) glue: build the augmented matmul operands --------------------------
    coords = jnp.asarray(np.indices(shape, dtype=np.float32).reshape(D, P))  # [D, P]
    norms = jnp.sum(coords * coords, axis=0)                                 # [P]
    # TODO(synk): the reference's `~tarn` is a uint8 bitwise NOT (255/254); we implement
    # the clearly intended logical negation of the binary mask instead.
    t = (tar.reshape(P) != 0).astype(jnp.float32)
    x = inp.reshape(P).astype(jnp.float32)

    coords_p = jnp.pad(coords, ((0, 0), (0, pad)))
    norms_p = jnp.pad(norms, (0, pad))
    t_p = jnp.pad(t, (0, pad))
    x_p = jnp.pad(x, (0, pad))                       # padded columns contribute 0
    valid_p = jnp.pad(jnp.ones((P,), jnp.float32), (0, pad))

    # Row operand A: padded rows get BIG in BOTH penalty slots -> never the minimum.
    pen_fg = _BIG * jnp.where(valid_p > 0, t_p, 1.0)
    pen_bg = _BIG * jnp.where(valid_p > 0, 1.0 - t_p, 1.0)
    ones_p = jnp.ones((P_pad,), jnp.float32)
    a_cols = [coords_p[d] for d in range(D)] + [norms_p, ones_p, pen_fg, pen_bg]
    A = jnp.pad(jnp.stack(a_cols, axis=1), ((0, 0), (0, K - (D + 4))))       # [P_pad, K]

    # Column operand B.
    b_rows = [-2.0 * coords_p[d] for d in range(D)] + [ones_p, norms_p, t_p, 1.0 - t_p]
    B = jnp.pad(jnp.stack(b_rows, axis=0), ((0, K - (D + 4)), (0, 0)))       # [K, P_pad]

    tar_row = t_p.reshape(1, P_pad)
    inp_row = x_p.reshape(1, P_pad)

    # Advisory cost: A re-streamed once per column tile, B/target/pred/out once each.
    flops = 2 * K * P_pad * P_pad + 2 * P_pad * P_pad
    bytes_accessed = (n_blk * P_pad * K * 4      # A re-stream
                      + P_pad * K * 4            # B
                      + 3 * P_pad * 4)           # target, prediction, output

    contrib = pl.pallas_call(
        _make_kernel(n_sub, msub),
        out_shape=jax.ShapeDtypeStruct((1, P_pad), jnp.float32),
        grid=(n_blk, n_blk),                                  # (columns j, rows i)
        in_specs=[
            pl.BlockSpec((tile, K), lambda j, i: (i, 0)),     # A: row tile (re-streamed)
            pl.BlockSpec((K, tile), lambda j, i: (0, j)),     # B: column tile (resident)
            pl.BlockSpec((1, tile), lambda j, i: (0, j)),     # target (columns)
            pl.BlockSpec((1, tile), lambda j, i: (0, j)),     # prediction (columns)
        ],
        out_specs=pl.BlockSpec((1, tile), lambda j, i: (0, j)),
        scratch_shapes=[pltpu.VMEM((8, tile), jnp.float32)],  # running-min accumulator
        compiler_params=pltpu.CompilerParams(
            dimension_semantics=("parallel", "arbitrary")),
        cost_estimate=pl.CostEstimate(flops=int(flops), transcendentals=0,
                                      bytes_accessed=int(bytes_accessed)),
    )(A, B, tar_row, inp_row)

    # TODO(synk): degenerate all-zero / all-one targets (scipy EDT with no opposite-label
    # pixels) are not reproduced; they hit the BIG penalty path instead.
    return jnp.sum(contrib) / jnp.float32(P)


if __name__ == "__main__":
    key = jax.random.PRNGKey(0)
    k1, k2 = jax.random.split(key)

    # (N, H, W) — the reference treats the batch axis as a spatial axis of the EDT.
    # P = 1152 -> P_pad = 1536, grid (3, 3): exercises padding + multi-step reduction.
    shape = (2, 24, 24)
    inp = jax.nn.sigmoid(jax.random.normal(k1, shape, dtype=jnp.float32))   # soft preds
    tar = (jax.random.uniform(k2, shape) > 0.5).astype(jnp.float32)         # binary target

    loss = dist_loss(inp, tar)
    jax.block_until_ready(loss)
    print("KERNEL_OK")
</pallas_src>

<mosaic_0001>
module attributes {stable_mosaic.version = 11 : i64} {
  func.func @kernel(%arg0: i32, %arg1: i32, %arg2: memref<512x8xf32, #tpu.memory_space<vmem>>, %arg3: memref<8x512xf32, #tpu.memory_space<vmem>>, %arg4: memref<1x512xf32, #tpu.memory_space<vmem>>, %arg5: memref<1x512xf32, #tpu.memory_space<vmem>>, %arg6: memref<1x512xf32, #tpu.memory_space<vmem>>, %arg7: memref<8x512xf32, #tpu.memory_space<vmem>>) attributes {dimension_semantics = [#tpu.dimension_semantics<parallel>, #tpu.dimension_semantics<arbitrary>], iteration_bounds = array<i64: 3, 3>, scalar_prefetch = 0 : i64, scratch_operands = 1 : i64, tpu.core_type = #tpu.core_type<tc>, window_params = [{transform_indices = @transform_0, window_bounds = array<i64: 512, 8>}, {transform_indices = @transform_1, window_bounds = array<i64: 8, 512>}, {transform_indices = @transform_2, window_bounds = array<i64: 1, 512>}, {transform_indices = @transform_3, window_bounds = array<i64: 1, 512>}, {transform_indices = @transform_4, window_bounds = array<i64: 1, 512>}]} {
    %c0_i32 = arith.constant 0 : i32
    %0 = arith.cmpi eq, %arg1, %c0_i32 : i32
    %1 = arith.extui %0 : i1 to i32
    %c0_i32_0 = arith.constant 0 : i32
    %2 = arith.cmpi ne, %1, %c0_i32_0 : i32
    scf.if %2 {
      %cst_31 = arith.constant 0x7F800000 : f32
      %163 = vector.broadcast %cst_31 : f32 to vector<8x512xf32>
      %c0_32 = arith.constant 0 : index
      %c0_33 = arith.constant 0 : index
      %164 = vector.load %arg7[%c0_32, %c0_33] : memref<8x512xf32, #tpu.memory_space<vmem>>, vector<8x512xf32>
      tpu.vector_store %arg7[%c0_32, %c0_33], %163 {strides = array<i32>} : memref<8x512xf32, #tpu.memory_space<vmem>>, vector<8x512xf32>,
    } else {
    }
    %c0 = arith.constant 0 : index
    %c0_1 = arith.constant 0 : index
    %3 = vector.load %arg3[%c0, %c0_1] : memref<8x512xf32, #tpu.memory_space<vmem>>, vector<8x512xf32>
    %c0_i32_2 = arith.constant 0 : i32
    %c128_i32 = arith.constant 128 : i32
    %4 = arith.muli %c0_i32_2, %c128_i32 : i32
    %5 = tpu.assume_multiple %4, 128 : i32
    %6 = arith.index_cast %5 : i32 to index
    %c0_3 = arith.constant 0 : index
    %7 = vector.load %arg2[%6, %c0_3] : memref<512x8xf32, #tpu.memory_space<vmem>>, vector<128x8xf32>
    %cst = arith.constant dense<0.000000e+00> : vector<128x512xf32>
    %8 = tpu.matmul %7, %3, %cst {dimension_numbers = #tpu.dot_dimension_numbers<[1], [0], [0], [1], [0, 0, 1, 1], [], []>, precision = #tpu.contract_precision<fp32>} : vector<128x8xf32>, vector<8x512xf32>, vector<128x512xf32> -> vector<128x512xf32>
    %9 = vector.extract_strided_slice %8 {offsets = [0, 0], sizes = [8, 512], strides = [1, 1]} : vector<128x512xf32> to vector<8x512xf32>
    %10 = vector.extract_strided_slice %8 {offsets = [8, 0], sizes = [8, 512], strides = [1, 1]} : vector<128x512xf32> to vector<8x512xf32>
    %11 = arith.minimumf %9, %10 : vector<8x512xf32>
    %12 = vector.extract_strided_slice %8 {offsets = [16, 0], sizes = [8, 512], strides = [1, 1]} : vector<128x512xf32> to vector<8x512xf32>
    %13 = arith.minimumf %11, %12 : vector<8x512xf32>
    %14 = vector.extract_strided_slice %8 {offsets = [24, 0], sizes = [8, 512], strides = [1, 1]} : vector<128x512xf32> to vector<8x512xf32>
    %15 = arith.minimumf %13, %14 : vector<8x512xf32>
    %16 = vector.extract_strided_slice %8 {offsets = [32, 0], sizes = [8, 512], strides = [1, 1]} : vector<128x512xf32> to vector<8x512xf32>
    %17 = arith.minimumf %15, %16 : vector<8x512xf32>
    %18 = vector.extract_strided_slice %8 {offsets = [40, 0], sizes = [8, 512], strides = [1, 1]} : vector<128x512xf32> to vector<8x512xf32>
    %19 = arith.minimumf %17, %18 : vector<8x512xf32>
    %20 = vector.extract_strided_slice %8 {offsets = [48, 0], sizes = [8, 512], strides = [1, 1]} : vector<128x512xf32> to vector<8x512xf32>
    %21 = arith.minimumf %19, %20 : vector<8x512xf32>
    %22 = vector.extract_strided_slice %8 {offsets = [56, 0], sizes = [8, 512], strides = [1, 1]} : vector<128x512xf32> to vector<8x512xf32>
    %23 = arith.minimumf %21, %22 : vector<8x512xf32>
    %24 = vector.extract_strided_slice %8 {offsets = [64, 0], sizes = [8, 512], strides = [1, 1]} : vector<128x512xf32> to vector<8x512xf32>
    %25 = arith.minimumf %23, %24 : vector<8x512xf32>
    %26 = vector.extract_strided_slice %8 {offsets = [72, 0], sizes = [8, 512], strides = [1, 1]} : vector<128x512xf32> to vector<8x512xf32>
    %27 = arith.minimumf %25, %26 : vector<8x512xf32>
    %28 = vector.extract_strided_slice %8 {offsets = [80, 0], sizes = [8, 512], strides = [1, 1]} : vector<128x512xf32> to vector<8x512xf32>
    %29 = arith.minimumf %27, %28 : vector<8x512xf32>
    %30 = vector.extract_strided_slice %8 {offsets = [88, 0], sizes = [8, 512], strides = [1, 1]} : vector<128x512xf32> to vector<8x512xf32>
    %31 = arith.minimumf %29, %30 : vector<8x512xf32>
    %32 = vector.extract_strided_slice %8 {offsets = [96, 0], sizes = [8, 512], strides = [1, 1]} : vector<128x512xf32> to vector<8x512xf32>
    %33 = arith.minimumf %31, %32 : vector<8x512xf32>
    %34 = vector.extract_strided_slice %8 {offsets = [104, 0], sizes = [8, 512], strides = [1, 1]} : vector<128x512xf32> to vector<8x512xf32>
    %35 = arith.minimumf %33, %34 : vector<8x512xf32>
    %36 = vector.extract_strided_slice %8 {offsets = [112, 0], sizes = [8, 512], strides = [1, 1]} : vector<128x512xf32> to vector<8x512xf32>
    %37 = arith.minimumf %35, %36 : vector<8x512xf32>
    %38 = vector.extract_strided_slice %8 {offsets = [120, 0], sizes = [8, 512], strides = [1, 1]} : vector<128x512xf32> to vector<8x512xf32>
    %39 = arith.minimumf %37, %38 : vector<8x512xf32>
    %c0_4 = arith.constant 0 : index
    %c0_5 = arith.constant 0 : index
    %40 = vector.load %arg7[%c0_4, %c0_5] : memref<8x512xf32, #tpu.memory_space<vmem>>, vector<8x512xf32>
    %41 = arith.minimumf %40, %39 : vector<8x512xf32>
    %c0_6 = arith.constant 0 : index
    %c0_7 = arith.constant 0 : index
    %42 = vector.load %arg7[%c0_6, %c0_7] : memref<8x512xf32, #tpu.memory_space<vmem>>, vector<8x512xf32>
    tpu.vector_store %arg7[%c0_6, %c0_7], %41 {strides = array<i32>} : memref<8x512xf32, #tpu.memory_space<vmem>>, vector<8x512xf32>,
    %c1_i32 = arith.constant 1 : i32
    %c128_i32_8 = arith.constant 128 : i32
    %43 = arith.muli %c1_i32, %c128_i32_8 : i32
    %44 = tpu.assume_multiple %43, 128 : i32
    %45 = arith.index_cast %44 : i32 to index
    %c0_9 = arith.constant 0 : index
    %46 = vector.load %arg2[%45, %c0_9] : memref<512x8xf32, #tpu.memory_space<vmem>>, vector<128x8xf32>
    %cst_10 = arith.constant dense<0.000000e+00> : vector<128x512xf32>
    %47 = tpu.matmul %46, %3, %cst_10 {dimension_numbers = #tpu.dot_dimension_numbers<[1], [0], [0], [1], [0, 0, 1, 1], [], []>, precision = #tpu.contract_precision<fp32>} : vector<128x8xf32>, vector<8x512xf32>, vector<128x512xf32> -> vector<128x512xf32>
    %48 = vector.extract_strided_slice %47 {offsets = [0, 0], sizes = [8, 512], strides = [1, 1]} : vector<128x512xf32> to vector<8x512xf32>
    %49 = vector.extract_strided_slice %47 {offsets = [8, 0], sizes = [8, 512], strides = [1, 1]} : vector<128x512xf32> to vector<8x512xf32>
    %50 = arith.minimumf %48, %49 : vector<8x512xf32>
    %51 = vector.extract_strided_slice %47 {offsets = [16, 0], sizes = [8, 512], strides = [1, 1]} : vector<128x512xf32> to vector<8x512xf32>
    %52 = arith.minimumf %50, %51 : vector<8x512xf32>
    %53 = vector.extract_strided_slice %47 {offsets = [24, 0], sizes = [8, 512], strides = [1, 1]} : vector<128x512xf32> to vector<8x512xf32>
    %54 = arith.minimumf %52, %53 : vector<8x512xf32>
    %55 = vector.extract_strided_slice %47 {offsets = [32, 0], sizes = [8, 512], strides = [1, 1]} : vector<128x512xf32> to vector<8x512xf32>
    %56 = arith.minimumf %54, %55 : vector<8x512xf32>
    %57 = vector.extract_strided_slice %47 {offsets = [40, 0], sizes = [8, 512], strides = [1, 1]} : vector<128x512xf32> to vector<8x512xf32>
    %58 = arith.minimumf %56, %57 : vector<8x512xf32>
    %59 = vector.extract_strided_slice %47 {offsets = [48, 0], sizes = [8, 512], strides = [1, 1]} : vector<128x512xf32> to vector<8x512xf32>
    %60 = arith.minimumf %58, %59 : vector<8x512xf32>
    %61 = vector.extract_strided_slice %47 {offsets = [56, 0], sizes = [8, 512], strides = [1, 1]} : vector<128x512xf32> to vector<8x512xf32>
    %62 = arith.minimumf %60, %61 : vector<8x512xf32>
    %63 = vector.extract_strided_slice %47 {offsets = [64, 0], sizes = [8, 512], strides = [1, 1]} : vector<128x512xf32> to vector<8x512xf32>
    %64 = arith.minimumf %62, %63 : vector<8x512xf32>
    %65 = vector.extract_strided_slice %47 {offsets = [72, 0], sizes = [8, 512], strides = [1, 1]} : vector<128x512xf32> to vector<8x512xf32>
    %66 = arith.minimumf %64, %65 : vector<8x512xf32>
    %67 = vector.extract_strided_slice %47 {offsets = [80, 0], sizes = [8, 512], strides = [1, 1]} : vector<128x512xf32> to vector<8x512xf32>
    %68 = arith.minimumf %66, %67 : vector<8x512xf32>
    %69 = vector.extract_strided_slice %47 {offsets = [88, 0], sizes = [8, 512], strides = [1, 1]} : vector<128x512xf32> to vector<8x512xf32>
    %70 = arith.minimumf %68, %69 : vector<8x512xf32>
    %71 = vector.extract_strided_slice %47 {offsets = [96, 0], sizes = [8, 512], strides = [1, 1]} : vector<128x512xf32> to vector<8x512xf32>
    %72 = arith.minimumf %70, %71 : vector<8x512xf32>
    %73 = vector.extract_strided_slice %47 {offsets = [104, 0], sizes = [8, 512], strides = [1, 1]} : vector<128x512xf32> to vector<8x512xf32>
    %74 = arith.minimumf %72, %73 : vector<8x512xf32>
    %75 = vector.extract_strided_slice %47 {offsets = [112, 0], sizes = [8, 512], strides = [1, 1]} : vector<128x512xf32> to vector<8x512xf32>
    %76 = arith.minimumf %74, %75 : vector<8x512xf32>
    %77 = vector.extract_strided_slice %47 {offsets = [120, 0], sizes = [8, 512], strides = [1, 1]} : vector<128x512xf32> to vector<8x512xf32>
    %78 = arith.minimumf %76, %77 : vector<8x512xf32>
    %c0_11 = arith.constant 0 : index
    %c0_12 = arith.constant 0 : index
    %79 = vector.load %arg7[%c0_11, %c0_12] : memref<8x512xf32, #tpu.memory_space<vmem>>, vector<8x512xf32>
    %80 = arith.minimumf %79, %78 : vector<8x512xf32>
    %c0_13 = arith.constant 0 : index
    %c0_14 = arith.constant 0 : index
    %81 = vector.load %arg7[%c0_13, %c0_14] : memref<8x512xf32, #tpu.memory_space<vmem>>, vector<8x512xf32>
    tpu.vector_store %arg7[%c0_13, %c0_14], %80 {strides = array<i32>} : memref<8x512xf32, #tpu.memory_space<vmem>>, vector<8x512xf32>,
    %c2_i32 = arith.constant 2 : i32
    %c128_i32_15 = arith.constant 128 : i32
    %82 = arith.muli %c2_i32, %c128_i32_15 : i32
    %83 = tpu.assume_multiple %82, 128 : i32
    %84 = arith.index_cast %83 : i32 to index
    %c0_16 = arith.constant 0 : index
    %85 = vector.load %arg2[%84, %c0_16] : memref<512x8xf32, #tpu.memory_space<vmem>>, vector<128x8xf32>
    %cst_17 = arith.constant dense<0.000000e+00> : vector<128x512xf32>
    %86 = tpu.matmul %85, %3, %cst_17 {dimension_numbers = #tpu.dot_dimension_numbers<[1], [0], [0], [1], [0, 0, 1, 1], [], []>, precision = #tpu.contract_precision<fp32>} : vector<128x8xf32>, vector<8x512xf32>, vector<128x512xf32> -> vector<128x512xf32>
    %87 = vector.extract_strided_slice %86 {offsets = [0, 0], sizes = [8, 512], strides = [1, 1]} : vector<128x512xf32> to vector<8x512xf32>
    %88 = vector.extract_strided_slice %86 {offsets = [8, 0], sizes = [8, 512], strides = [1, 1]} : vector<128x512xf32> to vector<8x512xf32>
    %89 = arith.minimumf %87, %88 : vector<8x512xf32>
    %90 = vector.extract_strided_slice %86 {offsets = [16, 0], sizes = [8, 512], strides = [1, 1]} : vector<128x512xf32> to vector<8x512xf32>
    %91 = arith.minimumf %89, %90 : vector<8x512xf32>
    %92 = vector.extract_strided_slice %86 {offsets = [24, 0], sizes = [8, 512], strides = [1, 1]} : vector<128x512xf32> to vector<8x512xf32>
    %93 = arith.minimumf %91, %92 : vector<8x512xf32>
    %94 = vector.extract_strided_slice %86 {offsets = [32, 0], sizes = [8, 512], strides = [1, 1]} : vector<128x512xf32> to vector<8x512xf32>
    %95 = arith.minimumf %93, %94 : vector<8x512xf32>
    %96 = vector.extract_strided_slice %86 {offsets = [40, 0], sizes = [8, 512], strides = [1, 1]} : vector<128x512xf32> to vector<8x512xf32>
    %97 = arith.minimumf %95, %96 : vector<8x512xf32>
    %98 = vector.extract_strided_slice %86 {offsets = [48, 0], sizes = [8, 512], strides = [1, 1]} : vector<128x512xf32> to vector<8x512xf32>
    %99 = arith.minimumf %97, %98 : vector<8x512xf32>
    %100 = vector.extract_strided_slice %86 {offsets = [56, 0], sizes = [8, 512], strides = [1, 1]} : vector<128x512xf32> to vector<8x512xf32>
    %101 = arith.minimumf %99, %100 : vector<8x512xf32>
    %102 = vector.extract_strided_slice %86 {offsets = [64, 0], sizes = [8, 512], strides = [1, 1]} : vector<128x512xf32> to vector<8x512xf32>
    %103 = arith.minimumf %101, %102 : vector<8x512xf32>
    %104 = vector.extract_strided_slice %86 {offsets = [72, 0], sizes = [8, 512], strides = [1, 1]} : vector<128x512xf32> to vector<8x512xf32>
    %105 = arith.minimumf %103, %104 : vector<8x512xf32>
    %106 = vector.extract_strided_slice %86 {offsets = [80, 0], sizes = [8, 512], strides = [1, 1]} : vector<128x512xf32> to vector<8x512xf32>
    %107 = arith.minimumf %105, %106 : vector<8x512xf32>
    %108 = vector.extract_strided_slice %86 {offsets = [88, 0], sizes = [8, 512], strides = [1, 1]} : vector<128x512xf32> to vector<8x512xf32>
    %109 = arith.minimumf %107, %108 : vector<8x512xf32>
    %110 = vector.extract_strided_slice %86 {offsets = [96, 0], sizes = [8, 512], strides = [1, 1]} : vector<128x512xf32> to vector<8x512xf32>
    %111 = arith.minimumf %109, %110 : vector<8x512xf32>
    %112 = vector.extract_strided_slice %86 {offsets = [104, 0], sizes = [8, 512], strides = [1, 1]} : vector<128x512xf32> to vector<8x512xf32>
    %113 = arith.minimumf %111, %112 : vector<8x512xf32>
    %114 = vector.extract_strided_slice %86 {offsets = [112, 0], sizes = [8, 512], strides = [1, 1]} : vector<128x512xf32> to vector<8x512xf32>
    %115 = arith.minimumf %113, %114 : vector<8x512xf32>
    %116 = vector.extract_strided_slice %86 {offsets = [120, 0], sizes = [8, 512], strides = [1, 1]} : vector<128x512xf32> to vector<8x512xf32>
    %117 = arith.minimumf %115, %116 : vector<8x512xf32>
    %c0_18 = arith.constant 0 : index
    %c0_19 = arith.constant 0 : index
    %118 = vector.load %arg7[%c0_18, %c0_19] : memref<8x512xf32, #tpu.memory_space<vmem>>, vector<8x512xf32>
    %119 = arith.minimumf %118, %117 : vector<8x512xf32>
    %c0_20 = arith.constant 0 : index
    %c0_21 = arith.constant 0 : index
    %120 = vector.load %arg7[%c0_20, %c0_21] : memref<8x512xf32, #tpu.memory_space<vmem>>, vector<8x512xf32>
    tpu.vector_store %arg7[%c0_20, %c0_21], %119 {strides = array<i32>} : memref<8x512xf32, #tpu.memory_space<vmem>>, vector<8x512xf32>,
    %c3_i32 = arith.constant 3 : i32
    %c128_i32_22 = arith.constant 128 : i32
    %121 = arith.muli %c3_i32, %c128_i32_22 : i32
    %122 = tpu.assume_multiple %121, 128 : i32
    %123 = arith.index_cast %122 : i32 to index
    %c0_23 = arith.constant 0 : index
    %124 = vector.load %arg2[%123, %c0_23] : memref<512x8xf32, #tpu.memory_space<vmem>>, vector<128x8xf32>
    %cst_24 = arith.constant dense<0.000000e+00> : vector<128x512xf32>
    %125 = tpu.matmul %124, %3, %cst_24 {dimension_numbers = #tpu.dot_dimension_numbers<[1], [0], [0], [1], [0, 0, 1, 1], [], []>, precision = #tpu.contract_precision<fp32>} : vector<128x8xf32>, vector<8x512xf32>, vector<128x512xf32> -> vector<128x512xf32>
    %126 = vector.extract_strided_slice %125 {offsets = [0, 0], sizes = [8, 512], strides = [1, 1]} : vector<128x512xf32> to vector<8x512xf32>
    %127 = vector.extract_strided_slice %125 {offsets = [8, 0], sizes = [8, 512], strides = [1, 1]} : vector<128x512xf32> to vector<8x512xf32>
    %128 = arith.minimumf %126, %127 : vector<8x512xf32>
    %129 = vector.extract_strided_slice %125 {offsets = [16, 0], sizes = [8, 512], strides = [1, 1]} : vector<128x512xf32> to vector<8x512xf32>
    %130 = arith.minimumf %128, %129 : vector<8x512xf32>
    %131 = vector.extract_strided_slice %125 {offsets = [24, 0], sizes = [8, 512], strides = [1, 1]} : vector<128x512xf32> to vector<8x512xf32>
    %132 = arith.minimumf %130, %131 : vector<8x512xf32>
    %133 = vector.extract_strided_slice %125 {offsets = [32, 0], sizes = [8, 512], strides = [1, 1]} : vector<128x512xf32> to vector<8x512xf32>
    %134 = arith.minimumf %132, %133 : vector<8x512xf32>
    %135 = vector.extract_strided_slice %125 {offsets = [40, 0], sizes = [8, 512], strides = [1, 1]} : vector<128x512xf32> to vector<8x512xf32>
    %136 = arith.minimumf %134, %135 : vector<8x512xf32>
    %137 = vector.extract_strided_slice %125 {offsets = [48, 0], sizes = [8, 512], strides = [1, 1]} : vector<128x512xf32> to vector<8x512xf32>
    %138 = arith.minimumf %136, %137 : vector<8x512xf32>
    %139 = vector.extract_strided_slice %125 {offsets = [56, 0], sizes = [8, 512], strides = [1, 1]} : vector<128x512xf32> to vector<8x512xf32>
    %140 = arith.minimumf %138, %139 : vector<8x512xf32>
    %141 = vector.extract_strided_slice %125 {offsets = [64, 0], sizes = [8, 512], strides = [1, 1]} : vector<128x512xf32> to vector<8x512xf32>
    %142 = arith.minimumf %140, %141 : vector<8x512xf32>
    %143 = vector.extract_strided_slice %125 {offsets = [72, 0], sizes = [8, 512], strides = [1, 1]} : vector<128x512xf32> to vector<8x512xf32>
    %144 = arith.minimumf %142, %143 : vector<8x512xf32>
    %145 = vector.extract_strided_slice %125 {offsets = [80, 0], sizes = [8, 512], strides = [1, 1]} : vector<128x512xf32> to vector<8x512xf32>
    %146 = arith.minimumf %144, %145 : vector<8x512xf32>
    %147 = vector.extract_strided_slice %125 {offsets = [88, 0], sizes = [8, 512], strides = [1, 1]} : vector<128x512xf32> to vector<8x512xf32>
    %148 = arith.minimumf %146, %147 : vector<8x512xf32>
    %149 = vector.extract_strided_slice %125 {offsets = [96, 0], sizes = [8, 512], strides = [1, 1]} : vector<128x512xf32> to vector<8x512xf32>
    %150 = arith.minimumf %148, %149 : vector<8x512xf32>
    %151 = vector.extract_strided_slice %125 {offsets = [104, 0], sizes = [8, 512], strides = [1, 1]} : vector<128x512xf32> to vector<8x512xf32>
    %152 = arith.minimumf %150, %151 : vector<8x512xf32>
    %153 = vector.extract_strided_slice %125 {offsets = [112, 0], sizes = [8, 512], strides = [1, 1]} : vector<128x512xf32> to vector<8x512xf32>
    %154 = arith.minimumf %152, %153 : vector<8x512xf32>
    %155 = vector.extract_strided_slice %125 {offsets = [120, 0], sizes = [8, 512], strides = [1, 1]} : vector<128x512xf32> to vector<8x512xf32>
    %156 = arith.minimumf %154, %155 : vector<8x512xf32>
    %c0_25 = arith.constant 0 : index
    %c0_26 = arith.constant 0 : index
    %157 = vector.load %arg7[%c0_25, %c0_26] : memref<8x512xf32, #tpu.memory_space<vmem>>, vector<8x512xf32>
    %158 = arith.minimumf %157, %156 : vector<8x512xf32>
    %c0_27 = arith.constant 0 : index
    %c0_28 = arith.constant 0 : index
    %159 = vector.load %arg7[%c0_27, %c0_28] : memref<8x512xf32, #tpu.memory_space<vmem>>, vector<8x512xf32>
    tpu.vector_store %arg7[%c0_27, %c0_28], %158 {strides = array<i32>} : memref<8x512xf32, #tpu.memory_space<vmem>>, vector<8x512xf32>,
    %c4_i32 = arith.constant 4 : i32
    %c2_i32_29 = arith.constant 2 : i32
    %160 = arith.cmpi eq, %arg1, %c2_i32_29 : i32
    %161 = arith.extui %160 : i1 to i32
    %c0_i32_30 = arith.constant 0 : i32
    %162 = arith.cmpi ne, %161, %c0_i32_30 : i32
    scf.if %162 {
      %c0_31 = arith.constant 0 : index
      %c0_32 = arith.constant 0 : index
      %163 = vector.load %arg7[%c0_31, %c0_32] : memref<8x512xf32, #tpu.memory_space<vmem>>, vector<8x512xf32>
      %cst_33 = arith.constant dense<0x7F800000> : vector<512xf32>
      %164 = vector.multi_reduction <minimumf>, %163, %cst_33 [0] : vector<8x512xf32> to vector<512xf32>
      %165 = vector.shape_cast %164 : vector<512xf32> to vector<1x512xf32>
      %cst_34 = arith.constant 0.000000e+00 : f32
      %166 = vector.broadcast %cst_34 : f32 to vector<1x512xf32>
      %167 = arith.maximumf %165, %166 : vector<1x512xf32>
      %168 = math.sqrt %167 : vector<1x512xf32>
      %c0_35 = arith.constant 0 : index
      %c0_36 = arith.constant 0 : index
      %169 = vector.load %arg4[%c0_35, %c0_36] : memref<1x512xf32, #tpu.memory_space<vmem>>, vector<1x512xf32>
      %cst_37 = arith.constant 0.000000e+00 : f32
      %170 = vector.broadcast %cst_37 : f32 to vector<1x512xf32>
      %171 = arith.cmpf one, %169, %170 : vector<1x512xf32>
      %cst_38 = arith.constant 1.000000e+00 : f32
      %172 = vector.broadcast %cst_38 : f32 to vector<1x512xf32>
      %173 = arith.subf %172, %168 : vector<1x512xf32>
      %174 = arith.select %171, %173, %168 : vector<1x512xi1>, vector<1x512xf32>
      %c0_39 = arith.constant 0 : index
      %c0_40 = arith.constant 0 : index
      %175 = vector.load %arg5[%c0_39, %c0_40] : memref<1x512xf32, #tpu.memory_space<vmem>>, vector<1x512xf32>
      %176 = arith.mulf %175, %174 : vector<1x512xf32>
      %c0_41 = arith.constant 0 : index
      %c0_42 = arith.constant 0 : index
      %177 = vector.load %arg6[%c0_41, %c0_42] : memref<1x512xf32, #tpu.memory_space<vmem>>, vector<1x512xf32>
      tpu.vector_store %arg6[%c0_41, %c0_42], %176 {strides = array<i32>} : memref<1x512xf32, #tpu.memory_space<vmem>>, vector<1x512xf32>,
    } else {
    }
    return
  }
  func.func @transform_0(%arg0: i32, %arg1: i32) -> (i32, i32) {
    %c0_i32 = arith.constant 0 : i32
    %c0_i32_0 = arith.constant 0 : i32
    return %arg1, %c0_i32 : i32, i32
  }
  func.func @transform_1(%arg0: i32, %arg1: i32) -> (i32, i32) {
    %c0_i32 = arith.constant 0 : i32
    %c0_i32_0 = arith.constant 0 : i32
    return %c0_i32, %arg0 : i32, i32
  }
  func.func @transform_2(%arg0: i32, %arg1: i32) -> (i32, i32) {
    %c0_i32 = arith.constant 0 : i32
    %c0_i32_0 = arith.constant 0 : i32
    return %c0_i32, %arg0 : i32, i32
  }
  func.func @transform_3(%arg0: i32, %arg1: i32) -> (i32, i32) {
    %c0_i32 = arith.constant 0 : i32
    %c0_i32_0 = arith.constant 0 : i32
    return %c0_i32, %arg0 : i32, i32
  }
  func.func @transform_4(%arg0: i32, %arg1: i32) -> (i32, i32) {
    %c0_i32 = arith.constant 0 : i32
    %c0_i32_0 = arith.constant 0 : i32
    return %c0_i32, %arg0 : i32, i32
  }
}

</mosaic_0001>

<bundles_post_ra>
// kernel: tpu_custom_call.1
= control target key start
LH: loop header
LB: loop body
LE: loop exit
PB: predicated region body
PF: predicated region fallthrough
CT: control target
= control target key end

     0   :  { %9 = vsyncpa [#allocation4], 0  ;;  %s15329_s0 = inlined_call_operand.vmem [shape: f32[1536,8], index: 0, kind: input, shape index: {}]   ;;  %s15330_s1 = inlined_call_operand.vmem [shape: f32[8,1536], index: 1, kind: input, shape index: {}]   ;;  %s15331_s2 = inlined_call_operand.vmem [shape: f32[1,1536], index: 2, kind: input, shape index: {}]   ;;  %s15332_s3 = inlined_call_operand.vmem [shape: f32[1,1536], index: 3, kind: input, shape index: {}]   ;;  %s15333_s4 = inlined_call_operand.hbm [shape: f32[1,1536], index: 4, kind: output, shape index: {}]  }
   0x1   :  { %11 = vsyncpa [#allocation4 + $0x1], 0  ;;  %s10955_s15 = smov 0   ;;  %s10957_s16 = smov 0  }
   0x2   :  { %s10959_s17 = smov 0   ;;  %s10961_s18 = smov 0  }
   0x3   :  { %s10963_s19 = smov 0   ;;  %s10965_s20 = smov 0  }
   0x4   :  { %s10967_s21 = smov 0   ;;  %s10969_s22 = smov 0  }
   0x5 LB: > { %s10682_s23 = sadd.s32 4294967295, %s10924_s22   ;;  %s10683_s24 = sadd.s32 4294967294, %s10924_s22   ;;  %s10924_s22 = sphi %s10969_s22, %s17_s22   ;;  %s10920_s21 = sphi %s10967_s21, %s16282_s21   ;;  %s10916_s20 = sphi %s10965_s20, %s16281_s20   ;;  %s10912_s19 = sphi %s10963_s19, %s16280_s19   ;;  %s10908_s18 = sphi %s10961_s18, %s16279_s18   ;;  %s10904_s17 = sphi %s10959_s17, %s16278_s17   ;;  %s10900_s16 = sphi %s10957_s16, %s16277_s16   ;;  %s10896_s15 = sphi %s10955_s15, %s16276_s15  }
   0x6   : > { %s26_s25 = sadd.s32 1, %s10916_s20  ;;  %s29_s26 = sadd.s32 1, %s10920_s21 }
   0x7   : > { %p27_p0 = scmp.ge.s32.totalorder %s26_s25, 3  ;;  %p150_p1 = scmp.ne.s32.totalorder %s10904_s17, %s10900_s16 }
   0x8   : > { %p151_p2 = scmp.eq.s32.totalorder %s10682_s23, 8  ;;  %p156_p4 = scmp.ne.s32.totalorder %s10900_s16, %s10896_s15 }
   0x9   : > { %s16284_s25 = smov (%p27_p0, %s26_s25), 0  ;;  %s16286_s26 = smov (!%p27_p0, %s29_s26), %s10920_s21 }
   0xa   : > { %15696 = sst [smem:[#allocation6_spill]] %s16284_s25  ;;  %p11004_p3 = por %p151_p2, %p150_p1 }
   0xb   : > { %p31_p5 = scmp.ge.s32.totalorder %s16286_s26, 3  ;;  %p157_p6 = scmp.eq.s32.totalorder %s10683_s24, 8 }
   0xc   : > { %p10686_p7 = scmp.ge.s32.totalorder %s10924_s22, 1  ;;  %p209_p8 = scmp.lt.s32.totalorder %s10924_s22, 10 }
   0xd   : > { %s16288_s26 = smov (%p31_p5, %s16286_s26), 0  ;;  %p11014_p9 = por %p157_p6, %p156_p4 }
   0xe   : > { %15698 = sst [smem:[#allocation7_spill]] %s16288_s26  ;;  %p210_p10 = pnand %p10686_p7, %p209_p8 }
   0xf   : > { %s137_s29 = ssub.s32 %s10920_s21, %s16288_s26  ;;  %s140_s30 = sadd.s32 1, %s10904_s17 }
  0x10   : > { %p138_p11 = scmp.eq.s32.totalorder %s137_s29, 0  ;;  %213 = sbr.rel (%p210_p10) target bundleno = 1863 (0x747), region = 36 }
  0x12   : > { %s11022_s5 = scalar_select %p138_p11, %s10904_s17, %s140_s30  }
  0x15   : > { %s15334_s6 = sand.u32 1, %s10900_s16   ;;  %s10688_s7 = sshll.u32 %s10908_s18, 6 }
  0x16   : > { %s11028_s8 = sshll.u32 %s15334_s6, 2  ;;  %p249_p12 = scmp.lt.s32.totalorder %s10688_s7, 191 }
  0x17   : > { %s10690_s9 = sshll.u32 %s10912_s19, 2  ;;  %s247_s11 = scalar_lea.vmem [#allocation3], %s11028_s8 }
  0x18   : > { %s16290_s7 = smov (!%p249_p12, %s10688_s7), 191  ;;  %p255_p13 = scmp.lt.s32.totalorder %s10690_s9, 11 }
  0x19   : > { %s10689_s10 = sshll.u32 %s16290_s7, 3  ;;  %p10694_p0 = scmp.ne.s32.totalorder %s10908_s18, 0 }
  0x1a   : > { %s11034_s13 = scalar_lea.vmem %s15329_s0, %s10689_s10  ;;  %s16292_s9 = smov (!%p255_p13, %s10690_s9), 11 }
  0x1b   : > { %s10691_s14 = sshll.u32 %s16292_s9, 3  ;;  %s263_s29 = scalar_lea.vmem %s15331_s2, %s16292_s9 }
  0x1c   : > { %s11046_s26 = scalar_lea.vmem %s15330_s1, %s10691_s14  ;;  %s268_s10 = scalar_lea.vmem %s15332_s3, %s16292_s9 }
  0x1d   : > { %274 = sbr.rel (%p10694_p0) target bundleno = 37 (0x25), region = 40 }
  0x22   : > { %v10926_v0 = vmov inf  }
  0x23   : > { %275 = vst [vmem:[#allocation2 + $0x10] sm:$0xff] %v10926_v0  ;;  %276 = vst [vmem:[#allocation2] sm:$0xff] %v10926_v0 }
  0x24   : > { %277 = vst [vmem:[#allocation2 + $0x18] sm:$0xff] %v10926_v0  ;;  %278 = vst [vmem:[#allocation2 + $0x8] sm:$0xff] %v10926_v0 }
  0x25 PF: > { %v280_v1 = vld [vmem:[%s11046_s26 + $0x8] sm:$0xff]  ;;  %v279_v2 = vld [vmem:[%s11046_s26] sm:$0xff]  ;;  %vm299_vm0 = vcmask 64512   ;;  %v15417_v6 = vmov 0.0   ;;  %v285_v9 = vld [vmem:[%s11034_s13 + $0x10] sm:$0xff]  ;;  %p10743_p1 = scmp.ne.s32.totalorder %s10908_s18, 2 }
  0x26   : > { %v283_v3 = vld [vmem:[%s11034_s13] sm:$0xff]  ;;  %v11057_v4 = vand.u32 4294901760, %v280_v1  ;;  %v11059_v5 = vand.u32 4294901760, %v279_v2  ;;  %414 = vmatprep.mubr.f32.mxu0 %v15417_v6  ;;  %665 = vmatprep.mubr.f32.mxu1 %v15417_v6  ;;  %v284_v8 = vld [vmem:[%s11034_s13 + $0x8] sm:$0xff]  ;;  %v286_v10 = vld [vmem:[%s11034_s13 + $0x18] sm:$0xff]  ;;  %v307_v13 = vsel %vm299_vm0, %v285_v9, 0 }
  0x27   : > { %v301_v7 = vsel %vm299_vm0, %v283_v3, 0  ;;  %v304_v12 = vsel %vm299_vm0, %v284_v8, 0  ;;  %v310_v14 = vsel %vm299_vm0, %v286_v10, 0  ;;  %v287_v15 = vld [vmem:[%s11034_s13 + $0x20] sm:$0xff]  ;;  %v11082_v19 = vand.u32 4294901760, %v307_v13  ;;  %v288_v23 = vld [vmem:[%s11034_s13 + $0x28] sm:$0xff] }
  0x28   : > { %15700 = vst [vmem:[#allocation8_spill] sm:$0xff] %v11057_v4  ;;  %15701 = vst [vmem:[#allocation9_spill] sm:$0xff] %v11059_v5  ;;  %v11067_v11 = vand.u32 4294901760, %v301_v7  ;;  %379 = vmatprep.subr.mxu0 %v11057_v4  ;;  %v11075_v16 = vsub.f32 %v280_v1, %v11057_v4  ;;  %v11078_v17 = vsub.f32 %v279_v2, %v11059_v5  ;;  %v11080_v18 = vand.u32 4294901760, %v304_v12  ;;  %v289_v41 = vld [vmem:[%s11034_s13 + $0x30] sm:$0xff]  ;;  %v290_v48 = vld [vmem:[%s11034_s13 + $0x38] sm:$0xff] }
  0x29   : > { %15706 = vst [vmem:[#allocation14_spill] sm:$0xff] %v11082_v19  ;;  %381 = vmatpush1.msra.mxu0 %v11059_v5  ;;  %v11088_v21 = vand.u32 4294901760, %v310_v14  ;;  %v313_v22 = vsel %vm299_vm0, %v287_v15, 0  ;;  %v11103_v27 = vsub.f32 %v307_v13, %v11082_v19  ;;  %v316_v32 = vsel %vm299_vm0, %v288_v23, 0  ;;  %v291_v55 = vld [vmem:[%s11034_s13 + $0x40] sm:$0xff]  ;;  %v292_v62 = vld [vmem:[%s11034_s13 + $0x48] sm:$0xff] }
  0x2a   : > { %15702 = vst [vmem:[#allocation10_spill] sm:$0xff] %v11067_v11  ;;  %15703 = vst [vmem:[#allocation11_spill] sm:$0xff] %v11075_v16  ;;  %v11086_v20 = vsub.f32 %v301_v7, %v11067_v11  ;;  %v11093_v24 = vand.u32 4294901760, %v11075_v16  ;;  %810 = vmatprep.subr.mxu0 %v11075_v16  ;;  %v11097_v25 = vand.u32 4294901760, %v11078_v17  ;;  %v11100_v26 = vsub.f32 %v304_v12, %v11080_v18  ;;  %v293_v7 = vld [vmem:[%s11034_s13 + $0x50] sm:$0xff] }
  0x2b   : > { %15704 = vst [vmem:[#allocation12_spill] sm:$0xff] %v11078_v17  ;;  %15705 = vst [vmem:[#allocation13_spill] sm:$0xff] %v11080_v18  ;;  %v11119_v34 = vand.u32 4294901760, %v11103_v27  ;;  %v11122_v35 = vsub.f32 %v310_v14, %v11088_v21  ;;  %v11124_v36 = vand.u32 4294901760, %v313_v22  ;;  %v11136_v42 = vand.u32 4294901760, %v316_v32 }
  0x2c   : > { %15707 = vst [vmem:[#allocation15_spill] sm:$0xff] %v11088_v21  ;;  %15708 = vst [vmem:[#allocation16_spill] sm:$0xff] %v11093_v24  ;;  %v11106_v28 = vand.u32 4294901760, %v11086_v20  ;;  %v624_v29 = vsub.f32 %v11075_v16, %v11093_v24  ;;  %v630_v30 = vsub.f32 %v11078_v17, %v11097_v25  ;;  %v11113_v31 = vand.u32 4294901760, %v11100_v26 }
  0x2d   : > { %15709 = vst [vmem:[#allocation17_spill] sm:$0xff] %v11097_v25  ;;  %15710 = vst [vmem:[#allocation18_spill] sm:$0xff] %v11124_v36  ;;  %v440_v44 = vsub.f32 %v11103_v27, %v11119_v34  ;;  %v11145_v45 = vand.u32 4294901760, %v11122_v35  ;;  %v11148_v46 = vsub.f32 %v313_v22, %v11124_v36  ;;  %v319_v47 = vsel %vm299_vm0, %v289_v41, 0  ;;  %v294_v22 = vld [vmem:[%s11034_s13 + $0x58] sm:$0xff]  ;;  %v295_v41 = vld [vmem:[%s11034_s13 + $0x60] sm:$0xff] }
  0x2e   : > { %v418_v33 = vsub.f32 %v11086_v20, %v11106_v28  ;;  %v11126_v37 = vand.u32 4294901760, %v624_v29  ;;  %v11128_v38 = vand.u32 4294901760, %v630_v30  ;;  %v429_v39 = vsub.f32 %v11100_v26, %v11113_v31  ;;  %15713 = vst [vmem:[#allocation21_spill] sm:$0xff] %v11136_v42 }
  0x2f   : > { %v11159_v49 = vsub.f32 %v316_v32, %v11136_v42  ;;  %v11162_v50 = vand.u32 4294901760, %v440_v44  ;;  %v451_v51 = vsub.f32 %v11122_v35, %v11145_v45  ;;  %v11167_v52 = vand.u32 4294901760, %v11148_v46 }
  0x30   : > { %15711 = vst [vmem:[#allocation19_spill] sm:$0xff] %v11126_v37  ;;  %15712 = vst [vmem:[#allocation20_spill] sm:$0xff] %v11128_v38  ;;  %v11132_v40 = vand.u32 4294901760, %v418_v33  ;;  %626 = vmatprep.subr.mxu1 %v11126_v37  ;;  %v11140_v43 = vand.u32 4294901760, %v429_v39  ;;  %v11169_v53 = vand.u32 4294901760, %v319_v47  ;;  %v322_v54 = vsel %vm299_vm0, %v290_v48, 0 }
  0x31   : > { %632 = vmatpush1.msra.mxu1 %v11128_v38  ;;  %v11179_v56 = vand.u32 4294901760, %v11159_v49  ;;  %v11182_v57 = vand.u32 4294901760, %v451_v51  ;;  %v462_v58 = vsub.f32 %v11148_v46, %v11167_v52  ;;  %v11189_v60 = vand.u32 4294901760, %v322_v54 }
  0x32   : > { %420 = vmatmul.mubr.f32.vlgmr.msra.gmra.mxu0 %v11132_v40  ;;  %667 = vmatmul.mubr.f32.vlgmr.msra.gmra.mxu1 %v11067_v11  ;;  %15714 = vst [vmem:[#allocation22_spill] sm:$0xff] %v11169_v53  ;;  %v11187_v59 = vsub.f32 %v319_v47, %v11169_v53  ;;  %v325_v61 = vsel %vm299_vm0, %v291_v55, 0  ;;  %v328_v8 = vsel %vm299_vm0, %v292_v62, 0  ;;  %v331_v10 = vsel %vm299_vm0, %v293_v7, 0 }
  0x33   : > { %813 = vmatpush1.msra.mxu0 %v11078_v17  ;;  %1006 = vmatprep.subr.mxu1 %v11057_v4  ;;  %15715 = vst [vmem:[#allocation23_spill] sm:$0xff] %v11189_v60  ;;  %v473_v63 = vsub.f32 %v11159_v49, %v11179_v56  ;;  %v11199_v0 = vand.u32 4294901760, %v462_v58  ;;  %v11205_v2 = vsub.f32 %v322_v54, %v11189_v60  ;;  %v11207_v3 = vand.u32 4294901760, %v325_v61  ;;  %v296_v58 = vld [vmem:[%s11034_s13 + $0x68] sm:$0xff] }
  0x34   : > { %425 = vmatprep.mubr.f32.mxu0 %v15417_v6  ;;  %1008 = vmatpush1.msra.mxu1 %v11059_v5  ;;  %v11202_v1 = vand.u32 4294901760, %v11187_v59  ;;  %v11226_v15 = vand.u32 4294901760, %v328_v8  ;;  %v11232_v23 = vand.u32 4294901760, %v331_v10  ;;  %v334_v29 = vsel %vm299_vm0, %v294_v22, 0 }
  0x35   : > { %672 = vmatprep.mubr.f32.mxu1 %v15417_v6  ;;  %1219 = vmatprep.subr.mxu0 %v11093_v24  ;;  %15716 = vst [vmem:[#allocation24_spill] sm:$0xff] %v11207_v3  ;;  %v11214_v9 = vand.u32 4294901760, %v473_v63  ;;  %v11221_v13 = vand.u32 4294901760, %v11205_v2  ;;  %v11224_v14 = vsub.f32 %v325_v61, %v11207_v3  ;;  %v11250_v44 = vand.u32 4294901760, %v334_v29 }
  0x36   : > { %431 = vmatmul.mubr.f32.gmra.mxu0 %v11140_v43  ;;  %674 = vmatmul.mubr.f32.gmra.mxu1 %v11080_v18  ;;  %v484_v12 = vsub.f32 %v11187_v59, %v11202_v1  ;;  %15718 = vst [vmem:[#allocation26_spill] sm:$0xff] %v11226_v15  ;;  %15719 = vst [vmem:[#allocation27_spill] sm:$0xff] %v11232_v23  ;;  %v11244_v39 = vsub.f32 %v328_v8, %v11226_v15  ;;  %v337_v47 = vsel %vm299_vm0, %v295_v41, 0 }
  0x37   : > { %436 = vmatprep.mubr.f32.mxu0 %v15417_v6  ;;  %679 = vmatprep.mubr.f32.mxu1 %v15417_v6  ;;  %15717 = vst [vmem:[#allocation25_spill] sm:$0xff] %v11214_v9  ;;  %v495_v32 = vsub.f32 %v11205_v2, %v11221_v13  ;;  %v11241_v33 = vand.u32 4294901760, %v11224_v14  ;;  %15721 = vst [vmem:[#allocation29_spill] sm:$0xff] %v11250_v44  ;;  %v11262_v55 = vsub.f32 %v331_v10, %v11232_v23 }
  0x38   : > { %1400 = vmatprep.subr.mxu1 %v11057_v4  ;;  %v11236_v30 = vand.u32 4294901760, %v484_v12  ;;  %v11259_v54 = vand.u32 4294901760, %v11244_v39  ;;  %v11268_v61 = vand.u32 4294901760, %v337_v47  ;;  %v11279_v8 = vsub.f32 %v334_v29, %v11250_v44  ;;  %v297_v12 = vld [vmem:[%s11034_s13 + $0x70] sm:$0xff] }
  0x39   : > { %v11254_v48 = vand.u32 4294901760, %v495_v32  ;;  %v506_v51 = vsub.f32 %v11224_v14, %v11241_v33  ;;  %v11276_v7 = vand.u32 4294901760, %v11262_v55  ;;  %v340_v10 = vsel %vm299_vm0, %v296_v58, 0 }
  0x3a   : > { %442 = vmatmul.mubr.f32.gmra.mxu0 %v11162_v50  ;;  %681 = vmatmul.mubr.f32.gmra.mxu1 %v11082_v19  ;;  %15720 = vst [vmem:[#allocation28_spill] sm:$0xff] %v11236_v30  ;;  %15723 = vst [vmem:[#allocation31_spill] sm:$0xff] %v11268_v61  ;;  %v517_v63 = vsub.f32 %v11244_v39, %v11259_v54  ;;  %v11287_v22 = vsub.f32 %v337_v47, %v11268_v61  ;;  %v11295_v41 = vand.u32 4294901760, %v11279_v8  ;;  %v298_v47 = vld [vmem:[%s11034_s13 + $0x78] sm:$0xff] }
  0x3b   : > { %447 = vmatprep.mubr.f32.mxu0 %v15417_v6  ;;  %686 = vmatprep.mubr.f32.mxu1 %v15417_v6  ;;  %15722 = vst [vmem:[#allocation30_spill] sm:$0xff] %v11254_v48  ;;  %v11271_v62 = vand.u32 4294901760, %v506_v51  ;;  %15725 = vst [vmem:[#allocation33_spill] sm:$0xff] %v11276_v7  ;;  %v528_v29 = vsub.f32 %v11262_v55, %v11276_v7  ;;  %v11297_v51 = vand.u32 4294901760, %v340_v10  ;;  %v343_v58 = vsel %vm299_vm0, %v297_v12, 0 }
  0x3c   : > { %15726 = vst [vmem:[#allocation34_spill] sm:$0xff] %v11279_v8  ;;  %15727 = vst [vmem:[#allocation35_spill] sm:$0xff] %v11287_v22  ;;  %v11290_v32 = vand.u32 4294901760, %v517_v63  ;;  %v11305_v63 = vand.u32 4294901760, %v11287_v22  ;;  %v539_v17 = vsub.f32 %v11279_v8, %v11295_v41  ;;  %v11315_v38 = vand.u32 4294901760, %v343_v58 }
  0x3d   : > { %15724 = vst [vmem:[#allocation32_spill] sm:$0xff] %v11271_v62  ;;  %15729 = vst [vmem:[#allocation37_spill] sm:$0xff] %v11295_v41  ;;  %v11308_v24 = vand.u32 4294901760, %v528_v29  ;;  %v11313_v16 = vsub.f32 %v340_v10, %v11297_v51  ;;  %v346_v12 = vsel %vm299_vm0, %v298_v47, 0 }
  0x3e   : > { %453 = vmatmul.mubr.f32.gmra.mxu0 %v11182_v57  ;;  %688 = vmatmul.mubr.f32.gmra.mxu1 %v11088_v21  ;;  %15728 = vst [vmem:[#allocation36_spill] sm:$0xff] %v11290_v32  ;;  %15730 = vst [vmem:[#allocation38_spill] sm:$0xff] %v11297_v51  ;;  %v550_v29 = vsub.f32 %v11287_v22, %v11305_v63  ;;  %v11324_v37 = vand.u32 4294901760, %v539_v17  ;;  %v11330_v4 = vsub.f32 %v343_v58, %v11315_v38 }
  0x3f   : > { %458 = vmatprep.mubr.f32.mxu0 %v15417_v6  ;;  %693 = vmatprep.mubr.f32.mxu1 %v15417_v6  ;;  %15731 = vst [vmem:[#allocation39_spill] sm:$0xff] %v11305_v63  ;;  %15732 = vst [vmem:[#allocation40_spill] sm:$0xff] %v11308_v24  ;;  %v11327_v10 = vand.u32 4294901760, %v11313_v16 }
  0x40   : > { %15733 = vst [vmem:[#allocation41_spill] sm:$0xff] %v11313_v16  ;;  %15734 = vst [vmem:[#allocation42_spill] sm:$0xff] %v11315_v38  ;;  %v11338_v47 = vand.u32 4294901760, %v550_v29 }
  0x41   : > { %15735 = vst [vmem:[#allocation43_spill] sm:$0xff] %v11324_v37  ;;  %15736 = vst [vmem:[#allocation44_spill] sm:$0xff] %v11327_v10  ;;  %v561_v17 = vsub.f32 %v11313_v16, %v11327_v10 }
  0x42   : > { %464 = vmatmul.mubr.f32.gmra.mxu0 %v11199_v0  ;;  %695 = vmatmul.mubr.f32.gmra.mxu1 %v11124_v36  ;;  %15737 = vst [vmem:[#allocation45_spill] sm:$0xff] %v11330_v4  ;;  %15738 = vst [vmem:[#allocation46_spill] sm:$0xff] %v11338_v47 }
  0x43   : > { %469 = vmatprep.mubr.f32.mxu0 %v15417_v6  ;;  %700 = vmatprep.mubr.f32.mxu1 %v15417_v6  ;;  %v11353_v29 = vand.u32 4294901760, %v561_v17 }
  0x45   : > { %15741 = vst [vmem:[#allocation49_spill] sm:$0xff] %v11353_v29 }
  0x46   : > { %475 = vmatmul.mubr.f32.gmra.mxu0 %v11214_v9  ;;  %702 = vmatmul.mubr.f32.gmra.mxu1 %v11136_v42 }
  0x47   : > { %480 = vmatprep.mubr.f32.mxu0 %v15417_v6  ;;  %707 = vmatprep.mubr.f32.mxu1 %v15417_v6 }
  0x4a   : > { %486 = vmatmul.mubr.f32.gmra.mxu0 %v11236_v30  ;;  %709 = vmatmul.mubr.f32.gmra.mxu1 %v11169_v53 }
  0x4b   : > { %491 = vmatprep.mubr.f32.mxu0 %v15417_v6  ;;  %714 = vmatprep.mubr.f32.mxu1 %v15417_v6 }
  0x4e   : > { %497 = vmatmul.mubr.f32.gmra.mxu0 %v11254_v48  ;;  %716 = vmatmul.mubr.f32.gmra.mxu1 %v11189_v60 }
  0x4f   : > { %502 = vmatprep.mubr.f32.mxu0 %v15417_v6  ;;  %721 = vmatprep.mubr.f32.mxu1 %v15417_v6 }
  0x52   : > { %508 = vmatmul.mubr.f32.gmra.mxu0 %v11271_v62  ;;  %723 = vmatmul.mubr.f32.gmra.mxu1 %v11207_v3  ;;  %v282_v62 = vld [vmem:[%s11046_s26 + $0x18] sm:$0xff] }
  0x53   : > { %513 = vmatprep.mubr.f32.mxu0 %v15417_v6  ;;  %728 = vmatprep.mubr.f32.mxu1 %v15417_v6  ;;  %v11360_v30 = vand.u32 4294901760, %v282_v62 }
  0x55   : > { %15743 = vst [vmem:[#allocation51_spill] sm:$0xff] %v11360_v30 }
  0x56   : > { %519 = vmatmul.mubr.f32.gmra.mxu0 %v11290_v32  ;;  %730 = vmatmul.mubr.f32.gmra.mxu1 %v11226_v15  ;;  %v11332_v32 = vand.u32 4294901760, %v346_v12 }
  0x57   : > { %524 = vmatprep.mubr.f32.mxu0 %v15417_v6  ;;  %735 = vmatprep.mubr.f32.mxu1 %v15417_v6 }
  0x58   : > { %v11346_v58 = vsub.f32 %v346_v12, %v11332_v32 }
  0x5a   : > { %530 = vmatmul.mubr.f32.gmra.mxu0 %v11308_v24  ;;  %737 = vmatmul.mubr.f32.gmra.mxu1 %v11232_v23  ;;  %v11343_v24 = vand.u32 4294901760, %v11330_v4  ;;  %15740 = vst [vmem:[#allocation48_spill] sm:$0xff] %v11346_v58  ;;  %v11358_v48 = vand.u32 4294901760, %v11346_v58 }
  0x5b   : > { %535 = vmatprep.mubr.f32.mxu0 %v15417_v6  ;;  %742 = vmatprep.mubr.f32.mxu1 %v15417_v6 }
  0x5c   : > { %15739 = vst [vmem:[#allocation47_spill] sm:$0xff] %v11343_v24  ;;  %15742 = vst [vmem:[#allocation50_spill] sm:$0xff] %v11358_v48  ;;  %v583_v17 = vsub.f32 %v11346_v58, %v11358_v48 }
  0x5e   : > { %541 = vmatmul.mubr.f32.gmra.mxu0 %v11324_v37  ;;  %744 = vmatmul.mubr.f32.gmra.mxu1 %v11250_v44  ;;  %v572_v37 = vsub.f32 %v11330_v4, %v11343_v24  ;;  %v11377_v9 = vand.u32 4294901760, %v583_v17  ;;  %v281_v17 = vld [vmem:[%s11046_s26 + $0x10] sm:$0xff] }
  0x5f   : > { %546 = vmatprep.mubr.f32.mxu0 %v15417_v6  ;;  %749 = vmatprep.mubr.f32.mxu1 %v15417_v6 }
  0x60   : > { %v11366_v12 = vand.u32 4294901760, %v572_v37 }
  0x62   : > { %552 = vmatmul.mubr.f32.gmra.mxu0 %v11338_v47  ;;  %751 = vmatmul.mubr.f32.gmra.mxu1 %v11268_v61  ;;  %v11371_v47 = vsub.f32 %v282_v62, %v11360_v30 }
  0x63   : > { %557 = vmatprep.mubr.f32.mxu0 %v15417_v6  ;;  %756 = vmatprep.mubr.f32.mxu1 %v15417_v6 }
  0x64   : > { %15744 = vst [vmem:[#allocation52_spill] sm:$0xff] %v11371_v47 }
  0x66   : > { %563 = vmatmul.mubr.f32.gmra.mxu0 %v11353_v29  ;;  %758 = vmatmul.mubr.f32.gmra.mxu1 %v11297_v51  ;;  %v11380_v29 = vand.u32 4294901760, %v11371_v47 }
  0x67   : > { %568 = vmatprep.mubr.f32.mxu0 %v15417_v6  ;;  %763 = vmatprep.mubr.f32.mxu1 %v15417_v6 }
  0x68   : > { %15745 = vst [vmem:[#allocation53_spill] sm:$0xff] %v11380_v29  ;;  %v1824_v37 = vsub.f32 %v11371_v47, %v11380_v29 }
  0x6a   : > { %574 = vmatmul.mubr.f32.gmra.mxu0 %v11366_v12  ;;  %765 = vmatmul.mubr.f32.gmra.mxu1 %v11315_v38  ;;  %v11392_v62 = vand.u32 4294901760, %v1824_v37  ;;  %v11446_v37 = vand.u32 4294901760, %v281_v17 }
  0x6b   : > { %579 = vmatprep.mubr.f32.mxu0 %v15417_v6  ;;  %770 = vmatprep.mubr.f32.mxu1 %v15417_v6 }
  0x6c   : > { %15746 = vst [vmem:[#allocation54_spill] sm:$0xff] %v11392_v62  ;;  %15747 = vst [vmem:[#allocation55_spill] sm:$0xff] %v11446_v37 }
  0x6e   : > { %585 = vmatmul.mubr.f32.gmra.mxu0 %v11377_v9  ;;  %772 = vmatmul.mubr.f32.gmra.mxu1 %v11332_v32 }
  0x6f   : > { %846 = vmatprep.mubr.f32.mxu0 %v15417_v6  ;;  %1041 = vmatprep.mubr.f32.mxu1 %v15417_v6 }
  0x72   : > { %849 = vmatmul.mubr.f32.vlgmr.msra.gmra.mxu0 %v11086_v20  ;;  %1045 = vmatmul.mubr.f32.vlgmr.msra.gmra.mxu1 %v11106_v28 }
  0x73   : > { %1223 = vmatpush1.msra.mxu0 %v11097_v25  ;;  %1402 = vmatpush1.msra.mxu1 %v11059_v5 }
  0x74   : > { %854 = vmatprep.mubr.f32.mxu0 %v15417_v6  ;;  %1050 = vmatprep.mubr.f32.mxu1 %v15417_v6 }
  0x75   : > { %1579 = vmatprep.subr.mxu0 %v11360_v30  ;;  %1826 = vmatprep.subr.mxu1 %v11392_v62  ;;  %v11453_v62 = vsub.f32 %v281_v17, %v11446_v37 }
  0x76   : > { %857 = vmatmul.mubr.f32.gmra.mxu0 %v11100_v26  ;;  %1054 = vmatmul.mubr.f32.gmra.mxu1 %v11113_v31 }
  0x77   : > { %862 = vmatprep.mubr.f32.mxu0 %v15417_v6  ;;  %1059 = vmatprep.mubr.f32.mxu1 %v15417_v6  ;;  %15748 = vst [vmem:[#allocation56_spill] sm:$0xff] %v11453_v62  ;;  %v11460_v25 = vand.u32 4294901760, %v11453_v62 }
  0x79   : > { %15749 = vst [vmem:[#allocation57_spill] sm:$0xff] %v11460_v25  ;;  %v1830_v17 = vsub.f32 %v11453_v62, %v11460_v25 }
  0x7a   : > { %865 = vmatmul.mubr.f32.gmra.mxu0 %v11103_v27  ;;  %1063 = vmatmul.mubr.f32.gmra.mxu1 %v11119_v34 }
  0x7b   : > { %870 = vmatprep.mubr.f32.mxu0 %v15417_v6  ;;  %1068 = vmatprep.mubr.f32.mxu1 %v15417_v6  ;;  %v11472_v5 = vand.u32 4294901760, %v1830_v17 }
  0x7d   : > { %15750 = vst [vmem:[#allocation58_spill] sm:$0xff] %v11472_v5 }
  0x7e   : > { %873 = vmatmul.mubr.f32.gmra.mxu0 %v11122_v35  ;;  %1072 = vmatmul.mubr.f32.gmra.mxu1 %v11145_v45 }
  0x7f   : > { %878 = vmatprep.mubr.f32.mxu0 %v15417_v6  ;;  %1077 = vmatprep.mubr.f32.mxu1 %v15417_v6 }
  0x82   : > { %881 = vmatmul.mubr.f32.gmra.mxu0 %v11148_v46  ;;  %1081 = vmatmul.mubr.f32.gmra.mxu1 %v11167_v52 }
  0x83   : > { %886 = vmatprep.mubr.f32.mxu0 %v15417_v6  ;;  %1086 = vmatprep.mubr.f32.mxu1 %v15417_v6 }
  0x86   : > { %889 = vmatmul.mubr.f32.gmra.mxu0 %v11159_v49  ;;  %1090 = vmatmul.mubr.f32.gmra.mxu1 %v11179_v56 }
  0x87   : > { %894 = vmatprep.mubr.f32.mxu0 %v15417_v6  ;;  %1095 = vmatprep.mubr.f32.mxu1 %v15417_v6 }
  0x8a   : > { %897 = vmatmul.mubr.f32.gmra.mxu0 %v11187_v59  ;;  %1099 = vmatmul.mubr.f32.gmra.mxu1 %v11202_v1 }
  0x8b   : > { %902 = vmatprep.mubr.f32.mxu0 %v15417_v6  ;;  %1104 = vmatprep.mubr.f32.mxu1 %v15417_v6 }
  0x8e   : > { %905 = vmatmul.mubr.f32.gmra.mxu0 %v11205_v2  ;;  %1108 = vmatmul.mubr.f32.gmra.mxu1 %v11221_v13 }
  0x8f   : > { %910 = vmatprep.mubr.f32.mxu0 %v15417_v6  ;;  %1113 = vmatprep.mubr.f32.mxu1 %v15417_v6 }
  0x92   : > { %913 = vmatmul.mubr.f32.gmra.mxu0 %v11224_v14  ;;  %1117 = vmatmul.mubr.f32.gmra.mxu1 %v11241_v33 }
  0x93   : > { %918 = vmatprep.mubr.f32.mxu0 %v15417_v6  ;;  %1122 = vmatprep.mubr.f32.mxu1 %v15417_v6 }
  0x96   : > { %921 = vmatmul.mubr.f32.gmra.mxu0 %v11244_v39  ;;  %1126 = vmatmul.mubr.f32.gmra.mxu1 %v11259_v54 }
  0x97   : > { %926 = vmatprep.mubr.f32.mxu0 %v15417_v6  ;;  %1131 = vmatprep.mubr.f32.mxu1 %v15417_v6 }
  0x9a   : > { %929 = vmatmul.mubr.f32.gmra.mxu0 %v11262_v55  ;;  %1135 = vmatmul.mubr.f32.gmra.mxu1 %v11276_v7  ;;  %v15759_v7 = vld [vmem:[#allocation46_spill] sm:$0xff] }
  0x9b   : > { %934 = vmatprep.mubr.f32.mxu0 %v15417_v6  ;;  %1140 = vmatprep.mubr.f32.mxu1 %v15417_v6 }
  0x9e   : > { %937 = vmatmul.mubr.f32.gmra.mxu0 %v11279_v8  ;;  %1144 = vmatmul.mubr.f32.gmra.mxu1 %v11295_v41  ;;  %v15756_v41 = vld [vmem:[#allocation40_spill] sm:$0xff]  ;;  %v15757_v8 = vld [vmem:[#allocation43_spill] sm:$0xff] }
  0x9f   : > { %942 = vmatprep.mubr.f32.mxu0 %v15417_v6  ;;  %1149 = vmatprep.mubr.f32.mxu1 %v15417_v6 }
  0xa2   : > { %945 = vmatmul.mubr.f32.gmra.mxu0 %v11287_v22  ;;  %1153 = vmatmul.mubr.f32.gmra.mxu1 %v11305_v63  ;;  %v15754_v63 = vld [vmem:[#allocation32_spill] sm:$0xff] }
  0xa3   : > { %950 = vmatprep.mubr.f32.mxu0 %v15417_v6  ;;  %1158 = vmatprep.mubr.f32.mxu1 %v15417_v6  ;;  %v15755_v22 = vld [vmem:[#allocation36_spill] sm:$0xff] }
  0xa6   : > { %953 = vmatmul.mubr.f32.gmra.mxu0 %v11313_v16  ;;  %1162 = vmatmul.mubr.f32.gmra.mxu1 %v11327_v10  ;;  %v15752_v10 = vld [vmem:[#allocation28_spill] sm:$0xff]  ;;  %v15753_v16 = vld [vmem:[#allocation30_spill] sm:$0xff] }
  0xa7   : > { %958 = vmatprep.mubr.f32.mxu0 %v15417_v6  ;;  %1167 = vmatprep.mubr.f32.mxu1 %v15417_v6 }
  0xaa   : > { %961 = vmatmul.mubr.f32.gmra.mxu0 %v11330_v4  ;;  %1171 = vmatmul.mubr.f32.gmra.mxu1 %v11343_v24 }
  0xab   : > { %966 = vmatprep.mubr.f32.mxu0 %v15417_v6  ;;  %1176 = vmatprep.mubr.f32.mxu1 %v15417_v6 }
  0xae   : > { %969 = vmatmul.mubr.f32.gmra.mxu0 %v11346_v58  ;;  %1180 = vmatmul.mubr.f32.gmra.mxu1 %v11358_v48 }
  0xaf   : > { %1256 = vmatprep.mubr.f32.mxu0 %v15417_v6  ;;  %1435 = vmatprep.mubr.f32.mxu1 %v15417_v6 }
  0xb2   : > { %1258 = vmatmul.mubr.f32.vlgmr.msra.gmra.mxu0 %v11067_v11  ;;  %1437 = vmatmul.mubr.f32.vlgmr.msra.gmra.mxu1 %v11067_v11 }
  0xb3   : > { %1581 = vmatpush1.msra.mxu0 %v11446_v37  ;;  %1832 = vmatpush1.msra.mxu1 %v11472_v5 }
  0xb4   : > { %1263 = vmatprep.mubr.f32.mxu0 %v15417_v6  ;;  %1442 = vmatprep.mubr.f32.mxu1 %v15417_v6 }
  0xb5   : > { %2010 = vmatprep.subr.mxu0 %v11371_v47  ;;  %2206 = vmatprep.subr.mxu1 %v11360_v30 }
  0xb6   : > { %1265 = vmatmul.mubr.f32.gmra.mxu0 %v11080_v18  ;;  %1444 = vmatmul.mubr.f32.gmra.mxu1 %v11080_v18 }
  0xb7   : > { %1270 = vmatprep.mubr.f32.mxu0 %v15417_v6  ;;  %1449 = vmatprep.mubr.f32.mxu1 %v15417_v6 }
  0xba   : > { %1272 = vmatmul.mubr.f32.gmra.mxu0 %v11082_v19  ;;  %1451 = vmatmul.mubr.f32.gmra.mxu1 %v11082_v19 }
  0xbb   : > { %1277 = vmatprep.mubr.f32.mxu0 %v15417_v6  ;;  %1456 = vmatprep.mubr.f32.mxu1 %v15417_v6 }
  0xbe   : > { %1279 = vmatmul.mubr.f32.gmra.mxu0 %v11088_v21  ;;  %1458 = vmatmul.mubr.f32.gmra.mxu1 %v11088_v21 }
  0xbf   : > { %1284 = vmatprep.mubr.f32.mxu0 %v15417_v6  ;;  %1463 = vmatprep.mubr.f32.mxu1 %v15417_v6 }
  0xc2   : > { %1286 = vmatmul.mubr.f32.gmra.mxu0 %v11124_v36  ;;  %1465 = vmatmul.mubr.f32.gmra.mxu1 %v11124_v36 }
  0xc3   : > { %1291 = vmatprep.mubr.f32.mxu0 %v15417_v6  ;;  %1470 = vmatprep.mubr.f32.mxu1 %v15417_v6 }
  0xc6   : > { %1293 = vmatmul.mubr.f32.gmra.mxu0 %v11136_v42  ;;  %1472 = vmatmul.mubr.f32.gmra.mxu1 %v11136_v42 }
  0xc7   : > { %1298 = vmatprep.mubr.f32.mxu0 %v15417_v6  ;;  %1477 = vmatprep.mubr.f32.mxu1 %v15417_v6 }
  0xca   : > { %1300 = vmatmul.mubr.f32.gmra.mxu0 %v11169_v53  ;;  %1479 = vmatmul.mubr.f32.gmra.mxu1 %v11169_v53 }
  0xcb   : > { %1305 = vmatprep.mubr.f32.mxu0 %v15417_v6  ;;  %1484 = vmatprep.mubr.f32.mxu1 %v15417_v6 }
  0xce   : > { %1307 = vmatmul.mubr.f32.gmra.mxu0 %v11189_v60  ;;  %1486 = vmatmul.mubr.f32.gmra.mxu1 %v11189_v60 }
  0xcf   : > { %1312 = vmatprep.mubr.f32.mxu0 %v15417_v6  ;;  %1491 = vmatprep.mubr.f32.mxu1 %v15417_v6 }
  0xd2   : > { %1314 = vmatmul.mubr.f32.gmra.mxu0 %v11207_v3  ;;  %1493 = vmatmul.mubr.f32.gmra.mxu1 %v11207_v3 }
  0xd3   : > { %1319 = vmatprep.mubr.f32.mxu0 %v15417_v6  ;;  %1498 = vmatprep.mubr.f32.mxu1 %v15417_v6 }
  0xd6   : > { %1321 = vmatmul.mubr.f32.gmra.mxu0 %v11226_v15  ;;  %1500 = vmatmul.mubr.f32.gmra.mxu1 %v11226_v15 }
  0xd7   : > { %1326 = vmatprep.mubr.f32.mxu0 %v15417_v6  ;;  %1505 = vmatprep.mubr.f32.mxu1 %v15417_v6 }
  0xda   : > { %1328 = vmatmul.mubr.f32.gmra.mxu0 %v11232_v23  ;;  %1507 = vmatmul.mubr.f32.gmra.mxu1 %v11232_v23 }
  0xdb   : > { %1333 = vmatprep.mubr.f32.mxu0 %v15417_v6  ;;  %1512 = vmatprep.mubr.f32.mxu1 %v15417_v6 }
  0xde   : > { %1335 = vmatmul.mubr.f32.gmra.mxu0 %v11250_v44  ;;  %1514 = vmatmul.mubr.f32.gmra.mxu1 %v11250_v44 }
  0xdf   : > { %1340 = vmatprep.mubr.f32.mxu0 %v15417_v6  ;;  %1519 = vmatprep.mubr.f32.mxu1 %v15417_v6 }
  0xe2   : > { %1342 = vmatmul.mubr.f32.gmra.mxu0 %v11268_v61  ;;  %1521 = vmatmul.mubr.f32.gmra.mxu1 %v11268_v61 }
  0xe3   : > { %1347 = vmatprep.mubr.f32.mxu0 %v15417_v6  ;;  %1526 = vmatprep.mubr.f32.mxu1 %v15417_v6 }
  0xe6   : > { %1349 = vmatmul.mubr.f32.gmra.mxu0 %v11297_v51  ;;  %1528 = vmatmul.mubr.f32.gmra.mxu1 %v11297_v51 }
  0xe7   : > { %1354 = vmatprep.mubr.f32.mxu0 %v15417_v6  ;;  %1533 = vmatprep.mubr.f32.mxu1 %v15417_v6 }
  0xea   : > { %1356 = vmatmul.mubr.f32.gmra.mxu0 %v11315_v38  ;;  %1535 = vmatmul.mubr.f32.gmra.mxu1 %v11315_v38 }
  0xeb   : > { %1361 = vmatprep.mubr.f32.mxu0 %v15417_v6  ;;  %1540 = vmatprep.mubr.f32.mxu1 %v15417_v6 }
  0xee   : > { %1363 = vmatmul.mubr.f32.gmra.mxu0 %v11332_v32  ;;  %1542 = vmatmul.mubr.f32.gmra.mxu1 %v11332_v32 }
  0xef   : > { %1614 = vmatprep.mubr.f32.mxu0 %v15417_v6  ;;  %1865 = vmatprep.mubr.f32.mxu1 %v15417_v6 }
  0xf2   : > { %v421_v17 = vpop.f32.mrf.mxu0  ;;  %1620 = vmatmul.mubr.f32.vlgmr.msra.gmra.mxu0 %v11132_v40  ;;  %v668_v47 = vpop.f32.mrf.mxu1  ;;  %1867 = vmatmul.mubr.f32.vlgmr.msra.gmra.mxu1 %v11067_v11 }
  0xf3   : > { %2013 = vmatpush1.msra.mxu0 %v11453_v62  ;;  %v11545_v5 = vadd.f32 %v668_v47, %v421_v17  ;;  %2208 = vmatpush1.msra.mxu1 %v11446_v37 }
  0xf4   : > { %v423_v48 = vpop.f32.mrf.mxu0  ;;  %1625 = vmatprep.mubr.f32.mxu0 %v15417_v6  ;;  %v670_v58 = vpop.f32.mrf.mxu1  ;;  %1872 = vmatprep.mubr.f32.mxu1 %v15417_v6 }
  0xf5   : > { %2419 = vmatprep.subr.mxu0 %v11380_v29  ;;  %v11551_v24 = vadd.f32 %v670_v58, %v423_v48  ;;  %2600 = vmatprep.subr.mxu1 %v11360_v30 }
  0xf6   : > { %v432_v40 = vpop.f32.mrf.mxu0  ;;  %1631 = vmatmul.mubr.f32.gmra.mxu0 %v11140_v43  ;;  %v675_v62 = vpop.f32.mrf.mxu1  ;;  %1874 = vmatmul.mubr.f32.gmra.mxu1 %v11080_v18  ;;  %v15751_v18 = vld [vmem:[#allocation25_spill] sm:$0xff] }
  0xf7   : > { %1636 = vmatprep.mubr.f32.mxu0 %v15417_v6  ;;  %v11557_v47 = vadd.f32 %v675_v62, %v432_v40  ;;  %1879 = vmatprep.mubr.f32.mxu1 %v15417_v6 }
  0xf8   : > { %v434_v17 = vpop.f32.mrf.mxu0  ;;  %v677_v11 = vpop.f32.mrf.mxu1 }
  0xf9   : > { %v11560_v4 = vadd.f32 %v677_v11, %v434_v17 }
  0xfa   : > { %v443_v48 = vpop.f32.mrf.mxu0  ;;  %1642 = vmatmul.mubr.f32.gmra.mxu0 %v11162_v50  ;;  %v682_v58 = vpop.f32.mrf.mxu1  ;;  %1881 = vmatmul.mubr.f32.gmra.mxu1 %v11082_v19 }
  0xfb   : > { %1647 = vmatprep.mubr.f32.mxu0 %v15417_v6  ;;  %v11565_v43 = vadd.f32 %v682_v58, %v443_v48  ;;  %1886 = vmatprep.mubr.f32.mxu1 %v15417_v6 }
  0xfc   : > { %v445_v29 = vpop.f32.mrf.mxu0  ;;  %v684_v62 = vpop.f32.mrf.mxu1 }
  0xfd   : > { %v11568_v40 = vadd.f32 %v684_v62, %v445_v29 }
  0xfe   : > { %v454_v30 = vpop.f32.mrf.mxu0  ;;  %1653 = vmatmul.mubr.f32.gmra.mxu0 %v11182_v57  ;;  %v689_v11 = vpop.f32.mrf.mxu1  ;;  %1888 = vmatmul.mubr.f32.gmra.mxu1 %v11088_v21 }
  0xff   : > { %1658 = vmatprep.mubr.f32.mxu0 %v15417_v6  ;;  %v11573_v50 = vadd.f32 %v689_v11, %v454_v30  ;;  %1893 = vmatprep.mubr.f32.mxu1 %v15417_v6 }
 0x100   : > { %v456_v17 = vpop.f32.mrf.mxu0  ;;  %v691_v48 = vpop.f32.mrf.mxu1 }
 0x101   : > { %v11576_v58 = vadd.f32 %v691_v48, %v456_v17 }
 0x102   : > { %v465_v19 = vpop.f32.mrf.mxu0  ;;  %1664 = vmatmul.mubr.f32.gmra.mxu0 %v11199_v0  ;;  %v696_v29 = vpop.f32.mrf.mxu1  ;;  %1895 = vmatmul.mubr.f32.gmra.mxu1 %v11124_v36 }
 0x103   : > { %1669 = vmatprep.mubr.f32.mxu0 %v15417_v6  ;;  %v11581_v57 = vadd.f32 %v696_v29, %v465_v19  ;;  %1900 = vmatprep.mubr.f32.mxu1 %v15417_v6 }
 0x104   : > { %v467_v62 = vpop.f32.mrf.mxu0  ;;  %v698_v30 = vpop.f32.mrf.mxu1 }
 0x105   : > { %v11584_v11 = vadd.f32 %v698_v30, %v467_v62 }
 0x106   : > { %v476_v21 = vpop.f32.mrf.mxu0  ;;  %1675 = vmatmul.mubr.f32.gmra.mxu0 %v15751_v18  ;;  %v703_v17 = vpop.f32.mrf.mxu1  ;;  %1902 = vmatmul.mubr.f32.gmra.mxu1 %v11136_v42 }
 0x107   : > { %1680 = vmatprep.mubr.f32.mxu0 %v15417_v6  ;;  %v11589_v0 = vadd.f32 %v703_v17, %v476_v21  ;;  %1907 = vmatprep.mubr.f32.mxu1 %v15417_v6 }
 0x108   : > { %v478_v48 = vpop.f32.mrf.mxu0  ;;  %v705_v19 = vpop.f32.mrf.mxu1 }
 0x109   : > { %v11592_v29 = vadd.f32 %v705_v19, %v478_v48 }
 0x10a   : > { %v487_v36 = vpop.f32.mrf.mxu0  ;;  %1686 = vmatmul.mubr.f32.gmra.mxu0 %v15752_v10  ;;  %v710_v62 = vpop.f32.mrf.mxu1  ;;  %1909 = vmatmul.mubr.f32.gmra.mxu1 %v11169_v53 }
 0x10b   : > { %1691 = vmatprep.mubr.f32.mxu0 %v15417_v6  ;;  %v11597_v18 = vadd.f32 %v710_v62, %v487_v36  ;;  %1914 = vmatprep.mubr.f32.mxu1 %v15417_v6 }
 0x10c   : > { %v489_v30 = vpop.f32.mrf.mxu0  ;;  %v712_v21 = vpop.f32.mrf.mxu1 }
 0x10d   : > { %v11600_v17 = vadd.f32 %v712_v21, %v489_v30 }
 0x10e   : > { %v498_v42 = vpop.f32.mrf.mxu0  ;;  %1697 = vmatmul.mubr.f32.gmra.mxu0 %v15753_v16  ;;  %v717_v48 = vpop.f32.mrf.mxu1  ;;  %1916 = vmatmul.mubr.f32.gmra.mxu1 %v11189_v60 }
 0x10f   : > { %1702 = vmatprep.mubr.f32.mxu0 %v15417_v6  ;;  %v11605_v10 = vadd.f32 %v717_v48, %v498_v42  ;;  %1921 = vmatprep.mubr.f32.mxu1 %v15417_v6 }
 0x110   : > { %v500_v19 = vpop.f32.mrf.mxu0  ;;  %v719_v36 = vpop.f32.mrf.mxu1 }
 0x111   : > { %v11608_v62 = vadd.f32 %v719_v36, %v500_v19 }
 0x112   : > { %v509_v53 = vpop.f32.mrf.mxu0  ;;  %1708 = vmatmul.mubr.f32.gmra.mxu0 %v15754_v63  ;;  %v724_v30 = vpop.f32.mrf.mxu1  ;;  %1923 = vmatmul.mubr.f32.gmra.mxu1 %v11207_v3 }
 0x113   : > { %1713 = vmatprep.mubr.f32.mxu0 %v15417_v6  ;;  %v11613_v16 = vadd.f32 %v724_v30, %v509_v53  ;;  %1928 = vmatprep.mubr.f32.mxu1 %v15417_v6 }
 0x114   : > { %v511_v21 = vpop.f32.mrf.mxu0  ;;  %v726_v42 = vpop.f32.mrf.mxu1 }
 0x115   : > { %v11616_v48 = vadd.f32 %v726_v42, %v511_v21 }
 0x116   : > { %v520_v60 = vpop.f32.mrf.mxu0  ;;  %1719 = vmatmul.mubr.f32.gmra.mxu0 %v15755_v22  ;;  %v731_v19 = vpop.f32.mrf.mxu1  ;;  %1930 = vmatmul.mubr.f32.gmra.mxu1 %v11226_v15 }
 0x117   : > { %1724 = vmatprep.mubr.f32.mxu0 %v15417_v6  ;;  %v11621_v63 = vadd.f32 %v731_v19, %v520_v60  ;;  %1935 = vmatprep.mubr.f32.mxu1 %v15417_v6 }
 0x118   : > { %v522_v36 = vpop.f32.mrf.mxu0  ;;  %v733_v53 = vpop.f32.mrf.mxu1 }
 0x119   : > { %v11624_v30 = vadd.f32 %v733_v53, %v522_v36 }
 0x11a   : > { %v531_v3 = vpop.f32.mrf.mxu0  ;;  %1730 = vmatmul.mubr.f32.gmra.mxu0 %v15756_v41  ;;  %v738_v21 = vpop.f32.mrf.mxu1  ;;  %1937 = vmatmul.mubr.f32.gmra.mxu1 %v11232_v23 }
 0x11b   : > { %1735 = vmatprep.mubr.f32.mxu0 %v15417_v6  ;;  %v11629_v22 = vadd.f32 %v738_v21, %v531_v3  ;;  %1942 = vmatprep.mubr.f32.mxu1 %v15417_v6 }
 0x11c   : > { %v533_v42 = vpop.f32.mrf.mxu0  ;;  %v740_v60 = vpop.f32.mrf.mxu1 }
 0x11d   : > { %v11632_v19 = vadd.f32 %v740_v60, %v533_v42 }
 0x11e   : > { %v542_v15 = vpop.f32.mrf.mxu0  ;;  %1741 = vmatmul.mubr.f32.gmra.mxu0 %v15757_v8  ;;  %v745_v36 = vpop.f32.mrf.mxu1  ;;  %1944 = vmatmul.mubr.f32.gmra.mxu1 %v11250_v44 }
 0x11f   : > { %1746 = vmatprep.mubr.f32.mxu0 %v15417_v6  ;;  %v11637_v41 = vadd.f32 %v745_v36, %v542_v15  ;;  %1949 = vmatprep.mubr.f32.mxu1 %v15417_v6 }
 0x120   : > { %v544_v53 = vpop.f32.mrf.mxu0  ;;  %v747_v3 = vpop.f32.mrf.mxu1 }
 0x121   : > { %15758 = vst [vmem:[#allocation25_spill] sm:$0xff] %v11637_v41  ;;  %v11640_v21 = vadd.f32 %v747_v3, %v544_v53  ;;  %v15760_v41 = vld [vmem:[#allocation49_spill] sm:$0xff] }
 0x122   : > { %v553_v23 = vpop.f32.mrf.mxu0  ;;  %1752 = vmatmul.mubr.f32.gmra.mxu0 %v15759_v7  ;;  %v752_v42 = vpop.f32.mrf.mxu1  ;;  %1951 = vmatmul.mubr.f32.gmra.mxu1 %v11268_v61 }
 0x123   : > { %1757 = vmatprep.mubr.f32.mxu0 %v15417_v6  ;;  %v11645_v8 = vadd.f32 %v752_v42, %v553_v23  ;;  %1956 = vmatprep.mubr.f32.mxu1 %v15417_v6 }
 0x124   : > { %v555_v60 = vpop.f32.mrf.mxu0  ;;  %v754_v15 = vpop.f32.mrf.mxu1 }
 0x125   : > { %v11648_v36 = vadd.f32 %v754_v15, %v555_v60 }
 0x126   : > { %v564_v44 = vpop.f32.mrf.mxu0  ;;  %1763 = vmatmul.mubr.f32.gmra.mxu0 %v15760_v41  ;;  %v759_v53 = vpop.f32.mrf.mxu1  ;;  %1958 = vmatmul.mubr.f32.gmra.mxu1 %v11297_v51 }
 0x127   : > { %1768 = vmatprep.mubr.f32.mxu0 %v15417_v6  ;;  %v11653_v7 = vadd.f32 %v759_v53, %v564_v44  ;;  %1963 = vmatprep.mubr.f32.mxu1 %v15417_v6 }
 0x128   : > { %v566_v3 = vpop.f32.mrf.mxu0  ;;  %v761_v23 = vpop.f32.mrf.mxu1 }
 0x129   : > { %v11656_v42 = vadd.f32 %v761_v23, %v566_v3 }
 0x12a   : > { %v575_v61 = vpop.f32.mrf.mxu0  ;;  %1774 = vmatmul.mubr.f32.gmra.mxu0 %v11366_v12  ;;  %v766_v60 = vpop.f32.mrf.mxu1  ;;  %1965 = vmatmul.mubr.f32.gmra.mxu1 %v11315_v38 }
 0x12b   : > { %1779 = vmatprep.mubr.f32.mxu0 %v15417_v6  ;;  %v11661_v41 = vadd.f32 %v766_v60, %v575_v61  ;;  %1970 = vmatprep.mubr.f32.mxu1 %v15417_v6 }
 0x12c   : > { %v577_v15 = vpop.f32.mrf.mxu0  ;;  %v768_v44 = vpop.f32.mrf.mxu1 }
 0x12d   : > { %v11664_v53 = vadd.f32 %v768_v44, %v577_v15 }
 0x12e   : > { %v586_v51 = vpop.f32.mrf.mxu0  ;;  %1785 = vmatmul.mubr.f32.gmra.mxu0 %v11377_v9  ;;  %v773_v3 = vpop.f32.mrf.mxu1  ;;  %1972 = vmatmul.mubr.f32.gmra.mxu1 %v11332_v32 }
 0x12f   : > { %2046 = vmatprep.mubr.f32.mxu0 %v15417_v6  ;;  %v11669_v12 = vadd.f32 %v773_v3, %v586_v51  ;;  %2241 = vmatprep.mubr.f32.mxu1 %v15417_v6 }
 0x130   : > { %v588_v23 = vpop.f32.mrf.mxu0  ;;  %v775_v61 = vpop.f32.mrf.mxu1 }
 0x131   : > { %v11672_v60 = vadd.f32 %v775_v61, %v588_v23 }
 0x132   : > { %v850_v38 = vpop.f32.mrf.mxu0  ;;  %2049 = vmatmul.mubr.f32.vlgmr.msra.gmra.mxu0 %v11086_v20  ;;  %v1046_v9 = vpop.f32.mrf.mxu1  ;;  %2245 = vmatmul.mubr.f32.vlgmr.msra.gmra.mxu1 %v11106_v28  ;;  %v15761_v20 = vld [vmem:[#allocation8_spill] sm:$0xff] }
 0x133   : > { %v851_v15 = vadd.f32 %v850_v38, %v11545_v5  ;;  %2423 = vmatpush1.msra.mxu0 %v11460_v25  ;;  %2602 = vmatpush1.msra.mxu1 %v11446_v37  ;;  %v15762_v38 = vld [vmem:[#allocation19_spill] sm:$0xff] }
 0x134   : > { %v852_v44 = vpop.f32.mrf.mxu0  ;;  %2054 = vmatprep.mubr.f32.mxu0 %v15417_v6  ;;  %v1048_v23 = vpop.f32.mrf.mxu1  ;;  %2250 = vmatprep.mubr.f32.mxu1 %v15417_v6 }
 0x135   : > { %v11680_v51 = vadd.f32 %v1046_v9, %v851_v15  ;;  %v853_v3 = vadd.f32 %v852_v44, %v11551_v24  ;;  %2916 = vmatprep.subr.mxu0 %v15761_v20  ;;  %3163 = vmatprep.subr.mxu1 %v15762_v38 }
 0x136   : > { %v858_v5 = vpop.f32.mrf.mxu0  ;;  %2057 = vmatmul.mubr.f32.gmra.mxu0 %v11100_v26  ;;  %v1055_v25 = vpop.f32.mrf.mxu1  ;;  %2254 = vmatmul.mubr.f32.gmra.mxu1 %v11113_v31 }
 0x137   : > { %v11687_v28 = vadd.f32 %v1048_v23, %v853_v3  ;;  %v859_v61 = vadd.f32 %v858_v5, %v11557_v47  ;;  %2062 = vmatprep.mubr.f32.mxu0 %v15417_v6  ;;  %2259 = vmatprep.mubr.f32.mxu1 %v15417_v6 }
 0x138   : > { %v860_v24 = vpop.f32.mrf.mxu0  ;;  %v1057_v44 = vpop.f32.mrf.mxu1 }
 0x139   : > { %v11693_v15 = vadd.f32 %v1055_v25, %v859_v61  ;;  %v861_v9 = vadd.f32 %v860_v24, %v11560_v4 }
 0x13a   : > { %v866_v26 = vpop.f32.mrf.mxu0  ;;  %2065 = vmatmul.mubr.f32.gmra.mxu0 %v11103_v27  ;;  %v1064_v23 = vpop.f32.mrf.mxu1  ;;  %2263 = vmatmul.mubr.f32.gmra.mxu1 %v11119_v34 }
 0x13b   : > { %v11697_v3 = vadd.f32 %v1057_v44, %v861_v9  ;;  %v867_v47 = vadd.f32 %v866_v26, %v11565_v43  ;;  %2070 = vmatprep.mubr.f32.mxu0 %v15417_v6  ;;  %2268 = vmatprep.mubr.f32.mxu1 %v15417_v6 }
 0x13c   : > { %v868_v31 = vpop.f32.mrf.mxu0  ;;  %v1066_v5 = vpop.f32.mrf.mxu1 }
 0x13d   : > { %v11703_v25 = vadd.f32 %v1064_v23, %v867_v47  ;;  %v869_v4 = vadd.f32 %v868_v31, %v11568_v40 }
 0x13e   : > { %v874_v61 = vpop.f32.mrf.mxu0  ;;  %2073 = vmatmul.mubr.f32.gmra.mxu0 %v11122_v35  ;;  %v1073_v24 = vpop.f32.mrf.mxu1  ;;  %2272 = vmatmul.mubr.f32.gmra.mxu1 %v11145_v45 }
 0x13f   : > { %v11707_v27 = vadd.f32 %v1066_v5, %v869_v4  ;;  %v875_v43 = vadd.f32 %v874_v61, %v11573_v50  ;;  %2078 = vmatprep.mubr.f32.mxu0 %v15417_v6  ;;  %2277 = vmatprep.mubr.f32.mxu1 %v15417_v6 }
 0x140   : > { %v876_v34 = vpop.f32.mrf.mxu0  ;;  %v1075_v44 = vpop.f32.mrf.mxu1 }
 0x141   : > { %v11713_v9 = vadd.f32 %v1073_v24, %v875_v43  ;;  %v877_v40 = vadd.f32 %v876_v34, %v11576_v58 }
 0x142   : > { %v882_v26 = vpop.f32.mrf.mxu0  ;;  %2081 = vmatmul.mubr.f32.gmra.mxu0 %v11148_v46  ;;  %v1082_v47 = vpop.f32.mrf.mxu1  ;;  %2281 = vmatmul.mubr.f32.gmra.mxu1 %v11167_v52 }
 0x143   : > { %v11717_v35 = vadd.f32 %v1075_v44, %v877_v40  ;;  %v883_v50 = vadd.f32 %v882_v26, %v11581_v57  ;;  %2086 = vmatprep.mubr.f32.mxu0 %v15417_v6  ;;  %2286 = vmatprep.mubr.f32.mxu1 %v15417_v6 }
 0x144   : > { %v884_v45 = vpop.f32.mrf.mxu0  ;;  %v1084_v31 = vpop.f32.mrf.mxu1 }
 0x145   : > { %v11723_v23 = vadd.f32 %v1082_v47, %v883_v50  ;;  %v885_v58 = vadd.f32 %v884_v45, %v11584_v11 }
 0x146   : > { %v890_v4 = vpop.f32.mrf.mxu0  ;;  %2089 = vmatmul.mubr.f32.gmra.mxu0 %v11159_v49  ;;  %v1091_v5 = vpop.f32.mrf.mxu1  ;;  %2290 = vmatmul.mubr.f32.gmra.mxu1 %v11179_v56 }
 0x147   : > { %v11727_v46 = vadd.f32 %v1084_v31, %v885_v58  ;;  %v891_v57 = vadd.f32 %v890_v4, %v11589_v0  ;;  %2094 = vmatprep.mubr.f32.mxu0 %v15417_v6  ;;  %2295 = vmatprep.mubr.f32.mxu1 %v15417_v6 }
 0x148   : > { %v892_v52 = vpop.f32.mrf.mxu0  ;;  %v1093_v43 = vpop.f32.mrf.mxu1 }
 0x149   : > { %v11733_v61 = vadd.f32 %v1091_v5, %v891_v57  ;;  %v893_v11 = vadd.f32 %v892_v52, %v11592_v29 }
 0x14a   : > { %v898_v24 = vpop.f32.mrf.mxu0  ;;  %2097 = vmatmul.mubr.f32.gmra.mxu0 %v11187_v59  ;;  %v1100_v34 = vpop.f32.mrf.mxu1  ;;  %2299 = vmatmul.mubr.f32.gmra.mxu1 %v11202_v1 }
 0x14b   : > { %v11737_v49 = vadd.f32 %v1093_v43, %v893_v11  ;;  %v899_v0 = vadd.f32 %v898_v24, %v11597_v18  ;;  %2102 = vmatprep.mubr.f32.mxu0 %v15417_v6  ;;  %2304 = vmatprep.mubr.f32.mxu1 %v15417_v6 }
 0x14c   : > { %v900_v56 = vpop.f32.mrf.mxu0  ;;  %v1102_v44 = vpop.f32.mrf.mxu1 }
 0x14d   : > { %v11743_v40 = vadd.f32 %v1100_v34, %v899_v0  ;;  %v901_v29 = vadd.f32 %v900_v56, %v11600_v17  ;;  %v15763_v34 = vld [vmem:[#allocation33_spill] sm:$0xff] }
 0x14e   : > { %v906_v26 = vpop.f32.mrf.mxu0  ;;  %2105 = vmatmul.mubr.f32.gmra.mxu0 %v11205_v2  ;;  %v1109_v50 = vpop.f32.mrf.mxu1  ;;  %2308 = vmatmul.mubr.f32.gmra.mxu1 %v11221_v13 }
 0x14f   : > { %v11747_v59 = vadd.f32 %v1102_v44, %v901_v29  ;;  %v907_v18 = vadd.f32 %v906_v26, %v11605_v10  ;;  %2110 = vmatprep.mubr.f32.mxu0 %v15417_v6  ;;  %2313 = vmatprep.mubr.f32.mxu1 %v15417_v6  ;;  %v15764_v26 = vld [vmem:[#allocation34_spill] sm:$0xff] }
 0x150   : > { %v908_v1 = vpop.f32.mrf.mxu0  ;;  %v1111_v45 = vpop.f32.mrf.mxu1 }
 0x151   : > { %v11753_v47 = vadd.f32 %v1109_v50, %v907_v18  ;;  %v909_v17 = vadd.f32 %v908_v1, %v11608_v62  ;;  %v15765_v18 = vld [vmem:[#allocation25_spill] sm:$0xff] }
 0x152   : > { %v914_v58 = vpop.f32.mrf.mxu0  ;;  %2113 = vmatmul.mubr.f32.gmra.mxu0 %v11224_v14  ;;  %v1118_v31 = vpop.f32.mrf.mxu1  ;;  %2317 = vmatmul.mubr.f32.gmra.mxu1 %v11241_v33  ;;  %v15766_v1 = vld [vmem:[#allocation37_spill] sm:$0xff] }
 0x153   : > { %v11757_v2 = vadd.f32 %v1111_v45, %v909_v17  ;;  %v915_v10 = vadd.f32 %v914_v58, %v11613_v16  ;;  %2118 = vmatprep.mubr.f32.mxu0 %v15417_v6  ;;  %2322 = vmatprep.mubr.f32.mxu1 %v15417_v6 }
 0x154   : > { %v916_v13 = vpop.f32.mrf.mxu0  ;;  %v1120_v57 = vpop.f32.mrf.mxu1 }
 0x155   : > { %v11763_v4 = vadd.f32 %v1118_v31, %v915_v10  ;;  %v917_v62 = vadd.f32 %v916_v13, %v11616_v48  ;;  %v15767_v31 = vld [vmem:[#allocation35_spill] sm:$0xff] }
 0x156   : > { %v922_v5 = vpop.f32.mrf.mxu0  ;;  %2121 = vmatmul.mubr.f32.gmra.mxu0 %v11244_v39  ;;  %v1127_v52 = vpop.f32.mrf.mxu1  ;;  %2326 = vmatmul.mubr.f32.gmra.mxu1 %v11259_v54 }
 0x157   : > { %v11767_v14 = vadd.f32 %v1120_v57, %v917_v62  ;;  %v923_v16 = vadd.f32 %v922_v5, %v11621_v63  ;;  %2126 = vmatprep.mubr.f32.mxu0 %v15417_v6  ;;  %2331 = vmatprep.mubr.f32.mxu1 %v15417_v6  ;;  %v15768_v5 = vld [vmem:[#allocation39_spill] sm:$0xff] }
 0x158   : > { %v924_v33 = vpop.f32.mrf.mxu0  ;;  %v1129_v43 = vpop.f32.mrf.mxu1 }
 0x159   : > { %v11773_v11 = vadd.f32 %v1127_v52, %v923_v16  ;;  %v925_v48 = vadd.f32 %v924_v33, %v11624_v30 }
 0x15a   : > { %v930_v24 = vpop.f32.mrf.mxu0  ;;  %2129 = vmatmul.mubr.f32.gmra.mxu0 %v11262_v55  ;;  %v1136_v0 = vpop.f32.mrf.mxu1  ;;  %2335 = vmatmul.mubr.f32.gmra.mxu1 %v15763_v34 }
 0x15b   : > { %v11777_v39 = vadd.f32 %v1129_v43, %v925_v48  ;;  %v931_v63 = vadd.f32 %v930_v24, %v11629_v22  ;;  %2134 = vmatprep.mubr.f32.mxu0 %v15417_v6  ;;  %2340 = vmatprep.mubr.f32.mxu1 %v15417_v6  ;;  %v15769_v43 = vld [vmem:[#allocation41_spill] sm:$0xff] }
 0x15c   : > { %v932_v54 = vpop.f32.mrf.mxu0  ;;  %v1138_v29 = vpop.f32.mrf.mxu1 }
 0x15d   : > { %v11783_v56 = vadd.f32 %v1136_v0, %v931_v63  ;;  %v933_v30 = vadd.f32 %v932_v54, %v11632_v19  ;;  %v15770_v0 = vld [vmem:[#allocation44_spill] sm:$0xff] }
 0x15e   : > { %v938_v44 = vpop.f32.mrf.mxu0  ;;  %2137 = vmatmul.mubr.f32.gmra.mxu0 %v15764_v26  ;;  %v1145_v50 = vpop.f32.mrf.mxu1  ;;  %2344 = vmatmul.mubr.f32.gmra.mxu1 %v15766_v1  ;;  %v15773_v1 = vld [vmem:[#allocation48_spill] sm:$0xff] }
 0x15f   : > { %v11787_v55 = vadd.f32 %v1138_v29, %v933_v30  ;;  %v939_v22 = vadd.f32 %v938_v44, %v15765_v18  ;;  %2142 = vmatprep.mubr.f32.mxu0 %v15417_v6  ;;  %2349 = vmatprep.mubr.f32.mxu1 %v15417_v6  ;;  %v15771_v44 = vld [vmem:[#allocation45_spill] sm:$0xff]  ;;  %v15772_v18 = vld [vmem:[#allocation47_spill] sm:$0xff] }
 0x160   : > { %v940_v17 = vpop.f32.mrf.mxu0  ;;  %v1147_v58 = vpop.f32.mrf.mxu1 }
 0x161   : > { %v11793_v45 = vadd.f32 %v1145_v50, %v939_v22  ;;  %v941_v19 = vadd.f32 %v940_v17, %v11640_v21 }
 0x162   : > { %v946_v10 = vpop.f32.mrf.mxu0  ;;  %2145 = vmatmul.mubr.f32.gmra.mxu0 %v15767_v31  ;;  %v1154_v57 = vpop.f32.mrf.mxu1  ;;  %2353 = vmatmul.mubr.f32.gmra.mxu1 %v15768_v5 }
 0x163   : > { %v11797_v13 = vadd.f32 %v1147_v58, %v941_v19  ;;  %v947_v62 = vadd.f32 %v946_v10, %v11645_v8  ;;  %2150 = vmatprep.mubr.f32.mxu0 %v15417_v6  ;;  %2358 = vmatprep.mubr.f32.mxu1 %v15417_v6  ;;  %v15774_v19 = vld [vmem:[#allocation50_spill] sm:$0xff] }
 0x164   : > { %v948_v16 = vpop.f32.mrf.mxu0  ;;  %v1156_v33 = vpop.f32.mrf.mxu1 }
 0x165   : > { %v11803_v52 = vadd.f32 %v1154_v57, %v947_v62  ;;  %v949_v21 = vadd.f32 %v948_v16, %v11648_v36  ;;  %v15775_v62 = vld [vmem:[#allocation10_spill] sm:$0xff]  ;;  %v15776_v57 = vld [vmem:[#allocation9_spill] sm:$0xff] }
 0x166   : > { %v954_v48 = vpop.f32.mrf.mxu0  ;;  %2153 = vmatmul.mubr.f32.gmra.mxu0 %v15769_v43  ;;  %v1163_v63 = vpop.f32.mrf.mxu1  ;;  %2362 = vmatmul.mubr.f32.gmra.mxu1 %v15770_v0  ;;  %v15778_v43 = vld [vmem:[#allocation11_spill] sm:$0xff]  ;;  %v15779_v0 = vld [vmem:[#allocation13_spill] sm:$0xff] }
 0x167   : > { %v11807_v24 = vadd.f32 %v1156_v33, %v949_v21  ;;  %v955_v8 = vadd.f32 %v954_v48, %v11653_v7  ;;  %2158 = vmatprep.mubr.f32.mxu0 %v15417_v6  ;;  %2367 = vmatprep.mubr.f32.mxu1 %v15417_v6  ;;  %v15777_v21 = vld [vmem:[#allocation20_spill] sm:$0xff] }
 0x168   : > { %v956_v34 = vpop.f32.mrf.mxu0  ;;  %v1165_v30 = vpop.f32.mrf.mxu1 }
 0x169   : > { %v11813_v54 = vadd.f32 %v1163_v63, %v955_v8  ;;  %v957_v36 = vadd.f32 %v956_v34, %v11656_v42 }
 0x16a   : > { %v11816_v29 = vpop.f32.mrf.mxu0  ;;  %2161 = vmatmul.mubr.f32.gmra.mxu0 %v15771_v44  ;;  %v11821_v7 = vpop.f32.mrf.mxu1  ;;  %2371 = vmatmul.mubr.f32.gmra.mxu1 %v15772_v18 }
 0x16b   : > { %v11819_v26 = vadd.f32 %v1165_v30, %v957_v36  ;;  %2166 = vmatprep.mubr.f32.mxu0 %v15417_v6  ;;  %2376 = vmatprep.mubr.f32.mxu1 %v15417_v6 }
 0x16c   : > { %v11825_v22 = vpop.f32.mrf.mxu0  ;;  %v11828_v50 = vpop.f32.mrf.mxu1 }
 0x16e   : > { %v11830_v42 = vpop.f32.mrf.mxu0  ;;  %2169 = vmatmul.mubr.f32.gmra.mxu0 %v15773_v1  ;;  %v11833_v17 = vpop.f32.mrf.mxu1  ;;  %2380 = vmatmul.mubr.f32.gmra.mxu1 %v15774_v19 }
 0x16f   : > { %2456 = vmatprep.mubr.f32.mxu0 %v15417_v6  ;;  %2635 = vmatprep.mubr.f32.mxu1 %v15417_v6 }
 0x170   : > { %v11837_v58 = vpop.f32.mrf.mxu0  ;;  %v11840_v10 = vpop.f32.mrf.mxu1 }
 0x172   : > { %v1259_v31 = vpop.f32.mrf.mxu0  ;;  %2458 = vmatmul.mubr.f32.vlgmr.msra.gmra.mxu0 %v15775_v62  ;;  %v1438_v5 = vpop.f32.mrf.mxu1  ;;  %2637 = vmatmul.mubr.f32.vlgmr.msra.gmra.mxu1 %v15775_v62 }
 0x173   : > { %2918 = vmatpush1.msra.mxu0 %v15776_v57  ;;  %3169 = vmatpush1.msra.mxu1 %v15777_v21  ;;  %v1260_v33 = vadd.f32 %v1259_v31, %v11680_v51  ;;  %v15780_v31 = vld [vmem:[#allocation14_spill] sm:$0xff] }
 0x174   : > { %v1261_v16 = vpop.f32.mrf.mxu0  ;;  %2463 = vmatprep.mubr.f32.mxu0 %v15417_v6  ;;  %v1440_v48 = vpop.f32.mrf.mxu1  ;;  %2642 = vmatprep.mubr.f32.mxu1 %v15417_v6 }
 0x175   : > { %3347 = vmatprep.subr.mxu0 %v15778_v43  ;;  %v1262_v8 = vadd.f32 %v1261_v16, %v11687_v28  ;;  %3543 = vmatprep.subr.mxu1 %v15761_v20  ;;  %v1439_v30 = vadd.f32 %v1438_v5, %v1260_v33 }
 0x176   : > { %v1266_v63 = vpop.f32.mrf.mxu0  ;;  %2465 = vmatmul.mubr.f32.gmra.mxu0 %v15779_v0  ;;  %v1445_v36 = vpop.f32.mrf.mxu1  ;;  %2644 = vmatmul.mubr.f32.gmra.mxu1 %v15779_v0 }
 0x177   : > { %v1267_v34 = vadd.f32 %v1266_v63, %v11693_v15  ;;  %2470 = vmatprep.mubr.f32.mxu0 %v15417_v6  ;;  %2649 = vmatprep.mubr.f32.mxu1 %v15417_v6  ;;  %v1441_v1 = vadd.f32 %v1440_v48, %v1262_v8 }
 0x178   : > { %v1268_v51 = vpop.f32.mrf.mxu0  ;;  %v1447_v28 = vpop.f32.mrf.mxu1 }
 0x179   : > { %v1446_v44 = vadd.f32 %v1445_v36, %v1267_v34  ;;  %v1269_v18 = vadd.f32 %v1268_v51, %v11697_v3  ;;  %v15781_v34 = vld [vmem:[#allocation15_spill] sm:$0xff] }
 0x17a   : > { %v1273_v19 = vpop.f32.mrf.mxu0  ;;  %2472 = vmatmul.mubr.f32.gmra.mxu0 %v15780_v31  ;;  %v1452_v63 = vpop.f32.mrf.mxu1  ;;  %2651 = vmatmul.mubr.f32.gmra.mxu1 %v15780_v31  ;;  %v15782_v31 = vld [vmem:[#allocation18_spill] sm:$0xff] }
 0x17b   : > { %v2748_v62 = vmin.f32 %v1439_v30, %v1446_v44  ;;  %v1448_v16 = vadd.f32 %v1447_v28, %v1269_v18  ;;  %v1274_v15 = vadd.f32 %v1273_v19, %v11703_v25  ;;  %2477 = vmatprep.mubr.f32.mxu0 %v15417_v6  ;;  %2656 = vmatprep.mubr.f32.mxu1 %v15417_v6 }
 0x17c   : > { %v1275_v0 = vpop.f32.mrf.mxu0  ;;  %v1454_v48 = vpop.f32.mrf.mxu1 }
 0x17d   : > { %v2749_v5 = vmin.f32 %v1441_v1, %v1448_v16  ;;  %v1453_v33 = vadd.f32 %v1452_v63, %v1274_v15  ;;  %v1276_v3 = vadd.f32 %v1275_v0, %v11707_v27 }
 0x17e   : > { %v1280_v8 = vpop.f32.mrf.mxu0  ;;  %2479 = vmatmul.mubr.f32.gmra.mxu0 %v15781_v34  ;;  %v1459_v30 = vpop.f32.mrf.mxu1  ;;  %2658 = vmatmul.mubr.f32.gmra.mxu1 %v15781_v34 }
 0x17f   : > { %v2752_v36 = vmin.f32 %v2748_v62, %v1453_v33  ;;  %v1455_v51 = vadd.f32 %v1454_v48, %v1276_v3  ;;  %v1281_v25 = vadd.f32 %v1280_v8, %v11713_v9  ;;  %2484 = vmatprep.mubr.f32.mxu0 %v15417_v6  ;;  %2663 = vmatprep.mubr.f32.mxu1 %v15417_v6  ;;  %v15783_v48 = vld [vmem:[#allocation21_spill] sm:$0xff] }
 0x180   : > { %v1282_v44 = vpop.f32.mrf.mxu0  ;;  %v1461_v1 = vpop.f32.mrf.mxu1 }
 0x181   : > { %v2753_v18 = vmin.f32 %v2749_v5, %v1455_v51  ;;  %v1460_v28 = vadd.f32 %v1459_v30, %v1281_v25  ;;  %v1283_v27 = vadd.f32 %v1282_v44, %v11717_v35 }
 0x182   : > { %v1287_v19 = vpop.f32.mrf.mxu0  ;;  %2486 = vmatmul.mubr.f32.gmra.mxu0 %v15782_v31  ;;  %v1466_v15 = vpop.f32.mrf.mxu1  ;;  %2665 = vmatmul.mubr.f32.gmra.mxu1 %v15782_v31 }
 0x183   : > { %v2756_v62 = vmin.f32 %v2752_v36, %v1460_v28  ;;  %v1462_v16 = vadd.f32 %v1461_v1, %v1283_v27  ;;  %v1288_v9 = vadd.f32 %v1287_v19, %v11723_v23  ;;  %2491 = vmatprep.mubr.f32.mxu0 %v15417_v6  ;;  %2670 = vmatprep.mubr.f32.mxu1 %v15417_v6  ;;  %v15784_v28 = vld [vmem:[#allocation22_spill] sm:$0xff] }
 0x184   : > { %v1289_v63 = vpop.f32.mrf.mxu0  ;;  %v1468_v33 = vpop.f32.mrf.mxu1 }
 0x185   : > { %v2757_v0 = vmin.f32 %v2753_v18, %v1462_v16  ;;  %v1467_v5 = vadd.f32 %v1466_v15, %v1288_v9  ;;  %v1290_v35 = vadd.f32 %v1289_v63, %v11727_v46  ;;  %v15785_v63 = vld [vmem:[#allocation23_spill] sm:$0xff] }
 0x186   : > { %v1294_v3 = vpop.f32.mrf.mxu0  ;;  %2493 = vmatmul.mubr.f32.gmra.mxu0 %v15783_v48  ;;  %v1473_v36 = vpop.f32.mrf.mxu1  ;;  %2672 = vmatmul.mubr.f32.gmra.mxu1 %v15783_v48 }
 0x187   : > { %v2760_v8 = vmin.f32 %v2756_v62, %v1467_v5  ;;  %v1469_v34 = vadd.f32 %v1468_v33, %v1290_v35  ;;  %v1295_v23 = vadd.f32 %v1294_v3, %v11733_v61  ;;  %2498 = vmatprep.mubr.f32.mxu0 %v15417_v6  ;;  %2677 = vmatprep.mubr.f32.mxu1 %v15417_v6 }
 0x188   : > { %v1296_v51 = vpop.f32.mrf.mxu0  ;;  %v1475_v44 = vpop.f32.mrf.mxu1 }
 0x189   : > { %v2761_v25 = vmin.f32 %v2757_v0, %v1469_v34  ;;  %v1474_v30 = vadd.f32 %v1473_v36, %v1295_v23  ;;  %v1297_v46 = vadd.f32 %v1296_v51, %v11737_v49  ;;  %v15786_v23 = vld [vmem:[#allocation24_spill] sm:$0xff] }
 0x18a   : > { %v1301_v18 = vpop.f32.mrf.mxu0  ;;  %2500 = vmatmul.mubr.f32.gmra.mxu0 %v15784_v28  ;;  %v1480_v19 = vpop.f32.mrf.mxu1  ;;  %2679 = vmatmul.mubr.f32.gmra.mxu1 %v15784_v28 }
 0x18b   : > { %v2764_v27 = vmin.f32 %v2760_v8, %v1474_v30  ;;  %v1476_v1 = vadd.f32 %v1475_v44, %v1297_v46  ;;  %v1302_v61 = vadd.f32 %v1301_v18, %v11743_v40  ;;  %2505 = vmatprep.mubr.f32.mxu0 %v15417_v6  ;;  %2684 = vmatprep.mubr.f32.mxu1 %v15417_v6 }
 0x18c   : > { %v1303_v31 = vpop.f32.mrf.mxu0  ;;  %v1482_v9 = vpop.f32.mrf.mxu1 }
 0x18d   : > { %v2765_v62 = vmin.f32 %v2761_v25, %v1476_v1  ;;  %v1481_v16 = vadd.f32 %v1480_v19, %v1302_v61  ;;  %v1304_v49 = vadd.f32 %v1303_v31, %v11747_v59 }
 0x18e   : > { %v1308_v15 = vpop.f32.mrf.mxu0  ;;  %2507 = vmatmul.mubr.f32.gmra.mxu0 %v15785_v63  ;;  %v1487_v35 = vpop.f32.mrf.mxu1  ;;  %2686 = vmatmul.mubr.f32.gmra.mxu1 %v15785_v63  ;;  %v15788_v63 = vld [vmem:[#allocation27_spill] sm:$0xff] }
 0x18f   : > { %v2768_v0 = vmin.f32 %v2764_v27, %v1481_v16  ;;  %v1483_v5 = vadd.f32 %v1482_v9, %v1304_v49  ;;  %v1309_v40 = vadd.f32 %v1308_v15, %v11753_v47  ;;  %2512 = vmatprep.mubr.f32.mxu0 %v15417_v6  ;;  %2691 = vmatprep.mubr.f32.mxu1 %v15417_v6  ;;  %v15787_v27 = vld [vmem:[#allocation26_spill] sm:$0xff] }
 0x190   : > { %v1310_v33 = vpop.f32.mrf.mxu0  ;;  %v1489_v8 = vpop.f32.mrf.mxu1 }
 0x191   : > { %v2769_v3 = vmin.f32 %v2765_v62, %v1483_v5  ;;  %v1488_v48 = vadd.f32 %v1487_v35, %v1309_v40  ;;  %v1311_v59 = vadd.f32 %v1310_v33, %v11757_v2  ;;  %v10695_v62 = vld [vmem:[%s11034_s13 + $0x80] sm:$0xff] }
 0x192   : > { %v1315_v34 = vpop.f32.mrf.mxu0  ;;  %2514 = vmatmul.mubr.f32.gmra.mxu0 %v15786_v23  ;;  %v1494_v25 = vpop.f32.mrf.mxu1  ;;  %2693 = vmatmul.mubr.f32.gmra.mxu1 %v15786_v23  ;;  %v2838_v35 = vsel %vm299_vm0, %v10695_v62, 0  ;;  %v15789_v23 = vld [vmem:[#allocation29_spill] sm:$0xff] }
 0x193   : > { %v2772_v36 = vmin.f32 %v2768_v0, %v1488_v48  ;;  %v1490_v51 = vadd.f32 %v1489_v8, %v1311_v59  ;;  %v1316_v47 = vadd.f32 %v1315_v34, %v11763_v4  ;;  %2519 = vmatprep.mubr.f32.mxu0 %v15417_v6  ;;  %2698 = vmatprep.mubr.f32.mxu1 %v15417_v6 }
 0x194   : > { %v1317_v30 = vpop.f32.mrf.mxu0  ;;  %v1496_v18 = vpop.f32.mrf.mxu1 }
 0x195   : > { %v2773_v46 = vmin.f32 %v2769_v3, %v1490_v51  ;;  %v1495_v44 = vadd.f32 %v1494_v25, %v1316_v47  ;;  %v1318_v2 = vadd.f32 %v1317_v30, %v11767_v14 }
 0x196   : > { %v1322_v28 = vpop.f32.mrf.mxu0  ;;  %2521 = vmatmul.mubr.f32.gmra.mxu0 %v15787_v27  ;;  %v1501_v19 = vpop.f32.mrf.mxu1  ;;  %2700 = vmatmul.mubr.f32.gmra.mxu1 %v15787_v27 }
 0x197   : > { %v2776_v1 = vmin.f32 %v2772_v36, %v1495_v44  ;;  %v1497_v61 = vadd.f32 %v1496_v18, %v1318_v2  ;;  %v1323_v4 = vadd.f32 %v1322_v28, %v11773_v11  ;;  %2526 = vmatprep.mubr.f32.mxu0 %v15417_v6  ;;  %2705 = vmatprep.mubr.f32.mxu1 %v15417_v6  ;;  %v10697_v36 = vld [vmem:[%s11034_s13 + $0x90] sm:$0xff] }
 0x198   : > { %v1324_v31 = vpop.f32.mrf.mxu0  ;;  %v1503_v9 = vpop.f32.mrf.mxu1  ;;  %v2844_v27 = vsel %vm299_vm0, %v10697_v36, 0 }
 0x199   : > { %v2777_v16 = vmin.f32 %v2773_v46, %v1497_v61  ;;  %v1502_v14 = vadd.f32 %v1501_v19, %v1323_v4  ;;  %v1325_v49 = vadd.f32 %v1324_v31, %v11777_v39  ;;  %v10696_v39 = vld [vmem:[%s11034_s13 + $0x88] sm:$0xff]  ;;  %v10698_v19 = vld [vmem:[%s11034_s13 + $0x98] sm:$0xff] }
 0x19a   : > { %v1329_v15 = vpop.f32.mrf.mxu0  ;;  %2528 = vmatmul.mubr.f32.gmra.mxu0 %v15788_v63  ;;  %v1508_v40 = vpop.f32.mrf.mxu1  ;;  %2707 = vmatmul.mubr.f32.gmra.mxu1 %v15788_v63  ;;  %v2841_v46 = vsel %vm299_vm0, %v10696_v39, 0 }
 0x19b   : > { %v2780_v0 = vmin.f32 %v2776_v1, %v1502_v14  ;;  %v1504_v11 = vadd.f32 %v1503_v9, %v1325_v49  ;;  %v1330_v5 = vadd.f32 %v1329_v15, %v11783_v56  ;;  %2533 = vmatprep.mubr.f32.mxu0 %v15417_v6  ;;  %2712 = vmatprep.mubr.f32.mxu1 %v15417_v6  ;;  %v11916_v56 = vand.u32 4294901760, %v2838_v35 }
 0x19c   : > { %v1331_v33 = vpop.f32.mrf.mxu0  ;;  %v1510_v8 = vpop.f32.mrf.mxu1  ;;  %v11930_v4 = vand.u32 4294901760, %v2841_v46  ;;  %v11939_v9 = vand.u32 4294901760, %v2844_v27 }
 0x19d   : > { %v2781_v3 = vmin.f32 %v2777_v16, %v1504_v11  ;;  %v1509_v48 = vadd.f32 %v1508_v40, %v1330_v5  ;;  %v1332_v59 = vadd.f32 %v1331_v33, %v11787_v55  ;;  %15790 = vst [vmem:[#allocation28_spill] sm:$0xff] %v11916_v56  ;;  %v11928_v61 = vsub.f32 %v2838_v35, %v11916_v56  ;;  %v15794_v35 = vld [vmem:[#allocation38_spill] sm:$0xff] }
 0x19e   : > { %v1336_v34 = vpop.f32.mrf.mxu0  ;;  %2535 = vmatmul.mubr.f32.gmra.mxu0 %v15789_v23  ;;  %v1515_v30 = vpop.f32.mrf.mxu1  ;;  %2714 = vmatmul.mubr.f32.gmra.mxu1 %v15789_v23  ;;  %15792 = vst [vmem:[#allocation30_spill] sm:$0xff] %v11930_v4  ;;  %15793 = vst [vmem:[#allocation32_spill] sm:$0xff] %v11939_v9  ;;  %v965_v5 = vadd.f32 %v11825_v22, %v11664_v53 }
 0x19f   : > { %v2784_v51 = vmin.f32 %v2780_v0, %v1509_v48  ;;  %v1511_v47 = vadd.f32 %v1510_v8, %v1332_v59  ;;  %v1337_v25 = vadd.f32 %v1336_v34, %v11793_v45  ;;  %2540 = vmatprep.mubr.f32.mxu0 %v15417_v6  ;;  %2719 = vmatprep.mubr.f32.mxu1 %v15417_v6  ;;  %v15791_v45 = vld [vmem:[#allocation31_spill] sm:$0xff] }
 0x1a0   : > { %v1338_v55 = vpop.f32.mrf.mxu0  ;;  %v1517_v28 = vpop.f32.mrf.mxu1  ;;  %v11958_v48 = vsub.f32 %v2844_v27, %v11939_v9  ;;  %v10699_v8 = vld [vmem:[%s11034_s13 + $0xa0] sm:$0xff]  ;;  %v971_v34 = vadd.f32 %v11830_v42, %v11669_v12 }
 0x1a1   : > { %v2785_v44 = vmin.f32 %v2781_v3, %v1511_v47  ;;  %v1516_v2 = vadd.f32 %v1515_v30, %v1337_v25  ;;  %v1339_v18 = vadd.f32 %v1338_v55, %v11797_v13  ;;  %v963_v13 = vadd.f32 %v11816_v29, %v11661_v41  ;;  %v15798_v30 = vld [vmem:[#allocation42_spill] sm:$0xff] }
 0x1a2   : > { %v1343_v1 = vpop.f32.mrf.mxu0  ;;  %2542 = vmatmul.mubr.f32.gmra.mxu0 %v15791_v45  ;;  %v1522_v14 = vpop.f32.mrf.mxu1  ;;  %2721 = vmatmul.mubr.f32.gmra.mxu1 %v15791_v45  ;;  %v11947_v41 = vand.u32 4294901760, %v11928_v61  ;;  %v11950_v29 = vsub.f32 %v2841_v46, %v11930_v4  ;;  %v1175_v47 = vadd.f32 %v11828_v50, %v965_v5 }
 0x1a3   : > { %v2788_v31 = vmin.f32 %v2784_v51, %v1516_v2  ;;  %v1518_v62 = vadd.f32 %v1517_v28, %v1339_v18  ;;  %v1344_v16 = vadd.f32 %v1343_v1, %v11803_v52  ;;  %2547 = vmatprep.mubr.f32.mxu0 %v15417_v6  ;;  %2726 = vmatprep.mubr.f32.mxu1 %v15417_v6  ;;  %v2847_v52 = vsel %vm299_vm0, %v10698_v19, 0  ;;  %v10700_v18 = vld [vmem:[%s11034_s13 + $0xa8] sm:$0xff] }
 0x1a4   : > { %v1345_v49 = vpop.f32.mrf.mxu0  ;;  %v1524_v11 = vpop.f32.mrf.mxu1  ;;  %15795 = vst [vmem:[#allocation36_spill] sm:$0xff] %v11947_v41  ;;  %15796 = vst [vmem:[#allocation40_spill] sm:$0xff] %v11950_v29  ;;  %v1173_v53 = vadd.f32 %v11821_v7, %v963_v13  ;;  %v11960_v59 = vand.u32 4294901760, %v2847_v52  ;;  %v973_v7 = vadd.f32 %v11837_v58, %v11672_v60  ;;  %v2955_v46 = vsub.f32 %v11928_v61, %v11947_v41 }
 0x1a5   : > { %v2789_v15 = vmin.f32 %v2785_v44, %v1518_v62  ;;  %v1523_v63 = vadd.f32 %v1522_v14, %v1344_v16  ;;  %v1346_v0 = vadd.f32 %v1345_v49, %v11807_v24  ;;  %v11973_v55 = vand.u32 4294901760, %v11950_v29 }
 0x1a6   : > { %v1350_v40 = vpop.f32.mrf.mxu0  ;;  %2549 = vmatmul.mubr.f32.gmra.mxu0 %v15794_v35  ;;  %v1529_v3 = vpop.f32.mrf.mxu1  ;;  %2728 = vmatmul.mubr.f32.gmra.mxu1 %v15794_v35  ;;  %15797 = vst [vmem:[#allocation43_spill] sm:$0xff] %v11960_v59  ;;  %v2850_v60 = vsel %vm299_vm0, %v10699_v8, 0  ;;  %v11980_v58 = vand.u32 4294901760, %v11958_v48  ;;  %v11983_v2 = vsub.f32 %v2847_v52, %v11960_v59  ;;  %v1182_v28 = vadd.f32 %v11833_v17, %v971_v34 }
 0x1a7   : > { %v2792_v33 = vmin.f32 %v2788_v31, %v1523_v63  ;;  %v1525_v39 = vadd.f32 %v1524_v11, %v1346_v0  ;;  %v1351_v24 = vadd.f32 %v1350_v40, %v11813_v54  ;;  %2554 = vmatprep.mubr.f32.mxu0 %v15417_v6  ;;  %2733 = vmatprep.mubr.f32.mxu1 %v15417_v6  ;;  %v11989_v16 = vand.u32 4294901760, %v2955_v46  ;;  %v10701_v0 = vld [vmem:[%s11034_s13 + $0xb0] sm:$0xff] }
 0x1a8   : > { %v1352_v22 = vpop.f32.mrf.mxu0  ;;  %v1531_v51 = vpop.f32.mrf.mxu1  ;;  %15799 = vst [vmem:[#allocation46_spill] sm:$0xff] %v11980_v58  ;;  %15800 = vst [vmem:[#allocation49_spill] sm:$0xff] %v11983_v2  ;;  %v1184_v31 = vadd.f32 %v11840_v10, %v973_v7  ;;  %v2966_v14 = vsub.f32 %v11950_v29, %v11973_v55  ;;  %v11993_v13 = vand.u32 4294901760, %v2850_v60  ;;  %v2853_v10 = vsel %vm299_vm0, %v10700_v18, 0 }
 0x1a9   : > { %v2793_v54 = vmin.f32 %v2789_v15, %v1525_v39  ;;  %v1530_v23 = vadd.f32 %v1529_v3, %v1351_v24  ;;  %v1353_v36 = vadd.f32 %v1352_v22, %v11819_v26  ;;  %15801 = vst [vmem:[#allocation33_spill] sm:$0xff] %v11989_v16  ;;  %v2977_v52 = vsub.f32 %v11958_v48, %v11980_v58 }
 0x1aa   : > { %v1357_v25 = vpop.f32.mrf.mxu0  ;;  %2556 = vmatmul.mubr.f32.gmra.mxu0 %v15798_v30  ;;  %v1536_v26 = vpop.f32.mrf.mxu1  ;;  %2735 = vmatmul.mubr.f32.gmra.mxu1 %v15798_v30  ;;  %15802 = vst [vmem:[#allocation34_spill] sm:$0xff] %v11993_v13  ;;  %v12003_v39 = vand.u32 4294901760, %v11983_v2  ;;  %v12006_v3 = vand.u32 4294901760, %v2966_v14  ;;  %v12011_v22 = vand.u32 4294901760, %v2853_v10  ;;  %v2856_v8 = vsel %vm299_vm0, %v10701_v0, 0 }
 0x1ab   : > { %v2796_v12 = vmin.f32 %v2792_v33, %v1530_v23  ;;  %v1532_v42 = vadd.f32 %v1531_v51, %v1353_v36  ;;  %v1358_v44 = vadd.f32 %v1357_v25, %v1173_v53  ;;  %2561 = vmatprep.mubr.f32.mxu0 %v15417_v6  ;;  %2740 = vmatprep.mubr.f32.mxu1 %v15417_v6  ;;  %v15807_v23 = vld [vmem:[#allocation12_spill] sm:$0xff]  ;;  %v10702_v51 = vld [vmem:[%s11034_s13 + $0xb8] sm:$0xff]  ;;  %v12021_v30 = vand.u32 4294901760, %v2977_v52 }
 0x1ac   : > { %v1359_v50 = vpop.f32.mrf.mxu0  ;;  %v1538_v19 = vpop.f32.mrf.mxu1  ;;  %15803 = vst [vmem:[#allocation25_spill] sm:$0xff] %v12003_v39  ;;  %15804 = vst [vmem:[#allocation37_spill] sm:$0xff] %v12006_v3  ;;  %v12009_v53 = vsub.f32 %v2850_v60, %v11993_v13  ;;  %v15810_v60 = vld [vmem:[#allocation16_spill] sm:$0xff] }
 0x1ad   : > { %v2797_v27 = vmin.f32 %v2793_v54, %v1532_v42  ;;  %v1537_v1 = vadd.f32 %v1536_v26, %v1358_v44  ;;  %v1360_v45 = vadd.f32 %v1359_v50, %v1175_v47  ;;  %15806 = vst [vmem:[#allocation39_spill] sm:$0xff] %v12011_v22  ;;  %v2809_v47 = vld [vmem:[#allocation2] sm:$0xff]  ;;  %15808 = vst [vmem:[#allocation41_spill] sm:$0xff] %v12021_v30  ;;  %v12026_v26 = vand.u32 4294901760, %v2856_v8 }
 0x1ae   : > { %v1364_v62 = vpop.f32.mrf.mxu0  ;;  %2563 = vmatmul.mubr.f32.gmra.mxu0 %v11332_v32  ;;  %v1543_v63 = vpop.f32.mrf.mxu1  ;;  %2742 = vmatmul.mubr.f32.gmra.mxu1 %v11332_v32  ;;  %v2808_v32 = vld [vmem:[#allocation2 + $0x10] sm:$0xff]  ;;  %15805 = vst [vmem:[#allocation35_spill] sm:$0xff] %v12009_v53  ;;  %v2988_v44 = vsub.f32 %v11983_v2, %v12003_v39 }
 0x1af   : > { %v2800_v49 = vmin.f32 %v2796_v12, %v1537_v1  ;;  %v1539_v15 = vadd.f32 %v1538_v19, %v1360_v45  ;;  %v1365_v17 = vadd.f32 %v1364_v62, %v1182_v28  ;;  %2951 = vmatprep.mubr.f32.mxu0 %v15417_v6  ;;  %3202 = vmatprep.mubr.f32.mxu1 %v15417_v6  ;;  %v12033_v28 = vand.u32 4294901760, %v12009_v53 }
 0x1b0   : > { %v1366_v11 = vpop.f32.mrf.mxu0  ;;  %v1545_v33 = vpop.f32.mrf.mxu1  ;;  %15809 = vst [vmem:[#allocation44_spill] sm:$0xff] %v12026_v26  ;;  %v2859_v1 = vsel %vm299_vm0, %v10702_v51, 0 }
 0x1b1   : > { %v2801_v5 = vmin.f32 %v2797_v27, %v1539_v15  ;;  %v1544_v40 = vadd.f32 %v1543_v63, %v1365_v17  ;;  %v1367_v35 = vadd.f32 %v1366_v11, %v1184_v31  ;;  %15811 = vst [vmem:[#allocation45_spill] sm:$0xff] %v12033_v28  ;;  %v12036_v27 = vsub.f32 %v2853_v10, %v12011_v22  ;;  %v10703_v31 = vld [vmem:[%s11034_s13 + $0xc0] sm:$0xff] }
 0x1b2   : > { %v1621_v24 = vpop.f32.mrf.mxu0  ;;  %2957 = vmatmul.mubr.f32.vlgmr.msra.gmra.mxu0 %v11989_v16  ;;  %v1868_v36 = vpop.f32.mrf.mxu1  ;;  %3204 = vmatmul.mubr.f32.vlgmr.msra.gmra.mxu1 %v11916_v56  ;;  %v12046_v15 = vand.u32 4294901760, %v2988_v44  ;;  %v12049_v17 = vsub.f32 %v2856_v8, %v12026_v26  ;;  %v12051_v63 = vand.u32 4294901760, %v2859_v1  ;;  %v2999_v11 = vsub.f32 %v12009_v53, %v12033_v28 }
 0x1b3   : > { %v2804_v34 = vmin.f32 %v2800_v49, %v1544_v40  ;;  %v1546_v54 = vadd.f32 %v1545_v33, %v1367_v35  ;;  %3350 = vmatpush1.msra.mxu0 %v15807_v23  ;;  %v12017_v7 = vadd.f32 %v1868_v36, %v1621_v24  ;;  %3545 = vmatpush1.msra.mxu1 %v15776_v57  ;;  %v12059_v52 = vand.u32 4294901760, %v12036_v27  ;;  %v10707_v23 = vld [vmem:[%s11034_s13 + $0xe0] sm:$0xff] }
 0x1b4   : > { %v1623_v25 = vpop.f32.mrf.mxu0  ;;  %2962 = vmatprep.mubr.f32.mxu0 %v15417_v6  ;;  %v1870_v42 = vpop.f32.mrf.mxu1  ;;  %3209 = vmatprep.mubr.f32.mxu1 %v15417_v6  ;;  %15812 = vst [vmem:[#allocation47_spill] sm:$0xff] %v12036_v27  ;;  %15813 = vst [vmem:[#allocation48_spill] sm:$0xff] %v12046_v15  ;;  %v12069_v8 = vand.u32 4294901760, %v12049_v17 }
 0x1b5   : > { %v2812_v46 = vmin.f32 %v2808_v32, %v2804_v34  ;;  %v2805_v12 = vmin.f32 %v2801_v5, %v1546_v54  ;;  %3756 = vmatprep.subr.mxu0 %v15810_v60  ;;  %v12029_v50 = vadd.f32 %v1870_v42, %v1623_v25  ;;  %3937 = vmatprep.subr.mxu1 %v15761_v20  ;;  %v2862_v5 = vsel %vm299_vm0, %v10703_v31, 0  ;;  %v10704_v32 = vld [vmem:[%s11034_s13 + $0xc8] sm:$0xff] }
 0x1b6   : > { %v1632_v18 = vpop.f32.mrf.mxu0  ;;  %2968 = vmatmul.mubr.f32.gmra.mxu0 %v12006_v3  ;;  %v1875_v19 = vpop.f32.mrf.mxu1  ;;  %3211 = vmatmul.mubr.f32.gmra.mxu1 %v11930_v4  ;;  %15814 = vst [vmem:[#allocation50_spill] sm:$0xff] %v12049_v17  ;;  %15815 = vst [vmem:[#allocation10_spill] sm:$0xff] %v12051_v63  ;;  %v12072_v34 = vsub.f32 %v2859_v1, %v12051_v63  ;;  %v12074_v54 = vand.u32 4294901760, %v2862_v5  ;;  %v3010_v25 = vsub.f32 %v12036_v27, %v12059_v52 }
 0x1b7   : > { %2816 = vst [vmem:[#allocation2 + $0x10] sm:$0xff] %v2812_v46  ;;  %v2813_v45 = vmin.f32 %v2809_v47, %v2805_v12  ;;  %2973 = vmatprep.mubr.f32.mxu0 %v15417_v6  ;;  %v12043_v62 = vadd.f32 %v1875_v19, %v1632_v18  ;;  %3216 = vmatprep.mubr.f32.mxu1 %v15417_v6  ;;  %15816 = vst [vmem:[#allocation13_spill] sm:$0xff] %v12059_v52  ;;  %v12079_v47 = vand.u32 4294901760, %v2999_v11  ;;  %v10705_v18 = vld [vmem:[%s11034_s13 + $0xd0] sm:$0xff] }
 0x1b8   : > { %v1634_v14 = vpop.f32.mrf.mxu0  ;;  %v1877_v49 = vpop.f32.mrf.mxu1  ;;  %15817 = vst [vmem:[#allocation14_spill] sm:$0xff] %v12069_v8  ;;  %15818 = vst [vmem:[#allocation15_spill] sm:$0xff] %v12072_v34  ;;  %v2865_v12 = vsel %vm299_vm0, %v10704_v32, 0  ;;  %v12093_v19 = vand.u32 4294901760, %v12072_v34  ;;  %v12096_v31 = vsub.f32 %v2862_v5, %v12074_v54  ;;  %v10706_v32 = vld [vmem:[%s11034_s13 + $0xd8] sm:$0xff] }
 0x1b9   : > { %2817 = vst [vmem:[#allocation2] sm:$0xff] %v2813_v45  ;;  %v12053_v10 = vadd.f32 %v1877_v49, %v1634_v14  ;;  %15819 = vst [vmem:[#allocation18_spill] sm:$0xff] %v12074_v54  ;;  %v3021_v45 = vsub.f32 %v12049_v17, %v12069_v8  ;;  %v12103_v11 = vand.u32 4294901760, %v2865_v12 }
 0x1ba   : > { %v1643_v0 = vpop.f32.mrf.mxu0  ;;  %2979 = vmatmul.mubr.f32.gmra.mxu0 %v12021_v30  ;;  %v1882_v40 = vpop.f32.mrf.mxu1  ;;  %3218 = vmatmul.mubr.f32.gmra.mxu1 %v11939_v9  ;;  %15820 = vst [vmem:[#allocation21_spill] sm:$0xff] %v12079_v47  ;;  %15821 = vst [vmem:[#allocation22_spill] sm:$0xff] %v12093_v19 }
 0x1bb   : > { %2984 = vmatprep.mubr.f32.mxu0 %v15417_v6  ;;  %v12064_v35 = vadd.f32 %v1882_v40, %v1643_v0  ;;  %3223 = vmatprep.mubr.f32.mxu1 %v15417_v6  ;;  %15822 = vst [vmem:[#allocation23_spill] sm:$0xff] %v12096_v31  ;;  %v12101_v0 = vand.u32 4294901760, %v3010_v25  ;;  %15824 = vst [vmem:[#allocation26_spill] sm:$0xff] %v12103_v11  ;;  %v3032_v25 = vsub.f32 %v12072_v34, %v12093_v19 }
 0x1bc   : > { %v1645_v33 = vpop.f32.mrf.mxu0  ;;  %v1884_v24 = vpop.f32.mrf.mxu1 }
 0x1bd   : > { %v12076_v36 = vadd.f32 %v1884_v24, %v1645_v33  ;;  %15823 = vst [vmem:[#allocation24_spill] sm:$0xff] %v12101_v0  ;;  %v2868_v33 = vsel %vm299_vm0, %v10705_v18, 0  ;;  %v12123_v18 = vsub.f32 %v2865_v12, %v12103_v11  ;;  %v12134_v21 = vand.u32 4294901760, %v3032_v25 }
 0x1be   : > { %v1654_v51 = vpop.f32.mrf.mxu0  ;;  %2990 = vmatmul.mubr.f32.gmra.mxu0 %v12046_v15  ;;  %v1889_v46 = vpop.f32.mrf.mxu1  ;;  %3225 = vmatmul.mubr.f32.gmra.mxu1 %v11960_v59 }
 0x1bf   : > { %2995 = vmatprep.mubr.f32.mxu0 %v15417_v6  ;;  %v12086_v42 = vadd.f32 %v1889_v46, %v1654_v51  ;;  %3230 = vmatprep.mubr.f32.mxu1 %v15417_v6  ;;  %v12112_v46 = vand.u32 4294901760, %v3021_v45  ;;  %15827 = vst [vmem:[#allocation31_spill] sm:$0xff] %v12123_v18  ;;  %15829 = vst [vmem:[#allocation42_spill] sm:$0xff] %v12134_v21 }
 0x1c0   : > { %v1656_v44 = vpop.f32.mrf.mxu0  ;;  %v1891_v1 = vpop.f32.mrf.mxu1 }
 0x1c1   : > { %v12098_v14 = vadd.f32 %v1891_v1, %v1656_v44  ;;  %15825 = vst [vmem:[#allocation27_spill] sm:$0xff] %v12112_v46  ;;  %v12117_v44 = vand.u32 4294901760, %v12096_v31 }
 0x1c2   : > { %v1665_v49 = vpop.f32.mrf.mxu0  ;;  %3001 = vmatmul.mubr.f32.gmra.mxu0 %v12079_v47  ;;  %v1896_v40 = vpop.f32.mrf.mxu1  ;;  %3232 = vmatmul.mubr.f32.gmra.mxu1 %v11993_v13 }
 0x1c3   : > { %3006 = vmatprep.mubr.f32.mxu0 %v15417_v6  ;;  %v12109_v24 = vadd.f32 %v1896_v40, %v1665_v49  ;;  %3237 = vmatprep.mubr.f32.mxu1 %v15417_v6  ;;  %15826 = vst [vmem:[#allocation29_spill] sm:$0xff] %v12117_v44  ;;  %v12125_v49 = vand.u32 4294901760, %v2868_v33  ;;  %v2871_v40 = vsel %vm299_vm0, %v10706_v32, 0  ;;  %v3043_v12 = vsub.f32 %v12096_v31, %v12117_v44 }
 0x1c4   : > { %v1667_v5 = vpop.f32.mrf.mxu0  ;;  %v1898_v51 = vpop.f32.mrf.mxu1  ;;  %v12138_v38 = vand.u32 4294901760, %v2871_v40 }
 0x1c5   : > { %v12119_v1 = vadd.f32 %v1898_v51, %v1667_v5  ;;  %15828 = vst [vmem:[#allocation38_spill] sm:$0xff] %v12125_v49  ;;  %v12164_v3 = vand.u32 4294901760, %v3043_v12  ;;  %v10709_v12 = vld [vmem:[%s11034_s13 + $0xf0] sm:$0xff] }
 0x1c6   : > { %v1676_v60 = vpop.f32.mrf.mxu0  ;;  %3012 = vmatmul.mubr.f32.gmra.mxu0 %v12101_v0  ;;  %v1903_v45 = vpop.f32.mrf.mxu1  ;;  %3239 = vmatmul.mubr.f32.gmra.mxu1 %v12011_v22  ;;  %15830 = vst [vmem:[#allocation59_spill] sm:$0xff] %v12138_v38  ;;  %v15833_v0 = vmov 0.0   ;;  %v12157_v15 = vsub.f32 %v2871_v40, %v12138_v38 }
 0x1c7   : > { %3017 = vmatprep.mubr.f32.mxu0 %v15417_v6  ;;  %v12131_v43 = vadd.f32 %v1903_v45, %v1676_v60  ;;  %3244 = vmatprep.mubr.f32.mxu1 %v15417_v6  ;;  %v12144_v60 = vand.u32 4294901760, %v12123_v18  ;;  %v12147_v45 = vsub.f32 %v2868_v33, %v12125_v49  ;;  %v2874_v6 = vsel %vm299_vm0, %v10707_v23, 0  ;;  %15836 = vst [vmem:[#allocation64_spill] sm:$0xff] %v12164_v3 }
 0x1c8   : > { %v1678_v5 = vpop.f32.mrf.mxu0  ;;  %v1905_v51 = vpop.f32.mrf.mxu1  ;;  %15834 = vst [vmem:[#allocation62_spill] sm:$0xff] %v12157_v15  ;;  %v12159_v33 = vand.u32 4294901760, %v2874_v6 }
 0x1c9   : > { %v12140_v32 = vadd.f32 %v1905_v51, %v1678_v5  ;;  %15831 = vst [vmem:[#allocation60_spill] sm:$0xff] %v12144_v60  ;;  %15832 = vst [vmem:[#allocation61_spill] sm:$0xff] %v12147_v45  ;;  %v10708_v51 = vld [vmem:[%s11034_s13 + $0xe8] sm:$0xff] }
 0x1ca   : > { %v1687_v20 = vpop.f32.mrf.mxu0  ;;  %3023 = vmatmul.mubr.f32.gmra.mxu0 %v12112_v46  ;;  %v1910_v25 = vpop.f32.mrf.mxu1  ;;  %3246 = vmatmul.mubr.f32.gmra.mxu1 %v12026_v26  ;;  %15835 = vst [vmem:[#allocation63_spill] sm:$0xff] %v12159_v33  ;;  %v2877_v40 = vsel %vm299_vm0, %v10708_v51, 0  ;;  %v12179_v26 = vand.u32 4294901760, %v12157_v15  ;;  %v12182_v22 = vsub.f32 %v2874_v6, %v12159_v33  ;;  %v2880_v6 = vsel %vm299_vm0, %v10709_v12, 0 }
 0x1cb   : > { %3028 = vmatprep.mubr.f32.mxu0 %v15833_v0  ;;  %v12152_v47 = vadd.f32 %v1910_v25, %v1687_v20  ;;  %3251 = vmatprep.mubr.f32.mxu1 %v15833_v0  ;;  %v3054_v20 = vsub.f32 %v12123_v18, %v12144_v60  ;;  %v12169_v25 = vand.u32 4294901760, %v12147_v45 }
 0x1cc   : > { %v1689_v5 = vpop.f32.mrf.mxu0  ;;  %v1912_v46 = vpop.f32.mrf.mxu1  ;;  %15838 = vst [vmem:[#allocation66_spill] sm:$0xff] %v12179_v26  ;;  %15839 = vst [vmem:[#allocation67_spill] sm:$0xff] %v12182_v22  ;;  %v12203_v4 = vand.u32 4294901760, %v12182_v22 }
 0x1cd   : > { %v12161_v30 = vadd.f32 %v1912_v46, %v1689_v5  ;;  %15837 = vst [vmem:[#allocation65_spill] sm:$0xff] %v12169_v25  ;;  %v12187_v51 = vand.u32 4294901760, %v3054_v20 }
 0x1ce   : > { %v1698_v23 = vpop.f32.mrf.mxu0  ;;  %3034 = vmatmul.mubr.f32.gmra.mxu0 %v12134_v21  ;;  %v1917_v16 = vpop.f32.mrf.mxu1  ;;  %3253 = vmatmul.mubr.f32.gmra.mxu1 %v12051_v63  ;;  %15842 = vst [vmem:[#allocation70_spill] sm:$0xff] %v12203_v4 }
 0x1cf   : > { %3039 = vmatprep.mubr.f32.mxu0 %v15833_v0  ;;  %v12174_v46 = vadd.f32 %v1917_v16, %v1698_v23  ;;  %3258 = vmatprep.mubr.f32.mxu1 %v15833_v0  ;;  %15840 = vst [vmem:[#allocation68_spill] sm:$0xff] %v12187_v51  ;;  %v3065_v16 = vsub.f32 %v12147_v45, %v12169_v25  ;;  %v12191_v23 = vand.u32 4294901760, %v2877_v40 }
 0x1d0   : > { %v1700_v5 = vpop.f32.mrf.mxu0  ;;  %v1919_v21 = vpop.f32.mrf.mxu1 }
 0x1d1   : > { %v12184_v13 = vadd.f32 %v1919_v21, %v1700_v5  ;;  %15841 = vst [vmem:[#allocation69_spill] sm:$0xff] %v12191_v23  ;;  %v10710_v5 = vld [vmem:[%s11034_s13 + $0xf8] sm:$0xff]  ;;  %v12208_v56 = vand.u32 4294901760, %v3065_v16 }
 0x1d2   : > { %v1709_v63 = vpop.f32.mrf.mxu0  ;;  %3045 = vmatmul.mubr.f32.gmra.mxu0 %v12164_v3  ;;  %v1924_v59 = vpop.f32.mrf.mxu1  ;;  %3260 = vmatmul.mubr.f32.gmra.mxu1 %v12074_v54  ;;  %v3076_v3 = vsub.f32 %v12157_v15, %v12179_v26  ;;  %v2883_v26 = vsel %vm299_vm0, %v10710_v5, 0 }
 0x1d3   : > { %3050 = vmatprep.mubr.f32.mxu0 %v15833_v0  ;;  %v12196_v9 = vadd.f32 %v1924_v59, %v1709_v63  ;;  %3265 = vmatprep.mubr.f32.mxu1 %v15833_v0  ;;  %15843 = vst [vmem:[#allocation71_spill] sm:$0xff] %v12208_v56  ;;  %v12211_v59 = vsub.f32 %v2877_v40, %v12191_v23  ;;  %v12213_v63 = vand.u32 4294901760, %v2880_v6  ;;  %v12234_v5 = vand.u32 4294901760, %v2883_v26 }
 0x1d4   : > { %v1711_v21 = vpop.f32.mrf.mxu0  ;;  %v1926_v20 = vpop.f32.mrf.mxu1  ;;  %v12221_v16 = vand.u32 4294901760, %v3076_v3  ;;  %v3087_v40 = vsub.f32 %v12182_v22, %v12203_v4 }
 0x1d5   : > { %v12205_v37 = vadd.f32 %v1926_v20, %v1711_v21  ;;  %15844 = vst [vmem:[#allocation72_spill] sm:$0xff] %v12211_v59  ;;  %15845 = vst [vmem:[#allocation73_spill] sm:$0xff] %v12213_v63 }
 0x1d6   : > { %v1720_v54 = vpop.f32.mrf.mxu0  ;;  %3056 = vmatmul.mubr.f32.gmra.mxu0 %v12187_v51  ;;  %v1931_v12 = vpop.f32.mrf.mxu1  ;;  %3267 = vmatmul.mubr.f32.gmra.mxu1 %v12103_v11  ;;  %15846 = vst [vmem:[#allocation74_spill] sm:$0xff] %v12221_v16  ;;  %v12229_v11 = vand.u32 4294901760, %v12211_v59  ;;  %15849 = vst [vmem:[#allocation77_spill] sm:$0xff] %v12234_v5 }
 0x1d7   : > { %3061 = vmatprep.mubr.f32.mxu0 %v15833_v0  ;;  %v12218_v15 = vadd.f32 %v1931_v12, %v1720_v54  ;;  %3272 = vmatprep.mubr.f32.mxu1 %v15833_v0  ;;  %v12232_v54 = vsub.f32 %v2880_v6, %v12213_v63 }
 0x1d8   : > { %v1722_v21 = vpop.f32.mrf.mxu0  ;;  %v1933_v20 = vpop.f32.mrf.mxu1  ;;  %15847 = vst [vmem:[#allocation75_spill] sm:$0xff] %v12229_v11  ;;  %v3098_v6 = vsub.f32 %v12211_v59, %v12229_v11 }
 0x1d9   : > { %v12225_v51 = vadd.f32 %v1933_v20, %v1722_v21  ;;  %15848 = vst [vmem:[#allocation76_spill] sm:$0xff] %v12232_v54 }
 0x1da   : > { %v1731_v25 = vpop.f32.mrf.mxu0  ;;  %3067 = vmatmul.mubr.f32.gmra.mxu0 %v12208_v56  ;;  %v1938_v12 = vpop.f32.mrf.mxu1  ;;  %3274 = vmatmul.mubr.f32.gmra.mxu1 %v12125_v49  ;;  %v12241_v56 = vand.u32 4294901760, %v3087_v40  ;;  %v12249_v49 = vand.u32 4294901760, %v12232_v54  ;;  %v12262_v59 = vand.u32 4294901760, %v3098_v6 }
 0x1db   : > { %3072 = vmatprep.mubr.f32.mxu0 %v15833_v0  ;;  %v12238_v3 = vadd.f32 %v1938_v12, %v1731_v25  ;;  %3279 = vmatprep.mubr.f32.mxu1 %v15833_v0  ;;  %v12252_v25 = vsub.f32 %v2883_v26, %v12234_v5 }
 0x1dc   : > { %v1733_v21 = vpop.f32.mrf.mxu0  ;;  %v1940_v20 = vpop.f32.mrf.mxu1  ;;  %15850 = vst [vmem:[#allocation78_spill] sm:$0xff] %v12241_v56  ;;  %15852 = vst [vmem:[#allocation80_spill] sm:$0xff] %v12249_v49  ;;  %v3109_v26 = vsub.f32 %v12232_v54, %v12249_v49 }
 0x1dd   : > { %v12243_v4 = vadd.f32 %v1940_v20, %v1733_v21  ;;  %15853 = vst [vmem:[#allocation81_spill] sm:$0xff] %v12252_v25  ;;  %15854 = vst [vmem:[#allocation82_spill] sm:$0xff] %v12262_v59 }
 0x1de   : > { %v1742_v22 = vpop.f32.mrf.mxu0  ;;  %3078 = vmatmul.mubr.f32.gmra.mxu0 %v12221_v16  ;;  %v1945_v12 = vpop.f32.mrf.mxu1  ;;  %3281 = vmatmul.mubr.f32.gmra.mxu1 %v12138_v38  ;;  %v12267_v38 = vand.u32 4294901760, %v12252_v25 }
 0x1df   : > { %15851 = vst [vmem:[#allocation79_spill] sm:$0xff] %v12243_v4  ;;  %3083 = vmatprep.mubr.f32.mxu0 %v15833_v0  ;;  %v12256_v40 = vadd.f32 %v1945_v12, %v1742_v22  ;;  %3286 = vmatprep.mubr.f32.mxu1 %v15833_v0 }
 0x1e0   : > { %v1744_v21 = vpop.f32.mrf.mxu0  ;;  %v1947_v20 = vpop.f32.mrf.mxu1  ;;  %15855 = vst [vmem:[#allocation83_spill] sm:$0xff] %v12267_v38  ;;  %v3120_v49 = vsub.f32 %v12252_v25, %v12267_v38 }
 0x1e1   : > { %v12259_v16 = vadd.f32 %v1947_v20, %v1744_v21 }
 0x1e2   : > { %v1753_v11 = vpop.f32.mrf.mxu0  ;;  %3089 = vmatmul.mubr.f32.gmra.mxu0 %v12241_v56  ;;  %v1952_v4 = vpop.f32.mrf.mxu1  ;;  %3288 = vmatmul.mubr.f32.gmra.mxu1 %v12159_v33  ;;  %v12277_v56 = vand.u32 4294901760, %v3109_v26  ;;  %v12289_v26 = vand.u32 4294901760, %v3120_v49 }
 0x1e3   : > { %3094 = vmatprep.mubr.f32.mxu0 %v15833_v0  ;;  %v12271_v22 = vadd.f32 %v1952_v4, %v1753_v11  ;;  %3293 = vmatprep.mubr.f32.mxu1 %v15833_v0 }
 0x1e4   : > { %v1755_v12 = vpop.f32.mrf.mxu0  ;;  %v1954_v21 = vpop.f32.mrf.mxu1  ;;  %15856 = vst [vmem:[#allocation84_spill] sm:$0xff] %v12277_v56  ;;  %15857 = vst [vmem:[#allocation85_spill] sm:$0xff] %v12289_v26 }
 0x1e5   : > { %v12274_v20 = vadd.f32 %v1954_v21, %v1755_v12 }
 0x1e6   : > { %v1764_v6 = vpop.f32.mrf.mxu0  ;;  %3100 = vmatmul.mubr.f32.gmra.mxu0 %v12262_v59  ;;  %v1959_v54 = vpop.f32.mrf.mxu1  ;;  %3295 = vmatmul.mubr.f32.gmra.mxu1 %v12191_v23 }
 0x1e7   : > { %3105 = vmatprep.mubr.f32.mxu0 %v15833_v0  ;;  %v12283_v4 = vadd.f32 %v1959_v54, %v1764_v6  ;;  %3300 = vmatprep.mubr.f32.mxu1 %v15833_v0 }
 0x1e8   : > { %v1766_v11 = vpop.f32.mrf.mxu0  ;;  %v1961_v12 = vpop.f32.mrf.mxu1 }
 0x1e9   : > { %v12286_v21 = vadd.f32 %v1961_v12, %v1766_v11 }
 0x1ea   : > { %v1775_v33 = vpop.f32.mrf.mxu0  ;;  %3111 = vmatmul.mubr.f32.gmra.mxu0 %v12277_v56  ;;  %v1966_v59 = vpop.f32.mrf.mxu1  ;;  %3302 = vmatmul.mubr.f32.gmra.mxu1 %v12213_v63 }
 0x1eb   : > { %3116 = vmatprep.mubr.f32.mxu0 %v15833_v0  ;;  %v12293_v23 = vadd.f32 %v1966_v59, %v1775_v33  ;;  %3307 = vmatprep.mubr.f32.mxu1 %v15833_v0 }
 0x1ec   : > { %v1777_v54 = vpop.f32.mrf.mxu0  ;;  %v1968_v6 = vpop.f32.mrf.mxu1 }
 0x1ed   : > { %v12296_v38 = vadd.f32 %v1968_v6, %v1777_v54  ;;  %v15858_v6 = vld [vmem:[#allocation17_spill] sm:$0xff] }
 0x1ee   : > { %v1786_v11 = vpop.f32.mrf.mxu0  ;;  %3122 = vmatmul.mubr.f32.gmra.mxu0 %v12289_v26  ;;  %v1973_v12 = vpop.f32.mrf.mxu1  ;;  %3309 = vmatmul.mubr.f32.gmra.mxu1 %v12234_v5 }
 0x1ef   : > { %3383 = vmatprep.mubr.f32.mxu0 %v15833_v0  ;;  %v12301_v49 = vadd.f32 %v1973_v12, %v1786_v11  ;;  %3578 = vmatprep.mubr.f32.mxu1 %v15833_v0 }
 0x1f0   : > { %v1788_v56 = vpop.f32.mrf.mxu0  ;;  %v1975_v33 = vpop.f32.mrf.mxu1 }
 0x1f1   : > { %v12304_v59 = vadd.f32 %v1975_v33, %v1788_v56  ;;  %v15859_v33 = vld [vmem:[#allocation51_spill] sm:$0xff] }
 0x1f2   : > { %v2050_v63 = vpop.f32.mrf.mxu0  ;;  %3386 = vmatmul.mubr.f32.vlgmr.msra.gmra.mxu0 %v11928_v61  ;;  %v2246_v26 = vpop.f32.mrf.mxu1  ;;  %3582 = vmatmul.mubr.f32.vlgmr.msra.gmra.mxu1 %v11947_v41 }
 0x1f3   : > { %v2051_v54 = vadd.f32 %v2050_v63, %v12017_v7  ;;  %3760 = vmatpush1.msra.mxu0 %v15858_v6  ;;  %3939 = vmatpush1.msra.mxu1 %v15776_v57  ;;  %v15860_v63 = vld [vmem:[#allocation54_spill] sm:$0xff] }
 0x1f4   : > { %v2052_v5 = vpop.f32.mrf.mxu0  ;;  %3391 = vmatprep.mubr.f32.mxu0 %v15833_v0  ;;  %v2248_v12 = vpop.f32.mrf.mxu1  ;;  %3587 = vmatprep.mubr.f32.mxu1 %v15833_v0 }
 0x1f5   : > { %v12312_v11 = vadd.f32 %v2246_v26, %v2051_v54  ;;  %v2053_v56 = vadd.f32 %v2052_v5, %v12029_v50  ;;  %4116 = vmatprep.subr.mxu0 %v15859_v33  ;;  %4363 = vmatprep.subr.mxu1 %v15860_v63 }
 0x1f6   : > { %v2058_v7 = vpop.f32.mrf.mxu0  ;;  %3394 = vmatmul.mubr.f32.gmra.mxu0 %v11950_v29  ;;  %v2255_v41 = vpop.f32.mrf.mxu1  ;;  %3591 = vmatmul.mubr.f32.gmra.mxu1 %v11973_v55 }
 0x1f7   : > { %v12319_v6 = vadd.f32 %v2248_v12, %v2053_v56  ;;  %v2059_v57 = vadd.f32 %v2058_v7, %v12043_v62  ;;  %3399 = vmatprep.mubr.f32.mxu0 %v15833_v0  ;;  %3596 = vmatprep.mubr.f32.mxu1 %v15833_v0 }
 0x1f8   : > { %v2060_v50 = vpop.f32.mrf.mxu0  ;;  %v2257_v54 = vpop.f32.mrf.mxu1 }
 0x1f9   : > { %v12325_v5 = vadd.f32 %v2255_v41, %v2059_v57  ;;  %v2061_v26 = vadd.f32 %v2060_v50, %v12053_v10 }
 0x1fa   : > { %v2066_v29 = vpop.f32.mrf.mxu0  ;;  %3402 = vmatmul.mubr.f32.gmra.mxu0 %v11958_v48  ;;  %v2264_v12 = vpop.f32.mrf.mxu1  ;;  %3600 = vmatmul.mubr.f32.gmra.mxu1 %v11980_v58 }
 0x1fb   : > { %v12329_v56 = vadd.f32 %v2257_v54, %v2061_v26  ;;  %v2067_v62 = vadd.f32 %v2066_v29, %v12064_v35  ;;  %3407 = vmatprep.mubr.f32.mxu0 %v15833_v0  ;;  %3605 = vmatprep.mubr.f32.mxu1 %v15833_v0 }
 0x1fc   : > { %v2068_v7 = vpop.f32.mrf.mxu0  ;;  %v2266_v10 = vpop.f32.mrf.mxu1 }
 0x1fd   : > { %v12335_v57 = vadd.f32 %v2264_v12, %v2067_v62  ;;  %v2069_v41 = vadd.f32 %v2068_v7, %v12076_v36 }
 0x1fe   : > { %v2074_v50 = vpop.f32.mrf.mxu0  ;;  %3410 = vmatmul.mubr.f32.gmra.mxu0 %v11983_v2  ;;  %v2273_v35 = vpop.f32.mrf.mxu1  ;;  %3609 = vmatmul.mubr.f32.gmra.mxu1 %v12003_v39 }
 0x1ff   : > { %v12339_v26 = vadd.f32 %v2266_v10, %v2069_v41  ;;  %v2075_v29 = vadd.f32 %v2074_v50, %v12086_v42  ;;  %3415 = vmatprep.mubr.f32.mxu0 %v15833_v0  ;;  %3614 = vmatprep.mubr.f32.mxu1 %v15833_v0 }
 0x200   : > { %v2076_v54 = vpop.f32.mrf.mxu0  ;;  %v2275_v12 = vpop.f32.mrf.mxu1 }
 0x201   : > { %v12345_v62 = vadd.f32 %v2273_v35, %v2075_v29  ;;  %v2077_v36 = vadd.f32 %v2076_v54, %v12098_v14 }
 0x202   : > { %v2082_v7 = vpop.f32.mrf.mxu0  ;;  %3418 = vmatmul.mubr.f32.gmra.mxu0 %v12009_v53  ;;  %v2282_v10 = vpop.f32.mrf.mxu1  ;;  %3618 = vmatmul.mubr.f32.gmra.mxu1 %v12033_v28  ;;  %v15877_v53 = vld [vmem:[#allocation32_spill] sm:$0xff] }
 0x203   : > { %v12349_v41 = vadd.f32 %v2275_v12, %v2077_v36  ;;  %v2083_v42 = vadd.f32 %v2082_v7, %v12109_v24  ;;  %3423 = vmatprep.mubr.f32.mxu0 %v15833_v0  ;;  %3623 = vmatprep.mubr.f32.mxu1 %v15833_v0 }
 0x204   : > { %v2084_v50 = vpop.f32.mrf.mxu0  ;;  %v2284_v35 = vpop.f32.mrf.mxu1 }
 0x205   : > { %v12355_v29 = vadd.f32 %v2282_v10, %v2083_v42  ;;  %v2085_v14 = vadd.f32 %v2084_v50, %v12119_v1 }
 0x206   : > { %v2090_v54 = vpop.f32.mrf.mxu0  ;;  %3426 = vmatmul.mubr.f32.gmra.mxu0 %v12036_v27  ;;  %v2291_v12 = vpop.f32.mrf.mxu1  ;;  %3627 = vmatmul.mubr.f32.gmra.mxu1 %v12059_v52 }
 0x207   : > { %v12359_v36 = vadd.f32 %v2284_v35, %v2085_v14  ;;  %v2091_v24 = vadd.f32 %v2090_v54, %v12131_v43  ;;  %3431 = vmatprep.mubr.f32.mxu0 %v15833_v0  ;;  %3632 = vmatprep.mubr.f32.mxu1 %v15833_v0 }
 0x208   : > { %v2092_v7 = vpop.f32.mrf.mxu0  ;;  %v2293_v10 = vpop.f32.mrf.mxu1 }
 0x209   : > { %v12365_v42 = vadd.f32 %v2291_v12, %v2091_v24  ;;  %v2093_v1 = vadd.f32 %v2092_v7, %v12140_v32 }
 0x20a   : > { %v2098_v50 = vpop.f32.mrf.mxu0  ;;  %3434 = vmatmul.mubr.f32.gmra.mxu0 %v12049_v17  ;;  %v2300_v35 = vpop.f32.mrf.mxu1  ;;  %3636 = vmatmul.mubr.f32.gmra.mxu1 %v12069_v8  ;;  %v15876_v17 = vld [vmem:[#allocation30_spill] sm:$0xff] }
 0x20b   : > { %v12369_v14 = vadd.f32 %v2293_v10, %v2093_v1  ;;  %v2099_v43 = vadd.f32 %v2098_v50, %v12152_v47  ;;  %3439 = vmatprep.mubr.f32.mxu0 %v15833_v0  ;;  %3641 = vmatprep.mubr.f32.mxu1 %v15833_v0 }
 0x20c   : > { %v2100_v54 = vpop.f32.mrf.mxu0  ;;  %v2302_v12 = vpop.f32.mrf.mxu1 }
 0x20d   : > { %v12375_v24 = vadd.f32 %v2300_v35, %v2099_v43  ;;  %v2101_v32 = vadd.f32 %v2100_v54, %v12161_v30 }
 0x20e   : > { %v2106_v7 = vpop.f32.mrf.mxu0  ;;  %3442 = vmatmul.mubr.f32.gmra.mxu0 %v12072_v34  ;;  %v2309_v10 = vpop.f32.mrf.mxu1  ;;  %3645 = vmatmul.mubr.f32.gmra.mxu1 %v12093_v19  ;;  %v15875_v19 = vld [vmem:[#allocation52_spill] sm:$0xff] }
 0x20f   : > { %v12379_v1 = vadd.f32 %v2302_v12, %v2101_v32  ;;  %v2107_v47 = vadd.f32 %v2106_v7, %v12174_v46  ;;  %3447 = vmatprep.mubr.f32.mxu0 %v15833_v0  ;;  %3650 = vmatprep.mubr.f32.mxu1 %v15833_v0 }
 0x210   : > { %v2108_v50 = vpop.f32.mrf.mxu0  ;;  %v2311_v35 = vpop.f32.mrf.mxu1 }
 0x211   : > { %v12385_v43 = vadd.f32 %v2309_v10, %v2107_v47  ;;  %v2109_v30 = vadd.f32 %v2108_v50, %v12184_v13 }
 0x212   : > { %v2114_v54 = vpop.f32.mrf.mxu0  ;;  %3450 = vmatmul.mubr.f32.gmra.mxu0 %v12096_v31  ;;  %v2318_v12 = vpop.f32.mrf.mxu1  ;;  %3654 = vmatmul.mubr.f32.gmra.mxu1 %v12117_v44  ;;  %v15874_v44 = vld [vmem:[#allocation58_spill] sm:$0xff] }
 0x213   : > { %v12389_v32 = vadd.f32 %v2311_v35, %v2109_v30  ;;  %v2115_v46 = vadd.f32 %v2114_v54, %v12196_v9  ;;  %3455 = vmatprep.mubr.f32.mxu0 %v15833_v0  ;;  %3659 = vmatprep.mubr.f32.mxu1 %v15833_v0 }
 0x214   : > { %v2116_v7 = vpop.f32.mrf.mxu0  ;;  %v2320_v10 = vpop.f32.mrf.mxu1 }
 0x215   : > { %v12395_v47 = vadd.f32 %v2318_v12, %v2115_v46  ;;  %v2117_v13 = vadd.f32 %v2116_v7, %v12205_v37 }
 0x216   : > { %v2122_v50 = vpop.f32.mrf.mxu0  ;;  %3458 = vmatmul.mubr.f32.gmra.mxu0 %v12123_v18  ;;  %v2327_v35 = vpop.f32.mrf.mxu1  ;;  %3663 = vmatmul.mubr.f32.gmra.mxu1 %v12144_v60  ;;  %v15863_v18 = vld [vmem:[#allocation62_spill] sm:$0xff] }
 0x217   : > { %v12399_v30 = vadd.f32 %v2320_v10, %v2117_v13  ;;  %v2123_v9 = vadd.f32 %v2122_v50, %v12218_v15  ;;  %3463 = vmatprep.mubr.f32.mxu0 %v15833_v0  ;;  %3668 = vmatprep.mubr.f32.mxu1 %v15833_v0  ;;  %v15861_v50 = vld [vmem:[#allocation65_spill] sm:$0xff] }
 0x218   : > { %v2124_v54 = vpop.f32.mrf.mxu0  ;;  %v2329_v12 = vpop.f32.mrf.mxu1 }
 0x219   : > { %v12405_v46 = vadd.f32 %v2327_v35, %v2123_v9  ;;  %v2125_v37 = vadd.f32 %v2124_v54, %v12225_v51  ;;  %v15862_v35 = vld [vmem:[#allocation79_spill] sm:$0xff] }
 0x21a   : > { %v2130_v7 = vpop.f32.mrf.mxu0  ;;  %3466 = vmatmul.mubr.f32.gmra.mxu0 %v12147_v45  ;;  %v2336_v10 = vpop.f32.mrf.mxu1  ;;  %3672 = vmatmul.mubr.f32.gmra.mxu1 %v15861_v50  ;;  %v15865_v45 = vld [vmem:[#allocation67_spill] sm:$0xff] }
 0x21b   : > { %v12409_v13 = vadd.f32 %v2329_v12, %v2125_v37  ;;  %v2131_v15 = vadd.f32 %v2130_v7, %v12238_v3  ;;  %3471 = vmatprep.mubr.f32.mxu0 %v15833_v0  ;;  %3677 = vmatprep.mubr.f32.mxu1 %v15833_v0  ;;  %v15864_v7 = vld [vmem:[#allocation66_spill] sm:$0xff] }
 0x21c   : > { %v2132_v63 = vpop.f32.mrf.mxu0  ;;  %v2338_v54 = vpop.f32.mrf.mxu1 }
 0x21d   : > { %v12415_v9 = vadd.f32 %v2336_v10, %v2131_v15  ;;  %v2133_v51 = vadd.f32 %v2132_v63, %v15862_v35 }
 0x21e   : > { %v2138_v60 = vpop.f32.mrf.mxu0  ;;  %3474 = vmatmul.mubr.f32.gmra.mxu0 %v15863_v18  ;;  %v2345_v12 = vpop.f32.mrf.mxu1  ;;  %3681 = vmatmul.mubr.f32.gmra.mxu1 %v15864_v7  ;;  %v15867_v18 = vld [vmem:[#allocation72_spill] sm:$0xff] }
 0x21f   : > { %v12419_v37 = vadd.f32 %v2338_v54, %v2133_v51  ;;  %v2139_v3 = vadd.f32 %v2138_v60, %v12256_v40  ;;  %3479 = vmatprep.mubr.f32.mxu0 %v15833_v0  ;;  %3686 = vmatprep.mubr.f32.mxu1 %v15833_v0  ;;  %v15866_v54 = vld [vmem:[#allocation70_spill] sm:$0xff] }
 0x220   : > { %v2140_v50 = vpop.f32.mrf.mxu0  ;;  %v2347_v10 = vpop.f32.mrf.mxu1 }
 0x221   : > { %v12425_v15 = vadd.f32 %v2345_v12, %v2139_v3  ;;  %v2141_v63 = vadd.f32 %v2140_v50, %v12259_v16 }
 0x222   : > { %v2146_v35 = vpop.f32.mrf.mxu0  ;;  %3482 = vmatmul.mubr.f32.gmra.mxu0 %v15865_v45  ;;  %v2354_v40 = vpop.f32.mrf.mxu1  ;;  %3690 = vmatmul.mubr.f32.gmra.mxu1 %v15866_v54 }
 0x223   : > { %v12429_v51 = vadd.f32 %v2347_v10, %v2141_v63  ;;  %v2147_v60 = vadd.f32 %v2146_v35, %v12271_v22  ;;  %3487 = vmatprep.mubr.f32.mxu0 %v15833_v0  ;;  %3695 = vmatprep.mubr.f32.mxu1 %v15833_v0  ;;  %v15868_v35 = vld [vmem:[#allocation75_spill] sm:$0xff] }
 0x224   : > { %v2148_v7 = vpop.f32.mrf.mxu0  ;;  %v2356_v50 = vpop.f32.mrf.mxu1 }
 0x225   : > { %v12435_v3 = vadd.f32 %v2354_v40, %v2147_v60  ;;  %v2149_v16 = vadd.f32 %v2148_v7, %v12274_v20 }
 0x226   : > { %v2154_v12 = vpop.f32.mrf.mxu0  ;;  %3490 = vmatmul.mubr.f32.gmra.mxu0 %v15867_v18  ;;  %v2363_v10 = vpop.f32.mrf.mxu1  ;;  %3699 = vmatmul.mubr.f32.gmra.mxu1 %v15868_v35  ;;  %v15869_v18 = vld [vmem:[#allocation76_spill] sm:$0xff]  ;;  %v15873_v35 = vld [vmem:[#allocation55_spill] sm:$0xff] }
 0x227   : > { %v12439_v63 = vadd.f32 %v2356_v50, %v2149_v16  ;;  %v2155_v22 = vadd.f32 %v2154_v12, %v12283_v4  ;;  %3495 = vmatprep.mubr.f32.mxu0 %v15833_v0  ;;  %3704 = vmatprep.mubr.f32.mxu1 %v15833_v0  ;;  %v15870_v50 = vld [vmem:[#allocation80_spill] sm:$0xff] }
 0x228   : > { %v2156_v54 = vpop.f32.mrf.mxu0  ;;  %v2365_v7 = vpop.f32.mrf.mxu1 }
 0x229   : > { %v12445_v60 = vadd.f32 %v2363_v10, %v2155_v22  ;;  %v2157_v20 = vadd.f32 %v2156_v54, %v12286_v21  ;;  %v15871_v10 = vld [vmem:[#allocation83_spill] sm:$0xff] }
 0x22a   : > { %v12448_v40 = vpop.f32.mrf.mxu0  ;;  %3498 = vmatmul.mubr.f32.gmra.mxu0 %v15869_v18  ;;  %v12453_v4 = vpop.f32.mrf.mxu1  ;;  %3708 = vmatmul.mubr.f32.gmra.mxu1 %v15870_v50  ;;  %v15872_v18 = vld [vmem:[#allocation28_spill] sm:$0xff] }
 0x22b   : > { %v12451_v16 = vadd.f32 %v2365_v7, %v2157_v20  ;;  %3503 = vmatprep.mubr.f32.mxu0 %v15833_v0  ;;  %3713 = vmatprep.mubr.f32.mxu1 %v15833_v0 }
 0x22c   : > { %v12457_v12 = vpop.f32.mrf.mxu0  ;;  %v12460_v22 = vpop.f32.mrf.mxu1 }
 0x22e   : > { %v12462_v21 = vpop.f32.mrf.mxu0  ;;  %3506 = vmatmul.mubr.f32.gmra.mxu0 %v12252_v25  ;;  %v12465_v54 = vpop.f32.mrf.mxu1  ;;  %3717 = vmatmul.mubr.f32.gmra.mxu1 %v15871_v10 }
 0x22f   : > { %3793 = vmatprep.mubr.f32.mxu0 %v15833_v0  ;;  %3972 = vmatprep.mubr.f32.mxu1 %v15833_v0 }
 0x230   : > { %v12469_v20 = vpop.f32.mrf.mxu0  ;;  %v12472_v7 = vpop.f32.mrf.mxu1 }
 0x232   : > { %v2459_v50 = vpop.f32.mrf.mxu0  ;;  %3795 = vmatmul.mubr.f32.vlgmr.msra.gmra.mxu0 %v15872_v18  ;;  %v2638_v45 = vpop.f32.mrf.mxu1  ;;  %3974 = vmatmul.mubr.f32.vlgmr.msra.gmra.mxu1 %v15872_v18 }
 0x233   : > { %4118 = vmatpush1.msra.mxu0 %v15873_v35  ;;  %4369 = vmatpush1.msra.mxu1 %v15874_v44  ;;  %v2460_v10 = vadd.f32 %v2459_v50, %v12312_v11 }
 0x234   : > { %v2461_v25 = vpop.f32.mrf.mxu0  ;;  %3800 = vmatprep.mubr.f32.mxu0 %v15833_v0  ;;  %v2640_v31 = vpop.f32.mrf.mxu1  ;;  %3979 = vmatprep.mubr.f32.mxu1 %v15833_v0 }
 0x235   : > { %4547 = vmatprep.subr.mxu0 %v15875_v19  ;;  %v2462_v34 = vadd.f32 %v2461_v25, %v12319_v6  ;;  %4743 = vmatprep.subr.mxu1 %v15859_v33  ;;  %v2639_v50 = vadd.f32 %v2638_v45, %v2460_v10 }
 0x236   : > { %v2466_v8 = vpop.f32.mrf.mxu0  ;;  %3802 = vmatmul.mubr.f32.gmra.mxu0 %v15876_v17  ;;  %v2645_v27 = vpop.f32.mrf.mxu1  ;;  %3981 = vmatmul.mubr.f32.gmra.mxu1 %v15876_v17 }
 0x237   : > { %v2467_v52 = vadd.f32 %v2466_v8, %v12325_v5  ;;  %3807 = vmatprep.mubr.f32.mxu0 %v15833_v0  ;;  %3986 = vmatprep.mubr.f32.mxu1 %v15833_v0  ;;  %v2641_v6 = vadd.f32 %v2640_v31, %v2462_v34 }
 0x238   : > { %v2468_v11 = vpop.f32.mrf.mxu0  ;;  %v2647_v25 = vpop.f32.mrf.mxu1 }
 0x239   : > { %v2646_v44 = vadd.f32 %v2645_v27, %v2467_v52  ;;  %v2469_v19 = vadd.f32 %v2468_v11, %v12329_v56  ;;  %v15878_v56 = vld [vmem:[#allocation43_spill] sm:$0xff] }
 0x23a   : > { %v2473_v28 = vpop.f32.mrf.mxu0  ;;  %3809 = vmatmul.mubr.f32.gmra.mxu0 %v15877_v53  ;;  %v2652_v5 = vpop.f32.mrf.mxu1  ;;  %3988 = vmatmul.mubr.f32.gmra.mxu1 %v15877_v53 }
 0x23b   : > { %v2750_v39 = vmin.f32 %v2639_v50, %v2646_v44  ;;  %v2648_v2 = vadd.f32 %v2647_v25, %v2469_v19  ;;  %v2474_v8 = vadd.f32 %v2473_v28, %v12335_v57  ;;  %3814 = vmatprep.mubr.f32.mxu0 %v15833_v0  ;;  %3993 = vmatprep.mubr.f32.mxu1 %v15833_v0  ;;  %v15879_v25 = vld [vmem:[#allocation34_spill] sm:$0xff] }
 0x23c   : > { %v2475_v58 = vpop.f32.mrf.mxu0  ;;  %v2654_v34 = vpop.f32.mrf.mxu1 }
 0x23d   : > { %v2751_v27 = vmin.f32 %v2641_v6, %v2648_v2  ;;  %v2653_v52 = vadd.f32 %v2652_v5, %v2474_v8  ;;  %v2476_v45 = vadd.f32 %v2475_v58, %v12339_v26 }
 0x23e   : > { %v2480_v31 = vpop.f32.mrf.mxu0  ;;  %3816 = vmatmul.mubr.f32.gmra.mxu0 %v15878_v56  ;;  %v2659_v57 = vpop.f32.mrf.mxu1  ;;  %3995 = vmatmul.mubr.f32.gmra.mxu1 %v15878_v56 }
 0x23f   : > { %v2754_v44 = vmin.f32 %v2750_v39, %v2653_v52  ;;  %v2655_v19 = vadd.f32 %v2654_v34, %v2476_v45  ;;  %v2481_v28 = vadd.f32 %v2480_v31, %v12345_v62  ;;  %3821 = vmatprep.mubr.f32.mxu0 %v15833_v0  ;;  %4000 = vmatprep.mubr.f32.mxu1 %v15833_v0  ;;  %v15880_v31 = vld [vmem:[#allocation39_spill] sm:$0xff] }
 0x240   : > { %v2482_v10 = vpop.f32.mrf.mxu0  ;;  %v2661_v26 = vpop.f32.mrf.mxu1 }
 0x241   : > { %v2755_v2 = vmin.f32 %v2751_v27, %v2655_v19  ;;  %v2660_v11 = vadd.f32 %v2659_v57, %v2481_v28  ;;  %v2483_v58 = vadd.f32 %v2482_v10, %v12349_v41 }
 0x242   : > { %v2487_v50 = vpop.f32.mrf.mxu0  ;;  %3823 = vmatmul.mubr.f32.gmra.mxu0 %v15879_v25  ;;  %v2666_v8 = vpop.f32.mrf.mxu1  ;;  %4002 = vmatmul.mubr.f32.gmra.mxu1 %v15879_v25 }
 0x243   : > { %v2758_v39 = vmin.f32 %v2754_v44, %v2660_v11  ;;  %v2662_v6 = vadd.f32 %v2661_v26, %v2483_v58  ;;  %v2488_v62 = vadd.f32 %v2487_v50, %v12355_v29  ;;  %3828 = vmatprep.mubr.f32.mxu0 %v15833_v0  ;;  %4007 = vmatprep.mubr.f32.mxu1 %v15833_v0  ;;  %v15881_v26 = vld [vmem:[#allocation44_spill] sm:$0xff] }
 0x244   : > { %v2489_v5 = vpop.f32.mrf.mxu0  ;;  %v2668_v45 = vpop.f32.mrf.mxu1 }
 0x245   : > { %v2759_v27 = vmin.f32 %v2755_v2, %v2662_v6  ;;  %v2667_v52 = vadd.f32 %v2666_v8, %v2488_v62  ;;  %v2490_v41 = vadd.f32 %v2489_v5, %v12359_v36 }
 0x246   : > { %v2494_v34 = vpop.f32.mrf.mxu0  ;;  %3830 = vmatmul.mubr.f32.gmra.mxu0 %v15880_v31  ;;  %v2673_v28 = vpop.f32.mrf.mxu1  ;;  %4009 = vmatmul.mubr.f32.gmra.mxu1 %v15880_v31 }
 0x247   : > { %v2762_v44 = vmin.f32 %v2758_v39, %v2667_v52  ;;  %v2669_v19 = vadd.f32 %v2668_v45, %v2490_v41  ;;  %v2495_v29 = vadd.f32 %v2494_v34, %v12365_v42  ;;  %3835 = vmatprep.mubr.f32.mxu0 %v15833_v0  ;;  %4014 = vmatprep.mubr.f32.mxu1 %v15833_v0  ;;  %v15882_v41 = vld [vmem:[#allocation10_spill] sm:$0xff] }
 0x248   : > { %v2496_v57 = vpop.f32.mrf.mxu0  ;;  %v2675_v11 = vpop.f32.mrf.mxu1 }
 0x249   : > { %v2763_v10 = vmin.f32 %v2759_v27, %v2669_v19  ;;  %v2674_v2 = vadd.f32 %v2673_v28, %v2495_v29  ;;  %v2497_v36 = vadd.f32 %v2496_v57, %v12369_v14 }
 0x24a   : > { %v2501_v58 = vpop.f32.mrf.mxu0  ;;  %3837 = vmatmul.mubr.f32.gmra.mxu0 %v15881_v26  ;;  %v2680_v6 = vpop.f32.mrf.mxu1  ;;  %4016 = vmatmul.mubr.f32.gmra.mxu1 %v15881_v26 }
 0x24b   : > { %v2766_v50 = vmin.f32 %v2762_v44, %v2674_v2  ;;  %v2676_v39 = vadd.f32 %v2675_v11, %v2497_v36  ;;  %v2502_v42 = vadd.f32 %v2501_v58, %v12375_v24  ;;  %3842 = vmatprep.mubr.f32.mxu0 %v15833_v0  ;;  %4021 = vmatprep.mubr.f32.mxu1 %v15833_v0  ;;  %v15883_v2 = vld [vmem:[#allocation18_spill] sm:$0xff] }
 0x24c   : > { %v2503_v62 = vpop.f32.mrf.mxu0  ;;  %v2682_v27 = vpop.f32.mrf.mxu1 }
 0x24d   : > { %v2767_v8 = vmin.f32 %v2763_v10, %v2676_v39  ;;  %v2681_v5 = vadd.f32 %v2680_v6, %v2502_v42  ;;  %v2504_v14 = vadd.f32 %v2503_v62, %v12379_v1 }
 0x24e   : > { %v2508_v52 = vpop.f32.mrf.mxu0  ;;  %3844 = vmatmul.mubr.f32.gmra.mxu0 %v15882_v41  ;;  %v2687_v44 = vpop.f32.mrf.mxu1  ;;  %4023 = vmatmul.mubr.f32.gmra.mxu1 %v15882_v41 }
 0x24f   : > { %v2770_v45 = vmin.f32 %v2766_v50, %v2681_v5  ;;  %v2683_v34 = vadd.f32 %v2682_v27, %v2504_v14  ;;  %v2509_v24 = vadd.f32 %v2508_v52, %v12385_v43  ;;  %3849 = vmatprep.mubr.f32.mxu0 %v15833_v0  ;;  %4028 = vmatprep.mubr.f32.mxu1 %v15833_v0 }
 0x250   : > { %v2510_v19 = vpop.f32.mrf.mxu0  ;;  %v2689_v57 = vpop.f32.mrf.mxu1 }
 0x251   : > { %v2771_v29 = vmin.f32 %v2767_v8, %v2683_v34  ;;  %v2688_v28 = vadd.f32 %v2687_v44, %v2509_v24  ;;  %v2511_v1 = vadd.f32 %v2510_v19, %v12389_v32  ;;  %v15884_v8 = vld [vmem:[#allocation26_spill] sm:$0xff] }
 0x252   : > { %v2515_v10 = vpop.f32.mrf.mxu0  ;;  %3851 = vmatmul.mubr.f32.gmra.mxu0 %v15883_v2  ;;  %v2694_v58 = vpop.f32.mrf.mxu1  ;;  %4030 = vmatmul.mubr.f32.gmra.mxu1 %v15883_v2  ;;  %v15885_v19 = vld [vmem:[#allocation38_spill] sm:$0xff] }
 0x253   : > { %v2774_v36 = vmin.f32 %v2770_v45, %v2688_v28  ;;  %v2690_v11 = vadd.f32 %v2689_v57, %v2511_v1  ;;  %v2516_v43 = vadd.f32 %v2515_v10, %v12395_v47  ;;  %3856 = vmatprep.mubr.f32.mxu0 %v15833_v0  ;;  %4035 = vmatprep.mubr.f32.mxu1 %v15833_v0 }
 0x254   : > { %v2517_v50 = vpop.f32.mrf.mxu0  ;;  %v2696_v6 = vpop.f32.mrf.mxu1 }
 0x255   : > { %v2775_v39 = vmin.f32 %v2771_v29, %v2690_v11  ;;  %v2695_v42 = vadd.f32 %v2694_v58, %v2516_v43  ;;  %v2518_v32 = vadd.f32 %v2517_v50, %v12399_v30  ;;  %v15886_v58 = vld [vmem:[#allocation59_spill] sm:$0xff] }
 0x256   : > { %v2522_v62 = vpop.f32.mrf.mxu0  ;;  %3858 = vmatmul.mubr.f32.gmra.mxu0 %v15884_v8  ;;  %v2701_v27 = vpop.f32.mrf.mxu1  ;;  %4037 = vmatmul.mubr.f32.gmra.mxu1 %v15884_v8 }
 0x257   : > { %v2778_v5 = vmin.f32 %v2774_v36, %v2695_v42  ;;  %v2697_v14 = vadd.f32 %v2696_v6, %v2518_v32  ;;  %v2523_v47 = vadd.f32 %v2522_v62, %v12405_v46  ;;  %3863 = vmatprep.mubr.f32.mxu0 %v15833_v0  ;;  %4042 = vmatprep.mubr.f32.mxu1 %v15833_v0 }
 0x258   : > { %v2524_v52 = vpop.f32.mrf.mxu0  ;;  %v2703_v24 = vpop.f32.mrf.mxu1 }
 0x259   : > { %v2779_v45 = vmin.f32 %v2775_v39, %v2697_v14  ;;  %v2702_v34 = vadd.f32 %v2701_v27, %v2523_v47  ;;  %v2525_v30 = vadd.f32 %v2524_v52, %v12409_v13  ;;  %v15887_v47 = vld [vmem:[#allocation63_spill] sm:$0xff] }
 0x25a   : > { %v2529_v44 = vpop.f32.mrf.mxu0  ;;  %3865 = vmatmul.mubr.f32.gmra.mxu0 %v15885_v19  ;;  %v2708_v1 = vpop.f32.mrf.mxu1  ;;  %4044 = vmatmul.mubr.f32.gmra.mxu1 %v15885_v19 }
 0x25b   : > { %v2782_v29 = vmin.f32 %v2778_v5, %v2702_v34  ;;  %v2704_v28 = vadd.f32 %v2703_v24, %v2525_v30  ;;  %v2530_v46 = vadd.f32 %v2529_v44, %v12415_v9  ;;  %3870 = vmatprep.mubr.f32.mxu0 %v15833_v0  ;;  %4049 = vmatprep.mubr.f32.mxu1 %v15833_v0 }
 0x25c   : > { %v2531_v57 = vpop.f32.mrf.mxu0  ;;  %v2710_v11 = vpop.f32.mrf.mxu1  ;;  %v2163_v34 = vadd.f32 %v12448_v40, %v12293_v23 }
 0x25d   : > { %v2783_v10 = vmin.f32 %v2779_v45, %v2704_v28  ;;  %v2709_v36 = vadd.f32 %v2708_v1, %v2530_v46  ;;  %v2532_v13 = vadd.f32 %v2531_v57, %v12419_v37  ;;  %v2165_v28 = vadd.f32 %v12457_v12, %v12296_v38  ;;  %v15888_v46 = vld [vmem:[#allocation69_spill] sm:$0xff] }
 0x25e   : > { %v2536_v43 = vpop.f32.mrf.mxu0  ;;  %3872 = vmatmul.mubr.f32.gmra.mxu0 %v15886_v58  ;;  %v2715_v42 = vpop.f32.mrf.mxu1  ;;  %4051 = vmatmul.mubr.f32.gmra.mxu1 %v15886_v58  ;;  %v2373_v23 = vadd.f32 %v12453_v4, %v2163_v34  ;;  %v2171_v38 = vadd.f32 %v12462_v21, %v12301_v49 }
 0x25f   : > { %v2786_v50 = vmin.f32 %v2782_v29, %v2709_v36  ;;  %v2711_v39 = vadd.f32 %v2710_v11, %v2532_v13  ;;  %v2537_v9 = vadd.f32 %v2536_v43, %v12425_v15  ;;  %3877 = vmatprep.mubr.f32.mxu0 %v15833_v0  ;;  %4056 = vmatprep.mubr.f32.mxu1 %v15833_v0 }
 0x260   : > { %v2538_v32 = vpop.f32.mrf.mxu0  ;;  %v2717_v5 = vpop.f32.mrf.mxu1  ;;  %v2173_v43 = vadd.f32 %v12469_v20, %v12304_v59 }
 0x261   : > { %v2787_v6 = vmin.f32 %v2783_v10, %v2711_v39  ;;  %v2716_v62 = vadd.f32 %v2715_v42, %v2537_v9  ;;  %v2539_v37 = vadd.f32 %v2538_v32, %v12429_v51  ;;  %v15889_v39 = vld [vmem:[#allocation73_spill] sm:$0xff] }
 0x262   : > { %v2543_v14 = vpop.f32.mrf.mxu0  ;;  %3879 = vmatmul.mubr.f32.gmra.mxu0 %v15887_v47  ;;  %v2722_v45 = vpop.f32.mrf.mxu1  ;;  %4058 = vmatmul.mubr.f32.gmra.mxu1 %v15887_v47  ;;  %v2384_v20 = vadd.f32 %v12472_v7, %v2173_v43 }
 0x263   : > { %v2790_v27 = vmin.f32 %v2786_v50, %v2716_v62  ;;  %v2718_v52 = vadd.f32 %v2717_v5, %v2539_v37  ;;  %v2544_v15 = vadd.f32 %v2543_v14, %v12435_v3  ;;  %3884 = vmatprep.mubr.f32.mxu0 %v15833_v0  ;;  %4063 = vmatprep.mubr.f32.mxu1 %v15833_v0  ;;  %v15890_v37 = vld [vmem:[#allocation77_spill] sm:$0xff] }
 0x264   : > { %v2545_v30 = vpop.f32.mrf.mxu0  ;;  %v2724_v29 = vpop.f32.mrf.mxu1 }
 0x265   : > { %v2791_v51 = vmin.f32 %v2787_v6, %v2718_v52  ;;  %v2723_v24 = vadd.f32 %v2722_v45, %v2544_v15  ;;  %v2546_v44 = vadd.f32 %v2545_v30, %v12439_v63 }
 0x266   : > { %v2550_v3 = vpop.f32.mrf.mxu0  ;;  %3886 = vmatmul.mubr.f32.gmra.mxu0 %v15888_v46  ;;  %v2729_v36 = vpop.f32.mrf.mxu1  ;;  %4065 = vmatmul.mubr.f32.gmra.mxu1 %v15888_v46 }
 0x267   : > { %v2794_v1 = vmin.f32 %v2790_v27, %v2723_v24  ;;  %v2725_v57 = vadd.f32 %v2724_v29, %v2546_v44  ;;  %v2551_v10 = vadd.f32 %v2550_v3, %v12445_v60  ;;  %3891 = vmatprep.mubr.f32.mxu0 %v15833_v0  ;;  %4070 = vmatprep.mubr.f32.mxu1 %v15833_v0  ;;  %v15891_v24 = vld [vmem:[#allocation33_spill] sm:$0xff] }
 0x268   : > { %v2552_v40 = vpop.f32.mrf.mxu0  ;;  %v2731_v11 = vpop.f32.mrf.mxu1  ;;  %v2375_v60 = vadd.f32 %v12460_v22, %v2165_v28  ;;  %v15892_v28 = vld [vmem:[#allocation56_spill] sm:$0xff] }
 0x269   : > { %v2795_v63 = vmin.f32 %v2791_v51, %v2725_v57  ;;  %v2730_v12 = vadd.f32 %v2729_v36, %v2551_v10  ;;  %v2553_v13 = vadd.f32 %v2552_v40, %v12451_v16  ;;  %v2382_v16 = vadd.f32 %v12465_v54, %v2171_v38  ;;  %v2810_v51 = vld [vmem:[#allocation2 + $0x18] sm:$0xff]  ;;  %v15893_v38 = vld [vmem:[#allocation53_spill] sm:$0xff] }
 0x26a   : > { %v2557_v50 = vpop.f32.mrf.mxu0  ;;  %3893 = vmatmul.mubr.f32.gmra.mxu0 %v15889_v39  ;;  %v2736_v32 = vpop.f32.mrf.mxu1  ;;  %4072 = vmatmul.mubr.f32.gmra.mxu1 %v15889_v39 }
 0x26b   : > { %v2798_v4 = vmin.f32 %v2794_v1, %v2730_v12  ;;  %v2732_v9 = vadd.f32 %v2731_v11, %v2553_v13  ;;  %v2558_v42 = vadd.f32 %v2557_v50, %v2373_v23  ;;  %3898 = vmatprep.mubr.f32.mxu0 %v15833_v0  ;;  %4077 = vmatprep.mubr.f32.mxu1 %v15833_v0  ;;  %v2811_v1 = vld [vmem:[#allocation2 + $0x8] sm:$0xff]  ;;  %v15894_v13 = vld [vmem:[#allocation37_spill] sm:$0xff] }
 0x26c   : > { %v2559_v49 = vpop.f32.mrf.mxu0  ;;  %v2738_v59 = vpop.f32.mrf.mxu1 }
 0x26d   : > { %v2799_v22 = vmin.f32 %v2795_v63, %v2732_v9  ;;  %v2737_v21 = vadd.f32 %v2736_v32, %v2558_v42  ;;  %v2560_v6 = vadd.f32 %v2559_v49, %v2375_v60  ;;  %v15895_v32 = vld [vmem:[#allocation41_spill] sm:$0xff] }
 0x26e   : > { %v2564_v62 = vpop.f32.mrf.mxu0  ;;  %3900 = vmatmul.mubr.f32.gmra.mxu0 %v15890_v37  ;;  %v2743_v52 = vpop.f32.mrf.mxu1  ;;  %4079 = vmatmul.mubr.f32.gmra.mxu1 %v15890_v37 }
 0x26f   : > { %v2802_v5 = vmin.f32 %v2798_v4, %v2737_v21  ;;  %v2739_v14 = vadd.f32 %v2738_v59, %v2560_v6  ;;  %v2565_v27 = vadd.f32 %v2564_v62, %v2382_v16  ;;  %4151 = vmatprep.mubr.f32.mxu0 %v15833_v0  ;;  %4402 = vmatprep.mubr.f32.mxu1 %v15833_v0 }
 0x270   : > { %v2566_v15 = vpop.f32.mrf.mxu0  ;;  %v2745_v30 = vpop.f32.mrf.mxu1 }
 0x271   : > { %v2803_v54 = vmin.f32 %v2799_v22, %v2739_v14  ;;  %v2744_v45 = vadd.f32 %v2743_v52, %v2565_v27  ;;  %v2567_v34 = vadd.f32 %v2566_v15, %v2384_v20  ;;  %v15896_v20 = vld [vmem:[#allocation48_spill] sm:$0xff] }
 0x272   : > { %v2958_v7 = vpop.f32.mrf.mxu0  ;;  %4157 = vmatmul.mubr.f32.vlgmr.msra.gmra.mxu0 %v15891_v24  ;;  %v3205_v3 = vpop.f32.mrf.mxu1  ;;  %4404 = vmatmul.mubr.f32.vlgmr.msra.gmra.mxu1 %v15872_v18 }
 0x273   : > { %v2806_v44 = vmin.f32 %v2802_v5, %v2744_v45  ;;  %v2746_v29 = vadd.f32 %v2745_v30, %v2567_v34  ;;  %4550 = vmatpush1.msra.mxu0 %v15892_v28  ;;  %v12585_v57 = vadd.f32 %v3205_v3, %v2958_v7  ;;  %4745 = vmatpush1.msra.mxu1 %v15873_v35 }
 0x274   : > { %v2960_v10 = vpop.f32.mrf.mxu0  ;;  %4162 = vmatprep.mubr.f32.mxu0 %v15833_v0  ;;  %v3207_v40 = vpop.f32.mrf.mxu1  ;;  %4409 = vmatprep.mubr.f32.mxu1 %v15833_v0 }
 0x275   : > { %v2814_v36 = vmin.f32 %v2810_v51, %v2806_v44  ;;  %v2807_v23 = vmin.f32 %v2803_v54, %v2746_v29  ;;  %4956 = vmatprep.subr.mxu0 %v15893_v38  ;;  %v12591_v63 = vadd.f32 %v3207_v40, %v2960_v10  ;;  %5137 = vmatprep.subr.mxu1 %v15859_v33  ;;  %v15897_v54 = vld [vmem:[#allocation21_spill] sm:$0xff]  ;;  %v15898_v44 = vld [vmem:[#allocation24_spill] sm:$0xff]  ;;  %v15899_v40 = vld [vmem:[#allocation27_spill] sm:$0xff] }
 0x276   : > { %v2969_v12 = vpop.f32.mrf.mxu0  ;;  %4168 = vmatmul.mubr.f32.gmra.mxu0 %v15894_v13  ;;  %v3212_v60 = vpop.f32.mrf.mxu1  ;;  %4411 = vmatmul.mubr.f32.gmra.mxu1 %v15876_v17  ;;  %v15911_v38 = vld [vmem:[#allocation36_spill] sm:$0xff] }
 0x277   : > { %2818 = vst [vmem:[#allocation2 + $0x18] sm:$0xff] %v2814_v36  ;;  %v2815_v11 = vmin.f32 %v2811_v1, %v2807_v23  ;;  %4173 = vmatprep.mubr.f32.mxu0 %v15833_v0  ;;  %v12597_v43 = vadd.f32 %v3212_v60, %v2969_v12  ;;  %4416 = vmatprep.mubr.f32.mxu1 %v15833_v0  ;;  %v15946_v33 = vld [vmem:[#allocation20_spill] sm:$0xff] }
 0x278   : > { %v2971_v50 = vpop.f32.mrf.mxu0  ;;  %v3214_v4 = vpop.f32.mrf.mxu1 }
 0x279   : > { %2819 = vst [vmem:[#allocation2 + $0x8] sm:$0xff] %v2815_v11  ;;  %v12600_v9 = vadd.f32 %v3214_v4, %v2971_v50 }
 0x27a   : > { %v2980_v42 = vpop.f32.mrf.mxu0  ;;  %4179 = vmatmul.mubr.f32.gmra.mxu0 %v15895_v32  ;;  %v3219_v49 = vpop.f32.mrf.mxu1  ;;  %4418 = vmatmul.mubr.f32.gmra.mxu1 %v15877_v53 }
 0x27b   : > { %4184 = vmatprep.mubr.f32.mxu0 %v15833_v0  ;;  %v12605_v16 = vadd.f32 %v3219_v49, %v2980_v42  ;;  %4423 = vmatprep.mubr.f32.mxu1 %v15833_v0  ;;  %v15900_v42 = vld [vmem:[#allocation42_spill] sm:$0xff] }
 0x27c   : > { %v2982_v22 = vpop.f32.mrf.mxu0  ;;  %v3221_v21 = vpop.f32.mrf.mxu1 }
 0x27d   : > { %v12608_v6 = vadd.f32 %v3221_v21, %v2982_v22 }
 0x27e   : > { %v2991_v59 = vpop.f32.mrf.mxu0  ;;  %4190 = vmatmul.mubr.f32.gmra.mxu0 %v15896_v20  ;;  %v3226_v62 = vpop.f32.mrf.mxu1  ;;  %4425 = vmatmul.mubr.f32.gmra.mxu1 %v15878_v56 }
 0x27f   : > { %4195 = vmatprep.mubr.f32.mxu0 %v15833_v0  ;;  %v12613_v5 = vadd.f32 %v3226_v62, %v2991_v59  ;;  %4430 = vmatprep.mubr.f32.mxu1 %v15833_v0  ;;  %v15901_v62 = vld [vmem:[#allocation64_spill] sm:$0xff] }
 0x280   : > { %v2993_v14 = vpop.f32.mrf.mxu0  ;;  %v3228_v27 = vpop.f32.mrf.mxu1 }
 0x281   : > { %v12616_v52 = vadd.f32 %v3228_v27, %v2993_v14 }
 0x282   : > { %v3002_v15 = vpop.f32.mrf.mxu0  ;;  %4201 = vmatmul.mubr.f32.gmra.mxu0 %v15897_v54  ;;  %v3233_v45 = vpop.f32.mrf.mxu1  ;;  %4432 = vmatmul.mubr.f32.gmra.mxu1 %v15879_v25 }
 0x283   : > { %4206 = vmatprep.mubr.f32.mxu0 %v15833_v0  ;;  %v12621_v34 = vadd.f32 %v3233_v45, %v3002_v15  ;;  %4437 = vmatprep.mubr.f32.mxu1 %v15833_v0 }
 0x284   : > { %v3004_v30 = vpop.f32.mrf.mxu0  ;;  %v3235_v51 = vpop.f32.mrf.mxu1 }
 0x285   : > { %v12624_v7 = vadd.f32 %v3235_v51, %v3004_v30  ;;  %v15902_v51 = vld [vmem:[#allocation68_spill] sm:$0xff] }
 0x286   : > { %v3013_v24 = vpop.f32.mrf.mxu0  ;;  %4212 = vmatmul.mubr.f32.gmra.mxu0 %v15898_v44  ;;  %v3240_v29 = vpop.f32.mrf.mxu1  ;;  %4439 = vmatmul.mubr.f32.gmra.mxu1 %v15880_v31 }
 0x287   : > { %4217 = vmatprep.mubr.f32.mxu0 %v15833_v0  ;;  %v12629_v3 = vadd.f32 %v3240_v29, %v3013_v24  ;;  %4444 = vmatprep.mubr.f32.mxu1 %v15833_v0 }
 0x288   : > { %v3015_v1 = vpop.f32.mrf.mxu0  ;;  %v3242_v10 = vpop.f32.mrf.mxu1 }
 0x289   : > { %v12632_v36 = vadd.f32 %v3242_v10, %v3015_v1 }
 0x28a   : > { %v3024_v23 = vpop.f32.mrf.mxu0  ;;  %4223 = vmatmul.mubr.f32.gmra.mxu0 %v15899_v40  ;;  %v3247_v12 = vpop.f32.mrf.mxu1  ;;  %4446 = vmatmul.mubr.f32.gmra.mxu1 %v15881_v26  ;;  %v15903_v40 = vld [vmem:[#allocation71_spill] sm:$0xff] }
 0x28b   : > { %4228 = vmatprep.mubr.f32.mxu0 %v15833_v0  ;;  %v12637_v13 = vadd.f32 %v3247_v12, %v3024_v23  ;;  %4451 = vmatprep.mubr.f32.mxu1 %v15833_v0 }
 0x28c   : > { %v3026_v11 = vpop.f32.mrf.mxu0  ;;  %v3249_v60 = vpop.f32.mrf.mxu1 }
 0x28d   : > { %v12640_v50 = vadd.f32 %v3249_v60, %v3026_v11 }
 0x28e   : > { %v3035_v4 = vpop.f32.mrf.mxu0  ;;  %4234 = vmatmul.mubr.f32.gmra.mxu0 %v15900_v42  ;;  %v3254_v32 = vpop.f32.mrf.mxu1  ;;  %4453 = vmatmul.mubr.f32.gmra.mxu1 %v15882_v41 }
 0x28f   : > { %4239 = vmatprep.mubr.f32.mxu0 %v15833_v0  ;;  %v12645_v49 = vadd.f32 %v3254_v32, %v3035_v4  ;;  %4458 = vmatprep.mubr.f32.mxu1 %v15833_v0 }
 0x290   : > { %v3037_v22 = vpop.f32.mrf.mxu0  ;;  %v3256_v21 = vpop.f32.mrf.mxu1 }
 0x291   : > { %v12648_v59 = vadd.f32 %v3256_v21, %v3037_v22  ;;  %v15904_v22 = vld [vmem:[#allocation74_spill] sm:$0xff] }
 0x292   : > { %v3046_v20 = vpop.f32.mrf.mxu0  ;;  %4245 = vmatmul.mubr.f32.gmra.mxu0 %v15901_v62  ;;  %v3261_v14 = vpop.f32.mrf.mxu1  ;;  %4460 = vmatmul.mubr.f32.gmra.mxu1 %v15883_v2 }
 0x293   : > { %4250 = vmatprep.mubr.f32.mxu0 %v15833_v0  ;;  %v12653_v27 = vadd.f32 %v3261_v14, %v3046_v20  ;;  %4465 = vmatprep.mubr.f32.mxu1 %v15833_v0 }
 0x294   : > { %v3048_v15 = vpop.f32.mrf.mxu0  ;;  %v3263_v54 = vpop.f32.mrf.mxu1 }
 0x295   : > { %v12656_v45 = vadd.f32 %v3263_v54, %v3048_v15 }
 0x296   : > { %v3057_v30 = vpop.f32.mrf.mxu0  ;;  %4256 = vmatmul.mubr.f32.gmra.mxu0 %v15902_v51  ;;  %v3268_v24 = vpop.f32.mrf.mxu1  ;;  %4467 = vmatmul.mubr.f32.gmra.mxu1 %v15884_v8 }
 0x297   : > { %4261 = vmatprep.mubr.f32.mxu0 %v15833_v0  ;;  %v12661_v44 = vadd.f32 %v3268_v24, %v3057_v30  ;;  %4472 = vmatprep.mubr.f32.mxu1 %v15833_v0  ;;  %v15905_v30 = vld [vmem:[#allocation78_spill] sm:$0xff] }
 0x298   : > { %v3059_v29 = vpop.f32.mrf.mxu0  ;;  %v3270_v1 = vpop.f32.mrf.mxu1 }
 0x299   : > { %v12664_v10 = vadd.f32 %v3270_v1, %v3059_v29 }
 0x29a   : > { %v3068_v23 = vpop.f32.mrf.mxu0  ;;  %4267 = vmatmul.mubr.f32.gmra.mxu0 %v15903_v40  ;;  %v3275_v12 = vpop.f32.mrf.mxu1  ;;  %4474 = vmatmul.mubr.f32.gmra.mxu1 %v15885_v19 }
 0x29b   : > { %4272 = vmatprep.mubr.f32.mxu0 %v15833_v0  ;;  %v12669_v11 = vadd.f32 %v3275_v12, %v3068_v23  ;;  %4479 = vmatprep.mubr.f32.mxu1 %v15833_v0  ;;  %v15906_v12 = vld [vmem:[#allocation82_spill] sm:$0xff] }
 0x29c   : > { %v3070_v60 = vpop.f32.mrf.mxu0  ;;  %v3277_v4 = vpop.f32.mrf.mxu1 }
 0x29d   : > { %v12672_v42 = vadd.f32 %v3277_v4, %v3070_v60 }
 0x29e   : > { %v3079_v32 = vpop.f32.mrf.mxu0  ;;  %4278 = vmatmul.mubr.f32.gmra.mxu0 %v15904_v22  ;;  %v3282_v21 = vpop.f32.mrf.mxu1  ;;  %4481 = vmatmul.mubr.f32.gmra.mxu1 %v15886_v58 }
 0x29f   : > { %4283 = vmatprep.mubr.f32.mxu0 %v15833_v0  ;;  %v12677_v20 = vadd.f32 %v3282_v21, %v3079_v32  ;;  %4486 = vmatprep.mubr.f32.mxu1 %v15833_v0 }
 0x2a0   : > { %v3081_v62 = vpop.f32.mrf.mxu0  ;;  %v3284_v14 = vpop.f32.mrf.mxu1 }
 0x2a1   : > { %v12680_v15 = vadd.f32 %v3284_v14, %v3081_v62  ;;  %v15907_v14 = vld [vmem:[#allocation84_spill] sm:$0xff] }
 0x2a2   : > { %v3090_v54 = vpop.f32.mrf.mxu0  ;;  %4289 = vmatmul.mubr.f32.gmra.mxu0 %v15905_v30  ;;  %v3289_v51 = vpop.f32.mrf.mxu1  ;;  %4488 = vmatmul.mubr.f32.gmra.mxu1 %v15887_v47 }
 0x2a3   : > { %4294 = vmatprep.mubr.f32.mxu0 %v15833_v0  ;;  %v12685_v24 = vadd.f32 %v3289_v51, %v3090_v54  ;;  %4493 = vmatprep.mubr.f32.mxu1 %v15833_v0 }
 0x2a4   : > { %v3092_v29 = vpop.f32.mrf.mxu0  ;;  %v3291_v1 = vpop.f32.mrf.mxu1 }
 0x2a5   : > { %v12688_v23 = vadd.f32 %v3291_v1, %v3092_v29 }
 0x2a6   : > { %v3101_v40 = vpop.f32.mrf.mxu0  ;;  %4300 = vmatmul.mubr.f32.gmra.mxu0 %v15906_v12  ;;  %v3296_v60 = vpop.f32.mrf.mxu1  ;;  %4495 = vmatmul.mubr.f32.gmra.mxu1 %v15888_v46  ;;  %v15908_v12 = vld [vmem:[#allocation85_spill] sm:$0xff] }
 0x2a7   : > { %4305 = vmatprep.mubr.f32.mxu0 %v15833_v0  ;;  %v12693_v4 = vadd.f32 %v3296_v60, %v3101_v40  ;;  %4500 = vmatprep.mubr.f32.mxu1 %v15833_v0 }
 0x2a8   : > { %v3103_v32 = vpop.f32.mrf.mxu0  ;;  %v3298_v22 = vpop.f32.mrf.mxu1 }
 0x2a9   : > { %v12696_v21 = vadd.f32 %v3298_v22, %v3103_v32 }
 0x2aa   : > { %v3112_v62 = vpop.f32.mrf.mxu0  ;;  %4311 = vmatmul.mubr.f32.gmra.mxu0 %v15907_v14  ;;  %v3303_v54 = vpop.f32.mrf.mxu1  ;;  %4502 = vmatmul.mubr.f32.gmra.mxu1 %v15889_v39 }
 0x2ab   : > { %4316 = vmatprep.mubr.f32.mxu0 %v15833_v0  ;;  %v12701_v30 = vadd.f32 %v3303_v54, %v3112_v62  ;;  %4507 = vmatprep.mubr.f32.mxu1 %v15833_v0 }
 0x2ac   : > { %v3114_v51 = vpop.f32.mrf.mxu0  ;;  %v3305_v29 = vpop.f32.mrf.mxu1 }
 0x2ad   : > { %v12704_v1 = vadd.f32 %v3305_v29, %v3114_v51  ;;  %v15910_v29 = vld [vmem:[#allocation57_spill] sm:$0xff] }
 0x2ae   : > { %v3123_v40 = vpop.f32.mrf.mxu0  ;;  %4322 = vmatmul.mubr.f32.gmra.mxu0 %v15908_v12  ;;  %v3310_v60 = vpop.f32.mrf.mxu1  ;;  %4509 = vmatmul.mubr.f32.gmra.mxu1 %v15890_v37 }
 0x2af   : > { %4583 = vmatprep.mubr.f32.mxu0 %v15833_v0  ;;  %v12709_v32 = vadd.f32 %v3310_v60, %v3123_v40  ;;  %4778 = vmatprep.mubr.f32.mxu1 %v15833_v0 }
 0x2b0   : > { %v3125_v22 = vpop.f32.mrf.mxu0  ;;  %v3312_v62 = vpop.f32.mrf.mxu1 }
 0x2b1   : > { %v12712_v14 = vadd.f32 %v3312_v62, %v3125_v22  ;;  %v15913_v62 = vld [vmem:[#allocation40_spill] sm:$0xff] }
 0x2b2   : > { %v3387_v54 = vpop.f32.mrf.mxu0  ;;  %4586 = vmatmul.mubr.f32.vlgmr.msra.gmra.mxu0 %v11928_v61  ;;  %v3583_v12 = vpop.f32.mrf.mxu1  ;;  %4782 = vmatmul.mubr.f32.vlgmr.msra.gmra.mxu1 %v15911_v38  ;;  %v15912_v61 = vld [vmem:[#allocation8_spill] sm:$0xff] }
 0x2b3   : > { %15909 = vst [vmem:[#allocation79_spill] sm:$0xff] %v12712_v14  ;;  %v3388_v51 = vadd.f32 %v3387_v54, %v12585_v57  ;;  %4960 = vmatpush1.msra.mxu0 %v15910_v29  ;;  %5139 = vmatpush1.msra.mxu1 %v15873_v35  ;;  %v15914_v54 = vld [vmem:[#allocation19_spill] sm:$0xff] }
 0x2b4   : > { %v3389_v28 = vpop.f32.mrf.mxu0  ;;  %4591 = vmatprep.mubr.f32.mxu0 %v15833_v0  ;;  %v3585_v22 = vpop.f32.mrf.mxu1  ;;  %4787 = vmatprep.mubr.f32.mxu1 %v15833_v0 }
 0x2b5   : > { %v12720_v40 = vadd.f32 %v3583_v12, %v3388_v51  ;;  %v3390_v60 = vadd.f32 %v3389_v28, %v12591_v63  ;;  %5453 = vmatprep.subr.mxu0 %v15912_v61  ;;  %5700 = vmatprep.subr.mxu1 %v15914_v54  ;;  %v15916_v54 = vld [vmem:[#allocation49_spill] sm:$0xff] }
 0x2b6   : > { %v3395_v57 = vpop.f32.mrf.mxu0  ;;  %4594 = vmatmul.mubr.f32.gmra.mxu0 %v15913_v62  ;;  %v3592_v35 = vpop.f32.mrf.mxu1  ;;  %4791 = vmatmul.mubr.f32.gmra.mxu1 %v11973_v55 }
 0x2b7   : > { %v12727_v38 = vadd.f32 %v3585_v22, %v3390_v60  ;;  %v3396_v29 = vadd.f32 %v3395_v57, %v12597_v43  ;;  %4599 = vmatprep.mubr.f32.mxu0 %v15833_v0  ;;  %4796 = vmatprep.mubr.f32.mxu1 %v15833_v0  ;;  %v15915_v57 = vld [vmem:[#allocation46_spill] sm:$0xff] }
 0x2b8   : > { %v3397_v28 = vpop.f32.mrf.mxu0  ;;  %v3594_v12 = vpop.f32.mrf.mxu1 }
 0x2b9   : > { %v12733_v63 = vadd.f32 %v3592_v35, %v3396_v29  ;;  %v3398_v51 = vadd.f32 %v3397_v28, %v12600_v9 }
 0x2ba   : > { %v3403_v62 = vpop.f32.mrf.mxu0  ;;  %4602 = vmatmul.mubr.f32.gmra.mxu0 %v11958_v48  ;;  %v3601_v22 = vpop.f32.mrf.mxu1  ;;  %4800 = vmatmul.mubr.f32.gmra.mxu1 %v15915_v57 }
 0x2bb   : > { %v12737_v60 = vadd.f32 %v3594_v12, %v3398_v51  ;;  %v3404_v43 = vadd.f32 %v3403_v62, %v12605_v16  ;;  %4607 = vmatprep.mubr.f32.mxu0 %v15833_v0  ;;  %4805 = vmatprep.mubr.f32.mxu1 %v15833_v0  ;;  %v15917_v12 = vld [vmem:[#allocation25_spill] sm:$0xff] }
 0x2bc   : > { %v3405_v55 = vpop.f32.mrf.mxu0  ;;  %v3603_v29 = vpop.f32.mrf.mxu1 }
 0x2bd   : > { %v12743_v35 = vadd.f32 %v3601_v22, %v3404_v43  ;;  %v3406_v9 = vadd.f32 %v3405_v55, %v12608_v6  ;;  %v15918_v55 = vld [vmem:[#allocation35_spill] sm:$0xff] }
 0x2be   : > { %v3411_v28 = vpop.f32.mrf.mxu0  ;;  %4610 = vmatmul.mubr.f32.gmra.mxu0 %v15916_v54  ;;  %v3610_v51 = vpop.f32.mrf.mxu1  ;;  %4809 = vmatmul.mubr.f32.gmra.mxu1 %v15917_v12 }
 0x2bf   : > { %v12747_v48 = vadd.f32 %v3603_v29, %v3406_v9  ;;  %v3412_v16 = vadd.f32 %v3411_v28, %v12613_v5  ;;  %4615 = vmatprep.mubr.f32.mxu0 %v15833_v0  ;;  %4814 = vmatprep.mubr.f32.mxu1 %v15833_v0  ;;  %v15919_v29 = vld [vmem:[#allocation45_spill] sm:$0xff] }
 0x2c0   : > { %v3413_v62 = vpop.f32.mrf.mxu0  ;;  %v3612_v22 = vpop.f32.mrf.mxu1 }
 0x2c1   : > { %v12753_v43 = vadd.f32 %v3610_v51, %v3412_v16  ;;  %v3414_v6 = vadd.f32 %v3413_v62, %v12616_v52  ;;  %v15920_v62 = vld [vmem:[#allocation47_spill] sm:$0xff] }
 0x2c2   : > { %v3419_v57 = vpop.f32.mrf.mxu0  ;;  %4618 = vmatmul.mubr.f32.gmra.mxu0 %v15918_v55  ;;  %v3619_v9 = vpop.f32.mrf.mxu1  ;;  %4818 = vmatmul.mubr.f32.gmra.mxu1 %v15919_v29 }
 0x2c3   : > { %v12757_v54 = vadd.f32 %v3612_v22, %v3414_v6  ;;  %v3420_v5 = vadd.f32 %v3419_v57, %v12621_v34  ;;  %4623 = vmatprep.mubr.f32.mxu0 %v15833_v0  ;;  %4823 = vmatprep.mubr.f32.mxu1 %v15833_v0  ;;  %v15921_v57 = vld [vmem:[#allocation13_spill] sm:$0xff] }
 0x2c4   : > { %v3421_v28 = vpop.f32.mrf.mxu0  ;;  %v3621_v51 = vpop.f32.mrf.mxu1 }
 0x2c5   : > { %v12763_v16 = vadd.f32 %v3619_v9, %v3420_v5  ;;  %v3422_v52 = vadd.f32 %v3421_v28, %v12624_v7  ;;  %v15922_v28 = vld [vmem:[#allocation50_spill] sm:$0xff] }
 0x2c6   : > { %v3427_v12 = vpop.f32.mrf.mxu0  ;;  %4626 = vmatmul.mubr.f32.gmra.mxu0 %v15920_v62  ;;  %v3628_v22 = vpop.f32.mrf.mxu1  ;;  %4827 = vmatmul.mubr.f32.gmra.mxu1 %v15921_v57 }
 0x2c7   : > { %v12767_v6 = vadd.f32 %v3621_v51, %v3422_v52  ;;  %v3428_v34 = vadd.f32 %v3427_v12, %v12629_v3  ;;  %4631 = vmatprep.mubr.f32.mxu0 %v15833_v0  ;;  %4832 = vmatprep.mubr.f32.mxu1 %v15833_v0  ;;  %v15923_v12 = vld [vmem:[#allocation14_spill] sm:$0xff] }
 0x2c8   : > { %v3429_v55 = vpop.f32.mrf.mxu0  ;;  %v3630_v9 = vpop.f32.mrf.mxu1 }
 0x2c9   : > { %v12773_v5 = vadd.f32 %v3628_v22, %v3428_v34  ;;  %v3430_v7 = vadd.f32 %v3429_v55, %v12632_v36  ;;  %v15924_v55 = vld [vmem:[#allocation15_spill] sm:$0xff] }
 0x2ca   : > { %v3435_v29 = vpop.f32.mrf.mxu0  ;;  %4634 = vmatmul.mubr.f32.gmra.mxu0 %v15922_v28  ;;  %v3637_v51 = vpop.f32.mrf.mxu1  ;;  %4836 = vmatmul.mubr.f32.gmra.mxu1 %v15923_v12 }
 0x2cb   : > { %v12777_v52 = vadd.f32 %v3630_v9, %v3430_v7  ;;  %v3436_v3 = vadd.f32 %v3435_v29, %v12637_v13  ;;  %4639 = vmatprep.mubr.f32.mxu0 %v15833_v0  ;;  %4841 = vmatprep.mubr.f32.mxu1 %v15833_v0  ;;  %v15925_v29 = vld [vmem:[#allocation22_spill] sm:$0xff] }
 0x2cc   : > { %v3437_v62 = vpop.f32.mrf.mxu0  ;;  %v3639_v22 = vpop.f32.mrf.mxu1 }
 0x2cd   : > { %v12783_v34 = vadd.f32 %v3637_v51, %v3436_v3  ;;  %v3438_v36 = vadd.f32 %v3437_v62, %v12640_v50  ;;  %v15926_v62 = vld [vmem:[#allocation23_spill] sm:$0xff] }
 0x2ce   : > { %v3443_v57 = vpop.f32.mrf.mxu0  ;;  %4642 = vmatmul.mubr.f32.gmra.mxu0 %v15924_v55  ;;  %v3646_v9 = vpop.f32.mrf.mxu1  ;;  %4845 = vmatmul.mubr.f32.gmra.mxu1 %v15925_v29 }
 0x2cf   : > { %v12787_v7 = vadd.f32 %v3639_v22, %v3438_v36  ;;  %v3444_v13 = vadd.f32 %v3443_v57, %v12645_v49  ;;  %4647 = vmatprep.mubr.f32.mxu0 %v15833_v0  ;;  %4850 = vmatprep.mubr.f32.mxu1 %v15833_v0  ;;  %v15927_v57 = vld [vmem:[#allocation29_spill] sm:$0xff] }
 0x2d0   : > { %v3445_v28 = vpop.f32.mrf.mxu0  ;;  %v3648_v51 = vpop.f32.mrf.mxu1 }
 0x2d1   : > { %v12793_v3 = vadd.f32 %v3646_v9, %v3444_v13  ;;  %v3446_v50 = vadd.f32 %v3445_v28, %v12648_v59  ;;  %v15928_v28 = vld [vmem:[#allocation31_spill] sm:$0xff] }
 0x2d2   : > { %v3451_v12 = vpop.f32.mrf.mxu0  ;;  %4650 = vmatmul.mubr.f32.gmra.mxu0 %v15926_v62  ;;  %v3655_v22 = vpop.f32.mrf.mxu1  ;;  %4854 = vmatmul.mubr.f32.gmra.mxu1 %v15927_v57 }
 0x2d3   : > { %v12797_v36 = vadd.f32 %v3648_v51, %v3446_v50  ;;  %v3452_v49 = vadd.f32 %v3451_v12, %v12653_v27  ;;  %4655 = vmatprep.mubr.f32.mxu0 %v15833_v0  ;;  %4859 = vmatprep.mubr.f32.mxu1 %v15833_v0  ;;  %v15929_v12 = vld [vmem:[#allocation60_spill] sm:$0xff] }
 0x2d4   : > { %v3453_v55 = vpop.f32.mrf.mxu0  ;;  %v3657_v9 = vpop.f32.mrf.mxu1 }
 0x2d5   : > { %v12803_v13 = vadd.f32 %v3655_v22, %v3452_v49  ;;  %v3454_v59 = vadd.f32 %v3453_v55, %v12656_v45  ;;  %v15930_v55 = vld [vmem:[#allocation61_spill] sm:$0xff] }
 0x2d6   : > { %v3459_v29 = vpop.f32.mrf.mxu0  ;;  %4658 = vmatmul.mubr.f32.gmra.mxu0 %v15928_v28  ;;  %v3664_v51 = vpop.f32.mrf.mxu1  ;;  %4863 = vmatmul.mubr.f32.gmra.mxu1 %v15929_v12 }
 0x2d7   : > { %v12807_v50 = vadd.f32 %v3657_v9, %v3454_v59  ;;  %v3460_v27 = vadd.f32 %v3459_v29, %v12661_v44  ;;  %4663 = vmatprep.mubr.f32.mxu0 %v15833_v0  ;;  %4868 = vmatprep.mubr.f32.mxu1 %v15833_v0  ;;  %v15931_v29 = vld [vmem:[#allocation65_spill] sm:$0xff] }
 0x2d8   : > { %v3461_v62 = vpop.f32.mrf.mxu0  ;;  %v3666_v22 = vpop.f32.mrf.mxu1 }
 0x2d9   : > { %v12813_v49 = vadd.f32 %v3664_v51, %v3460_v27  ;;  %v3462_v45 = vadd.f32 %v3461_v62, %v12664_v10  ;;  %v15932_v62 = vld [vmem:[#allocation62_spill] sm:$0xff] }
 0x2da   : > { %v3467_v57 = vpop.f32.mrf.mxu0  ;;  %4666 = vmatmul.mubr.f32.gmra.mxu0 %v15930_v55  ;;  %v3673_v9 = vpop.f32.mrf.mxu1  ;;  %4872 = vmatmul.mubr.f32.gmra.mxu1 %v15931_v29 }
 0x2db   : > { %v12817_v59 = vadd.f32 %v3666_v22, %v3462_v45  ;;  %v3468_v44 = vadd.f32 %v3467_v57, %v12669_v11  ;;  %4671 = vmatprep.mubr.f32.mxu0 %v15833_v0  ;;  %4877 = vmatprep.mubr.f32.mxu1 %v15833_v0  ;;  %v15933_v57 = vld [vmem:[#allocation66_spill] sm:$0xff] }
 0x2dc   : > { %v3469_v28 = vpop.f32.mrf.mxu0  ;;  %v3675_v51 = vpop.f32.mrf.mxu1 }
 0x2dd   : > { %v12823_v27 = vadd.f32 %v3673_v9, %v3468_v44  ;;  %v3470_v10 = vadd.f32 %v3469_v28, %v12672_v42  ;;  %v15934_v28 = vld [vmem:[#allocation67_spill] sm:$0xff] }
 0x2de   : > { %v3475_v12 = vpop.f32.mrf.mxu0  ;;  %4674 = vmatmul.mubr.f32.gmra.mxu0 %v15932_v62  ;;  %v3682_v22 = vpop.f32.mrf.mxu1  ;;  %4881 = vmatmul.mubr.f32.gmra.mxu1 %v15933_v57 }
 0x2df   : > { %v12827_v45 = vadd.f32 %v3675_v51, %v3470_v10  ;;  %v3476_v11 = vadd.f32 %v3475_v12, %v12677_v20  ;;  %4679 = vmatprep.mubr.f32.mxu0 %v15833_v0  ;;  %4886 = vmatprep.mubr.f32.mxu1 %v15833_v0  ;;  %v15935_v12 = vld [vmem:[#allocation70_spill] sm:$0xff] }
 0x2e0   : > { %v3477_v55 = vpop.f32.mrf.mxu0  ;;  %v3684_v9 = vpop.f32.mrf.mxu1 }
 0x2e1   : > { %v12833_v44 = vadd.f32 %v3682_v22, %v3476_v11  ;;  %v3478_v42 = vadd.f32 %v3477_v55, %v12680_v15  ;;  %v15936_v55 = vld [vmem:[#allocation72_spill] sm:$0xff] }
 0x2e2   : > { %v3483_v29 = vpop.f32.mrf.mxu0  ;;  %4682 = vmatmul.mubr.f32.gmra.mxu0 %v15934_v28  ;;  %v3691_v51 = vpop.f32.mrf.mxu1  ;;  %4890 = vmatmul.mubr.f32.gmra.mxu1 %v15935_v12 }
 0x2e3   : > { %v12837_v10 = vadd.f32 %v3684_v9, %v3478_v42  ;;  %v3484_v20 = vadd.f32 %v3483_v29, %v12685_v24  ;;  %4687 = vmatprep.mubr.f32.mxu0 %v15833_v0  ;;  %4895 = vmatprep.mubr.f32.mxu1 %v15833_v0  ;;  %v15937_v29 = vld [vmem:[#allocation75_spill] sm:$0xff] }
 0x2e4   : > { %v3485_v62 = vpop.f32.mrf.mxu0  ;;  %v3693_v22 = vpop.f32.mrf.mxu1 }
 0x2e5   : > { %v12843_v11 = vadd.f32 %v3691_v51, %v3484_v20  ;;  %v3486_v15 = vadd.f32 %v3485_v62, %v12688_v23  ;;  %v15938_v62 = vld [vmem:[#allocation76_spill] sm:$0xff] }
 0x2e6   : > { %v3491_v57 = vpop.f32.mrf.mxu0  ;;  %4690 = vmatmul.mubr.f32.gmra.mxu0 %v15936_v55  ;;  %v3700_v9 = vpop.f32.mrf.mxu1  ;;  %4899 = vmatmul.mubr.f32.gmra.mxu1 %v15937_v29  ;;  %v15942_v29 = vld [vmem:[#allocation83_spill] sm:$0xff] }
 0x2e7   : > { %v12847_v42 = vadd.f32 %v3693_v22, %v3486_v15  ;;  %v3492_v24 = vadd.f32 %v3491_v57, %v12693_v4  ;;  %4695 = vmatprep.mubr.f32.mxu0 %v15833_v0  ;;  %4904 = vmatprep.mubr.f32.mxu1 %v15833_v0  ;;  %v15939_v22 = vld [vmem:[#allocation80_spill] sm:$0xff] }
 0x2e8   : > { %v3493_v28 = vpop.f32.mrf.mxu0  ;;  %v3702_v51 = vpop.f32.mrf.mxu1 }
 0x2e9   : > { %v12853_v20 = vadd.f32 %v3700_v9, %v3492_v24  ;;  %v3494_v23 = vadd.f32 %v3493_v28, %v12696_v21  ;;  %v15940_v24 = vld [vmem:[#allocation81_spill] sm:$0xff] }
 0x2ea   : > { %v12856_v12 = vpop.f32.mrf.mxu0  ;;  %4698 = vmatmul.mubr.f32.gmra.mxu0 %v15938_v62  ;;  %v12861_v4 = vpop.f32.mrf.mxu1  ;;  %4908 = vmatmul.mubr.f32.gmra.mxu1 %v15939_v22  ;;  %v15945_v62 = vld [vmem:[#allocation9_spill] sm:$0xff] }
 0x2eb   : > { %v12859_v15 = vadd.f32 %v3702_v51, %v3494_v23  ;;  %4703 = vmatprep.mubr.f32.mxu0 %v15833_v0  ;;  %4913 = vmatprep.mubr.f32.mxu1 %v15833_v0 }
 0x2ec   : > { %v12865_v57 = vpop.f32.mrf.mxu0  ;;  %v12868_v55 = vpop.f32.mrf.mxu1 }
 0x2ee   : > { %v12870_v21 = vpop.f32.mrf.mxu0  ;;  %4706 = vmatmul.mubr.f32.gmra.mxu0 %v15940_v24  ;;  %v12873_v9 = vpop.f32.mrf.mxu1  ;;  %4917 = vmatmul.mubr.f32.gmra.mxu1 %v15942_v29 }
 0x2ef   : > { %15941 = vst [vmem:[#allocation28_spill] sm:$0xff] %v12873_v9  ;;  %4993 = vmatprep.mubr.f32.mxu0 %v15833_v0  ;;  %5172 = vmatprep.mubr.f32.mxu1 %v15833_v0  ;;  %v15947_v9 = vld [vmem:[#allocation11_spill] sm:$0xff] }
 0x2f0   : > { %v12877_v28 = vpop.f32.mrf.mxu0  ;;  %v12880_v23 = vpop.f32.mrf.mxu1 }
 0x2f1   : > { %15943 = vst [vmem:[#allocation30_spill] sm:$0xff] %v12877_v28  ;;  %15944 = vst [vmem:[#allocation32_spill] sm:$0xff] %v12880_v23 }
 0x2f2   : > { %v3796_v51 = vpop.f32.mrf.mxu0  ;;  %4995 = vmatmul.mubr.f32.vlgmr.msra.gmra.mxu0 %v15872_v18  ;;  %v3975_v22 = vpop.f32.mrf.mxu1  ;;  %5174 = vmatmul.mubr.f32.vlgmr.msra.gmra.mxu1 %v15872_v18 }
 0x2f3   : > { %5455 = vmatpush1.msra.mxu0 %v15945_v62  ;;  %5706 = vmatpush1.msra.mxu1 %v15946_v33  ;;  %v3797_v29 = vadd.f32 %v3796_v51, %v12720_v40 }
 0x2f4   : > { %v3798_v24 = vpop.f32.mrf.mxu0  ;;  %5000 = vmatprep.mubr.f32.mxu0 %v15833_v0  ;;  %v3977_v37 = vpop.f32.mrf.mxu1  ;;  %5179 = vmatprep.mubr.f32.mxu1 %v15833_v0 }
 0x2f5   : > { %5884 = vmatprep.subr.mxu0 %v15947_v9  ;;  %v3799_v23 = vadd.f32 %v3798_v24, %v12727_v38  ;;  %6080 = vmatprep.subr.mxu1 %v15912_v61  ;;  %v3976_v51 = vadd.f32 %v3975_v22, %v3797_v29 }
 0x2f6   : > { %v3803_v39 = vpop.f32.mrf.mxu0  ;;  %5002 = vmatmul.mubr.f32.gmra.mxu0 %v15876_v17  ;;  %v3982_v62 = vpop.f32.mrf.mxu1  ;;  %5181 = vmatmul.mubr.f32.gmra.mxu1 %v15876_v17 }
 0x2f7   : > { %v3804_v18 = vadd.f32 %v3803_v39, %v12733_v63  ;;  %5007 = vmatprep.mubr.f32.mxu0 %v15833_v0  ;;  %5186 = vmatprep.mubr.f32.mxu1 %v15833_v0  ;;  %v3978_v24 = vadd.f32 %v3977_v37, %v3799_v23 }
 0x2f8   : > { %v3805_v40 = vpop.f32.mrf.mxu0  ;;  %v3984_v38 = vpop.f32.mrf.mxu1 }
 0x2f9   : > { %v3983_v33 = vadd.f32 %v3982_v62, %v3804_v18  ;;  %v3806_v9 = vadd.f32 %v3805_v40, %v12737_v60 }
 0x2fa   : > { %v3810_v28 = vpop.f32.mrf.mxu0  ;;  %5009 = vmatmul.mubr.f32.gmra.mxu0 %v15877_v53  ;;  %v3989_v63 = vpop.f32.mrf.mxu1  ;;  %5188 = vmatmul.mubr.f32.gmra.mxu1 %v15877_v53 }
 0x2fb   : > { %v5285_v61 = vmin.f32 %v3976_v51, %v3983_v33  ;;  %v3985_v14 = vadd.f32 %v3984_v38, %v3806_v9  ;;  %v3811_v39 = vadd.f32 %v3810_v28, %v12743_v35  ;;  %5014 = vmatprep.mubr.f32.mxu0 %v15833_v0  ;;  %5193 = vmatprep.mubr.f32.mxu1 %v15833_v0 }
 0x2fc   : > { %v3812_v17 = vpop.f32.mrf.mxu0  ;;  %v3991_v37 = vpop.f32.mrf.mxu1 }
 0x2fd   : > { %v5286_v62 = vmin.f32 %v3978_v24, %v3985_v14  ;;  %v3990_v22 = vadd.f32 %v3989_v63, %v3811_v39  ;;  %v3813_v60 = vadd.f32 %v3812_v17, %v12747_v48 }
 0x2fe   : > { %v3817_v23 = vpop.f32.mrf.mxu0  ;;  %5016 = vmatmul.mubr.f32.gmra.mxu0 %v15878_v56  ;;  %v3996_v28 = vpop.f32.mrf.mxu1  ;;  %5195 = vmatmul.mubr.f32.gmra.mxu1 %v15878_v56 }
 0x2ff   : > { %v5289_v33 = vmin.f32 %v5285_v61, %v3990_v22  ;;  %v3992_v9 = vadd.f32 %v3991_v37, %v3813_v60  ;;  %v3818_v35 = vadd.f32 %v3817_v23, %v12753_v43  ;;  %5021 = vmatprep.mubr.f32.mxu0 %v15833_v0  ;;  %5200 = vmatprep.mubr.f32.mxu1 %v15833_v0 }
 0x300   : > { %v3819_v53 = vpop.f32.mrf.mxu0  ;;  %v3998_v18 = vpop.f32.mrf.mxu1 }
 0x301   : > { %v5290_v14 = vmin.f32 %v5286_v62, %v3992_v9  ;;  %v3997_v29 = vadd.f32 %v3996_v28, %v3818_v35  ;;  %v3820_v48 = vadd.f32 %v3819_v53, %v12757_v54 }
 0x302   : > { %v3824_v40 = vpop.f32.mrf.mxu0  ;;  %5023 = vmatmul.mubr.f32.gmra.mxu0 %v15879_v25  ;;  %v4003_v38 = vpop.f32.mrf.mxu1  ;;  %5202 = vmatmul.mubr.f32.gmra.mxu1 %v15879_v25 }
 0x303   : > { %v5293_v61 = vmin.f32 %v5289_v33, %v3997_v29  ;;  %v3999_v51 = vadd.f32 %v3998_v18, %v3820_v48  ;;  %v3825_v43 = vadd.f32 %v3824_v40, %v12763_v16  ;;  %5028 = vmatprep.mubr.f32.mxu0 %v15833_v0  ;;  %5207 = vmatprep.mubr.f32.mxu1 %v15833_v0 }
 0x304   : > { %v3826_v56 = vpop.f32.mrf.mxu0  ;;  %v4005_v63 = vpop.f32.mrf.mxu1 }
 0x305   : > { %v5294_v24 = vmin.f32 %v5290_v14, %v3999_v51  ;;  %v4004_v39 = vadd.f32 %v4003_v38, %v3825_v43  ;;  %v3827_v54 = vadd.f32 %v3826_v56, %v12767_v6 }
 0x306   : > { %v3831_v17 = vpop.f32.mrf.mxu0  ;;  %5030 = vmatmul.mubr.f32.gmra.mxu0 %v15880_v31  ;;  %v4010_v60 = vpop.f32.mrf.mxu1  ;;  %5209 = vmatmul.mubr.f32.gmra.mxu1 %v15880_v31 }
 0x307   : > { %v5297_v62 = vmin.f32 %v5293_v61, %v4004_v39  ;;  %v4006_v22 = vadd.f32 %v4005_v63, %v3827_v54  ;;  %v3832_v16 = vadd.f32 %v3831_v17, %v12773_v5  ;;  %5035 = vmatprep.mubr.f32.mxu0 %v15833_v0  ;;  %5214 = vmatprep.mubr.f32.mxu1 %v15833_v0 }
 0x308   : > { %v3833_v25 = vpop.f32.mrf.mxu0  ;;  %v4012_v33 = vpop.f32.mrf.mxu1 }
 0x309   : > { %v5298_v37 = vmin.f32 %v5294_v24, %v4006_v22  ;;  %v4011_v23 = vadd.f32 %v4010_v60, %v3832_v16  ;;  %v3834_v6 = vadd.f32 %v3833_v25, %v12777_v52 }
 0x30a   : > { %v3838_v9 = vpop.f32.mrf.mxu0  ;;  %5037 = vmatmul.mubr.f32.gmra.mxu0 %v15881_v26  ;;  %v4017_v53 = vpop.f32.mrf.mxu1  ;;  %5216 = vmatmul.mubr.f32.gmra.mxu1 %v15881_v26 }
 0x30b   : > { %v5301_v35 = vmin.f32 %v5297_v62, %v4011_v23  ;;  %v4013_v28 = vadd.f32 %v4012_v33, %v3834_v6  ;;  %v3839_v5 = vadd.f32 %v3838_v9, %v12783_v34  ;;  %5042 = vmatprep.mubr.f32.mxu0 %v15833_v0  ;;  %5221 = vmatprep.mubr.f32.mxu1 %v15833_v0  ;;  %v10711_v23 = vld [vmem:[%s11034_s13 + $0x100] sm:$0xff] }
 0x30c   : > { %v3840_v31 = vpop.f32.mrf.mxu0  ;;  %v4019_v48 = vpop.f32.mrf.mxu1 }
 0x30d   : > { %v5302_v14 = vmin.f32 %v5298_v37, %v4013_v28  ;;  %v4018_v29 = vadd.f32 %v4017_v53, %v3839_v5  ;;  %v3841_v52 = vadd.f32 %v3840_v31, %v12787_v7  ;;  %v5375_v53 = vsel %vm299_vm0, %v10711_v23, 0 }
 0x30e   : > { %v3845_v18 = vpop.f32.mrf.mxu0  ;;  %5044 = vmatmul.mubr.f32.gmra.mxu0 %v15882_v41  ;;  %v4024_v51 = vpop.f32.mrf.mxu1  ;;  %5223 = vmatmul.mubr.f32.gmra.mxu1 %v15882_v41 }
 0x30f   : > { %v5305_v40 = vmin.f32 %v5301_v35, %v4018_v29  ;;  %v4020_v61 = vadd.f32 %v4019_v48, %v3841_v52  ;;  %v3846_v34 = vadd.f32 %v3845_v18, %v12793_v3  ;;  %5049 = vmatprep.mubr.f32.mxu0 %v15833_v0  ;;  %5228 = vmatprep.mubr.f32.mxu1 %v15833_v0 }
 0x310   : > { %v3847_v26 = vpop.f32.mrf.mxu0  ;;  %v4026_v56 = vpop.f32.mrf.mxu1 }
 0x311   : > { %v5306_v43 = vmin.f32 %v5302_v14, %v4020_v61  ;;  %v4025_v38 = vadd.f32 %v4024_v51, %v3846_v34  ;;  %v3848_v7 = vadd.f32 %v3847_v26, %v12797_v36 }
 0x312   : > { %v3852_v24 = vpop.f32.mrf.mxu0  ;;  %5051 = vmatmul.mubr.f32.gmra.mxu0 %v15883_v2  ;;  %v4031_v63 = vpop.f32.mrf.mxu1  ;;  %5230 = vmatmul.mubr.f32.gmra.mxu1 %v15883_v2 }
 0x313   : > { %v5309_v39 = vmin.f32 %v5305_v40, %v4025_v38  ;;  %v4027_v54 = vadd.f32 %v4026_v56, %v3848_v7  ;;  %v3853_v3 = vadd.f32 %v3852_v24, %v12803_v13  ;;  %5056 = vmatprep.mubr.f32.mxu0 %v15833_v0  ;;  %5235 = vmatprep.mubr.f32.mxu1 %v15833_v0  ;;  %v10713_v40 = vld [vmem:[%s11034_s13 + $0x110] sm:$0xff] }
 0x314   : > { %v3854_v41 = vpop.f32.mrf.mxu0  ;;  %v4033_v22 = vpop.f32.mrf.mxu1  ;;  %v5381_v24 = vsel %vm299_vm0, %v10713_v40, 0  ;;  %v10716_v40 = vld [vmem:[%s11034_s13 + $0x128] sm:$0xff] }
 0x315   : > { %v5310_v17 = vmin.f32 %v5306_v43, %v4027_v54  ;;  %v4032_v62 = vadd.f32 %v4031_v63, %v3853_v3  ;;  %v3855_v36 = vadd.f32 %v3854_v41, %v12807_v50  ;;  %v10714_v54 = vld [vmem:[%s11034_s13 + $0x118] sm:$0xff] }
 0x316   : > { %v3859_v16 = vpop.f32.mrf.mxu0  ;;  %5058 = vmatmul.mubr.f32.gmra.mxu0 %v15884_v8  ;;  %v4038_v37 = vpop.f32.mrf.mxu1  ;;  %5237 = vmatmul.mubr.f32.gmra.mxu1 %v15884_v8 }
 0x317   : > { %v5313_v60 = vmin.f32 %v5309_v39, %v4032_v62  ;;  %v4034_v25 = vadd.f32 %v4033_v22, %v3855_v36  ;;  %v3860_v13 = vadd.f32 %v3859_v16, %v12813_v49  ;;  %5063 = vmatprep.mubr.f32.mxu0 %v15833_v0  ;;  %5242 = vmatprep.mubr.f32.mxu1 %v15833_v0  ;;  %v12979_v36 = vand.u32 4294901760, %v5381_v24 }
 0x318   : > { %v3861_v2 = vpop.f32.mrf.mxu0  ;;  %v4040_v9 = vpop.f32.mrf.mxu1 }
 0x319   : > { %v5314_v6 = vmin.f32 %v5310_v17, %v4034_v25  ;;  %v4039_v50 = vadd.f32 %v4038_v37, %v3860_v13  ;;  %v3862_v33 = vadd.f32 %v3861_v2, %v12817_v59  ;;  %v10712_v59 = vld [vmem:[%s11034_s13 + $0x108] sm:$0xff]  ;;  %15950 = vst [vmem:[#allocation39_spill] sm:$0xff] %v12979_v36 }
 0x31a   : > { %v3866_v35 = vpop.f32.mrf.mxu0  ;;  %5065 = vmatmul.mubr.f32.gmra.mxu0 %v15885_v19  ;;  %v4045_v5 = vpop.f32.mrf.mxu1  ;;  %5244 = vmatmul.mubr.f32.gmra.mxu1 %v15885_v19  ;;  %v5378_v26 = vsel %vm299_vm0, %v10712_v59, 0 }
 0x31b   : > { %v5317_v28 = vmin.f32 %v5313_v60, %v4039_v50  ;;  %v4041_v49 = vadd.f32 %v4040_v9, %v3862_v33  ;;  %v3867_v8 = vadd.f32 %v3866_v35, %v12823_v27  ;;  %5070 = vmatprep.mubr.f32.mxu0 %v15833_v0  ;;  %5249 = vmatprep.mubr.f32.mxu1 %v15833_v0  ;;  %v12956_v27 = vand.u32 4294901760, %v5375_v53  ;;  %v10715_v33 = vld [vmem:[%s11034_s13 + $0x120] sm:$0xff] }
 0x31c   : > { %v3868_v31 = vpop.f32.mrf.mxu0  ;;  %v4047_v48 = vpop.f32.mrf.mxu1  ;;  %v3508_v9 = vadd.f32 %v12870_v21, %v12709_v32 }
 0x31d   : > { %v5318_v14 = vmin.f32 %v5314_v6, %v4041_v49  ;;  %v4046_v29 = vadd.f32 %v4045_v5, %v3867_v8  ;;  %v3869_v52 = vadd.f32 %v3868_v31, %v12827_v45  ;;  %15948 = vst [vmem:[#allocation43_spill] sm:$0xff] %v12956_v27  ;;  %v12998_v6 = vsub.f32 %v5381_v24, %v12979_v36  ;;  %v15955_v8 = vld [vmem:[#allocation30_spill] sm:$0xff]  ;;  %v15956_v31 = vld [vmem:[#allocation73_spill] sm:$0xff] }
 0x31e   : > { %v3873_v18 = vpop.f32.mrf.mxu0  ;;  %5072 = vmatmul.mubr.f32.gmra.mxu0 %v15886_v58  ;;  %v4052_v51 = vpop.f32.mrf.mxu1  ;;  %5251 = vmatmul.mubr.f32.gmra.mxu1 %v15886_v58  ;;  %v12970_v58 = vand.u32 4294901760, %v5378_v26 }
 0x31f   : > { %v5321_v19 = vmin.f32 %v5317_v28, %v4046_v29  ;;  %v4048_v61 = vadd.f32 %v4047_v48, %v3869_v52  ;;  %v3874_v34 = vadd.f32 %v3873_v18, %v12833_v44  ;;  %5077 = vmatprep.mubr.f32.mxu0 %v15833_v0  ;;  %5256 = vmatprep.mubr.f32.mxu1 %v15833_v0  ;;  %v13020_v48 = vand.u32 4294901760, %v12998_v6 }
 0x320   : > { %v3875_v45 = vpop.f32.mrf.mxu0  ;;  %v4054_v56 = vpop.f32.mrf.mxu1  ;;  %v12968_v44 = vsub.f32 %v5375_v53, %v12956_v27  ;;  %15949 = vst [vmem:[#allocation34_spill] sm:$0xff] %v12970_v58 }
 0x321   : > { %v5322_v43 = vmin.f32 %v5318_v14, %v4048_v61  ;;  %v4053_v38 = vadd.f32 %v4052_v51, %v3874_v34  ;;  %v3876_v7 = vadd.f32 %v3875_v45, %v12837_v10  ;;  %v3500_v10 = vadd.f32 %v12856_v12, %v12701_v30  ;;  %15957 = vst [vmem:[#allocation26_spill] sm:$0xff] %v13020_v48 }
 0x322   : > { %v3880_v39 = vpop.f32.mrf.mxu0  ;;  %5079 = vmatmul.mubr.f32.gmra.mxu0 %v15887_v47  ;;  %v4059_v17 = vpop.f32.mrf.mxu1  ;;  %5258 = vmatmul.mubr.f32.gmra.mxu1 %v15887_v47  ;;  %v3502_v47 = vadd.f32 %v12865_v57, %v12704_v1  ;;  %v12987_v30 = vand.u32 4294901760, %v12968_v44  ;;  %v12990_v12 = vsub.f32 %v5378_v26, %v12970_v58 }
 0x323   : > { %v5325_v3 = vmin.f32 %v5321_v19, %v4053_v38  ;;  %v4055_v63 = vadd.f32 %v4054_v56, %v3876_v7  ;;  %v3881_v41 = vadd.f32 %v3880_v39, %v12843_v11  ;;  %5084 = vmatprep.mubr.f32.mxu0 %v15833_v0  ;;  %5263 = vmatprep.mubr.f32.mxu1 %v15833_v0  ;;  %v5384_v11 = vsel %vm299_vm0, %v10714_v54, 0  ;;  %v15959_v19 = vld [vmem:[#allocation28_spill] sm:$0xff]  ;;  %v15961_v56 = vld [vmem:[#allocation77_spill] sm:$0xff] }
 0x324   : > { %v3882_v62 = vpop.f32.mrf.mxu0  ;;  %v4061_v25 = vpop.f32.mrf.mxu1  ;;  %15951 = vst [vmem:[#allocation44_spill] sm:$0xff] %v12987_v30  ;;  %15952 = vst [vmem:[#allocation10_spill] sm:$0xff] %v12990_v12  ;;  %v3710_v1 = vadd.f32 %v12861_v4, %v3500_v10  ;;  %v13000_v50 = vand.u32 4294901760, %v5384_v11  ;;  %v3712_v49 = vadd.f32 %v12868_v55, %v3502_v47  ;;  %v15954_v4 = vld [vmem:[#allocation79_spill] sm:$0xff]  ;;  %v5492_v59 = vsub.f32 %v12968_v44, %v12987_v30 }
 0x325   : > { %v5326_v22 = vmin.f32 %v5322_v43, %v4055_v63  ;;  %v4060_v16 = vadd.f32 %v4059_v17, %v3881_v41  ;;  %v3883_v60 = vadd.f32 %v3882_v62, %v12847_v42  ;;  %v3510_v5 = vadd.f32 %v15955_v8, %v15954_v4  ;;  %v15960_v43 = vld [vmem:[#allocation32_spill] sm:$0xff]  ;;  %v10717_v62 = vld [vmem:[%s11034_s13 + $0x130] sm:$0xff] }
 0x326   : > { %v3887_v13 = vpop.f32.mrf.mxu0  ;;  %5086 = vmatmul.mubr.f32.gmra.mxu0 %v15888_v46  ;;  %v4066_v23 = vpop.f32.mrf.mxu1  ;;  %5265 = vmatmul.mubr.f32.gmra.mxu1 %v15888_v46  ;;  %15953 = vst [vmem:[#allocation18_spill] sm:$0xff] %v13000_v50  ;;  %v13013_v14 = vand.u32 4294901760, %v12990_v12  ;;  %v5387_v55 = vsel %vm299_vm0, %v10715_v33, 0  ;;  %v13023_v18 = vsub.f32 %v5384_v11, %v13000_v50  ;;  %v3719_v61 = vadd.f32 %v15959_v19, %v3508_v9  ;;  %v15968_v9 = vld [vmem:[#allocation12_spill] sm:$0xff]  ;;  %v15969_v4 = vld [vmem:[#allocation9_spill] sm:$0xff] }
 0x327   : > { %v5329_v37 = vmin.f32 %v5325_v3, %v4060_v16  ;;  %v4062_v2 = vadd.f32 %v4061_v25, %v3883_v60  ;;  %v3888_v42 = vadd.f32 %v3887_v13, %v12853_v20  ;;  %5091 = vmatprep.mubr.f32.mxu0 %v15833_v0  ;;  %5270 = vmatprep.mubr.f32.mxu1 %v15833_v0  ;;  %v13029_v24 = vand.u32 4294901760, %v5492_v59 }
 0x328   : > { %v3889_v57 = vpop.f32.mrf.mxu0  ;;  %v4068_v28 = vpop.f32.mrf.mxu1  ;;  %15958 = vst [vmem:[#allocation38_spill] sm:$0xff] %v13023_v18  ;;  %v3721_v38 = vadd.f32 %v15960_v43, %v3510_v5  ;;  %v5503_v39 = vsub.f32 %v12990_v12, %v13013_v14  ;;  %v13033_v54 = vand.u32 4294901760, %v5387_v55  ;;  %v5390_v10 = vsel %vm299_vm0, %v10716_v40, 0 }
 0x329   : > { %v5330_v20 = vmin.f32 %v5326_v22, %v4062_v2  ;;  %v4067_v35 = vadd.f32 %v4066_v23, %v3888_v42  ;;  %v3890_v46 = vadd.f32 %v3889_v57, %v12859_v15  ;;  %15962 = vst [vmem:[#allocation59_spill] sm:$0xff] %v13029_v24  ;;  %v5514_v16 = vsub.f32 %v12998_v6, %v13020_v48 }
 0x32a   : > { %v3894_v53 = vpop.f32.mrf.mxu0  ;;  %5093 = vmatmul.mubr.f32.gmra.mxu0 %v15956_v31  ;;  %v4073_v15 = vpop.f32.mrf.mxu1  ;;  %5272 = vmatmul.mubr.f32.gmra.mxu1 %v15956_v31  ;;  %15963 = vst [vmem:[#allocation63_spill] sm:$0xff] %v13033_v54  ;;  %v13043_v13 = vand.u32 4294901760, %v13023_v18  ;;  %v13046_v2 = vand.u32 4294901760, %v5503_v39  ;;  %v13049_v42 = vsub.f32 %v5387_v55, %v13033_v54  ;;  %v13051_v23 = vand.u32 4294901760, %v5390_v10 }
 0x32b   : > { %v5333_v32 = vmin.f32 %v5329_v37, %v4067_v35  ;;  %v4069_v21 = vadd.f32 %v4068_v28, %v3890_v46  ;;  %v3895_v29 = vadd.f32 %v3894_v53, %v3710_v1  ;;  %5098 = vmatprep.mubr.f32.mxu0 %v15833_v0  ;;  %5277 = vmatprep.mubr.f32.mxu1 %v15833_v0  ;;  %v5393_v1 = vsel %vm299_vm0, %v10717_v62, 0  ;;  %v10718_v35 = vld [vmem:[%s11034_s13 + $0x138] sm:$0xff]  ;;  %v5345_v46 = vld [vmem:[#allocation2 + $0x10] sm:$0xff] }
 0x32c   : > { %v3896_v52 = vpop.f32.mrf.mxu0  ;;  %v4075_v45 = vpop.f32.mrf.mxu1  ;;  %15964 = vst [vmem:[#allocation69_spill] sm:$0xff] %v13043_v13  ;;  %15965 = vst [vmem:[#allocation33_spill] sm:$0xff] %v13046_v2  ;;  %v13061_v8 = vand.u32 4294901760, %v5514_v16  ;;  %v5525_v59 = vsub.f32 %v13023_v18, %v13043_v13  ;;  %v13076_v40 = vsub.f32 %v5390_v10, %v13051_v23  ;;  %v5396_v19 = vsel %vm299_vm0, %v10718_v35, 0 }
 0x32d   : > { %v5334_v34 = vmin.f32 %v5330_v20, %v4069_v21  ;;  %v4074_v51 = vadd.f32 %v4073_v15, %v3895_v29  ;;  %v3897_v26 = vadd.f32 %v3896_v52, %v3712_v49  ;;  %15966 = vst [vmem:[#allocation37_spill] sm:$0xff] %v13049_v42  ;;  %15967 = vst [vmem:[#allocation41_spill] sm:$0xff] %v13051_v23  ;;  %v15972_v21 = vld [vmem:[#allocation16_spill] sm:$0xff]  ;;  %v5346_v29 = vld [vmem:[#allocation2] sm:$0xff]  ;;  %v13073_v52 = vand.u32 4294901760, %v13049_v42 }
 0x32e   : > { %v3901_v7 = vpop.f32.mrf.mxu0  ;;  %5100 = vmatmul.mubr.f32.gmra.mxu0 %v15961_v56  ;;  %v4080_v17 = vpop.f32.mrf.mxu1  ;;  %5279 = vmatmul.mubr.f32.gmra.mxu1 %v15961_v56  ;;  %15970 = vst [vmem:[#allocation48_spill] sm:$0xff] %v13061_v8  ;;  %15974 = vst [vmem:[#allocation27_spill] sm:$0xff] %v13076_v40  ;;  %v13091_v39 = vand.u32 4294901760, %v5396_v19 }
 0x32f   : > { %v5337_v3 = vmin.f32 %v5333_v32, %v4074_v51  ;;  %v4076_v63 = vadd.f32 %v4075_v45, %v3897_v26  ;;  %v3902_v41 = vadd.f32 %v3901_v7, %v3719_v61  ;;  %5488 = vmatprep.mubr.f32.mxu0 %v15833_v0  ;;  %5739 = vmatprep.mubr.f32.mxu1 %v15833_v0  ;;  %v13066_v32 = vand.u32 4294901760, %v5393_v1  ;;  %v15975_v61 = vld [vmem:[#allocation8_spill] sm:$0xff]  ;;  %v10719_v26 = vld [vmem:[%s11034_s13 + $0x140] sm:$0xff] }
 0x330   : > { %v3903_v22 = vpop.f32.mrf.mxu0  ;;  %v4082_v47 = vpop.f32.mrf.mxu1  ;;  %15973 = vst [vmem:[#allocation24_spill] sm:$0xff] %v13073_v52  ;;  %v13086_v7 = vand.u32 4294901760, %v5525_v59  ;;  %15978 = vst [vmem:[#allocation68_spill] sm:$0xff] %v13091_v39  ;;  %v5399_v10 = vsel %vm299_vm0, %v10719_v26, 0 }
 0x331   : > { %v5338_v60 = vmin.f32 %v5334_v34, %v4076_v63  ;;  %v4081_v25 = vadd.f32 %v4080_v17, %v3902_v41  ;;  %v3904_v11 = vadd.f32 %v3903_v22, %v3721_v38  ;;  %15971 = vst [vmem:[#allocation21_spill] sm:$0xff] %v13066_v32  ;;  %v13089_v56 = vsub.f32 %v5393_v1, %v13066_v32 }
 0x332   : > { %v4158_v37 = vpop.f32.mrf.mxu0  ;;  %5494 = vmatmul.mubr.f32.vlgmr.msra.gmra.mxu0 %v13029_v24  ;;  %v4405_v20 = vpop.f32.mrf.mxu1  ;;  %5741 = vmatmul.mubr.f32.vlgmr.msra.gmra.mxu1 %v12956_v27  ;;  %15976 = vst [vmem:[#allocation42_spill] sm:$0xff] %v13086_v7  ;;  %v5536_v41 = vsub.f32 %v13049_v42, %v13073_v52  ;;  %v13099_v17 = vand.u32 4294901760, %v13076_v40 }
 0x333   : > { %v5341_v57 = vmin.f32 %v5337_v3, %v4081_v25  ;;  %v4083_v33 = vadd.f32 %v4082_v47, %v3904_v11  ;;  %5887 = vmatpush1.msra.mxu0 %v15968_v9  ;;  %v13057_v28 = vadd.f32 %v4405_v20, %v4158_v37  ;;  %6082 = vmatpush1.msra.mxu1 %v15969_v4  ;;  %v13109_v11 = vand.u32 4294901760, %v13089_v56 }
 0x334   : > { %v4160_v49 = vpop.f32.mrf.mxu0  ;;  %5499 = vmatprep.mubr.f32.mxu0 %v15833_v0  ;;  %v4407_v31 = vpop.f32.mrf.mxu1  ;;  %5746 = vmatprep.mubr.f32.mxu1 %v15833_v0  ;;  %15977 = vst [vmem:[#allocation64_spill] sm:$0xff] %v13089_v56  ;;  %15979 = vst [vmem:[#allocation71_spill] sm:$0xff] %v13099_v17  ;;  %v13112_v47 = vsub.f32 %v5396_v19, %v13091_v39  ;;  %v13114_v37 = vand.u32 4294901760, %v5399_v10  ;;  %v5547_v20 = vsub.f32 %v13076_v40, %v13099_v17 }
 0x335   : > { %v5349_v5 = vmin.f32 %v5345_v46, %v5341_v57  ;;  %v5342_v53 = vmin.f32 %v5338_v60, %v4083_v33  ;;  %6293 = vmatprep.subr.mxu0 %v15972_v21  ;;  %v13069_v15 = vadd.f32 %v4407_v31, %v4160_v49  ;;  %6474 = vmatprep.subr.mxu1 %v15975_v61  ;;  %v10720_v60 = vld [vmem:[%s11034_s13 + $0x148] sm:$0xff]  ;;  %v13119_v33 = vand.u32 4294901760, %v5536_v41 }
 0x336   : > { %v4169_v55 = vpop.f32.mrf.mxu0  ;;  %5505 = vmatmul.mubr.f32.gmra.mxu0 %v13046_v2  ;;  %v4412_v51 = vpop.f32.mrf.mxu1  ;;  %5748 = vmatmul.mubr.f32.gmra.mxu1 %v12970_v58  ;;  %15980 = vst [vmem:[#allocation74_spill] sm:$0xff] %v13109_v11  ;;  %15981 = vst [vmem:[#allocation78_spill] sm:$0xff] %v13112_v47  ;;  %v5402_v46 = vsel %vm299_vm0, %v10720_v60, 0  ;;  %v5558_v59 = vsub.f32 %v13089_v56, %v13109_v11 }
 0x337   : > { %5353 = vst [vmem:[#allocation2 + $0x10] sm:$0xff] %v5349_v5  ;;  %v5350_v34 = vmin.f32 %v5346_v29, %v5342_v53  ;;  %5510 = vmatprep.mubr.f32.mxu0 %v15833_v0  ;;  %v13083_v45 = vadd.f32 %v4412_v51, %v4169_v55  ;;  %5753 = vmatprep.mubr.f32.mxu1 %v15833_v0  ;;  %15982 = vst [vmem:[#allocation82_spill] sm:$0xff] %v13114_v37  ;;  %v10721_v53 = vld [vmem:[%s11034_s13 + $0x150] sm:$0xff]  ;;  %v13133_v29 = vand.u32 4294901760, %v13112_v47 }
 0x338   : > { %v4171_v43 = vpop.f32.mrf.mxu0  ;;  %v4414_v38 = vpop.f32.mrf.mxu1  ;;  %15983 = vst [vmem:[#allocation84_spill] sm:$0xff] %v13119_v33  ;;  %v13136_v55 = vsub.f32 %v5399_v10, %v13114_v37  ;;  %v13141_v51 = vand.u32 4294901760, %v5547_v20  ;;  %v13143_v26 = vand.u32 4294901760, %v5402_v46 }
 0x339   : > { %5354 = vst [vmem:[#allocation2] sm:$0xff] %v5350_v34  ;;  %v13093_v3 = vadd.f32 %v4414_v38, %v4171_v43  ;;  %15984 = vst [vmem:[#allocation85_spill] sm:$0xff] %v13133_v29  ;;  %v5405_v38 = vsel %vm299_vm0, %v10721_v53, 0  ;;  %v5569_v60 = vsub.f32 %v13112_v47, %v13133_v29 }
 0x33a   : > { %v4180_v63 = vpop.f32.mrf.mxu0  ;;  %5516 = vmatmul.mubr.f32.gmra.mxu0 %v13061_v8  ;;  %v4419_v62 = vpop.f32.mrf.mxu1  ;;  %5755 = vmatmul.mubr.f32.gmra.mxu1 %v12979_v36  ;;  %15985 = vst [vmem:[#allocation36_spill] sm:$0xff] %v13136_v55  ;;  %15986 = vst [vmem:[#allocation40_spill] sm:$0xff] %v13141_v51 }
 0x33b   : > { %5521 = vmatprep.mubr.f32.mxu0 %v15833_v0  ;;  %v13104_v22 = vadd.f32 %v4419_v62, %v4180_v63  ;;  %5760 = vmatprep.mubr.f32.mxu1 %v15833_v0  ;;  %15987 = vst [vmem:[#allocation46_spill] sm:$0xff] %v13143_v26  ;;  %v10722_v63 = vld [vmem:[%s11034_s13 + $0x158] sm:$0xff] }
 0x33c   : > { %v4182_v16 = vpop.f32.mrf.mxu0  ;;  %v4421_v25 = vpop.f32.mrf.mxu1  ;;  %v5408_v53 = vsel %vm299_vm0, %v10722_v63, 0 }
 0x33d   : > { %v13116_v1 = vadd.f32 %v4421_v25, %v4182_v16  ;;  %v13152_v16 = vand.u32 4294901760, %v5558_v59  ;;  %v13157_v25 = vand.u32 4294901760, %v13136_v55  ;;  %v10723_v59 = vld [vmem:[%s11034_s13 + $0x160] sm:$0xff]  ;;  %v13178_v21 = vand.u32 4294901760, %v5408_v53 }
 0x33e   : > { %v4191_v57 = vpop.f32.mrf.mxu0  ;;  %5527 = vmatmul.mubr.f32.gmra.mxu0 %v13086_v7  ;;  %v4426_v35 = vpop.f32.mrf.mxu1  ;;  %5762 = vmatmul.mubr.f32.gmra.mxu1 %v13000_v50  ;;  %v5411_v61 = vsel %vm299_vm0, %v10723_v59, 0 }
 0x33f   : > { %5532 = vmatprep.mubr.f32.mxu0 %v15833_v0  ;;  %v13126_v49 = vadd.f32 %v4426_v35, %v4191_v57  ;;  %5767 = vmatprep.mubr.f32.mxu1 %v15833_v0  ;;  %15988 = vst [vmem:[#allocation49_spill] sm:$0xff] %v13152_v16  ;;  %15989 = vst [vmem:[#allocation25_spill] sm:$0xff] %v13157_v25  ;;  %v13163_v35 = vsub.f32 %v5402_v46, %v13143_v26 }
 0x340   : > { %v4193_v5 = vpop.f32.mrf.mxu0  ;;  %v4428_v31 = vpop.f32.mrf.mxu1  ;;  %v5580_v46 = vsub.f32 %v13136_v55, %v13157_v25  ;;  %15993 = vst [vmem:[#allocation13_spill] sm:$0xff] %v13178_v21 }
 0x341   : > { %v13138_v19 = vadd.f32 %v4428_v31, %v4193_v5  ;;  %15990 = vst [vmem:[#allocation35_spill] sm:$0xff] %v13163_v35  ;;  %v13165_v5 = vand.u32 4294901760, %v5405_v38 }
 0x342   : > { %v4202_v34 = vpop.f32.mrf.mxu0  ;;  %5538 = vmatmul.mubr.f32.gmra.mxu0 %v13119_v33  ;;  %v4433_v43 = vpop.f32.mrf.mxu1  ;;  %5769 = vmatmul.mubr.f32.gmra.mxu1 %v13033_v54  ;;  %v13197_v33 = vsub.f32 %v5408_v53, %v13178_v21  ;;  %v13204_v8 = vand.u32 4294901760, %v5580_v46  ;;  %v10725_v46 = vld [vmem:[%s11034_s13 + $0x170] sm:$0xff] }
 0x343   : > { %5543 = vmatprep.mubr.f32.mxu0 %v15833_v0  ;;  %v13149_v41 = vadd.f32 %v4433_v43, %v4202_v34  ;;  %5774 = vmatprep.mubr.f32.mxu1 %v15833_v0  ;;  %15991 = vst [vmem:[#allocation45_spill] sm:$0xff] %v13165_v5 }
 0x344   : > { %v4204_v10 = vpop.f32.mrf.mxu0  ;;  %v4435_v62 = vpop.f32.mrf.mxu1  ;;  %15996 = vst [vmem:[#allocation15_spill] sm:$0xff] %v13197_v33  ;;  %15998 = vst [vmem:[#allocation23_spill] sm:$0xff] %v13204_v8  ;;  %v13219_v24 = vand.u32 4294901760, %v13197_v33 }
 0x345   : > { %v13159_v57 = vadd.f32 %v4435_v62, %v4204_v10  ;;  %v13174_v62 = vand.u32 4294901760, %v5569_v60 }
 0x346   : > { %v4213_v20 = vpop.f32.mrf.mxu0  ;;  %5549 = vmatmul.mubr.f32.gmra.mxu0 %v13141_v51  ;;  %v4440_v31 = vpop.f32.mrf.mxu1  ;;  %5776 = vmatmul.mubr.f32.gmra.mxu1 %v13051_v23  ;;  %16000 = vst [vmem:[#allocation31_spill] sm:$0xff] %v13219_v24 }
 0x347   : > { %5554 = vmatprep.mubr.f32.mxu0 %v15833_v0  ;;  %v13171_v34 = vadd.f32 %v4440_v31, %v4213_v20  ;;  %5781 = vmatprep.mubr.f32.mxu1 %v15833_v0  ;;  %15992 = vst [vmem:[#allocation47_spill] sm:$0xff] %v13174_v62  ;;  %v13184_v20 = vand.u32 4294901760, %v13163_v35  ;;  %v13187_v31 = vsub.f32 %v5405_v38, %v13165_v5  ;;  %v13199_v38 = vand.u32 4294901760, %v5411_v61 }
 0x348   : > { %v4215_v43 = vpop.f32.mrf.mxu0  ;;  %v4442_v10 = vpop.f32.mrf.mxu1 }
 0x349   : > { %v13180_v63 = vadd.f32 %v4442_v10, %v4215_v43  ;;  %15994 = vst [vmem:[#allocation50_spill] sm:$0xff] %v13184_v20  ;;  %15995 = vst [vmem:[#allocation14_spill] sm:$0xff] %v13187_v31  ;;  %v10724_v10 = vld [vmem:[%s11034_s13 + $0x168] sm:$0xff] }
 0x34a   : > { %v4224_v9 = vpop.f32.mrf.mxu0  ;;  %5560 = vmatmul.mubr.f32.gmra.mxu0 %v13152_v16  ;;  %v4447_v60 = vpop.f32.mrf.mxu1  ;;  %5783 = vmatmul.mubr.f32.gmra.mxu1 %v13066_v32  ;;  %15997 = vst [vmem:[#allocation22_spill] sm:$0xff] %v13199_v38  ;;  %v5414_v53 = vsel %vm299_vm0, %v10724_v10, 0  ;;  %v13222_v32 = vsub.f32 %v5411_v61, %v13199_v38  ;;  %v5417_v61 = vsel %vm299_vm0, %v10725_v46, 0 }
 0x34b   : > { %5565 = vmatprep.mubr.f32.mxu0 %v15833_v0  ;;  %v13192_v51 = vadd.f32 %v4447_v60, %v4224_v9  ;;  %5788 = vmatprep.mubr.f32.mxu1 %v15833_v0  ;;  %v5591_v9 = vsub.f32 %v13163_v35, %v13184_v20  ;;  %v13209_v60 = vand.u32 4294901760, %v13187_v31 }
 0x34c   : > { %v4226_v43 = vpop.f32.mrf.mxu0  ;;  %v4449_v16 = vpop.f32.mrf.mxu1  ;;  %16001 = vst [vmem:[#allocation60_spill] sm:$0xff] %v13222_v32  ;;  %v13243_v36 = vand.u32 4294901760, %v13222_v32 }
 0x34d   : > { %v13201_v7 = vadd.f32 %v4449_v16, %v4226_v43  ;;  %15999 = vst [vmem:[#allocation29_spill] sm:$0xff] %v13209_v60  ;;  %v13227_v10 = vand.u32 4294901760, %v5591_v9 }
 0x34e   : > { %v4235_v59 = vpop.f32.mrf.mxu0  ;;  %5571 = vmatmul.mubr.f32.gmra.mxu0 %v13174_v62  ;;  %v4454_v2 = vpop.f32.mrf.mxu1  ;;  %5790 = vmatmul.mubr.f32.gmra.mxu1 %v13091_v39  ;;  %16004 = vst [vmem:[#allocation62_spill] sm:$0xff] %v13243_v36 }
 0x34f   : > { %5576 = vmatprep.mubr.f32.mxu0 %v15833_v0  ;;  %v13214_v16 = vadd.f32 %v4454_v2, %v4235_v59  ;;  %5795 = vmatprep.mubr.f32.mxu1 %v15833_v0  ;;  %16002 = vst [vmem:[#allocation61_spill] sm:$0xff] %v13227_v10  ;;  %v5602_v2 = vsub.f32 %v13187_v31, %v13209_v60  ;;  %v13231_v59 = vand.u32 4294901760, %v5414_v53 }
 0x350   : > { %v4237_v43 = vpop.f32.mrf.mxu0  ;;  %v4456_v62 = vpop.f32.mrf.mxu1 }
 0x351   : > { %v13224_v23 = vadd.f32 %v4456_v62, %v4237_v43  ;;  %16003 = vst [vmem:[#allocation65_spill] sm:$0xff] %v13231_v59  ;;  %v10726_v43 = vld [vmem:[%s11034_s13 + $0x178] sm:$0xff]  ;;  %v13248_v27 = vand.u32 4294901760, %v5602_v2 }
 0x352   : > { %v4246_v39 = vpop.f32.mrf.mxu0  ;;  %5582 = vmatmul.mubr.f32.gmra.mxu0 %v13204_v8  ;;  %v4461_v54 = vpop.f32.mrf.mxu1  ;;  %5797 = vmatmul.mubr.f32.gmra.mxu1 %v13114_v37  ;;  %v5613_v8 = vsub.f32 %v13197_v33, %v13219_v24  ;;  %v5420_v24 = vsel %vm299_vm0, %v10726_v43, 0 }
 0x353   : > { %5587 = vmatprep.mubr.f32.mxu0 %v15833_v0  ;;  %v13236_v50 = vadd.f32 %v4461_v54, %v4246_v39  ;;  %5802 = vmatprep.mubr.f32.mxu1 %v15833_v0  ;;  %16005 = vst [vmem:[#allocation66_spill] sm:$0xff] %v13248_v27  ;;  %v13251_v54 = vsub.f32 %v5414_v53, %v13231_v59  ;;  %v13253_v39 = vand.u32 4294901760, %v5417_v61  ;;  %v13274_v43 = vand.u32 4294901760, %v5420_v24 }
 0x354   : > { %v4248_v62 = vpop.f32.mrf.mxu0  ;;  %v4463_v9 = vpop.f32.mrf.mxu1  ;;  %v13261_v2 = vand.u32 4294901760, %v5613_v8  ;;  %v5624_v53 = vsub.f32 %v13222_v32, %v13243_v36 }
 0x355   : > { %v13245_v58 = vadd.f32 %v4463_v9, %v4248_v62  ;;  %16006 = vst [vmem:[#allocation67_spill] sm:$0xff] %v13251_v54  ;;  %16007 = vst [vmem:[#allocation70_spill] sm:$0xff] %v13253_v39 }
 0x356   : > { %v4257_v37 = vpop.f32.mrf.mxu0  ;;  %5593 = vmatmul.mubr.f32.gmra.mxu0 %v13227_v10  ;;  %v4468_v46 = vpop.f32.mrf.mxu1  ;;  %5804 = vmatmul.mubr.f32.gmra.mxu1 %v13143_v26  ;;  %16008 = vst [vmem:[#allocation72_spill] sm:$0xff] %v13261_v2  ;;  %v13269_v26 = vand.u32 4294901760, %v13251_v54  ;;  %16011 = vst [vmem:[#allocation80_spill] sm:$0xff] %v13274_v43 }
 0x357   : > { %5598 = vmatprep.mubr.f32.mxu0 %v15833_v0  ;;  %v13258_v33 = vadd.f32 %v4468_v46, %v4257_v37  ;;  %5809 = vmatprep.mubr.f32.mxu1 %v15833_v0  ;;  %v13272_v37 = vsub.f32 %v5417_v61, %v13253_v39 }
 0x358   : > { %v4259_v62 = vpop.f32.mrf.mxu0  ;;  %v4470_v9 = vpop.f32.mrf.mxu1  ;;  %16009 = vst [vmem:[#allocation75_spill] sm:$0xff] %v13269_v26  ;;  %v5635_v61 = vsub.f32 %v13251_v54, %v13269_v26 }
 0x359   : > { %v13265_v10 = vadd.f32 %v4470_v9, %v4259_v62  ;;  %16010 = vst [vmem:[#allocation76_spill] sm:$0xff] %v13272_v37 }
 0x35a   : > { %v4268_v60 = vpop.f32.mrf.mxu0  ;;  %5604 = vmatmul.mubr.f32.gmra.mxu0 %v13248_v27  ;;  %v4475_v46 = vpop.f32.mrf.mxu1  ;;  %5811 = vmatmul.mubr.f32.gmra.mxu1 %v13165_v5  ;;  %v13281_v27 = vand.u32 4294901760, %v5624_v53  ;;  %v13289_v5 = vand.u32 4294901760, %v13272_v37  ;;  %v13302_v54 = vand.u32 4294901760, %v5635_v61 }
 0x35b   : > { %5609 = vmatprep.mubr.f32.mxu0 %v15833_v0  ;;  %v13278_v8 = vadd.f32 %v4475_v46, %v4268_v60  ;;  %5816 = vmatprep.mubr.f32.mxu1 %v15833_v0  ;;  %v13292_v60 = vsub.f32 %v5420_v24, %v13274_v43 }
 0x35c   : > { %v4270_v62 = vpop.f32.mrf.mxu0  ;;  %v4477_v9 = vpop.f32.mrf.mxu1  ;;  %16012 = vst [vmem:[#allocation81_spill] sm:$0xff] %v13281_v27  ;;  %16014 = vst [vmem:[#allocation79_spill] sm:$0xff] %v13289_v5  ;;  %v5646_v24 = vsub.f32 %v13272_v37, %v13289_v5 }
 0x35d   : > { %v13283_v36 = vadd.f32 %v4477_v9, %v4270_v62  ;;  %16015 = vst [vmem:[#allocation30_spill] sm:$0xff] %v13292_v60  ;;  %16016 = vst [vmem:[#allocation73_spill] sm:$0xff] %v13302_v54 }
 0x35e   : > { %v4279_v32 = vpop.f32.mrf.mxu0  ;;  %5615 = vmatmul.mubr.f32.gmra.mxu0 %v13261_v2  ;;  %v4482_v46 = vpop.f32.mrf.mxu1  ;;  %5818 = vmatmul.mubr.f32.gmra.mxu1 %v13178_v21  ;;  %v13307_v21 = vand.u32 4294901760, %v13292_v60 }
 0x35f   : > { %16013 = vst [vmem:[#allocation83_spill] sm:$0xff] %v13283_v36  ;;  %5620 = vmatprep.mubr.f32.mxu0 %v15833_v0  ;;  %v13296_v53 = vadd.f32 %v4482_v46, %v4279_v32  ;;  %5823 = vmatprep.mubr.f32.mxu1 %v15833_v0 }
 0x360   : > { %v4281_v62 = vpop.f32.mrf.mxu0  ;;  %v4484_v9 = vpop.f32.mrf.mxu1  ;;  %16017 = vst [vmem:[#allocation28_spill] sm:$0xff] %v13307_v21  ;;  %v5657_v5 = vsub.f32 %v13292_v60, %v13307_v21 }
 0x361   : > { %v13299_v2 = vadd.f32 %v4484_v9, %v4281_v62 }
 0x362   : > { %v4290_v26 = vpop.f32.mrf.mxu0  ;;  %5626 = vmatmul.mubr.f32.gmra.mxu0 %v13281_v27  ;;  %v4489_v36 = vpop.f32.mrf.mxu1  ;;  %5825 = vmatmul.mubr.f32.gmra.mxu1 %v13199_v38  ;;  %v13317_v27 = vand.u32 4294901760, %v5646_v24  ;;  %v13329_v24 = vand.u32 4294901760, %v5657_v5 }
 0x363   : > { %5631 = vmatprep.mubr.f32.mxu0 %v15833_v0  ;;  %v13311_v32 = vadd.f32 %v4489_v36, %v4290_v26  ;;  %5830 = vmatprep.mubr.f32.mxu1 %v15833_v0 }
 0x364   : > { %v4292_v46 = vpop.f32.mrf.mxu0  ;;  %v4491_v62 = vpop.f32.mrf.mxu1  ;;  %16018 = vst [vmem:[#allocation32_spill] sm:$0xff] %v13317_v27  ;;  %16019 = vst [vmem:[#allocation77_spill] sm:$0xff] %v13329_v24 }
 0x365   : > { %v13314_v9 = vadd.f32 %v4491_v62, %v4292_v46 }
 0x366   : > { %v4301_v61 = vpop.f32.mrf.mxu0  ;;  %5637 = vmatmul.mubr.f32.gmra.mxu0 %v13302_v54  ;;  %v4496_v37 = vpop.f32.mrf.mxu1  ;;  %5832 = vmatmul.mubr.f32.gmra.mxu1 %v13231_v59 }
 0x367   : > { %5642 = vmatprep.mubr.f32.mxu0 %v15833_v0  ;;  %v13323_v36 = vadd.f32 %v4496_v37, %v4301_v61  ;;  %5837 = vmatprep.mubr.f32.mxu1 %v15833_v0 }
 0x368   : > { %v4303_v26 = vpop.f32.mrf.mxu0  ;;  %v4498_v46 = vpop.f32.mrf.mxu1 }
 0x369   : > { %v13326_v62 = vadd.f32 %v4498_v46, %v4303_v26 }
 0x36a   : > { %v4312_v38 = vpop.f32.mrf.mxu0  ;;  %5648 = vmatmul.mubr.f32.gmra.mxu0 %v13317_v27  ;;  %v4503_v54 = vpop.f32.mrf.mxu1  ;;  %5839 = vmatmul.mubr.f32.gmra.mxu1 %v13253_v39 }
 0x36b   : > { %5653 = vmatprep.mubr.f32.mxu0 %v15833_v0  ;;  %v13333_v59 = vadd.f32 %v4503_v54, %v4312_v38  ;;  %5844 = vmatprep.mubr.f32.mxu1 %v15833_v0 }
 0x36c   : > { %v4314_v37 = vpop.f32.mrf.mxu0  ;;  %v4505_v61 = vpop.f32.mrf.mxu1 }
 0x36d   : > { %v13336_v21 = vadd.f32 %v4505_v61, %v4314_v37  ;;  %v16020_v61 = vld [vmem:[#allocation17_spill] sm:$0xff] }
 0x36e   : > { %v4323_v26 = vpop.f32.mrf.mxu0  ;;  %5659 = vmatmul.mubr.f32.gmra.mxu0 %v13329_v24  ;;  %v4510_v46 = vpop.f32.mrf.mxu1  ;;  %5846 = vmatmul.mubr.f32.gmra.mxu1 %v13274_v43 }
 0x36f   : > { %5920 = vmatprep.mubr.f32.mxu0 %v15833_v0  ;;  %v13341_v5 = vadd.f32 %v4510_v46, %v4323_v26  ;;  %6115 = vmatprep.mubr.f32.mxu1 %v15833_v0 }
 0x370   : > { %v4325_v27 = vpop.f32.mrf.mxu0  ;;  %v4512_v38 = vpop.f32.mrf.mxu1 }
 0x371   : > { %v13344_v54 = vadd.f32 %v4512_v38, %v4325_v27  ;;  %v16021_v38 = vld [vmem:[#allocation51_spill] sm:$0xff] }
 0x372   : > { %v4587_v39 = vpop.f32.mrf.mxu0  ;;  %5923 = vmatmul.mubr.f32.vlgmr.msra.gmra.mxu0 %v12968_v44  ;;  %v4783_v24 = vpop.f32.mrf.mxu1  ;;  %6119 = vmatmul.mubr.f32.vlgmr.msra.gmra.mxu1 %v12987_v30 }
 0x373   : > { %v4588_v37 = vadd.f32 %v4587_v39, %v13057_v28  ;;  %6297 = vmatpush1.msra.mxu0 %v16020_v61  ;;  %6476 = vmatpush1.msra.mxu1 %v15969_v4  ;;  %v16022_v39 = vld [vmem:[#allocation54_spill] sm:$0xff] }
 0x374   : > { %v4589_v43 = vpop.f32.mrf.mxu0  ;;  %5928 = vmatprep.mubr.f32.mxu0 %v15833_v0  ;;  %v4785_v46 = vpop.f32.mrf.mxu1  ;;  %6124 = vmatprep.mubr.f32.mxu1 %v15833_v0 }
 0x375   : > { %v13352_v26 = vadd.f32 %v4783_v24, %v4588_v37  ;;  %v4590_v27 = vadd.f32 %v4589_v43, %v13069_v15  ;;  %6653 = vmatprep.subr.mxu0 %v16021_v38  ;;  %6900 = vmatprep.subr.mxu1 %v16022_v39 }
 0x376   : > { %v4595_v28 = vpop.f32.mrf.mxu0  ;;  %5931 = vmatmul.mubr.f32.gmra.mxu0 %v12990_v12  ;;  %v4792_v30 = vpop.f32.mrf.mxu1  ;;  %6128 = vmatmul.mubr.f32.gmra.mxu1 %v13013_v14 }
 0x377   : > { %v13359_v61 = vadd.f32 %v4785_v46, %v4590_v27  ;;  %v4596_v4 = vadd.f32 %v4595_v28, %v13083_v45  ;;  %5936 = vmatprep.mubr.f32.mxu0 %v15833_v0  ;;  %6133 = vmatprep.mubr.f32.mxu1 %v15833_v0 }
 0x378   : > { %v4597_v15 = vpop.f32.mrf.mxu0  ;;  %v4794_v37 = vpop.f32.mrf.mxu1 }
 0x379   : > { %v13365_v43 = vadd.f32 %v4792_v30, %v4596_v4  ;;  %v4598_v24 = vadd.f32 %v4597_v15, %v13093_v3 }
 0x37a   : > { %v4603_v12 = vpop.f32.mrf.mxu0  ;;  %5939 = vmatmul.mubr.f32.gmra.mxu0 %v12998_v6  ;;  %v4801_v46 = vpop.f32.mrf.mxu1  ;;  %6137 = vmatmul.mubr.f32.gmra.mxu1 %v13020_v48 }
 0x37b   : > { %v13369_v27 = vadd.f32 %v4794_v37, %v4598_v24  ;;  %v4604_v45 = vadd.f32 %v4603_v12, %v13104_v22  ;;  %5944 = vmatprep.mubr.f32.mxu0 %v15833_v0  ;;  %6142 = vmatprep.mubr.f32.mxu1 %v15833_v0 }
 0x37c   : > { %v4605_v28 = vpop.f32.mrf.mxu0  ;;  %v4803_v3 = vpop.f32.mrf.mxu1 }
 0x37d   : > { %v13375_v30 = vadd.f32 %v4801_v46, %v4604_v45  ;;  %v4606_v4 = vadd.f32 %v4605_v28, %v13116_v1 }
 0x37e   : > { %v4611_v15 = vpop.f32.mrf.mxu0  ;;  %5947 = vmatmul.mubr.f32.gmra.mxu0 %v13023_v18  ;;  %v4810_v22 = vpop.f32.mrf.mxu1  ;;  %6146 = vmatmul.mubr.f32.gmra.mxu1 %v13043_v13 }
 0x37f   : > { %v13379_v24 = vadd.f32 %v4803_v3, %v4606_v4  ;;  %v4612_v12 = vadd.f32 %v4611_v15, %v13126_v49  ;;  %5952 = vmatprep.mubr.f32.mxu0 %v15833_v0  ;;  %6151 = vmatprep.mubr.f32.mxu1 %v15833_v0 }
 0x380   : > { %v4613_v37 = vpop.f32.mrf.mxu0  ;;  %v4812_v46 = vpop.f32.mrf.mxu1 }
 0x381   : > { %v13385_v45 = vadd.f32 %v4810_v22, %v4612_v12  ;;  %v4614_v1 = vadd.f32 %v4613_v37, %v13138_v19 }
 0x382   : > { %v4619_v28 = vpop.f32.mrf.mxu0  ;;  %5955 = vmatmul.mubr.f32.gmra.mxu0 %v13049_v42  ;;  %v4819_v3 = vpop.f32.mrf.mxu1  ;;  %6155 = vmatmul.mubr.f32.gmra.mxu1 %v13073_v52  ;;  %v16039_v42 = vld [vmem:[#allocation39_spill] sm:$0xff] }
 0x383   : > { %v13389_v4 = vadd.f32 %v4812_v46, %v4614_v1  ;;  %v4620_v49 = vadd.f32 %v4619_v28, %v13149_v41  ;;  %5960 = vmatprep.mubr.f32.mxu0 %v15833_v0  ;;  %6160 = vmatprep.mubr.f32.mxu1 %v15833_v0 }
 0x384   : > { %v4621_v15 = vpop.f32.mrf.mxu0  ;;  %v4821_v22 = vpop.f32.mrf.mxu1 }
 0x385   : > { %v13395_v12 = vadd.f32 %v4819_v3, %v4620_v49  ;;  %v4622_v19 = vadd.f32 %v4621_v15, %v13159_v57 }
 0x386   : > { %v4627_v37 = vpop.f32.mrf.mxu0  ;;  %5963 = vmatmul.mubr.f32.gmra.mxu0 %v13076_v40  ;;  %v4828_v46 = vpop.f32.mrf.mxu1  ;;  %6164 = vmatmul.mubr.f32.gmra.mxu1 %v13099_v17 }
 0x387   : > { %v13399_v1 = vadd.f32 %v4821_v22, %v4622_v19  ;;  %v4628_v41 = vadd.f32 %v4627_v37, %v13171_v34  ;;  %5968 = vmatprep.mubr.f32.mxu0 %v15833_v0  ;;  %6169 = vmatprep.mubr.f32.mxu1 %v15833_v0 }
 0x388   : > { %v4629_v28 = vpop.f32.mrf.mxu0  ;;  %v4830_v3 = vpop.f32.mrf.mxu1 }
 0x389   : > { %v13405_v49 = vadd.f32 %v4828_v46, %v4628_v41  ;;  %v4630_v57 = vadd.f32 %v4629_v28, %v13180_v63 }
 0x38a   : > { %v4635_v15 = vpop.f32.mrf.mxu0  ;;  %5971 = vmatmul.mubr.f32.gmra.mxu0 %v13089_v56  ;;  %v4837_v22 = vpop.f32.mrf.mxu1  ;;  %6173 = vmatmul.mubr.f32.gmra.mxu1 %v13109_v11  ;;  %v16038_v56 = vld [vmem:[#allocation34_spill] sm:$0xff] }
 0x38b   : > { %v13409_v19 = vadd.f32 %v4830_v3, %v4630_v57  ;;  %v4636_v34 = vadd.f32 %v4635_v15, %v13192_v51  ;;  %5976 = vmatprep.mubr.f32.mxu0 %v15833_v0  ;;  %6178 = vmatprep.mubr.f32.mxu1 %v15833_v0 }
 0x38c   : > { %v4637_v37 = vpop.f32.mrf.mxu0  ;;  %v4839_v46 = vpop.f32.mrf.mxu1 }
 0x38d   : > { %v13415_v41 = vadd.f32 %v4837_v22, %v4636_v34  ;;  %v4638_v63 = vadd.f32 %v4637_v37, %v13201_v7 }
 0x38e   : > { %v4643_v28 = vpop.f32.mrf.mxu0  ;;  %5979 = vmatmul.mubr.f32.gmra.mxu0 %v13112_v47  ;;  %v4846_v3 = vpop.f32.mrf.mxu1  ;;  %6182 = vmatmul.mubr.f32.gmra.mxu1 %v13133_v29  ;;  %v16037_v29 = vld [vmem:[#allocation52_spill] sm:$0xff] }
 0x38f   : > { %v13419_v57 = vadd.f32 %v4839_v46, %v4638_v63  ;;  %v4644_v51 = vadd.f32 %v4643_v28, %v13214_v16  ;;  %5984 = vmatprep.mubr.f32.mxu0 %v15833_v0  ;;  %6187 = vmatprep.mubr.f32.mxu1 %v15833_v0 }
 0x390   : > { %v4645_v15 = vpop.f32.mrf.mxu0  ;;  %v4848_v22 = vpop.f32.mrf.mxu1 }
 0x391   : > { %v13425_v34 = vadd.f32 %v4846_v3, %v4644_v51  ;;  %v4646_v7 = vadd.f32 %v4645_v15, %v13224_v23 }
 0x392   : > { %v4651_v37 = vpop.f32.mrf.mxu0  ;;  %5987 = vmatmul.mubr.f32.gmra.mxu0 %v13136_v55  ;;  %v4855_v46 = vpop.f32.mrf.mxu1  ;;  %6191 = vmatmul.mubr.f32.gmra.mxu1 %v13157_v25  ;;  %v16036_v25 = vld [vmem:[#allocation58_spill] sm:$0xff] }
 0x393   : > { %v13429_v63 = vadd.f32 %v4848_v22, %v4646_v7  ;;  %v4652_v16 = vadd.f32 %v4651_v37, %v13236_v50  ;;  %5992 = vmatprep.mubr.f32.mxu0 %v15833_v0  ;;  %6196 = vmatprep.mubr.f32.mxu1 %v15833_v0 }
 0x394   : > { %v4653_v28 = vpop.f32.mrf.mxu0  ;;  %v4857_v3 = vpop.f32.mrf.mxu1 }
 0x395   : > { %v13435_v51 = vadd.f32 %v4855_v46, %v4652_v16  ;;  %v4654_v23 = vadd.f32 %v4653_v28, %v13245_v58 }
 0x396   : > { %v4659_v15 = vpop.f32.mrf.mxu0  ;;  %5995 = vmatmul.mubr.f32.gmra.mxu0 %v13163_v35  ;;  %v4864_v22 = vpop.f32.mrf.mxu1  ;;  %6200 = vmatmul.mubr.f32.gmra.mxu1 %v13184_v20  ;;  %v16025_v35 = vld [vmem:[#allocation15_spill] sm:$0xff] }
 0x397   : > { %v13439_v7 = vadd.f32 %v4857_v3, %v4654_v23  ;;  %v4660_v50 = vadd.f32 %v4659_v15, %v13258_v33  ;;  %6000 = vmatprep.mubr.f32.mxu0 %v15833_v0  ;;  %6205 = vmatprep.mubr.f32.mxu1 %v15833_v0  ;;  %v16023_v15 = vld [vmem:[#allocation29_spill] sm:$0xff] }
 0x398   : > { %v4661_v37 = vpop.f32.mrf.mxu0  ;;  %v4866_v46 = vpop.f32.mrf.mxu1 }
 0x399   : > { %v13445_v16 = vadd.f32 %v4864_v22, %v4660_v50  ;;  %v4662_v58 = vadd.f32 %v4661_v37, %v13265_v10  ;;  %v16024_v22 = vld [vmem:[#allocation83_spill] sm:$0xff] }
 0x39a   : > { %v4667_v28 = vpop.f32.mrf.mxu0  ;;  %6003 = vmatmul.mubr.f32.gmra.mxu0 %v13187_v31  ;;  %v4873_v3 = vpop.f32.mrf.mxu1  ;;  %6209 = vmatmul.mubr.f32.gmra.mxu1 %v16023_v15  ;;  %v16027_v31 = vld [vmem:[#allocation60_spill] sm:$0xff] }
 0x39b   : > { %v13449_v23 = vadd.f32 %v4866_v46, %v4662_v58  ;;  %v4668_v33 = vadd.f32 %v4667_v28, %v13278_v8  ;;  %6008 = vmatprep.mubr.f32.mxu0 %v15833_v0  ;;  %6214 = vmatprep.mubr.f32.mxu1 %v15833_v0  ;;  %v16026_v28 = vld [vmem:[#allocation31_spill] sm:$0xff] }
 0x39c   : > { %v4669_v39 = vpop.f32.mrf.mxu0  ;;  %v4875_v37 = vpop.f32.mrf.mxu1 }
 0x39d   : > { %v13455_v50 = vadd.f32 %v4873_v3, %v4668_v33  ;;  %v4670_v10 = vadd.f32 %v4669_v39, %v16024_v22 }
 0x39e   : > { %v4675_v20 = vpop.f32.mrf.mxu0  ;;  %6011 = vmatmul.mubr.f32.gmra.mxu0 %v16025_v35  ;;  %v4882_v46 = vpop.f32.mrf.mxu1  ;;  %6218 = vmatmul.mubr.f32.gmra.mxu1 %v16026_v28  ;;  %v16029_v35 = vld [vmem:[#allocation67_spill] sm:$0xff] }
 0x39f   : > { %v13459_v58 = vadd.f32 %v4875_v37, %v4670_v10  ;;  %v4676_v8 = vadd.f32 %v4675_v20, %v13296_v53  ;;  %6016 = vmatprep.mubr.f32.mxu0 %v15833_v0  ;;  %6223 = vmatprep.mubr.f32.mxu1 %v15833_v0  ;;  %v16028_v37 = vld [vmem:[#allocation62_spill] sm:$0xff] }
 0x3a0   : > { %v4677_v15 = vpop.f32.mrf.mxu0  ;;  %v4884_v3 = vpop.f32.mrf.mxu1 }
 0x3a1   : > { %v13465_v33 = vadd.f32 %v4882_v46, %v4676_v8  ;;  %v4678_v39 = vadd.f32 %v4677_v15, %v13299_v2 }
 0x3a2   : > { %v4683_v22 = vpop.f32.mrf.mxu0  ;;  %6019 = vmatmul.mubr.f32.gmra.mxu0 %v16027_v31  ;;  %v4891_v53 = vpop.f32.mrf.mxu1  ;;  %6227 = vmatmul.mubr.f32.gmra.mxu1 %v16028_v37 }
 0x3a3   : > { %v13469_v10 = vadd.f32 %v4884_v3, %v4678_v39  ;;  %v4684_v20 = vadd.f32 %v4683_v22, %v13311_v32  ;;  %6024 = vmatprep.mubr.f32.mxu0 %v15833_v0  ;;  %6232 = vmatprep.mubr.f32.mxu1 %v15833_v0  ;;  %v16030_v22 = vld [vmem:[#allocation75_spill] sm:$0xff] }
 0x3a4   : > { %v4685_v28 = vpop.f32.mrf.mxu0  ;;  %v4893_v15 = vpop.f32.mrf.mxu1 }
 0x3a5   : > { %v13475_v8 = vadd.f32 %v4891_v53, %v4684_v20  ;;  %v4686_v2 = vadd.f32 %v4685_v28, %v13314_v9 }
 0x3a6   : > { %v4691_v46 = vpop.f32.mrf.mxu0  ;;  %6027 = vmatmul.mubr.f32.gmra.mxu0 %v16029_v35  ;;  %v4900_v3 = vpop.f32.mrf.mxu1  ;;  %6236 = vmatmul.mubr.f32.gmra.mxu1 %v16030_v22  ;;  %v16031_v35 = vld [vmem:[#allocation76_spill] sm:$0xff]  ;;  %v16035_v22 = vld [vmem:[#allocation55_spill] sm:$0xff] }
 0x3a7   : > { %v13479_v39 = vadd.f32 %v4893_v15, %v4686_v2  ;;  %v4692_v32 = vadd.f32 %v4691_v46, %v13323_v36  ;;  %6032 = vmatprep.mubr.f32.mxu0 %v15833_v0  ;;  %6241 = vmatprep.mubr.f32.mxu1 %v15833_v0  ;;  %v16032_v15 = vld [vmem:[#allocation79_spill] sm:$0xff] }
 0x3a8   : > { %v4693_v37 = vpop.f32.mrf.mxu0  ;;  %v4902_v28 = vpop.f32.mrf.mxu1 }
 0x3a9   : > { %v13485_v20 = vadd.f32 %v4900_v3, %v4692_v32  ;;  %v4694_v9 = vadd.f32 %v4693_v37, %v13326_v62  ;;  %v16033_v3 = vld [vmem:[#allocation28_spill] sm:$0xff] }
 0x3aa   : > { %v13488_v53 = vpop.f32.mrf.mxu0  ;;  %6035 = vmatmul.mubr.f32.gmra.mxu0 %v16031_v35  ;;  %v13493_v36 = vpop.f32.mrf.mxu1  ;;  %6245 = vmatmul.mubr.f32.gmra.mxu1 %v16032_v15  ;;  %v16034_v35 = vld [vmem:[#allocation43_spill] sm:$0xff] }
 0x3ab   : > { %v13491_v2 = vadd.f32 %v4902_v28, %v4694_v9  ;;  %6040 = vmatprep.mubr.f32.mxu0 %v15833_v0  ;;  %6250 = vmatprep.mubr.f32.mxu1 %v15833_v0 }
 0x3ac   : > { %v13497_v46 = vpop.f32.mrf.mxu0  ;;  %v13500_v32 = vpop.f32.mrf.mxu1 }
 0x3ae   : > { %v13502_v62 = vpop.f32.mrf.mxu0  ;;  %6043 = vmatmul.mubr.f32.gmra.mxu0 %v13292_v60  ;;  %v13505_v37 = vpop.f32.mrf.mxu1  ;;  %6254 = vmatmul.mubr.f32.gmra.mxu1 %v16033_v3 }
 0x3af   : > { %6330 = vmatprep.mubr.f32.mxu0 %v15833_v0  ;;  %6509 = vmatprep.mubr.f32.mxu1 %v15833_v0 }
 0x3b0   : > { %v13509_v9 = vpop.f32.mrf.mxu0  ;;  %v13512_v28 = vpop.f32.mrf.mxu1 }
 0x3b2   : > { %v4996_v15 = vpop.f32.mrf.mxu0  ;;  %6332 = vmatmul.mubr.f32.vlgmr.msra.gmra.mxu0 %v16034_v35  ;;  %v5175_v31 = vpop.f32.mrf.mxu1  ;;  %6511 = vmatmul.mubr.f32.vlgmr.msra.gmra.mxu1 %v16034_v35 }
 0x3b3   : > { %6655 = vmatpush1.msra.mxu0 %v16035_v22  ;;  %6906 = vmatpush1.msra.mxu1 %v16036_v25  ;;  %v4997_v3 = vadd.f32 %v4996_v15, %v13352_v26 }
 0x3b4   : > { %v4998_v60 = vpop.f32.mrf.mxu0  ;;  %6337 = vmatprep.mubr.f32.mxu0 %v15833_v0  ;;  %v5177_v55 = vpop.f32.mrf.mxu1  ;;  %6516 = vmatprep.mubr.f32.mxu1 %v15833_v0 }
 0x3b5   : > { %7084 = vmatprep.subr.mxu0 %v16037_v29  ;;  %v4999_v47 = vadd.f32 %v4998_v60, %v13359_v61  ;;  %7280 = vmatprep.subr.mxu1 %v16021_v38  ;;  %v5176_v15 = vadd.f32 %v5175_v31, %v4997_v3 }
 0x3b6   : > { %v5003_v11 = vpop.f32.mrf.mxu0  ;;  %6339 = vmatmul.mubr.f32.gmra.mxu0 %v16038_v56  ;;  %v5182_v40 = vpop.f32.mrf.mxu1  ;;  %6518 = vmatmul.mubr.f32.gmra.mxu1 %v16038_v56 }
 0x3b7   : > { %v5004_v17 = vadd.f32 %v5003_v11, %v13365_v43  ;;  %6344 = vmatprep.mubr.f32.mxu0 %v15833_v0  ;;  %6523 = vmatprep.mubr.f32.mxu1 %v15833_v0  ;;  %v5178_v61 = vadd.f32 %v5177_v55, %v4999_v47 }
 0x3b8   : > { %v5005_v26 = vpop.f32.mrf.mxu0  ;;  %v5184_v60 = vpop.f32.mrf.mxu1 }
 0x3b9   : > { %v5183_v25 = vadd.f32 %v5182_v40, %v5004_v17  ;;  %v5006_v29 = vadd.f32 %v5005_v26, %v13369_v27  ;;  %v16040_v27 = vld [vmem:[#allocation18_spill] sm:$0xff] }
 0x3ba   : > { %v5010_v52 = vpop.f32.mrf.mxu0  ;;  %6346 = vmatmul.mubr.f32.gmra.mxu0 %v16039_v42  ;;  %v5189_v43 = vpop.f32.mrf.mxu1  ;;  %6525 = vmatmul.mubr.f32.gmra.mxu1 %v16039_v42 }
 0x3bb   : > { %v5287_v13 = vmin.f32 %v5176_v15, %v5183_v25  ;;  %v5185_v18 = vadd.f32 %v5184_v60, %v5006_v29  ;;  %v5011_v11 = vadd.f32 %v5010_v52, %v13375_v30  ;;  %6351 = vmatprep.mubr.f32.mxu0 %v15833_v0  ;;  %6530 = vmatprep.mubr.f32.mxu1 %v15833_v0  ;;  %v16041_v60 = vld [vmem:[#allocation63_spill] sm:$0xff] }
 0x3bc   : > { %v5012_v48 = vpop.f32.mrf.mxu0  ;;  %v5191_v47 = vpop.f32.mrf.mxu1 }
 0x3bd   : > { %v5288_v40 = vmin.f32 %v5178_v61, %v5185_v18  ;;  %v5190_v17 = vadd.f32 %v5189_v43, %v5011_v11  ;;  %v5013_v31 = vadd.f32 %v5012_v48, %v13379_v24 }
 0x3be   : > { %v5017_v55 = vpop.f32.mrf.mxu0  ;;  %6353 = vmatmul.mubr.f32.gmra.mxu0 %v16040_v27  ;;  %v5196_v30 = vpop.f32.mrf.mxu1  ;;  %6532 = vmatmul.mubr.f32.gmra.mxu1 %v16040_v27 }
 0x3bf   : > { %v5291_v25 = vmin.f32 %v5287_v13, %v5190_v17  ;;  %v5192_v29 = vadd.f32 %v5191_v47, %v5013_v31  ;;  %v5018_v52 = vadd.f32 %v5017_v55, %v13385_v45  ;;  %6358 = vmatprep.mubr.f32.mxu0 %v15833_v0  ;;  %6537 = vmatprep.mubr.f32.mxu1 %v15833_v0  ;;  %v16042_v55 = vld [vmem:[#allocation41_spill] sm:$0xff] }
 0x3c0   : > { %v5019_v3 = vpop.f32.mrf.mxu0  ;;  %v5198_v24 = vpop.f32.mrf.mxu1 }
 0x3c1   : > { %v5292_v18 = vmin.f32 %v5288_v40, %v5192_v29  ;;  %v5197_v26 = vadd.f32 %v5196_v30, %v5018_v52  ;;  %v5020_v48 = vadd.f32 %v5019_v3, %v13389_v4 }
 0x3c2   : > { %v5024_v15 = vpop.f32.mrf.mxu0  ;;  %6360 = vmatmul.mubr.f32.gmra.mxu0 %v16041_v60  ;;  %v5203_v11 = vpop.f32.mrf.mxu1  ;;  %6539 = vmatmul.mubr.f32.gmra.mxu1 %v16041_v60 }
 0x3c3   : > { %v5295_v13 = vmin.f32 %v5291_v25, %v5197_v26  ;;  %v5199_v61 = vadd.f32 %v5198_v24, %v5020_v48  ;;  %v5025_v45 = vadd.f32 %v5024_v15, %v13395_v12  ;;  %6365 = vmatprep.mubr.f32.mxu0 %v15833_v0  ;;  %6544 = vmatprep.mubr.f32.mxu1 %v15833_v0  ;;  %v16043_v24 = vld [vmem:[#allocation21_spill] sm:$0xff] }
 0x3c4   : > { %v5026_v43 = vpop.f32.mrf.mxu0  ;;  %v5205_v31 = vpop.f32.mrf.mxu1 }
 0x3c5   : > { %v5296_v40 = vmin.f32 %v5292_v18, %v5199_v61  ;;  %v5204_v17 = vadd.f32 %v5203_v11, %v5025_v45  ;;  %v5027_v4 = vadd.f32 %v5026_v43, %v13399_v1 }
 0x3c6   : > { %v5031_v47 = vpop.f32.mrf.mxu0  ;;  %6367 = vmatmul.mubr.f32.gmra.mxu0 %v16042_v55  ;;  %v5210_v52 = vpop.f32.mrf.mxu1  ;;  %6546 = vmatmul.mubr.f32.gmra.mxu1 %v16042_v55 }
 0x3c7   : > { %v5299_v25 = vmin.f32 %v5295_v13, %v5204_v17  ;;  %v5206_v29 = vadd.f32 %v5205_v31, %v5027_v4  ;;  %v5032_v12 = vadd.f32 %v5031_v47, %v13405_v49  ;;  %6372 = vmatprep.mubr.f32.mxu0 %v15833_v0  ;;  %6551 = vmatprep.mubr.f32.mxu1 %v15833_v0  ;;  %v16044_v4 = vld [vmem:[#allocation68_spill] sm:$0xff] }
 0x3c8   : > { %v5033_v30 = vpop.f32.mrf.mxu0  ;;  %v5212_v26 = vpop.f32.mrf.mxu1 }
 0x3c9   : > { %v5300_v3 = vmin.f32 %v5296_v40, %v5206_v29  ;;  %v5211_v18 = vadd.f32 %v5210_v52, %v5032_v12  ;;  %v5034_v1 = vadd.f32 %v5033_v30, %v13409_v19 }
 0x3ca   : > { %v5038_v48 = vpop.f32.mrf.mxu0  ;;  %6374 = vmatmul.mubr.f32.gmra.mxu0 %v16043_v24  ;;  %v5217_v61 = vpop.f32.mrf.mxu1  ;;  %6553 = vmatmul.mubr.f32.gmra.mxu1 %v16043_v24 }
 0x3cb   : > { %v5303_v15 = vmin.f32 %v5299_v25, %v5211_v18  ;;  %v5213_v13 = vadd.f32 %v5212_v26, %v5034_v1  ;;  %v5039_v49 = vadd.f32 %v5038_v48, %v13415_v41  ;;  %6379 = vmatprep.mubr.f32.mxu0 %v15833_v0  ;;  %6558 = vmatprep.mubr.f32.mxu1 %v15833_v0  ;;  %v16045_v18 = vld [vmem:[#allocation82_spill] sm:$0xff] }
 0x3cc   : > { %v5040_v45 = vpop.f32.mrf.mxu0  ;;  %v5219_v40 = vpop.f32.mrf.mxu1 }
 0x3cd   : > { %v5304_v11 = vmin.f32 %v5300_v3, %v5213_v13  ;;  %v5218_v43 = vadd.f32 %v5217_v61, %v5039_v49  ;;  %v5041_v19 = vadd.f32 %v5040_v45, %v13419_v57 }
 0x3ce   : > { %v5045_v17 = vpop.f32.mrf.mxu0  ;;  %6381 = vmatmul.mubr.f32.gmra.mxu0 %v16044_v4  ;;  %v5224_v25 = vpop.f32.mrf.mxu1  ;;  %6560 = vmatmul.mubr.f32.gmra.mxu1 %v16044_v4 }
 0x3cf   : > { %v5307_v31 = vmin.f32 %v5303_v15, %v5218_v43  ;;  %v5220_v47 = vadd.f32 %v5219_v40, %v5041_v19  ;;  %v5046_v41 = vadd.f32 %v5045_v17, %v13425_v34  ;;  %6386 = vmatprep.mubr.f32.mxu0 %v15833_v0  ;;  %6565 = vmatprep.mubr.f32.mxu1 %v15833_v0 }
 0x3d0   : > { %v5047_v29 = vpop.f32.mrf.mxu0  ;;  %v5226_v30 = vpop.f32.mrf.mxu1 }
 0x3d1   : > { %v5308_v12 = vmin.f32 %v5304_v11, %v5220_v47  ;;  %v5225_v52 = vadd.f32 %v5224_v25, %v5046_v41  ;;  %v5048_v57 = vadd.f32 %v5047_v29, %v13429_v63  ;;  %v16046_v11 = vld [vmem:[#allocation46_spill] sm:$0xff]  ;;  %v16047_v29 = vld [vmem:[#allocation45_spill] sm:$0xff] }
 0x3d2   : > { %v5052_v3 = vpop.f32.mrf.mxu0  ;;  %6388 = vmatmul.mubr.f32.gmra.mxu0 %v16045_v18  ;;  %v5231_v48 = vpop.f32.mrf.mxu1  ;;  %6567 = vmatmul.mubr.f32.gmra.mxu1 %v16045_v18 }
 0x3d3   : > { %v5311_v1 = vmin.f32 %v5307_v31, %v5225_v52  ;;  %v5227_v26 = vadd.f32 %v5226_v30, %v5048_v57  ;;  %v5053_v34 = vadd.f32 %v5052_v3, %v13435_v51  ;;  %6393 = vmatprep.mubr.f32.mxu0 %v15833_v0  ;;  %6572 = vmatprep.mubr.f32.mxu1 %v15833_v0 }
 0x3d4   : > { %v5054_v15 = vpop.f32.mrf.mxu0  ;;  %v5233_v61 = vpop.f32.mrf.mxu1 }
 0x3d5   : > { %v5312_v13 = vmin.f32 %v5308_v12, %v5227_v26  ;;  %v5232_v49 = vadd.f32 %v5231_v48, %v5053_v34  ;;  %v5055_v63 = vadd.f32 %v5054_v15, %v13439_v7  ;;  %v16048_v48 = vld [vmem:[#allocation13_spill] sm:$0xff] }
 0x3d6   : > { %v5059_v45 = vpop.f32.mrf.mxu0  ;;  %6395 = vmatmul.mubr.f32.gmra.mxu0 %v16046_v11  ;;  %v5238_v40 = vpop.f32.mrf.mxu1  ;;  %6574 = vmatmul.mubr.f32.gmra.mxu1 %v16046_v11 }
 0x3d7   : > { %v5315_v43 = vmin.f32 %v5311_v1, %v5232_v49  ;;  %v5234_v19 = vadd.f32 %v5233_v61, %v5055_v63  ;;  %v5060_v51 = vadd.f32 %v5059_v45, %v13445_v16  ;;  %6400 = vmatprep.mubr.f32.mxu0 %v15833_v0  ;;  %6579 = vmatprep.mubr.f32.mxu1 %v15833_v0 }
 0x3d8   : > { %v5061_v17 = vpop.f32.mrf.mxu0  ;;  %v5240_v41 = vpop.f32.mrf.mxu1 }
 0x3d9   : > { %v5316_v31 = vmin.f32 %v5312_v13, %v5234_v19  ;;  %v5239_v47 = vadd.f32 %v5238_v40, %v5060_v51  ;;  %v5062_v7 = vadd.f32 %v5061_v17, %v13449_v23  ;;  %v16049_v51 = vld [vmem:[#allocation22_spill] sm:$0xff] }
 0x3da   : > { %v5066_v25 = vpop.f32.mrf.mxu0  ;;  %6402 = vmatmul.mubr.f32.gmra.mxu0 %v16047_v29  ;;  %v5245_v57 = vpop.f32.mrf.mxu1  ;;  %6581 = vmatmul.mubr.f32.gmra.mxu1 %v16047_v29 }
 0x3db   : > { %v5319_v12 = vmin.f32 %v5315_v43, %v5239_v47  ;;  %v5241_v52 = vadd.f32 %v5240_v41, %v5062_v7  ;;  %v5067_v16 = vadd.f32 %v5066_v25, %v13455_v50  ;;  %6407 = vmatprep.mubr.f32.mxu0 %v15833_v0  ;;  %6586 = vmatprep.mubr.f32.mxu1 %v15833_v0 }
 0x3dc   : > { %v5068_v30 = vpop.f32.mrf.mxu0  ;;  %v5247_v26 = vpop.f32.mrf.mxu1  ;;  %v4700_v47 = vadd.f32 %v13488_v53, %v13333_v59 }
 0x3dd   : > { %v5320_v3 = vmin.f32 %v5316_v31, %v5241_v52  ;;  %v5246_v1 = vadd.f32 %v5245_v57, %v5067_v16  ;;  %v5069_v23 = vadd.f32 %v5068_v30, %v13459_v58  ;;  %v4702_v52 = vadd.f32 %v13497_v46, %v13336_v21  ;;  %v16050_v16 = vld [vmem:[#allocation65_spill] sm:$0xff] }
 0x3de   : > { %v5073_v34 = vpop.f32.mrf.mxu0  ;;  %6409 = vmatmul.mubr.f32.gmra.mxu0 %v16048_v48  ;;  %v5252_v49 = vpop.f32.mrf.mxu1  ;;  %6588 = vmatmul.mubr.f32.gmra.mxu1 %v16048_v48  ;;  %v4910_v59 = vadd.f32 %v13493_v36, %v4700_v47  ;;  %v4708_v21 = vadd.f32 %v13502_v62, %v13341_v5 }
 0x3df   : > { %v5323_v15 = vmin.f32 %v5319_v12, %v5246_v1  ;;  %v5248_v13 = vadd.f32 %v5247_v26, %v5069_v23  ;;  %v5074_v50 = vadd.f32 %v5073_v34, %v13465_v33  ;;  %6414 = vmatprep.mubr.f32.mxu0 %v15833_v0  ;;  %6593 = vmatprep.mubr.f32.mxu1 %v15833_v0 }
 0x3e0   : > { %v5075_v63 = vpop.f32.mrf.mxu0  ;;  %v5254_v43 = vpop.f32.mrf.mxu1  ;;  %v4710_v34 = vadd.f32 %v13509_v9, %v13344_v54 }
 0x3e1   : > { %v5324_v61 = vmin.f32 %v5320_v3, %v5248_v13  ;;  %v5253_v45 = vadd.f32 %v5252_v49, %v5074_v50  ;;  %v5076_v58 = vadd.f32 %v5075_v63, %v13469_v10  ;;  %v16051_v13 = vld [vmem:[#allocation70_spill] sm:$0xff] }
 0x3e2   : > { %v5080_v19 = vpop.f32.mrf.mxu0  ;;  %6416 = vmatmul.mubr.f32.gmra.mxu0 %v16049_v51  ;;  %v5259_v31 = vpop.f32.mrf.mxu1  ;;  %6595 = vmatmul.mubr.f32.gmra.mxu1 %v16049_v51  ;;  %v4921_v9 = vadd.f32 %v13512_v28, %v4710_v34  ;;  %v16053_v28 = vld [vmem:[#allocation59_spill] sm:$0xff] }
 0x3e3   : > { %v5327_v40 = vmin.f32 %v5323_v15, %v5253_v45  ;;  %v5255_v17 = vadd.f32 %v5254_v43, %v5076_v58  ;;  %v5081_v33 = vadd.f32 %v5080_v19, %v13475_v8  ;;  %6421 = vmatprep.mubr.f32.mxu0 %v15833_v0  ;;  %6600 = vmatprep.mubr.f32.mxu1 %v15833_v0  ;;  %v16052_v58 = vld [vmem:[#allocation80_spill] sm:$0xff] }
 0x3e4   : > { %v5082_v7 = vpop.f32.mrf.mxu0  ;;  %v5261_v12 = vpop.f32.mrf.mxu1 }
 0x3e5   : > { %v5328_v10 = vmin.f32 %v5324_v61, %v5255_v17  ;;  %v5260_v41 = vadd.f32 %v5259_v31, %v5081_v33  ;;  %v5083_v25 = vadd.f32 %v5082_v7, %v13479_v39 }
 0x3e6   : > { %v5087_v8 = vpop.f32.mrf.mxu0  ;;  %6423 = vmatmul.mubr.f32.gmra.mxu0 %v16050_v16  ;;  %v5266_v1 = vpop.f32.mrf.mxu1  ;;  %6602 = vmatmul.mubr.f32.gmra.mxu1 %v16050_v16 }
 0x3e7   : > { %v5331_v57 = vmin.f32 %v5327_v40, %v5260_v41  ;;  %v5262_v30 = vadd.f32 %v5261_v12, %v5083_v25  ;;  %v5088_v3 = vadd.f32 %v5087_v8, %v13485_v20  ;;  %6428 = vmatprep.mubr.f32.mxu0 %v15833_v0  ;;  %6607 = vmatprep.mubr.f32.mxu1 %v15833_v0  ;;  %v16054_v12 = vld [vmem:[#allocation56_spill] sm:$0xff]  ;;  %v5347_v8 = vld [vmem:[#allocation2 + $0x18] sm:$0xff] }
 0x3e8   : > { %v5089_v53 = vpop.f32.mrf.mxu0  ;;  %v5268_v26 = vpop.f32.mrf.mxu1  ;;  %v4912_v20 = vadd.f32 %v13500_v32, %v4702_v52 }
 0x3e9   : > { %v5332_v39 = vmin.f32 %v5328_v10, %v5262_v30  ;;  %v5267_v46 = vadd.f32 %v5266_v1, %v5088_v3  ;;  %v5090_v23 = vadd.f32 %v5089_v53, %v13491_v2  ;;  %v4919_v2 = vadd.f32 %v13505_v37, %v4708_v21  ;;  %v16055_v53 = vld [vmem:[#allocation53_spill] sm:$0xff]  ;;  %v5348_v21 = vld [vmem:[#allocation2 + $0x8] sm:$0xff] }
 0x3ea   : > { %v5094_v15 = vpop.f32.mrf.mxu0  ;;  %6430 = vmatmul.mubr.f32.gmra.mxu0 %v16051_v13  ;;  %v5273_v63 = vpop.f32.mrf.mxu1  ;;  %6609 = vmatmul.mubr.f32.gmra.mxu1 %v16051_v13 }
 0x3eb   : > { %v5335_v36 = vmin.f32 %v5331_v57, %v5267_v46  ;;  %v5269_v50 = vadd.f32 %v5268_v26, %v5090_v23  ;;  %v5095_v49 = vadd.f32 %v5094_v15, %v4910_v59  ;;  %6435 = vmatprep.mubr.f32.mxu0 %v15833_v0  ;;  %6614 = vmatprep.mubr.f32.mxu1 %v15833_v0  ;;  %v16056_v23 = vld [vmem:[#allocation33_spill] sm:$0xff] }
 0x3ec   : > { %v5096_v5 = vpop.f32.mrf.mxu0  ;;  %v5275_v54 = vpop.f32.mrf.mxu1 }
 0x3ed   : > { %v5336_v32 = vmin.f32 %v5332_v39, %v5269_v50  ;;  %v5274_v62 = vadd.f32 %v5273_v63, %v5095_v49  ;;  %v5097_v61 = vadd.f32 %v5096_v5, %v4912_v20  ;;  %v16057_v63 = vld [vmem:[#allocation48_spill] sm:$0xff] }
 0x3ee   : > { %v5101_v45 = vpop.f32.mrf.mxu0  ;;  %6437 = vmatmul.mubr.f32.gmra.mxu0 %v16052_v58  ;;  %v5280_v17 = vpop.f32.mrf.mxu1  ;;  %6616 = vmatmul.mubr.f32.gmra.mxu1 %v16052_v58 }
 0x3ef   : > { %v5339_v43 = vmin.f32 %v5335_v36, %v5274_v62  ;;  %v5276_v19 = vadd.f32 %v5275_v54, %v5097_v61  ;;  %v5102_v40 = vadd.f32 %v5101_v45, %v4919_v2  ;;  %6688 = vmatprep.mubr.f32.mxu0 %v15833_v0  ;;  %6939 = vmatprep.mubr.f32.mxu1 %v15833_v0 }
 0x3f0   : > { %v5103_v33 = vpop.f32.mrf.mxu0  ;;  %v5282_v7 = vpop.f32.mrf.mxu1 }
 0x3f1   : > { %v5340_v37 = vmin.f32 %v5336_v32, %v5276_v19  ;;  %v5281_v31 = vadd.f32 %v5280_v17, %v5102_v40  ;;  %v5104_v47 = vadd.f32 %v5103_v33, %v4921_v9  ;;  %v16058_v9 = vld [vmem:[#allocation42_spill] sm:$0xff] }
 0x3f2   : > { %v5495_v10 = vpop.f32.mrf.mxu0  ;;  %6694 = vmatmul.mubr.f32.vlgmr.msra.gmra.mxu0 %v16053_v28  ;;  %v5742_v52 = vpop.f32.mrf.mxu1  ;;  %6941 = vmatmul.mubr.f32.vlgmr.msra.gmra.mxu1 %v16034_v35 }
 0x3f3   : > { %v5343_v41 = vmin.f32 %v5339_v43, %v5281_v31  ;;  %v5283_v25 = vadd.f32 %v5282_v7, %v5104_v47  ;;  %7087 = vmatpush1.msra.mxu0 %v16054_v12  ;;  %v13625_v57 = vadd.f32 %v5742_v52, %v5495_v10  ;;  %7282 = vmatpush1.msra.mxu1 %v16035_v22 }
 0x3f4   : > { %v5497_v30 = vpop.f32.mrf.mxu0  ;;  %6699 = vmatprep.mubr.f32.mxu0 %v15833_v0  ;;  %v5744_v59 = vpop.f32.mrf.mxu1  ;;  %6946 = vmatprep.mubr.f32.mxu1 %v15833_v0 }
 0x3f5   : > { %v5351_v3 = vmin.f32 %v5347_v8, %v5343_v41  ;;  %v5344_v1 = vmin.f32 %v5340_v37, %v5283_v25  ;;  %7493 = vmatprep.subr.mxu0 %v16055_v53  ;;  %v13631_v39 = vadd.f32 %v5744_v59, %v5497_v30  ;;  %7674 = vmatprep.subr.mxu1 %v16021_v38  ;;  %v16059_v37 = vld [vmem:[#allocation84_spill] sm:$0xff] }
 0x3f6   : > { %v5506_v46 = vpop.f32.mrf.mxu0  ;;  %6705 = vmatmul.mubr.f32.gmra.mxu0 %v16056_v23  ;;  %v5749_v20 = vpop.f32.mrf.mxu1  ;;  %6948 = vmatmul.mubr.f32.gmra.mxu1 %v16038_v56  ;;  %v16060_v25 = vld [vmem:[#allocation40_spill] sm:$0xff] }
 0x3f7   : > { %5355 = vst [vmem:[#allocation2 + $0x18] sm:$0xff] %v5351_v3  ;;  %v5352_v26 = vmin.f32 %v5348_v21, %v5344_v1  ;;  %6710 = vmatprep.mubr.f32.mxu0 %v15833_v0  ;;  %v13637_v34 = vadd.f32 %v5749_v20, %v5506_v46  ;;  %6953 = vmatprep.mubr.f32.mxu1 %v15833_v0  ;;  %v16061_v21 = vld [vmem:[#allocation49_spill] sm:$0xff]  ;;  %v16073_v53 = vld [vmem:[#allocation44_spill] sm:$0xff] }
 0x3f8   : > { %v5508_v15 = vpop.f32.mrf.mxu0  ;;  %v5751_v36 = vpop.f32.mrf.mxu1  ;;  %v16108_v38 = vld [vmem:[#allocation20_spill] sm:$0xff] }
 0x3f9   : > { %5356 = vst [vmem:[#allocation2 + $0x8] sm:$0xff] %v5352_v26  ;;  %v13640_v50 = vadd.f32 %v5751_v36, %v5508_v15 }
 0x3fa   : > { %v5517_v49 = vpop.f32.mrf.mxu0  ;;  %6716 = vmatmul.mubr.f32.gmra.mxu0 %v16057_v63  ;;  %v5756_v5 = vpop.f32.mrf.mxu1  ;;  %6955 = vmatmul.mubr.f32.gmra.mxu1 %v16039_v42 }
 0x3fb   : > { %6721 = vmatprep.mubr.f32.mxu0 %v15833_v0  ;;  %v13645_v2 = vadd.f32 %v5756_v5, %v5517_v49  ;;  %6960 = vmatprep.mubr.f32.mxu1 %v15833_v0  ;;  %v16062_v49 = vld [vmem:[#allocation47_spill] sm:$0xff] }
 0x3fc   : > { %v5519_v32 = vpop.f32.mrf.mxu0  ;;  %v5758_v62 = vpop.f32.mrf.mxu1 }
 0x3fd   : > { %v13648_v61 = vadd.f32 %v5758_v62, %v5519_v32 }
 0x3fe   : > { %v5528_v54 = vpop.f32.mrf.mxu0  ;;  %6727 = vmatmul.mubr.f32.gmra.mxu0 %v16058_v9  ;;  %v5763_v45 = vpop.f32.mrf.mxu1  ;;  %6962 = vmatmul.mubr.f32.gmra.mxu1 %v16040_v27 }
 0x3ff   : > { %6732 = vmatprep.mubr.f32.mxu0 %v15833_v0  ;;  %v13653_v43 = vadd.f32 %v5763_v45, %v5528_v54  ;;  %6967 = vmatprep.mubr.f32.mxu1 %v15833_v0  ;;  %v16063_v45 = vld [vmem:[#allocation23_spill] sm:$0xff] }
 0x400   : > { %v5530_v19 = vpop.f32.mrf.mxu0  ;;  %v5765_v40 = vpop.f32.mrf.mxu1 }
 0x401   : > { %v13656_v17 = vadd.f32 %v5765_v40, %v5530_v19 }
 0x402   : > { %v5539_v33 = vpop.f32.mrf.mxu0  ;;  %6738 = vmatmul.mubr.f32.gmra.mxu0 %v16059_v37  ;;  %v5770_v31 = vpop.f32.mrf.mxu1  ;;  %6969 = vmatmul.mubr.f32.gmra.mxu1 %v16041_v60 }
 0x403   : > { %6743 = vmatprep.mubr.f32.mxu0 %v15833_v0  ;;  %v13661_v47 = vadd.f32 %v5770_v31, %v5539_v33  ;;  %6974 = vmatprep.mubr.f32.mxu1 %v15833_v0 }
 0x404   : > { %v5541_v7 = vpop.f32.mrf.mxu0  ;;  %v5772_v10 = vpop.f32.mrf.mxu1 }
 0x405   : > { %v13664_v28 = vadd.f32 %v5772_v10, %v5541_v7  ;;  %v16064_v10 = vld [vmem:[#allocation61_spill] sm:$0xff] }
 0x406   : > { %v5550_v41 = vpop.f32.mrf.mxu0  ;;  %6749 = vmatmul.mubr.f32.gmra.mxu0 %v16060_v25  ;;  %v5777_v52 = vpop.f32.mrf.mxu1  ;;  %6976 = vmatmul.mubr.f32.gmra.mxu1 %v16042_v55 }
 0x407   : > { %6754 = vmatprep.mubr.f32.mxu0 %v15833_v0  ;;  %v13669_v8 = vadd.f32 %v5777_v52, %v5550_v41  ;;  %6981 = vmatprep.mubr.f32.mxu1 %v15833_v0 }
 0x408   : > { %v5552_v30 = vpop.f32.mrf.mxu0  ;;  %v5779_v3 = vpop.f32.mrf.mxu1 }
 0x409   : > { %v13672_v1 = vadd.f32 %v5779_v3, %v5552_v30 }
 0x40a   : > { %v5561_v59 = vpop.f32.mrf.mxu0  ;;  %6760 = vmatmul.mubr.f32.gmra.mxu0 %v16061_v21  ;;  %v5784_v46 = vpop.f32.mrf.mxu1  ;;  %6983 = vmatmul.mubr.f32.gmra.mxu1 %v16043_v24  ;;  %v16065_v21 = vld [vmem:[#allocation66_spill] sm:$0xff] }
 0x40b   : > { %6765 = vmatprep.mubr.f32.mxu0 %v15833_v0  ;;  %v13677_v23 = vadd.f32 %v5784_v46, %v5561_v59  ;;  %6988 = vmatprep.mubr.f32.mxu1 %v15833_v0 }
 0x40c   : > { %v5563_v26 = vpop.f32.mrf.mxu0  ;;  %v5786_v20 = vpop.f32.mrf.mxu1 }
 0x40d   : > { %v13680_v15 = vadd.f32 %v5786_v20, %v5563_v26 }
 0x40e   : > { %v5572_v36 = vpop.f32.mrf.mxu0  ;;  %6771 = vmatmul.mubr.f32.gmra.mxu0 %v16062_v49  ;;  %v5791_v63 = vpop.f32.mrf.mxu1  ;;  %6990 = vmatmul.mubr.f32.gmra.mxu1 %v16044_v4 }
 0x40f   : > { %6776 = vmatprep.mubr.f32.mxu0 %v15833_v0  ;;  %v13685_v5 = vadd.f32 %v5791_v63, %v5572_v36  ;;  %6995 = vmatprep.mubr.f32.mxu1 %v15833_v0 }
 0x410   : > { %v5574_v32 = vpop.f32.mrf.mxu0  ;;  %v5793_v62 = vpop.f32.mrf.mxu1 }
 0x411   : > { %v13688_v54 = vadd.f32 %v5793_v62, %v5574_v32  ;;  %v16066_v32 = vld [vmem:[#allocation72_spill] sm:$0xff] }
 0x412   : > { %v5583_v9 = vpop.f32.mrf.mxu0  ;;  %6782 = vmatmul.mubr.f32.gmra.mxu0 %v16063_v45  ;;  %v5798_v19 = vpop.f32.mrf.mxu1  ;;  %6997 = vmatmul.mubr.f32.gmra.mxu1 %v16045_v18 }
 0x413   : > { %6787 = vmatprep.mubr.f32.mxu0 %v15833_v0  ;;  %v13693_v40 = vadd.f32 %v5798_v19, %v5583_v9  ;;  %7002 = vmatprep.mubr.f32.mxu1 %v15833_v0 }
 0x414   : > { %v5585_v33 = vpop.f32.mrf.mxu0  ;;  %v5800_v37 = vpop.f32.mrf.mxu1 }
 0x415   : > { %v13696_v31 = vadd.f32 %v5800_v37, %v5585_v33 }
 0x416   : > { %v5594_v7 = vpop.f32.mrf.mxu0  ;;  %6793 = vmatmul.mubr.f32.gmra.mxu0 %v16064_v10  ;;  %v5805_v41 = vpop.f32.mrf.mxu1  ;;  %7004 = vmatmul.mubr.f32.gmra.mxu1 %v16046_v11 }
 0x417   : > { %6798 = vmatprep.mubr.f32.mxu0 %v15833_v0  ;;  %v13701_v25 = vadd.f32 %v5805_v41, %v5594_v7  ;;  %7009 = vmatprep.mubr.f32.mxu1 %v15833_v0  ;;  %v16067_v7 = vld [vmem:[#allocation81_spill] sm:$0xff] }
 0x418   : > { %v5596_v52 = vpop.f32.mrf.mxu0  ;;  %v5807_v30 = vpop.f32.mrf.mxu1 }
 0x419   : > { %v13704_v3 = vadd.f32 %v5807_v30, %v5596_v52 }
 0x41a   : > { %v5605_v59 = vpop.f32.mrf.mxu0  ;;  %6804 = vmatmul.mubr.f32.gmra.mxu0 %v16065_v21  ;;  %v5812_v46 = vpop.f32.mrf.mxu1  ;;  %7011 = vmatmul.mubr.f32.gmra.mxu1 %v16047_v29 }
 0x41b   : > { %6809 = vmatprep.mubr.f32.mxu0 %v15833_v0  ;;  %v13709_v26 = vadd.f32 %v5812_v46, %v5605_v59  ;;  %7016 = vmatprep.mubr.f32.mxu1 %v15833_v0  ;;  %v16068_v46 = vld [vmem:[#allocation73_spill] sm:$0xff] }
 0x41c   : > { %v5607_v20 = vpop.f32.mrf.mxu0  ;;  %v5814_v36 = vpop.f32.mrf.mxu1 }
 0x41d   : > { %v13712_v49 = vadd.f32 %v5814_v36, %v5607_v20 }
 0x41e   : > { %v5616_v63 = vpop.f32.mrf.mxu0  ;;  %6815 = vmatmul.mubr.f32.gmra.mxu0 %v16066_v32  ;;  %v5819_v62 = vpop.f32.mrf.mxu1  ;;  %7018 = vmatmul.mubr.f32.gmra.mxu1 %v16048_v48 }
 0x41f   : > { %6820 = vmatprep.mubr.f32.mxu0 %v15833_v0  ;;  %v13717_v9 = vadd.f32 %v5819_v62, %v5616_v63  ;;  %7023 = vmatprep.mubr.f32.mxu1 %v15833_v0 }
 0x420   : > { %v5618_v45 = vpop.f32.mrf.mxu0  ;;  %v5821_v19 = vpop.f32.mrf.mxu1 }
 0x421   : > { %v13720_v33 = vadd.f32 %v5821_v19, %v5618_v45  ;;  %v16069_v19 = vld [vmem:[#allocation32_spill] sm:$0xff] }
 0x422   : > { %v5627_v37 = vpop.f32.mrf.mxu0  ;;  %6826 = vmatmul.mubr.f32.gmra.mxu0 %v16067_v7  ;;  %v5826_v10 = vpop.f32.mrf.mxu1  ;;  %7025 = vmatmul.mubr.f32.gmra.mxu1 %v16049_v51 }
 0x423   : > { %6831 = vmatprep.mubr.f32.mxu0 %v15833_v0  ;;  %v13725_v41 = vadd.f32 %v5826_v10, %v5627_v37  ;;  %7030 = vmatprep.mubr.f32.mxu1 %v15833_v0 }
 0x424   : > { %v5629_v52 = vpop.f32.mrf.mxu0  ;;  %v5828_v30 = vpop.f32.mrf.mxu1 }
 0x425   : > { %v13728_v59 = vadd.f32 %v5828_v30, %v5629_v52 }
 0x426   : > { %v5638_v21 = vpop.f32.mrf.mxu0  ;;  %6837 = vmatmul.mubr.f32.gmra.mxu0 %v16068_v46  ;;  %v5833_v20 = vpop.f32.mrf.mxu1  ;;  %7032 = vmatmul.mubr.f32.gmra.mxu1 %v16050_v16  ;;  %v16070_v46 = vld [vmem:[#allocation77_spill] sm:$0xff] }
 0x427   : > { %6842 = vmatprep.mubr.f32.mxu0 %v15833_v0  ;;  %v13733_v36 = vadd.f32 %v5833_v20, %v5638_v21  ;;  %7037 = vmatprep.mubr.f32.mxu1 %v15833_v0 }
 0x428   : > { %v5640_v63 = vpop.f32.mrf.mxu0  ;;  %v5835_v32 = vpop.f32.mrf.mxu1 }
 0x429   : > { %v13736_v62 = vadd.f32 %v5835_v32, %v5640_v63 }
 0x42a   : > { %v5649_v45 = vpop.f32.mrf.mxu0  ;;  %6848 = vmatmul.mubr.f32.gmra.mxu0 %v16069_v19  ;;  %v5840_v37 = vpop.f32.mrf.mxu1  ;;  %7039 = vmatmul.mubr.f32.gmra.mxu1 %v16051_v13 }
 0x42b   : > { %6853 = vmatprep.mubr.f32.mxu0 %v15833_v0  ;;  %v13741_v7 = vadd.f32 %v5840_v37, %v5649_v45  ;;  %7044 = vmatprep.mubr.f32.mxu1 %v15833_v0 }
 0x42c   : > { %v5651_v10 = vpop.f32.mrf.mxu0  ;;  %v5842_v52 = vpop.f32.mrf.mxu1 }
 0x42d   : > { %v13744_v30 = vadd.f32 %v5842_v52, %v5651_v10  ;;  %v16072_v52 = vld [vmem:[#allocation57_spill] sm:$0xff] }
 0x42e   : > { %v5660_v21 = vpop.f32.mrf.mxu0  ;;  %6859 = vmatmul.mubr.f32.gmra.mxu0 %v16070_v46  ;;  %v5847_v20 = vpop.f32.mrf.mxu1  ;;  %7046 = vmatmul.mubr.f32.gmra.mxu1 %v16052_v58 }
 0x42f   : > { %7120 = vmatprep.mubr.f32.mxu0 %v15833_v0  ;;  %v13749_v63 = vadd.f32 %v5847_v20, %v5660_v21  ;;  %7315 = vmatprep.mubr.f32.mxu1 %v15833_v0 }
 0x430   : > { %v5662_v32 = vpop.f32.mrf.mxu0  ;;  %v5849_v45 = vpop.f32.mrf.mxu1 }
 0x431   : > { %v13752_v19 = vadd.f32 %v5849_v45, %v5662_v32  ;;  %v16075_v45 = vld [vmem:[#allocation10_spill] sm:$0xff] }
 0x432   : > { %v5924_v37 = vpop.f32.mrf.mxu0  ;;  %7123 = vmatmul.mubr.f32.vlgmr.msra.gmra.mxu0 %v12968_v44  ;;  %v6120_v46 = vpop.f32.mrf.mxu1  ;;  %7319 = vmatmul.mubr.f32.vlgmr.msra.gmra.mxu1 %v16073_v53  ;;  %v16074_v44 = vld [vmem:[#allocation8_spill] sm:$0xff] }
 0x433   : > { %16071 = vst [vmem:[#allocation83_spill] sm:$0xff] %v13752_v19  ;;  %v5925_v10 = vadd.f32 %v5924_v37, %v13625_v57  ;;  %7497 = vmatpush1.msra.mxu0 %v16072_v52  ;;  %7676 = vmatpush1.msra.mxu1 %v16035_v22  ;;  %v16076_v37 = vld [vmem:[#allocation19_spill] sm:$0xff] }
 0x434   : > { %v5926_v12 = vpop.f32.mrf.mxu0  ;;  %7128 = vmatprep.mubr.f32.mxu0 %v15833_v0  ;;  %v6122_v32 = vpop.f32.mrf.mxu1  ;;  %7324 = vmatprep.mubr.f32.mxu1 %v15833_v0 }
 0x435   : > { %v13760_v21 = vadd.f32 %v6120_v46, %v5925_v10  ;;  %v5927_v20 = vadd.f32 %v5926_v12, %v13631_v39  ;;  %7990 = vmatprep.subr.mxu0 %v16074_v44  ;;  %8237 = vmatprep.subr.mxu1 %v16076_v37 }
 0x436   : > { %v5932_v57 = vpop.f32.mrf.mxu0  ;;  %7131 = vmatmul.mubr.f32.gmra.mxu0 %v16075_v45  ;;  %v6129_v22 = vpop.f32.mrf.mxu1  ;;  %7328 = vmatmul.mubr.f32.gmra.mxu1 %v13013_v14 }
 0x437   : > { %v13767_v53 = vadd.f32 %v6122_v32, %v5927_v20  ;;  %v5933_v52 = vadd.f32 %v5932_v57, %v13637_v34  ;;  %7136 = vmatprep.mubr.f32.mxu0 %v15833_v0  ;;  %7333 = vmatprep.mubr.f32.mxu1 %v15833_v0  ;;  %v16077_v57 = vld [vmem:[#allocation26_spill] sm:$0xff] }
 0x438   : > { %v5934_v12 = vpop.f32.mrf.mxu0  ;;  %v6131_v46 = vpop.f32.mrf.mxu1 }
 0x439   : > { %v13773_v39 = vadd.f32 %v6129_v22, %v5933_v52  ;;  %v5935_v10 = vadd.f32 %v5934_v12, %v13640_v50  ;;  %v16078_v12 = vld [vmem:[#allocation38_spill] sm:$0xff] }
 0x43a   : > { %v5940_v45 = vpop.f32.mrf.mxu0  ;;  %7139 = vmatmul.mubr.f32.gmra.mxu0 %v12998_v6  ;;  %v6138_v32 = vpop.f32.mrf.mxu1  ;;  %7337 = vmatmul.mubr.f32.gmra.mxu1 %v16077_v57 }
 0x43b   : > { %v13777_v20 = vadd.f32 %v6131_v46, %v5935_v10  ;;  %v5941_v34 = vadd.f32 %v5940_v45, %v13645_v2  ;;  %7144 = vmatprep.mubr.f32.mxu0 %v15833_v0  ;;  %7342 = vmatprep.mubr.f32.mxu1 %v15833_v0  ;;  %v16079_v46 = vld [vmem:[#allocation69_spill] sm:$0xff] }
 0x43c   : > { %v5942_v14 = vpop.f32.mrf.mxu0  ;;  %v6140_v52 = vpop.f32.mrf.mxu1 }
 0x43d   : > { %v13783_v22 = vadd.f32 %v6138_v32, %v5941_v34  ;;  %v5943_v50 = vadd.f32 %v5942_v14, %v13648_v61  ;;  %v16080_v14 = vld [vmem:[#allocation37_spill] sm:$0xff] }
 0x43e   : > { %v5948_v37 = vpop.f32.mrf.mxu0  ;;  %7147 = vmatmul.mubr.f32.gmra.mxu0 %v16078_v12  ;;  %v6147_v10 = vpop.f32.mrf.mxu1  ;;  %7346 = vmatmul.mubr.f32.gmra.mxu1 %v16079_v46 }
 0x43f   : > { %v13787_v6 = vadd.f32 %v6140_v52, %v5943_v50  ;;  %v5949_v2 = vadd.f32 %v5948_v37, %v13653_v43  ;;  %7152 = vmatprep.mubr.f32.mxu0 %v15833_v0  ;;  %7351 = vmatprep.mubr.f32.mxu1 %v15833_v0  ;;  %v16081_v37 = vld [vmem:[#allocation24_spill] sm:$0xff] }
 0x440   : > { %v5950_v45 = vpop.f32.mrf.mxu0  ;;  %v6149_v32 = vpop.f32.mrf.mxu1 }
 0x441   : > { %v13793_v34 = vadd.f32 %v6147_v10, %v5949_v2  ;;  %v5951_v61 = vadd.f32 %v5950_v45, %v13656_v17  ;;  %v16082_v45 = vld [vmem:[#allocation27_spill] sm:$0xff] }
 0x442   : > { %v5956_v57 = vpop.f32.mrf.mxu0  ;;  %7155 = vmatmul.mubr.f32.gmra.mxu0 %v16080_v14  ;;  %v6156_v52 = vpop.f32.mrf.mxu1  ;;  %7355 = vmatmul.mubr.f32.gmra.mxu1 %v16081_v37 }
 0x443   : > { %v13797_v50 = vadd.f32 %v6149_v32, %v5951_v61  ;;  %v5957_v43 = vadd.f32 %v5956_v57, %v13661_v47  ;;  %7160 = vmatprep.mubr.f32.mxu0 %v15833_v0  ;;  %7360 = vmatprep.mubr.f32.mxu1 %v15833_v0  ;;  %v16083_v57 = vld [vmem:[#allocation71_spill] sm:$0xff] }
 0x444   : > { %v5958_v12 = vpop.f32.mrf.mxu0  ;;  %v6158_v10 = vpop.f32.mrf.mxu1 }
 0x445   : > { %v13803_v2 = vadd.f32 %v6156_v52, %v5957_v43  ;;  %v5959_v17 = vadd.f32 %v5958_v12, %v13664_v28  ;;  %v16084_v12 = vld [vmem:[#allocation64_spill] sm:$0xff] }
 0x446   : > { %v5964_v46 = vpop.f32.mrf.mxu0  ;;  %7163 = vmatmul.mubr.f32.gmra.mxu0 %v16082_v45  ;;  %v6165_v32 = vpop.f32.mrf.mxu1  ;;  %7364 = vmatmul.mubr.f32.gmra.mxu1 %v16083_v57 }
 0x447   : > { %v13807_v61 = vadd.f32 %v6158_v10, %v5959_v17  ;;  %v5965_v47 = vadd.f32 %v5964_v46, %v13669_v8  ;;  %7168 = vmatprep.mubr.f32.mxu0 %v15833_v0  ;;  %7369 = vmatprep.mubr.f32.mxu1 %v15833_v0  ;;  %v16085_v46 = vld [vmem:[#allocation74_spill] sm:$0xff] }
 0x448   : > { %v5966_v14 = vpop.f32.mrf.mxu0  ;;  %v6167_v52 = vpop.f32.mrf.mxu1 }
 0x449   : > { %v13813_v43 = vadd.f32 %v6165_v32, %v5965_v47  ;;  %v5967_v28 = vadd.f32 %v5966_v14, %v13672_v1  ;;  %v16086_v14 = vld [vmem:[#allocation78_spill] sm:$0xff] }
 0x44a   : > { %v5972_v37 = vpop.f32.mrf.mxu0  ;;  %7171 = vmatmul.mubr.f32.gmra.mxu0 %v16084_v12  ;;  %v6174_v10 = vpop.f32.mrf.mxu1  ;;  %7373 = vmatmul.mubr.f32.gmra.mxu1 %v16085_v46 }
 0x44b   : > { %v13817_v17 = vadd.f32 %v6167_v52, %v5967_v28  ;;  %v5973_v8 = vadd.f32 %v5972_v37, %v13677_v23  ;;  %7176 = vmatprep.mubr.f32.mxu0 %v15833_v0  ;;  %7378 = vmatprep.mubr.f32.mxu1 %v15833_v0  ;;  %v16087_v37 = vld [vmem:[#allocation85_spill] sm:$0xff] }
 0x44c   : > { %v5974_v45 = vpop.f32.mrf.mxu0  ;;  %v6176_v32 = vpop.f32.mrf.mxu1 }
 0x44d   : > { %v13823_v47 = vadd.f32 %v6174_v10, %v5973_v8  ;;  %v5975_v1 = vadd.f32 %v5974_v45, %v13680_v15  ;;  %v16088_v45 = vld [vmem:[#allocation36_spill] sm:$0xff] }
 0x44e   : > { %v5980_v57 = vpop.f32.mrf.mxu0  ;;  %7179 = vmatmul.mubr.f32.gmra.mxu0 %v16086_v14  ;;  %v6183_v52 = vpop.f32.mrf.mxu1  ;;  %7382 = vmatmul.mubr.f32.gmra.mxu1 %v16087_v37 }
 0x44f   : > { %v13827_v28 = vadd.f32 %v6176_v32, %v5975_v1  ;;  %v5981_v23 = vadd.f32 %v5980_v57, %v13685_v5  ;;  %7184 = vmatprep.mubr.f32.mxu0 %v15833_v0  ;;  %7387 = vmatprep.mubr.f32.mxu1 %v15833_v0  ;;  %v16089_v57 = vld [vmem:[#allocation25_spill] sm:$0xff] }
 0x450   : > { %v5982_v12 = vpop.f32.mrf.mxu0  ;;  %v6185_v10 = vpop.f32.mrf.mxu1 }
 0x451   : > { %v13833_v8 = vadd.f32 %v6183_v52, %v5981_v23  ;;  %v5983_v15 = vadd.f32 %v5982_v12, %v13688_v54  ;;  %v16090_v12 = vld [vmem:[#allocation35_spill] sm:$0xff] }
 0x452   : > { %v5988_v46 = vpop.f32.mrf.mxu0  ;;  %7187 = vmatmul.mubr.f32.gmra.mxu0 %v16088_v45  ;;  %v6192_v32 = vpop.f32.mrf.mxu1  ;;  %7391 = vmatmul.mubr.f32.gmra.mxu1 %v16089_v57 }
 0x453   : > { %v13837_v1 = vadd.f32 %v6185_v10, %v5983_v15  ;;  %v5989_v5 = vadd.f32 %v5988_v46, %v13693_v40  ;;  %7192 = vmatprep.mubr.f32.mxu0 %v15833_v0  ;;  %7396 = vmatprep.mubr.f32.mxu1 %v15833_v0  ;;  %v16091_v46 = vld [vmem:[#allocation50_spill] sm:$0xff] }
 0x454   : > { %v5990_v14 = vpop.f32.mrf.mxu0  ;;  %v6194_v52 = vpop.f32.mrf.mxu1 }
 0x455   : > { %v13843_v23 = vadd.f32 %v6192_v32, %v5989_v5  ;;  %v5991_v54 = vadd.f32 %v5990_v14, %v13696_v31  ;;  %v16092_v14 = vld [vmem:[#allocation14_spill] sm:$0xff] }
 0x456   : > { %v5996_v37 = vpop.f32.mrf.mxu0  ;;  %7195 = vmatmul.mubr.f32.gmra.mxu0 %v16090_v12  ;;  %v6201_v10 = vpop.f32.mrf.mxu1  ;;  %7400 = vmatmul.mubr.f32.gmra.mxu1 %v16091_v46 }
 0x457   : > { %v13847_v15 = vadd.f32 %v6194_v52, %v5991_v54  ;;  %v5997_v40 = vadd.f32 %v5996_v37, %v13701_v25  ;;  %7200 = vmatprep.mubr.f32.mxu0 %v15833_v0  ;;  %7405 = vmatprep.mubr.f32.mxu1 %v15833_v0  ;;  %v16093_v37 = vld [vmem:[#allocation29_spill] sm:$0xff] }
 0x458   : > { %v5998_v45 = vpop.f32.mrf.mxu0  ;;  %v6203_v32 = vpop.f32.mrf.mxu1 }
 0x459   : > { %v13853_v5 = vadd.f32 %v6201_v10, %v5997_v40  ;;  %v5999_v31 = vadd.f32 %v5998_v45, %v13704_v3  ;;  %v16094_v45 = vld [vmem:[#allocation15_spill] sm:$0xff] }
 0x45a   : > { %v6004_v57 = vpop.f32.mrf.mxu0  ;;  %7203 = vmatmul.mubr.f32.gmra.mxu0 %v16092_v14  ;;  %v6210_v52 = vpop.f32.mrf.mxu1  ;;  %7409 = vmatmul.mubr.f32.gmra.mxu1 %v16093_v37 }
 0x45b   : > { %v13857_v54 = vadd.f32 %v6203_v32, %v5999_v31  ;;  %v6005_v25 = vadd.f32 %v6004_v57, %v13709_v26  ;;  %7208 = vmatprep.mubr.f32.mxu0 %v15833_v0  ;;  %7414 = vmatprep.mubr.f32.mxu1 %v15833_v0  ;;  %v16095_v57 = vld [vmem:[#allocation31_spill] sm:$0xff] }
 0x45c   : > { %v6006_v12 = vpop.f32.mrf.mxu0  ;;  %v6212_v10 = vpop.f32.mrf.mxu1 }
 0x45d   : > { %v13863_v40 = vadd.f32 %v6210_v52, %v6005_v25  ;;  %v6007_v3 = vadd.f32 %v6006_v12, %v13712_v49  ;;  %v16096_v12 = vld [vmem:[#allocation60_spill] sm:$0xff] }
 0x45e   : > { %v6012_v46 = vpop.f32.mrf.mxu0  ;;  %7211 = vmatmul.mubr.f32.gmra.mxu0 %v16094_v45  ;;  %v6219_v32 = vpop.f32.mrf.mxu1  ;;  %7418 = vmatmul.mubr.f32.gmra.mxu1 %v16095_v57 }
 0x45f   : > { %v13867_v31 = vadd.f32 %v6212_v10, %v6007_v3  ;;  %v6013_v26 = vadd.f32 %v6012_v46, %v13717_v9  ;;  %7216 = vmatprep.mubr.f32.mxu0 %v15833_v0  ;;  %7423 = vmatprep.mubr.f32.mxu1 %v15833_v0  ;;  %v16097_v46 = vld [vmem:[#allocation62_spill] sm:$0xff] }
 0x460   : > { %v6014_v14 = vpop.f32.mrf.mxu0  ;;  %v6221_v52 = vpop.f32.mrf.mxu1 }
 0x461   : > { %v13873_v25 = vadd.f32 %v6219_v32, %v6013_v26  ;;  %v6015_v49 = vadd.f32 %v6014_v14, %v13720_v33  ;;  %v16098_v14 = vld [vmem:[#allocation67_spill] sm:$0xff] }
 0x462   : > { %v6020_v37 = vpop.f32.mrf.mxu0  ;;  %7219 = vmatmul.mubr.f32.gmra.mxu0 %v16096_v12  ;;  %v6228_v10 = vpop.f32.mrf.mxu1  ;;  %7427 = vmatmul.mubr.f32.gmra.mxu1 %v16097_v46 }
 0x463   : > { %v13877_v3 = vadd.f32 %v6221_v52, %v6015_v49  ;;  %v6021_v9 = vadd.f32 %v6020_v37, %v13725_v41  ;;  %7224 = vmatprep.mubr.f32.mxu0 %v15833_v0  ;;  %7432 = vmatprep.mubr.f32.mxu1 %v15833_v0  ;;  %v16099_v37 = vld [vmem:[#allocation75_spill] sm:$0xff] }
 0x464   : > { %v6022_v45 = vpop.f32.mrf.mxu0  ;;  %v6230_v32 = vpop.f32.mrf.mxu1 }
 0x465   : > { %v13883_v26 = vadd.f32 %v6228_v10, %v6021_v9  ;;  %v6023_v33 = vadd.f32 %v6022_v45, %v13728_v59  ;;  %v16100_v45 = vld [vmem:[#allocation76_spill] sm:$0xff] }
 0x466   : > { %v6028_v57 = vpop.f32.mrf.mxu0  ;;  %7227 = vmatmul.mubr.f32.gmra.mxu0 %v16098_v14  ;;  %v6237_v52 = vpop.f32.mrf.mxu1  ;;  %7436 = vmatmul.mubr.f32.gmra.mxu1 %v16099_v37  ;;  %v16104_v37 = vld [vmem:[#allocation28_spill] sm:$0xff] }
 0x467   : > { %v13887_v49 = vadd.f32 %v6230_v32, %v6023_v33  ;;  %v6029_v41 = vadd.f32 %v6028_v57, %v13733_v36  ;;  %7232 = vmatprep.mubr.f32.mxu0 %v15833_v0  ;;  %7441 = vmatprep.mubr.f32.mxu1 %v15833_v0  ;;  %v16101_v32 = vld [vmem:[#allocation79_spill] sm:$0xff] }
 0x468   : > { %v6030_v12 = vpop.f32.mrf.mxu0  ;;  %v6239_v10 = vpop.f32.mrf.mxu1 }
 0x469   : > { %v13893_v9 = vadd.f32 %v6237_v52, %v6029_v41  ;;  %v6031_v59 = vadd.f32 %v6030_v12, %v13736_v62  ;;  %v16102_v41 = vld [vmem:[#allocation30_spill] sm:$0xff] }
 0x46a   : > { %v13896_v46 = vpop.f32.mrf.mxu0  ;;  %7235 = vmatmul.mubr.f32.gmra.mxu0 %v16100_v45  ;;  %v13901_v36 = vpop.f32.mrf.mxu1  ;;  %7445 = vmatmul.mubr.f32.gmra.mxu1 %v16101_v32  ;;  %v16107_v45 = vld [vmem:[#allocation9_spill] sm:$0xff] }
 0x46b   : > { %v13899_v33 = vadd.f32 %v6239_v10, %v6031_v59  ;;  %7240 = vmatprep.mubr.f32.mxu0 %v15833_v0  ;;  %7450 = vmatprep.mubr.f32.mxu1 %v15833_v0 }
 0x46c   : > { %v13905_v57 = vpop.f32.mrf.mxu0  ;;  %v13908_v14 = vpop.f32.mrf.mxu1 }
 0x46e   : > { %v13910_v62 = vpop.f32.mrf.mxu0  ;;  %7243 = vmatmul.mubr.f32.gmra.mxu0 %v16102_v41  ;;  %v13913_v52 = vpop.f32.mrf.mxu1  ;;  %7454 = vmatmul.mubr.f32.gmra.mxu1 %v16104_v37 }
 0x46f   : > { %16103 = vst [vmem:[#allocation43_spill] sm:$0xff] %v13913_v52  ;;  %7530 = vmatprep.mubr.f32.mxu0 %v15833_v0  ;;  %7709 = vmatprep.mubr.f32.mxu1 %v15833_v0  ;;  %v16109_v52 = vld [vmem:[#allocation11_spill] sm:$0xff] }
 0x470   : > { %v13917_v12 = vpop.f32.mrf.mxu0  ;;  %v13920_v59 = vpop.f32.mrf.mxu1 }
 0x471   : > { %16105 = vst [vmem:[#allocation34_spill] sm:$0xff] %v13917_v12  ;;  %16106 = vst [vmem:[#allocation39_spill] sm:$0xff] %v13920_v59 }
 0x472   : > { %v6333_v10 = vpop.f32.mrf.mxu0  ;;  %7532 = vmatmul.mubr.f32.vlgmr.msra.gmra.mxu0 %v16034_v35  ;;  %v6512_v32 = vpop.f32.mrf.mxu1  ;;  %7711 = vmatmul.mubr.f32.vlgmr.msra.gmra.mxu1 %v16034_v35 }
 0x473   : > { %7992 = vmatpush1.msra.mxu0 %v16107_v45  ;;  %8243 = vmatpush1.msra.mxu1 %v16108_v38  ;;  %v6334_v37 = vadd.f32 %v6333_v10, %v13760_v21 }
 0x474   : > { %v6335_v41 = vpop.f32.mrf.mxu0  ;;  %7537 = vmatprep.mubr.f32.mxu0 %v15833_v0  ;;  %v6514_v58 = vpop.f32.mrf.mxu1  ;;  %7716 = vmatprep.mubr.f32.mxu1 %v15833_v0 }
 0x475   : > { %8421 = vmatprep.subr.mxu0 %v16109_v52  ;;  %v6336_v59 = vadd.f32 %v6335_v41, %v13767_v53  ;;  %8617 = vmatprep.subr.mxu1 %v16074_v44  ;;  %v6513_v21 = vadd.f32 %v6512_v32, %v6334_v37 }
 0x476   : > { %v6340_v13 = vpop.f32.mrf.mxu0  ;;  %7539 = vmatmul.mubr.f32.gmra.mxu0 %v16038_v56  ;;  %v6519_v45 = vpop.f32.mrf.mxu1  ;;  %7718 = vmatmul.mubr.f32.gmra.mxu1 %v16038_v56 }
 0x477   : > { %v6341_v35 = vadd.f32 %v6340_v13, %v13773_v39  ;;  %7544 = vmatprep.mubr.f32.mxu0 %v15833_v0  ;;  %7723 = vmatprep.mubr.f32.mxu1 %v15833_v0  ;;  %v6515_v41 = vadd.f32 %v6514_v58, %v6336_v59 }
 0x478   : > { %v6342_v38 = vpop.f32.mrf.mxu0  ;;  %v6521_v53 = vpop.f32.mrf.mxu1 }
 0x479   : > { %v6520_v10 = vadd.f32 %v6519_v45, %v6341_v35  ;;  %v6343_v52 = vadd.f32 %v6342_v38, %v13777_v20 }
 0x47a   : > { %v6347_v12 = vpop.f32.mrf.mxu0  ;;  %7546 = vmatmul.mubr.f32.gmra.mxu0 %v16039_v42  ;;  %v6526_v39 = vpop.f32.mrf.mxu1  ;;  %7725 = vmatmul.mubr.f32.gmra.mxu1 %v16039_v42 }
 0x47b   : > { %v7822_v44 = vmin.f32 %v6513_v21, %v6520_v10  ;;  %v6522_v19 = vadd.f32 %v6521_v53, %v6343_v52  ;;  %v6348_v13 = vadd.f32 %v6347_v12, %v13783_v22  ;;  %7551 = vmatprep.mubr.f32.mxu0 %v15833_v0  ;;  %7730 = vmatprep.mubr.f32.mxu1 %v15833_v0 }
 0x47c   : > { %v6349_v56 = vpop.f32.mrf.mxu0  ;;  %v6528_v58 = vpop.f32.mrf.mxu1 }
 0x47d   : > { %v7823_v45 = vmin.f32 %v6515_v41, %v6522_v19  ;;  %v6527_v32 = vadd.f32 %v6526_v39, %v6348_v13  ;;  %v6350_v20 = vadd.f32 %v6349_v56, %v13787_v6 }
 0x47e   : > { %v6354_v59 = vpop.f32.mrf.mxu0  ;;  %7553 = vmatmul.mubr.f32.gmra.mxu0 %v16040_v27  ;;  %v6533_v12 = vpop.f32.mrf.mxu1  ;;  %7732 = vmatmul.mubr.f32.gmra.mxu1 %v16040_v27 }
 0x47f   : > { %v7826_v37 = vmin.f32 %v7822_v44, %v6527_v32  ;;  %v6529_v35 = vadd.f32 %v6528_v58, %v6350_v20  ;;  %v6355_v22 = vadd.f32 %v6354_v59, %v13793_v34  ;;  %7558 = vmatprep.mubr.f32.mxu0 %v15833_v0  ;;  %7737 = vmatprep.mubr.f32.mxu1 %v15833_v0 }
 0x480   : > { %v6356_v42 = vpop.f32.mrf.mxu0  ;;  %v6535_v21 = vpop.f32.mrf.mxu1 }
 0x481   : > { %v7827_v19 = vmin.f32 %v7823_v45, %v6529_v35  ;;  %v6534_v38 = vadd.f32 %v6533_v12, %v6355_v22  ;;  %v6357_v6 = vadd.f32 %v6356_v42, %v13797_v50 }
 0x482   : > { %v6361_v10 = vpop.f32.mrf.mxu0  ;;  %7560 = vmatmul.mubr.f32.gmra.mxu0 %v16041_v60  ;;  %v6540_v53 = vpop.f32.mrf.mxu1  ;;  %7739 = vmatmul.mubr.f32.gmra.mxu1 %v16041_v60 }
 0x483   : > { %v7830_v44 = vmin.f32 %v7826_v37, %v6534_v38  ;;  %v6536_v52 = vadd.f32 %v6535_v21, %v6357_v6  ;;  %v6362_v34 = vadd.f32 %v6361_v10, %v13803_v2  ;;  %7565 = vmatprep.mubr.f32.mxu0 %v15833_v0  ;;  %7744 = vmatprep.mubr.f32.mxu1 %v15833_v0 }
 0x484   : > { %v6363_v27 = vpop.f32.mrf.mxu0  ;;  %v6542_v39 = vpop.f32.mrf.mxu1 }
 0x485   : > { %v7831_v41 = vmin.f32 %v7827_v19, %v6536_v52  ;;  %v6541_v13 = vadd.f32 %v6540_v53, %v6362_v34  ;;  %v6364_v50 = vadd.f32 %v6363_v27, %v13807_v61 }
 0x486   : > { %v6368_v56 = vpop.f32.mrf.mxu0  ;;  %7567 = vmatmul.mubr.f32.gmra.mxu0 %v16042_v55  ;;  %v6547_v20 = vpop.f32.mrf.mxu1  ;;  %7746 = vmatmul.mubr.f32.gmra.mxu1 %v16042_v55 }
 0x487   : > { %v7834_v45 = vmin.f32 %v7830_v44, %v6541_v13  ;;  %v6543_v32 = vadd.f32 %v6542_v39, %v6364_v50  ;;  %v6369_v2 = vadd.f32 %v6368_v56, %v13813_v43  ;;  %7572 = vmatprep.mubr.f32.mxu0 %v15833_v0  ;;  %7751 = vmatprep.mubr.f32.mxu1 %v15833_v0 }
 0x488   : > { %v6370_v60 = vpop.f32.mrf.mxu0  ;;  %v6549_v37 = vpop.f32.mrf.mxu1 }
 0x489   : > { %v7835_v58 = vmin.f32 %v7831_v41, %v6543_v32  ;;  %v6548_v59 = vadd.f32 %v6547_v20, %v6369_v2  ;;  %v6371_v61 = vadd.f32 %v6370_v60, %v13817_v17 }
 0x48a   : > { %v6375_v35 = vpop.f32.mrf.mxu0  ;;  %7574 = vmatmul.mubr.f32.gmra.mxu0 %v16043_v24  ;;  %v6554_v42 = vpop.f32.mrf.mxu1  ;;  %7753 = vmatmul.mubr.f32.gmra.mxu1 %v16043_v24 }
 0x48b   : > { %v7838_v22 = vmin.f32 %v7834_v45, %v6548_v59  ;;  %v6550_v12 = vadd.f32 %v6549_v37, %v6371_v61  ;;  %v6376_v43 = vadd.f32 %v6375_v35, %v13823_v47  ;;  %7579 = vmatprep.mubr.f32.mxu0 %v15833_v0  ;;  %7758 = vmatprep.mubr.f32.mxu1 %v15833_v0  ;;  %v10727_v59 = vld [vmem:[%s11034_s13 + $0x180] sm:$0xff] }
 0x48c   : > { %v6377_v55 = vpop.f32.mrf.mxu0  ;;  %v6556_v6 = vpop.f32.mrf.mxu1 }
 0x48d   : > { %v7839_v19 = vmin.f32 %v7835_v58, %v6550_v12  ;;  %v6555_v38 = vadd.f32 %v6554_v42, %v6376_v43  ;;  %v6378_v17 = vadd.f32 %v6377_v55, %v13827_v28  ;;  %v7912_v42 = vsel %vm299_vm0, %v10727_v59, 0 }
 0x48e   : > { %v6382_v21 = vpop.f32.mrf.mxu0  ;;  %7581 = vmatmul.mubr.f32.gmra.mxu0 %v16044_v4  ;;  %v6561_v52 = vpop.f32.mrf.mxu1  ;;  %7760 = vmatmul.mubr.f32.gmra.mxu1 %v16044_v4 }
 0x48f   : > { %v7842_v10 = vmin.f32 %v7838_v22, %v6555_v38  ;;  %v6557_v44 = vadd.f32 %v6556_v6, %v6378_v17  ;;  %v6383_v47 = vadd.f32 %v6382_v21, %v13833_v8  ;;  %7586 = vmatprep.mubr.f32.mxu0 %v15833_v0  ;;  %7765 = vmatprep.mubr.f32.mxu1 %v15833_v0 }
 0x490   : > { %v6384_v24 = vpop.f32.mrf.mxu0  ;;  %v6563_v27 = vpop.f32.mrf.mxu1 }
 0x491   : > { %v7843_v34 = vmin.f32 %v7839_v19, %v6557_v44  ;;  %v6562_v53 = vadd.f32 %v6561_v52, %v6383_v47  ;;  %v6385_v28 = vadd.f32 %v6384_v24, %v13837_v1 }
 0x492   : > { %v6389_v41 = vpop.f32.mrf.mxu0  ;;  %7588 = vmatmul.mubr.f32.gmra.mxu0 %v16045_v18  ;;  %v6568_v39 = vpop.f32.mrf.mxu1  ;;  %7767 = vmatmul.mubr.f32.gmra.mxu1 %v16045_v18 }
 0x493   : > { %v7846_v13 = vmin.f32 %v7842_v10, %v6562_v53  ;;  %v6564_v50 = vadd.f32 %v6563_v27, %v6385_v28  ;;  %v6390_v8 = vadd.f32 %v6389_v41, %v13843_v23  ;;  %7593 = vmatprep.mubr.f32.mxu0 %v15833_v0  ;;  %7772 = vmatprep.mubr.f32.mxu1 %v15833_v0  ;;  %v10729_v10 = vld [vmem:[%s11034_s13 + $0x190] sm:$0xff] }
 0x494   : > { %v6391_v4 = vpop.f32.mrf.mxu0  ;;  %v6570_v32 = vpop.f32.mrf.mxu1  ;;  %v7918_v41 = vsel %vm299_vm0, %v10729_v10, 0  ;;  %v10732_v10 = vld [vmem:[%s11034_s13 + $0x1a8] sm:$0xff] }
 0x495   : > { %v7847_v56 = vmin.f32 %v7843_v34, %v6564_v50  ;;  %v6569_v45 = vadd.f32 %v6568_v39, %v6390_v8  ;;  %v6392_v1 = vadd.f32 %v6391_v4, %v13847_v15  ;;  %v10730_v50 = vld [vmem:[%s11034_s13 + $0x198] sm:$0xff] }
 0x496   : > { %v6396_v2 = vpop.f32.mrf.mxu0  ;;  %7595 = vmatmul.mubr.f32.gmra.mxu0 %v16046_v11  ;;  %v6575_v58 = vpop.f32.mrf.mxu1  ;;  %7774 = vmatmul.mubr.f32.gmra.mxu1 %v16046_v11 }
 0x497   : > { %v7850_v20 = vmin.f32 %v7846_v13, %v6569_v45  ;;  %v6571_v60 = vadd.f32 %v6570_v32, %v6392_v1  ;;  %v6397_v23 = vadd.f32 %v6396_v2, %v13853_v5  ;;  %7600 = vmatprep.mubr.f32.mxu0 %v15833_v0  ;;  %7779 = vmatprep.mubr.f32.mxu1 %v15833_v0  ;;  %v14019_v1 = vand.u32 4294901760, %v7918_v41 }
 0x498   : > { %v6398_v18 = vpop.f32.mrf.mxu0  ;;  %v6577_v35 = vpop.f32.mrf.mxu1 }
 0x499   : > { %v7851_v61 = vmin.f32 %v7847_v56, %v6571_v60  ;;  %v6576_v15 = vadd.f32 %v6575_v58, %v6397_v23  ;;  %v6399_v37 = vadd.f32 %v6398_v18, %v13857_v54  ;;  %v10728_v54 = vld [vmem:[%s11034_s13 + $0x188] sm:$0xff]  ;;  %16112 = vst [vmem:[#allocation41_spill] sm:$0xff] %v14019_v1 }
 0x49a   : > { %v6403_v22 = vpop.f32.mrf.mxu0  ;;  %7602 = vmatmul.mubr.f32.gmra.mxu0 %v16047_v29  ;;  %v6582_v43 = vpop.f32.mrf.mxu1  ;;  %7781 = vmatmul.mubr.f32.gmra.mxu1 %v16047_v29  ;;  %v7915_v24 = vsel %vm299_vm0, %v10728_v54, 0 }
 0x49b   : > { %v7854_v12 = vmin.f32 %v7850_v20, %v6576_v15  ;;  %v6578_v5 = vadd.f32 %v6577_v35, %v6399_v37  ;;  %v6404_v11 = vadd.f32 %v6403_v22, %v13863_v40  ;;  %7607 = vmatprep.mubr.f32.mxu0 %v15833_v0  ;;  %7786 = vmatprep.mubr.f32.mxu1 %v15833_v0  ;;  %v13996_v40 = vand.u32 4294901760, %v7912_v42  ;;  %v10731_v37 = vld [vmem:[%s11034_s13 + $0x1a0] sm:$0xff] }
 0x49c   : > { %v6405_v55 = vpop.f32.mrf.mxu0  ;;  %v6584_v6 = vpop.f32.mrf.mxu1  ;;  %v6045_v35 = vadd.f32 %v13910_v62, %v13749_v63 }
 0x49d   : > { %v7855_v19 = vmin.f32 %v7851_v61, %v6578_v5  ;;  %v6583_v38 = vadd.f32 %v6582_v43, %v6404_v11  ;;  %v6406_v17 = vadd.f32 %v6405_v55, %v13867_v31  ;;  %16110 = vst [vmem:[#allocation18_spill] sm:$0xff] %v13996_v40  ;;  %v14038_v61 = vsub.f32 %v7918_v41, %v14019_v1  ;;  %v16117_v11 = vld [vmem:[#allocation34_spill] sm:$0xff] }
 0x49e   : > { %v6410_v21 = vpop.f32.mrf.mxu0  ;;  %7609 = vmatmul.mubr.f32.gmra.mxu0 %v16048_v48  ;;  %v6589_v52 = vpop.f32.mrf.mxu1  ;;  %7788 = vmatmul.mubr.f32.gmra.mxu1 %v16048_v48  ;;  %v14010_v48 = vand.u32 4294901760, %v7915_v24  ;;  %v16118_v55 = vld [vmem:[#allocation70_spill] sm:$0xff] }
 0x49f   : > { %v7858_v29 = vmin.f32 %v7854_v12, %v6583_v38  ;;  %v6585_v44 = vadd.f32 %v6584_v6, %v6406_v17  ;;  %v6411_v47 = vadd.f32 %v6410_v21, %v13873_v25  ;;  %7614 = vmatprep.mubr.f32.mxu0 %v15833_v0  ;;  %7793 = vmatprep.mubr.f32.mxu1 %v15833_v0  ;;  %v14060_v6 = vand.u32 4294901760, %v14038_v61 }
 0x4a0   : > { %v6412_v31 = vpop.f32.mrf.mxu0  ;;  %v6591_v27 = vpop.f32.mrf.mxu1  ;;  %v14008_v25 = vsub.f32 %v7912_v42, %v13996_v40  ;;  %16111 = vst [vmem:[#allocation63_spill] sm:$0xff] %v14010_v48 }
 0x4a1   : > { %v7859_v34 = vmin.f32 %v7855_v19, %v6585_v44  ;;  %v6590_v53 = vadd.f32 %v6589_v52, %v6411_v47  ;;  %v6413_v28 = vadd.f32 %v6412_v31, %v13877_v3  ;;  %v6037_v3 = vadd.f32 %v13896_v46, %v13741_v7  ;;  %16119 = vst [vmem:[#allocation46_spill] sm:$0xff] %v14060_v6 }
 0x4a2   : > { %v6417_v13 = vpop.f32.mrf.mxu0  ;;  %7616 = vmatmul.mubr.f32.gmra.mxu0 %v16049_v51  ;;  %v6596_v56 = vpop.f32.mrf.mxu1  ;;  %7795 = vmatmul.mubr.f32.gmra.mxu1 %v16049_v51  ;;  %v6039_v51 = vadd.f32 %v13905_v57, %v13744_v30  ;;  %v14027_v7 = vand.u32 4294901760, %v14008_v25  ;;  %v14030_v46 = vsub.f32 %v7915_v24, %v14010_v48 }
 0x4a3   : > { %v7862_v8 = vmin.f32 %v7858_v29, %v6590_v53  ;;  %v6592_v39 = vadd.f32 %v6591_v27, %v6413_v28  ;;  %v6418_v4 = vadd.f32 %v6417_v13, %v13883_v26  ;;  %7621 = vmatprep.mubr.f32.mxu0 %v15833_v0  ;;  %7800 = vmatprep.mubr.f32.mxu1 %v15833_v0  ;;  %v7921_v26 = vsel %vm299_vm0, %v10730_v50, 0  ;;  %v16121_v29 = vld [vmem:[#allocation43_spill] sm:$0xff]  ;;  %v16123_v27 = vld [vmem:[#allocation80_spill] sm:$0xff] }
 0x4a4   : > { %v6419_v45 = vpop.f32.mrf.mxu0  ;;  %v6598_v60 = vpop.f32.mrf.mxu1  ;;  %16113 = vst [vmem:[#allocation21_spill] sm:$0xff] %v14027_v7  ;;  %16114 = vst [vmem:[#allocation68_spill] sm:$0xff] %v14030_v46  ;;  %v6247_v30 = vadd.f32 %v13901_v36, %v6037_v3  ;;  %v14040_v15 = vand.u32 4294901760, %v7921_v26  ;;  %v6249_v5 = vadd.f32 %v13908_v14, %v6039_v51  ;;  %v16116_v36 = vld [vmem:[#allocation83_spill] sm:$0xff]  ;;  %v8029_v54 = vsub.f32 %v14008_v25, %v14027_v7 }
 0x4a5   : > { %v7863_v32 = vmin.f32 %v7859_v34, %v6592_v39  ;;  %v6597_v2 = vadd.f32 %v6596_v56, %v6418_v4  ;;  %v6420_v20 = vadd.f32 %v6419_v45, %v13887_v49  ;;  %v6047_v43 = vadd.f32 %v16117_v11, %v16116_v36  ;;  %v16122_v34 = vld [vmem:[#allocation39_spill] sm:$0xff]  ;;  %v10733_v45 = vld [vmem:[%s11034_s13 + $0x1b0] sm:$0xff] }
 0x4a6   : > { %v6424_v23 = vpop.f32.mrf.mxu0  ;;  %7623 = vmatmul.mubr.f32.gmra.mxu0 %v16050_v16  ;;  %v6603_v59 = vpop.f32.mrf.mxu1  ;;  %7802 = vmatmul.mubr.f32.gmra.mxu1 %v16050_v16  ;;  %16115 = vst [vmem:[#allocation82_spill] sm:$0xff] %v14040_v15  ;;  %v14053_v19 = vand.u32 4294901760, %v14030_v46  ;;  %v7924_v14 = vsel %vm299_vm0, %v10731_v37, 0  ;;  %v14063_v21 = vsub.f32 %v7921_v26, %v14040_v15  ;;  %v6256_v44 = vadd.f32 %v16121_v29, %v6045_v35  ;;  %v16130_v35 = vld [vmem:[#allocation12_spill] sm:$0xff]  ;;  %v16131_v36 = vld [vmem:[#allocation9_spill] sm:$0xff] }
 0x4a7   : > { %v7866_v58 = vmin.f32 %v7862_v8, %v6597_v2  ;;  %v6599_v18 = vadd.f32 %v6598_v60, %v6420_v20  ;;  %v6425_v49 = vadd.f32 %v6424_v23, %v13893_v9  ;;  %7628 = vmatprep.mubr.f32.mxu0 %v15833_v0  ;;  %7807 = vmatprep.mubr.f32.mxu1 %v15833_v0  ;;  %v14069_v41 = vand.u32 4294901760, %v8029_v54 }
 0x4a8   : > { %v6426_v57 = vpop.f32.mrf.mxu0  ;;  %v6605_v12 = vpop.f32.mrf.mxu1  ;;  %16120 = vst [vmem:[#allocation45_spill] sm:$0xff] %v14063_v21  ;;  %v6258_v53 = vadd.f32 %v16122_v34, %v6047_v43  ;;  %v8040_v13 = vsub.f32 %v14030_v46, %v14053_v19  ;;  %v14073_v50 = vand.u32 4294901760, %v7924_v14  ;;  %v7927_v3 = vsel %vm299_vm0, %v10732_v10, 0 }
 0x4a9   : > { %v7867_v9 = vmin.f32 %v7863_v32, %v6599_v18  ;;  %v6604_v22 = vadd.f32 %v6603_v59, %v6425_v49  ;;  %v6427_v16 = vadd.f32 %v6426_v57, %v13899_v33  ;;  %16124 = vst [vmem:[#allocation13_spill] sm:$0xff] %v14069_v41  ;;  %v8051_v2 = vsub.f32 %v14038_v61, %v14060_v6 }
 0x4aa   : > { %v6431_v42 = vpop.f32.mrf.mxu0  ;;  %7630 = vmatmul.mubr.f32.gmra.mxu0 %v16118_v55  ;;  %v6610_v33 = vpop.f32.mrf.mxu1  ;;  %7809 = vmatmul.mubr.f32.gmra.mxu1 %v16118_v55  ;;  %16125 = vst [vmem:[#allocation22_spill] sm:$0xff] %v14073_v50  ;;  %v14083_v23 = vand.u32 4294901760, %v14063_v21  ;;  %v14086_v18 = vand.u32 4294901760, %v8040_v13  ;;  %v14089_v49 = vsub.f32 %v7924_v14, %v14073_v50  ;;  %v14091_v59 = vand.u32 4294901760, %v7927_v3 }
 0x4ab   : > { %v7870_v63 = vmin.f32 %v7866_v58, %v6604_v22  ;;  %v6606_v62 = vadd.f32 %v6605_v12, %v6427_v16  ;;  %v6432_v38 = vadd.f32 %v6431_v42, %v6247_v30  ;;  %7635 = vmatprep.mubr.f32.mxu0 %v15833_v0  ;;  %7814 = vmatprep.mubr.f32.mxu1 %v15833_v0  ;;  %v7930_v30 = vsel %vm299_vm0, %v10733_v45, 0  ;;  %v10734_v22 = vld [vmem:[%s11034_s13 + $0x1b8] sm:$0xff]  ;;  %v7882_v16 = vld [vmem:[#allocation2 + $0x10] sm:$0xff] }
 0x4ac   : > { %v6433_v17 = vpop.f32.mrf.mxu0  ;;  %v6612_v31 = vpop.f32.mrf.mxu1  ;;  %16126 = vst [vmem:[#allocation65_spill] sm:$0xff] %v14083_v23  ;;  %16127 = vst [vmem:[#allocation59_spill] sm:$0xff] %v14086_v18  ;;  %v14101_v11 = vand.u32 4294901760, %v8051_v2  ;;  %v8062_v54 = vsub.f32 %v14063_v21, %v14083_v23  ;;  %v14116_v10 = vsub.f32 %v7927_v3, %v14091_v59  ;;  %v7933_v29 = vsel %vm299_vm0, %v10734_v22, 0 }
 0x4ad   : > { %v7871_v47 = vmin.f32 %v7867_v9, %v6606_v62  ;;  %v6611_v52 = vadd.f32 %v6610_v33, %v6432_v38  ;;  %v6434_v24 = vadd.f32 %v6433_v17, %v6249_v5  ;;  %16128 = vst [vmem:[#allocation33_spill] sm:$0xff] %v14089_v49  ;;  %16129 = vst [vmem:[#allocation48_spill] sm:$0xff] %v14091_v59  ;;  %v16134_v62 = vld [vmem:[#allocation16_spill] sm:$0xff]  ;;  %v7883_v38 = vld [vmem:[#allocation2] sm:$0xff]  ;;  %v14113_v17 = vand.u32 4294901760, %v14089_v49 }
 0x4ae   : > { %v6438_v28 = vpop.f32.mrf.mxu0  ;;  %7637 = vmatmul.mubr.f32.gmra.mxu0 %v16123_v27  ;;  %v6617_v56 = vpop.f32.mrf.mxu1  ;;  %7816 = vmatmul.mubr.f32.gmra.mxu1 %v16123_v27  ;;  %16132 = vst [vmem:[#allocation42_spill] sm:$0xff] %v14101_v11  ;;  %16136 = vst [vmem:[#allocation49_spill] sm:$0xff] %v14116_v10  ;;  %v14131_v13 = vand.u32 4294901760, %v7933_v29 }
 0x4af   : > { %v7874_v8 = vmin.f32 %v7870_v63, %v6611_v52  ;;  %v6613_v39 = vadd.f32 %v6612_v31, %v6434_v24  ;;  %v6439_v4 = vadd.f32 %v6438_v28, %v6256_v44  ;;  %8025 = vmatprep.mubr.f32.mxu0 %v15833_v0  ;;  %8276 = vmatprep.mubr.f32.mxu1 %v15833_v0  ;;  %v14106_v63 = vand.u32 4294901760, %v7930_v30  ;;  %v16137_v44 = vld [vmem:[#allocation8_spill] sm:$0xff]  ;;  %v10735_v24 = vld [vmem:[%s11034_s13 + $0x1c0] sm:$0xff] }
 0x4b0   : > { %v6440_v32 = vpop.f32.mrf.mxu0  ;;  %v6619_v51 = vpop.f32.mrf.mxu1  ;;  %16135 = vst [vmem:[#allocation40_spill] sm:$0xff] %v14113_v17  ;;  %v14126_v28 = vand.u32 4294901760, %v8062_v54  ;;  %16140 = vst [vmem:[#allocation61_spill] sm:$0xff] %v14131_v13  ;;  %v7936_v3 = vsel %vm299_vm0, %v10735_v24, 0  ;;  %v10738_v24 = vld [vmem:[%s11034_s13 + $0x1d8] sm:$0xff] }
 0x4b1   : > { %v7875_v20 = vmin.f32 %v7871_v47, %v6613_v39  ;;  %v6618_v60 = vadd.f32 %v6617_v56, %v6439_v4  ;;  %v6441_v26 = vadd.f32 %v6440_v32, %v6258_v53  ;;  %16133 = vst [vmem:[#allocation84_spill] sm:$0xff] %v14106_v63  ;;  %v14129_v27 = vsub.f32 %v7930_v30, %v14106_v63 }
 0x4b2   : > { %v6695_v58 = vpop.f32.mrf.mxu0  ;;  %8031 = vmatmul.mubr.f32.vlgmr.msra.gmra.mxu0 %v14069_v41  ;;  %v6942_v9 = vpop.f32.mrf.mxu1  ;;  %8278 = vmatmul.mubr.f32.vlgmr.msra.gmra.mxu1 %v13996_v40  ;;  %16138 = vst [vmem:[#allocation47_spill] sm:$0xff] %v14126_v28  ;;  %v8073_v4 = vsub.f32 %v14089_v49, %v14113_v17  ;;  %v14139_v56 = vand.u32 4294901760, %v14116_v10 }
 0x4b3   : > { %v7878_v57 = vmin.f32 %v7874_v8, %v6618_v60  ;;  %v6620_v37 = vadd.f32 %v6619_v51, %v6441_v26  ;;  %8424 = vmatpush1.msra.mxu0 %v16130_v35  ;;  %v14097_v12 = vadd.f32 %v6942_v9, %v6695_v58  ;;  %8619 = vmatpush1.msra.mxu1 %v16131_v36  ;;  %v14149_v26 = vand.u32 4294901760, %v14129_v27 }
 0x4b4   : > { %v6697_v5 = vpop.f32.mrf.mxu0  ;;  %8036 = vmatprep.mubr.f32.mxu0 %v15833_v0  ;;  %v6944_v55 = vpop.f32.mrf.mxu1  ;;  %8283 = vmatprep.mubr.f32.mxu1 %v15833_v0  ;;  %16139 = vst [vmem:[#allocation23_spill] sm:$0xff] %v14129_v27  ;;  %16141 = vst [vmem:[#allocation66_spill] sm:$0xff] %v14139_v56  ;;  %v14152_v51 = vsub.f32 %v7933_v29, %v14131_v13  ;;  %v14154_v58 = vand.u32 4294901760, %v7936_v3  ;;  %v8084_v35 = vsub.f32 %v14116_v10, %v14139_v56 }
 0x4b5   : > { %v7886_v43 = vmin.f32 %v7882_v16, %v7878_v57  ;;  %v7879_v42 = vmin.f32 %v7875_v20, %v6620_v37  ;;  %8830 = vmatprep.subr.mxu0 %v16134_v62  ;;  %v14109_v33 = vadd.f32 %v6944_v55, %v6697_v5  ;;  %9011 = vmatprep.subr.mxu1 %v16137_v44  ;;  %v10736_v20 = vld [vmem:[%s11034_s13 + $0x1c8] sm:$0xff]  ;;  %v14159_v37 = vand.u32 4294901760, %v8073_v4 }
 0x4b6   : > { %v6706_v14 = vpop.f32.mrf.mxu0  ;;  %8042 = vmatmul.mubr.f32.gmra.mxu0 %v14086_v18  ;;  %v6949_v52 = vpop.f32.mrf.mxu1  ;;  %8285 = vmatmul.mubr.f32.gmra.mxu1 %v14010_v48  ;;  %16142 = vst [vmem:[#allocation72_spill] sm:$0xff] %v14149_v26  ;;  %16143 = vst [vmem:[#allocation81_spill] sm:$0xff] %v14152_v51  ;;  %v7939_v22 = vsel %vm299_vm0, %v10736_v20, 0  ;;  %v8095_v55 = vsub.f32 %v14129_v27, %v14149_v26  ;;  %v14173_v54 = vand.u32 4294901760, %v14152_v51  ;;  %v14181_v29 = vand.u32 4294901760, %v8084_v35 }
 0x4b7   : > { %7890 = vst [vmem:[#allocation2 + $0x10] sm:$0xff] %v7886_v43  ;;  %v7887_v47 = vmin.f32 %v7883_v38, %v7879_v42  ;;  %8047 = vmatprep.mubr.f32.mxu0 %v15833_v0  ;;  %v14123_v31 = vadd.f32 %v6949_v52, %v6706_v14  ;;  %8290 = vmatprep.mubr.f32.mxu1 %v15833_v0  ;;  %16144 = vst [vmem:[#allocation73_spill] sm:$0xff] %v14154_v58  ;;  %v10737_v43 = vld [vmem:[%s11034_s13 + $0x1d0] sm:$0xff]  ;;  %v14183_v44 = vand.u32 4294901760, %v7939_v22 }
 0x4b8   : > { %v6708_v34 = vpop.f32.mrf.mxu0  ;;  %v6951_v53 = vpop.f32.mrf.mxu1  ;;  %16145 = vst [vmem:[#allocation32_spill] sm:$0xff] %v14159_v37  ;;  %16146 = vst [vmem:[#allocation77_spill] sm:$0xff] %v14173_v54  ;;  %v14176_v62 = vsub.f32 %v7936_v3, %v14154_v58  ;;  %v7942_v52 = vsel %vm299_vm0, %v10737_v43, 0  ;;  %v14192_v4 = vand.u32 4294901760, %v8095_v55  ;;  %v8106_v3 = vsub.f32 %v14152_v51, %v14173_v54 }
 0x4b9   : > { %7891 = vst [vmem:[#allocation2] sm:$0xff] %v7887_v47  ;;  %v14133_v8 = vadd.f32 %v6951_v53, %v6708_v34  ;;  %16148 = vst [vmem:[#allocation10_spill] sm:$0xff] %v14181_v29  ;;  %v7945_v35 = vsel %vm299_vm0, %v10738_v24, 0 }
 0x4ba   : > { %v6717_v39 = vpop.f32.mrf.mxu0  ;;  %8053 = vmatmul.mubr.f32.gmra.mxu0 %v14101_v11  ;;  %v6956_v45 = vpop.f32.mrf.mxu1  ;;  %8292 = vmatmul.mubr.f32.gmra.mxu1 %v14019_v1  ;;  %16147 = vst [vmem:[#allocation44_spill] sm:$0xff] %v14176_v62  ;;  %16149 = vst [vmem:[#allocation19_spill] sm:$0xff] %v14183_v44 }
 0x4bb   : > { %8058 = vmatprep.mubr.f32.mxu0 %v15833_v0  ;;  %v14144_v32 = vadd.f32 %v6956_v45, %v6717_v39  ;;  %8297 = vmatprep.mubr.f32.mxu1 %v15833_v0  ;;  %16150 = vst [vmem:[#allocation26_spill] sm:$0xff] %v14192_v4  ;;  %v14197_v45 = vand.u32 4294901760, %v14176_v62 }
 0x4bc   : > { %v6719_v2 = vpop.f32.mrf.mxu0  ;;  %v6958_v60 = vpop.f32.mrf.mxu1 }
 0x4bd   : > { %v14156_v30 = vadd.f32 %v6958_v60, %v6719_v2  ;;  %16151 = vst [vmem:[#allocation38_spill] sm:$0xff] %v14197_v45  ;;  %v14203_v60 = vsub.f32 %v7939_v22, %v14183_v44  ;;  %v8117_v22 = vsub.f32 %v14176_v62, %v14197_v45 }
 0x4be   : > { %v6728_v57 = vpop.f32.mrf.mxu0  ;;  %8064 = vmatmul.mubr.f32.gmra.mxu0 %v14126_v28  ;;  %v6963_v9 = vpop.f32.mrf.mxu1  ;;  %8299 = vmatmul.mubr.f32.gmra.mxu1 %v14040_v15 }
 0x4bf   : > { %8069 = vmatprep.mubr.f32.mxu0 %v15833_v0  ;;  %v14166_v16 = vadd.f32 %v6963_v9, %v6728_v57  ;;  %8304 = vmatprep.mubr.f32.mxu1 %v15833_v0  ;;  %16152 = vst [vmem:[#allocation69_spill] sm:$0xff] %v14203_v60  ;;  %v14205_v57 = vand.u32 4294901760, %v7942_v52  ;;  %v14244_v11 = vand.u32 4294901760, %v8117_v22  ;;  %v10741_v22 = vld [vmem:[%s11034_s13 + $0x1f0] sm:$0xff] }
 0x4c0   : > { %v6730_v5 = vpop.f32.mrf.mxu0  ;;  %v6965_v42 = vpop.f32.mrf.mxu1 }
 0x4c1   : > { %v14178_v38 = vadd.f32 %v6965_v42, %v6730_v5  ;;  %16153 = vst [vmem:[#allocation37_spill] sm:$0xff] %v14205_v57  ;;  %v10739_v5 = vld [vmem:[%s11034_s13 + $0x1e0] sm:$0xff]  ;;  %16160 = vst [vmem:[#allocation85_spill] sm:$0xff] %v14244_v11 }
 0x4c2   : > { %v6739_v14 = vpop.f32.mrf.mxu0  ;;  %8075 = vmatmul.mubr.f32.gmra.mxu0 %v14159_v37  ;;  %v6970_v47 = vpop.f32.mrf.mxu1  ;;  %8306 = vmatmul.mubr.f32.gmra.mxu1 %v14073_v50 }
 0x4c3   : > { %8080 = vmatprep.mubr.f32.mxu0 %v15833_v0  ;;  %v14189_v34 = vadd.f32 %v6970_v47, %v6739_v14  ;;  %8311 = vmatprep.mubr.f32.mxu1 %v15833_v0  ;;  %v14214_v14 = vand.u32 4294901760, %v8106_v3  ;;  %v14218_v47 = vand.u32 4294901760, %v7945_v35 }
 0x4c4   : > { %v6741_v53 = vpop.f32.mrf.mxu0  ;;  %v6972_v39 = vpop.f32.mrf.mxu1 }
 0x4c5   : > { %v14199_v2 = vadd.f32 %v6972_v39, %v6741_v53  ;;  %16154 = vst [vmem:[#allocation24_spill] sm:$0xff] %v14214_v14  ;;  %16155 = vst [vmem:[#allocation27_spill] sm:$0xff] %v14218_v47  ;;  %v14224_v39 = vand.u32 4294901760, %v14203_v60  ;;  %v14237_v37 = vsub.f32 %v7945_v35, %v14218_v47 }
 0x4c6   : > { %v6750_v20 = vpop.f32.mrf.mxu0  ;;  %8086 = vmatmul.mubr.f32.gmra.mxu0 %v14181_v29  ;;  %v6977_v9 = vpop.f32.mrf.mxu1  ;;  %8313 = vmatmul.mubr.f32.gmra.mxu1 %v14091_v59 }
 0x4c7   : > { %8091 = vmatprep.mubr.f32.mxu0 %v15833_v0  ;;  %v14211_v43 = vadd.f32 %v6977_v9, %v6750_v20  ;;  %8318 = vmatprep.mubr.f32.mxu1 %v15833_v0  ;;  %16156 = vst [vmem:[#allocation71_spill] sm:$0xff] %v14224_v39  ;;  %v14227_v20 = vsub.f32 %v7942_v52, %v14205_v57  ;;  %v7948_v9 = vsel %vm299_vm0, %v10739_v5, 0  ;;  %16158 = vst [vmem:[#allocation74_spill] sm:$0xff] %v14237_v37 }
 0x4c8   : > { %v6752_v42 = vpop.f32.mrf.mxu0  ;;  %v6979_v55 = vpop.f32.mrf.mxu1  ;;  %v14239_v52 = vand.u32 4294901760, %v7948_v9  ;;  %v14259_v41 = vand.u32 4294901760, %v14237_v37 }
 0x4c9   : > { %v14220_v24 = vadd.f32 %v6979_v55, %v6752_v42  ;;  %16157 = vst [vmem:[#allocation64_spill] sm:$0xff] %v14227_v20  ;;  %v10740_v55 = vld [vmem:[%s11034_s13 + $0x1e8] sm:$0xff] }
 0x4ca   : > { %v6761_v53 = vpop.f32.mrf.mxu0  ;;  %8097 = vmatmul.mubr.f32.gmra.mxu0 %v14192_v4  ;;  %v6984_v3 = vpop.f32.mrf.mxu1  ;;  %8320 = vmatmul.mubr.f32.gmra.mxu1 %v14106_v63  ;;  %16159 = vst [vmem:[#allocation78_spill] sm:$0xff] %v14239_v52  ;;  %v7951_v35 = vsel %vm299_vm0, %v10740_v55, 0  ;;  %16162 = vst [vmem:[#allocation25_spill] sm:$0xff] %v14259_v41  ;;  %v14262_v63 = vsub.f32 %v7948_v9, %v14239_v52  ;;  %v7954_v9 = vsel %vm299_vm0, %v10741_v22, 0 }
 0x4cb   : > { %8102 = vmatprep.mubr.f32.mxu0 %v15833_v0  ;;  %v14232_v29 = vadd.f32 %v6984_v3, %v6761_v53  ;;  %8325 = vmatprep.mubr.f32.mxu1 %v15833_v0  ;;  %v8128_v53 = vsub.f32 %v14203_v60, %v14224_v39  ;;  %v14249_v3 = vand.u32 4294901760, %v14227_v20 }
 0x4cc   : > { %v6763_v42 = vpop.f32.mrf.mxu0  ;;  %v6986_v4 = vpop.f32.mrf.mxu1  ;;  %16163 = vst [vmem:[#allocation35_spill] sm:$0xff] %v14262_v63  ;;  %v14283_v1 = vand.u32 4294901760, %v14262_v63 }
 0x4cd   : > { %v14241_v28 = vadd.f32 %v6986_v4, %v6763_v42  ;;  %16161 = vst [vmem:[#allocation36_spill] sm:$0xff] %v14249_v3  ;;  %v14267_v55 = vand.u32 4294901760, %v8128_v53 }
 0x4ce   : > { %v6772_v5 = vpop.f32.mrf.mxu0  ;;  %8108 = vmatmul.mubr.f32.gmra.mxu0 %v14214_v14  ;;  %v6991_v18 = vpop.f32.mrf.mxu1  ;;  %8327 = vmatmul.mubr.f32.gmra.mxu1 %v14131_v13  ;;  %16166 = vst [vmem:[#allocation29_spill] sm:$0xff] %v14283_v1 }
 0x4cf   : > { %8113 = vmatprep.mubr.f32.mxu0 %v15833_v0  ;;  %v14254_v4 = vadd.f32 %v6991_v18, %v6772_v5  ;;  %8332 = vmatprep.mubr.f32.mxu1 %v15833_v0  ;;  %16164 = vst [vmem:[#allocation50_spill] sm:$0xff] %v14267_v55  ;;  %v8139_v18 = vsub.f32 %v14227_v20, %v14249_v3  ;;  %v14271_v5 = vand.u32 4294901760, %v7951_v35 }
 0x4d0   : > { %v6774_v42 = vpop.f32.mrf.mxu0  ;;  %v6993_v14 = vpop.f32.mrf.mxu1 }
 0x4d1   : > { %v14264_v59 = vadd.f32 %v6993_v14, %v6774_v42  ;;  %16165 = vst [vmem:[#allocation14_spill] sm:$0xff] %v14271_v5  ;;  %v10742_v42 = vld [vmem:[%s11034_s13 + $0x1f8] sm:$0xff]  ;;  %v14288_v40 = vand.u32 4294901760, %v8139_v18 }
 0x4d2   : > { %v6783_v13 = vpop.f32.mrf.mxu0  ;;  %8119 = vmatmul.mubr.f32.gmra.mxu0 %v14244_v11  ;;  %v6998_v50 = vpop.f32.mrf.mxu1  ;;  %8334 = vmatmul.mubr.f32.gmra.mxu1 %v14154_v58  ;;  %v8150_v11 = vsub.f32 %v14237_v37, %v14259_v41  ;;  %v7957_v41 = vsel %vm299_vm0, %v10742_v42, 0 }
 0x4d3   : > { %8124 = vmatprep.mubr.f32.mxu0 %v15833_v0  ;;  %v14276_v15 = vadd.f32 %v6998_v50, %v6783_v13  ;;  %8339 = vmatprep.mubr.f32.mxu1 %v15833_v0  ;;  %16167 = vst [vmem:[#allocation15_spill] sm:$0xff] %v14288_v40  ;;  %v14291_v50 = vsub.f32 %v7951_v35, %v14271_v5  ;;  %v14293_v13 = vand.u32 4294901760, %v7954_v9  ;;  %v14314_v42 = vand.u32 4294901760, %v7957_v41 }
 0x4d4   : > { %v6785_v14 = vpop.f32.mrf.mxu0  ;;  %v7000_v53 = vpop.f32.mrf.mxu1  ;;  %v14301_v18 = vand.u32 4294901760, %v8150_v11  ;;  %v8161_v35 = vsub.f32 %v14262_v63, %v14283_v1 }
 0x4d5   : > { %v14285_v48 = vadd.f32 %v7000_v53, %v6785_v14  ;;  %16168 = vst [vmem:[#allocation31_spill] sm:$0xff] %v14291_v50  ;;  %16169 = vst [vmem:[#allocation60_spill] sm:$0xff] %v14293_v13 }
 0x4d6   : > { %v6794_v58 = vpop.f32.mrf.mxu0  ;;  %8130 = vmatmul.mubr.f32.gmra.mxu0 %v14267_v55  ;;  %v7005_v22 = vpop.f32.mrf.mxu1  ;;  %8341 = vmatmul.mubr.f32.gmra.mxu1 %v14183_v44  ;;  %16170 = vst [vmem:[#allocation62_spill] sm:$0xff] %v14301_v18  ;;  %v14309_v44 = vand.u32 4294901760, %v14291_v50  ;;  %16173 = vst [vmem:[#allocation76_spill] sm:$0xff] %v14314_v42 }
 0x4d7   : > { %8135 = vmatprep.mubr.f32.mxu0 %v15833_v0  ;;  %v14298_v37 = vadd.f32 %v7005_v22, %v6794_v58  ;;  %8346 = vmatprep.mubr.f32.mxu1 %v15833_v0  ;;  %v14312_v58 = vsub.f32 %v7954_v9, %v14293_v13 }
 0x4d8   : > { %v6796_v14 = vpop.f32.mrf.mxu0  ;;  %v7007_v53 = vpop.f32.mrf.mxu1  ;;  %16171 = vst [vmem:[#allocation67_spill] sm:$0xff] %v14309_v44  ;;  %v8172_v9 = vsub.f32 %v14291_v50, %v14309_v44 }
 0x4d9   : > { %v14305_v55 = vadd.f32 %v7007_v53, %v6796_v14  ;;  %16172 = vst [vmem:[#allocation75_spill] sm:$0xff] %v14312_v58 }
 0x4da   : > { %v6805_v3 = vpop.f32.mrf.mxu0  ;;  %8141 = vmatmul.mubr.f32.gmra.mxu0 %v14288_v40  ;;  %v7012_v22 = vpop.f32.mrf.mxu1  ;;  %8348 = vmatmul.mubr.f32.gmra.mxu1 %v14205_v57  ;;  %v14321_v40 = vand.u32 4294901760, %v8161_v35  ;;  %v14329_v57 = vand.u32 4294901760, %v14312_v58  ;;  %v14342_v50 = vand.u32 4294901760, %v8172_v9 }
 0x4db   : > { %8146 = vmatprep.mubr.f32.mxu0 %v15833_v0  ;;  %v14318_v11 = vadd.f32 %v7012_v22, %v6805_v3  ;;  %8353 = vmatprep.mubr.f32.mxu1 %v15833_v0  ;;  %v14332_v3 = vsub.f32 %v7957_v41, %v14314_v42 }
 0x4dc   : > { %v6807_v14 = vpop.f32.mrf.mxu0  ;;  %v7014_v53 = vpop.f32.mrf.mxu1  ;;  %16174 = vst [vmem:[#allocation79_spill] sm:$0xff] %v14321_v40  ;;  %16176 = vst [vmem:[#allocation28_spill] sm:$0xff] %v14329_v57  ;;  %v8183_v41 = vsub.f32 %v14312_v58, %v14329_v57 }
 0x4dd   : > { %v14323_v1 = vadd.f32 %v7014_v53, %v6807_v14  ;;  %16177 = vst [vmem:[#allocation20_spill] sm:$0xff] %v14332_v3  ;;  %16178 = vst [vmem:[#allocation11_spill] sm:$0xff] %v14342_v50 }
 0x4de   : > { %v6816_v63 = vpop.f32.mrf.mxu0  ;;  %8152 = vmatmul.mubr.f32.gmra.mxu0 %v14301_v18  ;;  %v7019_v22 = vpop.f32.mrf.mxu1  ;;  %8355 = vmatmul.mubr.f32.gmra.mxu1 %v14218_v47  ;;  %v14347_v47 = vand.u32 4294901760, %v14332_v3 }
 0x4df   : > { %16175 = vst [vmem:[#allocation30_spill] sm:$0xff] %v14323_v1  ;;  %8157 = vmatprep.mubr.f32.mxu0 %v15833_v0  ;;  %v14336_v35 = vadd.f32 %v7019_v22, %v6816_v63  ;;  %8360 = vmatprep.mubr.f32.mxu1 %v15833_v0 }
 0x4e0   : > { %v6818_v14 = vpop.f32.mrf.mxu0  ;;  %v7021_v53 = vpop.f32.mrf.mxu1  ;;  %16179 = vst [vmem:[#allocation83_spill] sm:$0xff] %v14347_v47  ;;  %v8194_v57 = vsub.f32 %v14332_v3, %v14347_v47 }
 0x4e1   : > { %v14339_v18 = vadd.f32 %v7021_v53, %v6818_v14 }
 0x4e2   : > { %v6827_v44 = vpop.f32.mrf.mxu0  ;;  %8163 = vmatmul.mubr.f32.gmra.mxu0 %v14321_v40  ;;  %v7026_v1 = vpop.f32.mrf.mxu1  ;;  %8362 = vmatmul.mubr.f32.gmra.mxu1 %v14239_v52  ;;  %v14357_v40 = vand.u32 4294901760, %v8183_v41  ;;  %v14369_v41 = vand.u32 4294901760, %v8194_v57 }
 0x4e3   : > { %8168 = vmatprep.mubr.f32.mxu0 %v15833_v0  ;;  %v14351_v63 = vadd.f32 %v7026_v1, %v6827_v44  ;;  %8367 = vmatprep.mubr.f32.mxu1 %v15833_v0 }
 0x4e4   : > { %v6829_v22 = vpop.f32.mrf.mxu0  ;;  %v7028_v14 = vpop.f32.mrf.mxu1  ;;  %16180 = vst [vmem:[#allocation34_spill] sm:$0xff] %v14357_v40  ;;  %16181 = vst [vmem:[#allocation70_spill] sm:$0xff] %v14369_v41 }
 0x4e5   : > { %v14354_v53 = vadd.f32 %v7028_v14, %v6829_v22 }
 0x4e6   : > { %v6838_v9 = vpop.f32.mrf.mxu0  ;;  %8174 = vmatmul.mubr.f32.gmra.mxu0 %v14342_v50  ;;  %v7033_v58 = vpop.f32.mrf.mxu1  ;;  %8369 = vmatmul.mubr.f32.gmra.mxu1 %v14271_v5 }
 0x4e7   : > { %8179 = vmatprep.mubr.f32.mxu0 %v15833_v0  ;;  %v14363_v1 = vadd.f32 %v7033_v58, %v6838_v9  ;;  %8374 = vmatprep.mubr.f32.mxu1 %v15833_v0 }
 0x4e8   : > { %v6840_v44 = vpop.f32.mrf.mxu0  ;;  %v7035_v22 = vpop.f32.mrf.mxu1 }
 0x4e9   : > { %v14366_v14 = vadd.f32 %v7035_v22, %v6840_v44 }
 0x4ea   : > { %v6849_v52 = vpop.f32.mrf.mxu0  ;;  %8185 = vmatmul.mubr.f32.gmra.mxu0 %v14357_v40  ;;  %v7040_v50 = vpop.f32.mrf.mxu1  ;;  %8376 = vmatmul.mubr.f32.gmra.mxu1 %v14293_v13 }
 0x4eb   : > { %8190 = vmatprep.mubr.f32.mxu0 %v15833_v0  ;;  %v14373_v5 = vadd.f32 %v7040_v50, %v6849_v52  ;;  %8381 = vmatprep.mubr.f32.mxu1 %v15833_v0 }
 0x4ec   : > { %v6851_v58 = vpop.f32.mrf.mxu0  ;;  %v7042_v9 = vpop.f32.mrf.mxu1 }
 0x4ed   : > { %v14376_v47 = vadd.f32 %v7042_v9, %v6851_v58  ;;  %v16182_v9 = vld [vmem:[#allocation17_spill] sm:$0xff] }
 0x4ee   : > { %v6860_v44 = vpop.f32.mrf.mxu0  ;;  %8196 = vmatmul.mubr.f32.gmra.mxu0 %v14369_v41  ;;  %v7047_v22 = vpop.f32.mrf.mxu1  ;;  %8383 = vmatmul.mubr.f32.gmra.mxu1 %v14314_v42 }
 0x4ef   : > { %8457 = vmatprep.mubr.f32.mxu0 %v15833_v0  ;;  %v14381_v57 = vadd.f32 %v7047_v22, %v6860_v44  ;;  %8652 = vmatprep.mubr.f32.mxu1 %v15833_v0 }
 0x4f0   : > { %v6862_v40 = vpop.f32.mrf.mxu0  ;;  %v7049_v52 = vpop.f32.mrf.mxu1 }
 0x4f1   : > { %v14384_v50 = vadd.f32 %v7049_v52, %v6862_v40  ;;  %v16183_v52 = vld [vmem:[#allocation51_spill] sm:$0xff] }
 0x4f2   : > { %v7124_v13 = vpop.f32.mrf.mxu0  ;;  %8460 = vmatmul.mubr.f32.vlgmr.msra.gmra.mxu0 %v14008_v25  ;;  %v7320_v41 = vpop.f32.mrf.mxu1  ;;  %8656 = vmatmul.mubr.f32.vlgmr.msra.gmra.mxu1 %v14027_v7 }
 0x4f3   : > { %v7125_v58 = vadd.f32 %v7124_v13, %v14097_v12  ;;  %8834 = vmatpush1.msra.mxu0 %v16182_v9  ;;  %9013 = vmatpush1.msra.mxu1 %v16131_v36  ;;  %v16184_v13 = vld [vmem:[#allocation54_spill] sm:$0xff] }
 0x4f4   : > { %v7126_v42 = vpop.f32.mrf.mxu0  ;;  %8465 = vmatprep.mubr.f32.mxu0 %v15833_v0  ;;  %v7322_v22 = vpop.f32.mrf.mxu1  ;;  %8661 = vmatprep.mubr.f32.mxu1 %v15833_v0 }
 0x4f5   : > { %v14392_v44 = vadd.f32 %v7320_v41, %v7125_v58  ;;  %v7127_v40 = vadd.f32 %v7126_v42, %v14109_v33  ;;  %9190 = vmatprep.subr.mxu0 %v16183_v52  ;;  %9437 = vmatprep.subr.mxu1 %v16184_v13 }
 0x4f6   : > { %v7132_v12 = vpop.f32.mrf.mxu0  ;;  %8468 = vmatmul.mubr.f32.gmra.mxu0 %v14030_v46  ;;  %v7329_v7 = vpop.f32.mrf.mxu1  ;;  %8665 = vmatmul.mubr.f32.gmra.mxu1 %v14053_v19 }
 0x4f7   : > { %v14399_v9 = vadd.f32 %v7322_v22, %v7127_v40  ;;  %v7133_v36 = vadd.f32 %v7132_v12, %v14123_v31  ;;  %8473 = vmatprep.mubr.f32.mxu0 %v15833_v0  ;;  %8670 = vmatprep.mubr.f32.mxu1 %v15833_v0 }
 0x4f8   : > { %v7134_v33 = vpop.f32.mrf.mxu0  ;;  %v7331_v58 = vpop.f32.mrf.mxu1 }
 0x4f9   : > { %v14405_v42 = vadd.f32 %v7329_v7, %v7133_v36  ;;  %v7135_v41 = vadd.f32 %v7134_v33, %v14133_v8 }
 0x4fa   : > { %v7140_v46 = vpop.f32.mrf.mxu0  ;;  %8476 = vmatmul.mubr.f32.gmra.mxu0 %v14038_v61  ;;  %v7338_v22 = vpop.f32.mrf.mxu1  ;;  %8674 = vmatmul.mubr.f32.gmra.mxu1 %v14060_v6 }
 0x4fb   : > { %v14409_v40 = vadd.f32 %v7331_v58, %v7135_v41  ;;  %v7141_v31 = vadd.f32 %v7140_v46, %v14144_v32  ;;  %8481 = vmatprep.mubr.f32.mxu0 %v15833_v0  ;;  %8679 = vmatprep.mubr.f32.mxu1 %v15833_v0 }
 0x4fc   : > { %v7142_v12 = vpop.f32.mrf.mxu0  ;;  %v7340_v13 = vpop.f32.mrf.mxu1 }
 0x4fd   : > { %v14415_v7 = vadd.f32 %v7338_v22, %v7141_v31  ;;  %v7143_v8 = vadd.f32 %v7142_v12, %v14156_v30 }
 0x4fe   : > { %v7148_v36 = vpop.f32.mrf.mxu0  ;;  %8484 = vmatmul.mubr.f32.gmra.mxu0 %v14063_v21  ;;  %v7347_v32 = vpop.f32.mrf.mxu1  ;;  %8683 = vmatmul.mubr.f32.gmra.mxu1 %v14083_v23 }
 0x4ff   : > { %v14419_v33 = vadd.f32 %v7340_v13, %v7143_v8  ;;  %v7149_v46 = vadd.f32 %v7148_v36, %v14166_v16  ;;  %8489 = vmatprep.mubr.f32.mxu0 %v15833_v0  ;;  %8688 = vmatprep.mubr.f32.mxu1 %v15833_v0 }
 0x500   : > { %v7150_v41 = vpop.f32.mrf.mxu0  ;;  %v7349_v31 = vpop.f32.mrf.mxu1 }
 0x501   : > { %v14425_v58 = vadd.f32 %v7347_v32, %v7149_v46  ;;  %v7151_v30 = vadd.f32 %v7150_v41, %v14178_v38 }
 0x502   : > { %v7156_v22 = vpop.f32.mrf.mxu0  ;;  %8492 = vmatmul.mubr.f32.gmra.mxu0 %v14089_v49  ;;  %v7356_v8 = vpop.f32.mrf.mxu1  ;;  %8692 = vmatmul.mubr.f32.gmra.mxu1 %v14113_v17  ;;  %v16201_v49 = vld [vmem:[#allocation41_spill] sm:$0xff] }
 0x503   : > { %v14429_v12 = vadd.f32 %v7349_v31, %v7151_v30  ;;  %v7157_v16 = vadd.f32 %v7156_v22, %v14189_v34  ;;  %8497 = vmatprep.mubr.f32.mxu0 %v15833_v0  ;;  %8697 = vmatprep.mubr.f32.mxu1 %v15833_v0 }
 0x504   : > { %v7158_v13 = vpop.f32.mrf.mxu0  ;;  %v7358_v46 = vpop.f32.mrf.mxu1 }
 0x505   : > { %v14435_v36 = vadd.f32 %v7356_v8, %v7157_v16  ;;  %v7159_v38 = vadd.f32 %v7158_v13, %v14199_v2 }
 0x506   : > { %v7164_v32 = vpop.f32.mrf.mxu0  ;;  %8500 = vmatmul.mubr.f32.gmra.mxu0 %v14116_v10  ;;  %v7365_v30 = vpop.f32.mrf.mxu1  ;;  %8701 = vmatmul.mubr.f32.gmra.mxu1 %v14139_v56 }
 0x507   : > { %v14439_v41 = vadd.f32 %v7358_v46, %v7159_v38  ;;  %v7165_v34 = vadd.f32 %v7164_v32, %v14211_v43  ;;  %8505 = vmatprep.mubr.f32.mxu0 %v15833_v0  ;;  %8706 = vmatprep.mubr.f32.mxu1 %v15833_v0 }
 0x508   : > { %v7166_v31 = vpop.f32.mrf.mxu0  ;;  %v7367_v16 = vpop.f32.mrf.mxu1 }
 0x509   : > { %v14445_v22 = vadd.f32 %v7365_v30, %v7165_v34  ;;  %v7167_v2 = vadd.f32 %v7166_v31, %v14220_v24 }
 0x50a   : > { %v7172_v8 = vpop.f32.mrf.mxu0  ;;  %8508 = vmatmul.mubr.f32.gmra.mxu0 %v14129_v27  ;;  %v7374_v38 = vpop.f32.mrf.mxu1  ;;  %8710 = vmatmul.mubr.f32.gmra.mxu1 %v14149_v26  ;;  %v16200_v27 = vld [vmem:[#allocation63_spill] sm:$0xff] }
 0x50b   : > { %v14449_v13 = vadd.f32 %v7367_v16, %v7167_v2  ;;  %v7173_v43 = vadd.f32 %v7172_v8, %v14232_v29  ;;  %8513 = vmatprep.mubr.f32.mxu0 %v15833_v0  ;;  %8715 = vmatprep.mubr.f32.mxu1 %v15833_v0 }
 0x50c   : > { %v7174_v46 = vpop.f32.mrf.mxu0  ;;  %v7376_v34 = vpop.f32.mrf.mxu1 }
 0x50d   : > { %v14455_v32 = vadd.f32 %v7374_v38, %v7173_v43  ;;  %v7175_v24 = vadd.f32 %v7174_v46, %v14241_v28 }
 0x50e   : > { %v7180_v30 = vpop.f32.mrf.mxu0  ;;  %8516 = vmatmul.mubr.f32.gmra.mxu0 %v14152_v51  ;;  %v7383_v2 = vpop.f32.mrf.mxu1  ;;  %8719 = vmatmul.mubr.f32.gmra.mxu1 %v14173_v54  ;;  %v16199_v54 = vld [vmem:[#allocation52_spill] sm:$0xff] }
 0x50f   : > { %v14459_v31 = vadd.f32 %v7376_v34, %v7175_v24  ;;  %v7181_v29 = vadd.f32 %v7180_v30, %v14254_v4  ;;  %8521 = vmatprep.mubr.f32.mxu0 %v15833_v0  ;;  %8724 = vmatprep.mubr.f32.mxu1 %v15833_v0 }
 0x510   : > { %v7182_v16 = vpop.f32.mrf.mxu0  ;;  %v7385_v43 = vpop.f32.mrf.mxu1 }
 0x511   : > { %v14465_v8 = vadd.f32 %v7383_v2, %v7181_v29  ;;  %v7183_v28 = vadd.f32 %v7182_v16, %v14264_v59 }
 0x512   : > { %v7188_v38 = vpop.f32.mrf.mxu0  ;;  %8524 = vmatmul.mubr.f32.gmra.mxu0 %v14176_v62  ;;  %v7392_v24 = vpop.f32.mrf.mxu1  ;;  %8728 = vmatmul.mubr.f32.gmra.mxu1 %v14197_v45  ;;  %v16198_v45 = vld [vmem:[#allocation58_spill] sm:$0xff] }
 0x513   : > { %v14469_v46 = vadd.f32 %v7385_v43, %v7183_v28  ;;  %v7189_v4 = vadd.f32 %v7188_v38, %v14276_v15  ;;  %8529 = vmatprep.mubr.f32.mxu0 %v15833_v0  ;;  %8733 = vmatprep.mubr.f32.mxu1 %v15833_v0 }
 0x514   : > { %v7190_v34 = vpop.f32.mrf.mxu0  ;;  %v7394_v29 = vpop.f32.mrf.mxu1 }
 0x515   : > { %v14475_v30 = vadd.f32 %v7392_v24, %v7189_v4  ;;  %v7191_v59 = vadd.f32 %v7190_v34, %v14285_v48 }
 0x516   : > { %v7196_v2 = vpop.f32.mrf.mxu0  ;;  %8532 = vmatmul.mubr.f32.gmra.mxu0 %v14203_v60  ;;  %v7401_v28 = vpop.f32.mrf.mxu1  ;;  %8737 = vmatmul.mubr.f32.gmra.mxu1 %v14224_v39  ;;  %v16187_v60 = vld [vmem:[#allocation74_spill] sm:$0xff] }
 0x517   : > { %v14479_v16 = vadd.f32 %v7394_v29, %v7191_v59  ;;  %v7197_v15 = vadd.f32 %v7196_v2, %v14298_v37  ;;  %8537 = vmatprep.mubr.f32.mxu0 %v15833_v0  ;;  %8742 = vmatprep.mubr.f32.mxu1 %v15833_v0  ;;  %v16185_v29 = vld [vmem:[#allocation36_spill] sm:$0xff] }
 0x518   : > { %v7198_v43 = vpop.f32.mrf.mxu0  ;;  %v7403_v4 = vpop.f32.mrf.mxu1 }
 0x519   : > { %v14485_v38 = vadd.f32 %v7401_v28, %v7197_v15  ;;  %v7199_v48 = vadd.f32 %v7198_v43, %v14305_v55  ;;  %v16186_v28 = vld [vmem:[#allocation30_spill] sm:$0xff] }
 0x51a   : > { %v7204_v24 = vpop.f32.mrf.mxu0  ;;  %8540 = vmatmul.mubr.f32.gmra.mxu0 %v14227_v20  ;;  %v7410_v59 = vpop.f32.mrf.mxu1  ;;  %8746 = vmatmul.mubr.f32.gmra.mxu1 %v16185_v29  ;;  %v16189_v20 = vld [vmem:[#allocation35_spill] sm:$0xff] }
 0x51b   : > { %v14489_v34 = vadd.f32 %v7403_v4, %v7199_v48  ;;  %v7205_v37 = vadd.f32 %v7204_v24, %v14318_v11  ;;  %8545 = vmatprep.mubr.f32.mxu0 %v15833_v0  ;;  %8751 = vmatprep.mubr.f32.mxu1 %v15833_v0  ;;  %v16188_v24 = vld [vmem:[#allocation25_spill] sm:$0xff] }
 0x51c   : > { %v7206_v2 = vpop.f32.mrf.mxu0  ;;  %v7412_v43 = vpop.f32.mrf.mxu1 }
 0x51d   : > { %v14495_v15 = vadd.f32 %v7410_v59, %v7205_v37  ;;  %v7207_v55 = vadd.f32 %v7206_v2, %v16186_v28 }
 0x51e   : > { %v7212_v39 = vpop.f32.mrf.mxu0  ;;  %8548 = vmatmul.mubr.f32.gmra.mxu0 %v16187_v60  ;;  %v7419_v4 = vpop.f32.mrf.mxu1  ;;  %8755 = vmatmul.mubr.f32.gmra.mxu1 %v16188_v24  ;;  %v16191_v60 = vld [vmem:[#allocation31_spill] sm:$0xff] }
 0x51f   : > { %v14499_v48 = vadd.f32 %v7412_v43, %v7207_v55  ;;  %v7213_v11 = vadd.f32 %v7212_v39, %v14336_v35  ;;  %8553 = vmatprep.mubr.f32.mxu0 %v15833_v0  ;;  %8760 = vmatprep.mubr.f32.mxu1 %v15833_v0  ;;  %v16190_v43 = vld [vmem:[#allocation29_spill] sm:$0xff] }
 0x520   : > { %v7214_v29 = vpop.f32.mrf.mxu0  ;;  %v7421_v2 = vpop.f32.mrf.mxu1 }
 0x521   : > { %v14505_v37 = vadd.f32 %v7419_v4, %v7213_v11  ;;  %v7215_v59 = vadd.f32 %v7214_v29, %v14339_v18 }
 0x522   : > { %v7220_v28 = vpop.f32.mrf.mxu0  ;;  %8556 = vmatmul.mubr.f32.gmra.mxu0 %v16189_v20  ;;  %v7428_v35 = vpop.f32.mrf.mxu1  ;;  %8764 = vmatmul.mubr.f32.gmra.mxu1 %v16190_v43 }
 0x523   : > { %v14509_v55 = vadd.f32 %v7421_v2, %v7215_v59  ;;  %v7221_v39 = vadd.f32 %v7220_v28, %v14351_v63  ;;  %8561 = vmatprep.mubr.f32.mxu0 %v15833_v0  ;;  %8769 = vmatprep.mubr.f32.mxu1 %v15833_v0  ;;  %v16192_v28 = vld [vmem:[#allocation67_spill] sm:$0xff] }
 0x524   : > { %v7222_v24 = vpop.f32.mrf.mxu0  ;;  %v7430_v29 = vpop.f32.mrf.mxu1 }
 0x525   : > { %v14515_v11 = vadd.f32 %v7428_v35, %v7221_v39  ;;  %v7223_v18 = vadd.f32 %v7222_v24, %v14354_v53 }
 0x526   : > { %v7228_v4 = vpop.f32.mrf.mxu0  ;;  %8564 = vmatmul.mubr.f32.gmra.mxu0 %v16191_v60  ;;  %v7437_v2 = vpop.f32.mrf.mxu1  ;;  %8773 = vmatmul.mubr.f32.gmra.mxu1 %v16192_v28  ;;  %v16193_v60 = vld [vmem:[#allocation75_spill] sm:$0xff] }
 0x527   : > { %v14519_v59 = vadd.f32 %v7430_v29, %v7223_v18  ;;  %v7229_v63 = vadd.f32 %v7228_v4, %v14363_v1  ;;  %8569 = vmatprep.mubr.f32.mxu0 %v15833_v0  ;;  %8778 = vmatprep.mubr.f32.mxu1 %v15833_v0  ;;  %v16194_v29 = vld [vmem:[#allocation28_spill] sm:$0xff]  ;;  %v16197_v28 = vld [vmem:[#allocation55_spill] sm:$0xff] }
 0x528   : > { %v7230_v43 = vpop.f32.mrf.mxu0  ;;  %v7439_v24 = vpop.f32.mrf.mxu1 }
 0x529   : > { %v14525_v39 = vadd.f32 %v7437_v2, %v7229_v63  ;;  %v7231_v53 = vadd.f32 %v7230_v43, %v14366_v14  ;;  %v16195_v2 = vld [vmem:[#allocation83_spill] sm:$0xff] }
 0x52a   : > { %v14528_v35 = vpop.f32.mrf.mxu0  ;;  %8572 = vmatmul.mubr.f32.gmra.mxu0 %v16193_v60  ;;  %v14533_v1 = vpop.f32.mrf.mxu1  ;;  %8782 = vmatmul.mubr.f32.gmra.mxu1 %v16194_v29  ;;  %v16196_v60 = vld [vmem:[#allocation18_spill] sm:$0xff] }
 0x52b   : > { %v14531_v18 = vadd.f32 %v7439_v24, %v7231_v53  ;;  %8577 = vmatprep.mubr.f32.mxu0 %v15833_v0  ;;  %8787 = vmatprep.mubr.f32.mxu1 %v15833_v0 }
 0x52c   : > { %v14537_v4 = vpop.f32.mrf.mxu0  ;;  %v14540_v63 = vpop.f32.mrf.mxu1 }
 0x52e   : > { %v14542_v14 = vpop.f32.mrf.mxu0  ;;  %8580 = vmatmul.mubr.f32.gmra.mxu0 %v14332_v3  ;;  %v14545_v43 = vpop.f32.mrf.mxu1  ;;  %8791 = vmatmul.mubr.f32.gmra.mxu1 %v16195_v2 }
 0x52f   : > { %8867 = vmatprep.mubr.f32.mxu0 %v15833_v0  ;;  %9046 = vmatprep.mubr.f32.mxu1 %v15833_v0 }
 0x530   : > { %v14549_v53 = vpop.f32.mrf.mxu0  ;;  %v14552_v24 = vpop.f32.mrf.mxu1 }
 0x532   : > { %v7533_v29 = vpop.f32.mrf.mxu0  ;;  %8869 = vmatmul.mubr.f32.vlgmr.msra.gmra.mxu0 %v16196_v60  ;;  %v7712_v20 = vpop.f32.mrf.mxu1  ;;  %9048 = vmatmul.mubr.f32.vlgmr.msra.gmra.mxu1 %v16196_v60 }
 0x533   : > { %9192 = vmatpush1.msra.mxu0 %v16197_v28  ;;  %9443 = vmatpush1.msra.mxu1 %v16198_v45  ;;  %v7534_v2 = vadd.f32 %v7533_v29, %v14392_v44 }
 0x534   : > { %v7535_v3 = vpop.f32.mrf.mxu0  ;;  %8874 = vmatprep.mubr.f32.mxu0 %v15833_v0  ;;  %v7714_v62 = vpop.f32.mrf.mxu1  ;;  %9053 = vmatprep.mubr.f32.mxu1 %v15833_v0 }
 0x535   : > { %9621 = vmatprep.subr.mxu0 %v16199_v54  ;;  %v7536_v51 = vadd.f32 %v7535_v3, %v14399_v9  ;;  %9817 = vmatprep.subr.mxu1 %v16183_v52  ;;  %v7713_v44 = vadd.f32 %v7712_v20, %v7534_v2 }
 0x536   : > { %v7540_v26 = vpop.f32.mrf.mxu0  ;;  %8876 = vmatmul.mubr.f32.gmra.mxu0 %v16200_v27  ;;  %v7719_v10 = vpop.f32.mrf.mxu1  ;;  %9055 = vmatmul.mubr.f32.gmra.mxu1 %v16200_v27 }
 0x537   : > { %v7541_v56 = vadd.f32 %v7540_v26, %v14405_v42  ;;  %8881 = vmatprep.mubr.f32.mxu0 %v15833_v0  ;;  %9060 = vmatprep.mubr.f32.mxu1 %v15833_v0  ;;  %v7715_v9 = vadd.f32 %v7714_v62, %v7536_v51 }
 0x538   : > { %v7542_v45 = vpop.f32.mrf.mxu0  ;;  %v7721_v3 = vpop.f32.mrf.mxu1 }
 0x539   : > { %v7720_v29 = vadd.f32 %v7719_v10, %v7541_v56  ;;  %v7543_v54 = vadd.f32 %v7542_v45, %v14409_v40  ;;  %v16202_v40 = vld [vmem:[#allocation82_spill] sm:$0xff] }
 0x53a   : > { %v7547_v17 = vpop.f32.mrf.mxu0  ;;  %8883 = vmatmul.mubr.f32.gmra.mxu0 %v16201_v49  ;;  %v7726_v42 = vpop.f32.mrf.mxu1  ;;  %9062 = vmatmul.mubr.f32.gmra.mxu1 %v16201_v49 }
 0x53b   : > { %v7824_v23 = vmin.f32 %v7713_v44, %v7720_v29  ;;  %v7722_v21 = vadd.f32 %v7721_v3, %v7543_v54  ;;  %v7548_v26 = vadd.f32 %v7547_v17, %v14415_v7  ;;  %8888 = vmatprep.mubr.f32.mxu0 %v15833_v0  ;;  %9067 = vmatprep.mubr.f32.mxu1 %v15833_v0  ;;  %v16203_v3 = vld [vmem:[#allocation22_spill] sm:$0xff] }
 0x53c   : > { %v7549_v6 = vpop.f32.mrf.mxu0  ;;  %v7728_v51 = vpop.f32.mrf.mxu1 }
 0x53d   : > { %v7825_v10 = vmin.f32 %v7715_v9, %v7722_v21  ;;  %v7727_v56 = vadd.f32 %v7726_v42, %v7548_v26  ;;  %v7550_v20 = vadd.f32 %v7549_v6, %v14419_v33 }
 0x53e   : > { %v7554_v62 = vpop.f32.mrf.mxu0  ;;  %8890 = vmatmul.mubr.f32.gmra.mxu0 %v16202_v40  ;;  %v7733_v7 = vpop.f32.mrf.mxu1  ;;  %9069 = vmatmul.mubr.f32.gmra.mxu1 %v16202_v40 }
 0x53f   : > { %v7828_v2 = vmin.f32 %v7824_v23, %v7727_v56  ;;  %v7729_v45 = vadd.f32 %v7728_v51, %v7550_v20  ;;  %v7555_v17 = vadd.f32 %v7554_v62, %v14425_v58  ;;  %8895 = vmatprep.mubr.f32.mxu0 %v15833_v0  ;;  %9074 = vmatprep.mubr.f32.mxu1 %v15833_v0  ;;  %v16204_v62 = vld [vmem:[#allocation48_spill] sm:$0xff] }
 0x540   : > { %v7556_v44 = vpop.f32.mrf.mxu0  ;;  %v7735_v33 = vpop.f32.mrf.mxu1 }
 0x541   : > { %v7829_v21 = vmin.f32 %v7825_v10, %v7729_v45  ;;  %v7734_v29 = vadd.f32 %v7733_v7, %v7555_v17  ;;  %v7557_v6 = vadd.f32 %v7556_v44, %v14429_v12 }
 0x542   : > { %v7561_v54 = vpop.f32.mrf.mxu0  ;;  %8897 = vmatmul.mubr.f32.gmra.mxu0 %v16203_v3  ;;  %v7740_v26 = vpop.f32.mrf.mxu1  ;;  %9076 = vmatmul.mubr.f32.gmra.mxu1 %v16203_v3 }
 0x543   : > { %v7832_v23 = vmin.f32 %v7828_v2, %v7734_v29  ;;  %v7736_v9 = vadd.f32 %v7735_v33, %v7557_v6  ;;  %v7562_v58 = vadd.f32 %v7561_v54, %v14435_v36  ;;  %8902 = vmatprep.mubr.f32.mxu0 %v15833_v0  ;;  %9081 = vmatprep.mubr.f32.mxu1 %v15833_v0  ;;  %v16205_v33 = vld [vmem:[#allocation84_spill] sm:$0xff] }
 0x544   : > { %v7563_v42 = vpop.f32.mrf.mxu0  ;;  %v7742_v20 = vpop.f32.mrf.mxu1 }
 0x545   : > { %v7833_v10 = vmin.f32 %v7829_v21, %v7736_v9  ;;  %v7741_v56 = vadd.f32 %v7740_v26, %v7562_v58  ;;  %v7564_v12 = vadd.f32 %v7563_v42, %v14439_v41 }
 0x546   : > { %v7568_v51 = vpop.f32.mrf.mxu0  ;;  %8904 = vmatmul.mubr.f32.gmra.mxu0 %v16204_v62  ;;  %v7747_v17 = vpop.f32.mrf.mxu1  ;;  %9083 = vmatmul.mubr.f32.gmra.mxu1 %v16204_v62 }
 0x547   : > { %v7836_v2 = vmin.f32 %v7832_v23, %v7741_v56  ;;  %v7743_v45 = vadd.f32 %v7742_v20, %v7564_v12  ;;  %v7569_v36 = vadd.f32 %v7568_v51, %v14445_v22  ;;  %8909 = vmatprep.mubr.f32.mxu0 %v15833_v0  ;;  %9088 = vmatprep.mubr.f32.mxu1 %v15833_v0  ;;  %v16206_v12 = vld [vmem:[#allocation61_spill] sm:$0xff] }
 0x548   : > { %v7570_v7 = vpop.f32.mrf.mxu0  ;;  %v7749_v29 = vpop.f32.mrf.mxu1 }
 0x549   : > { %v7837_v44 = vmin.f32 %v7833_v10, %v7743_v45  ;;  %v7748_v21 = vadd.f32 %v7747_v17, %v7569_v36  ;;  %v7571_v41 = vadd.f32 %v7570_v7, %v14449_v13 }
 0x54a   : > { %v7575_v6 = vpop.f32.mrf.mxu0  ;;  %8911 = vmatmul.mubr.f32.gmra.mxu0 %v16205_v33  ;;  %v7754_v9 = vpop.f32.mrf.mxu1  ;;  %9090 = vmatmul.mubr.f32.gmra.mxu1 %v16205_v33 }
 0x54b   : > { %v7840_v54 = vmin.f32 %v7836_v2, %v7748_v21  ;;  %v7750_v23 = vadd.f32 %v7749_v29, %v7571_v41  ;;  %v7576_v22 = vadd.f32 %v7575_v6, %v14455_v32  ;;  %8916 = vmatprep.mubr.f32.mxu0 %v15833_v0  ;;  %9095 = vmatprep.mubr.f32.mxu1 %v15833_v0  ;;  %v16207_v21 = vld [vmem:[#allocation73_spill] sm:$0xff] }
 0x54c   : > { %v7577_v58 = vpop.f32.mrf.mxu0  ;;  %v7756_v10 = vpop.f32.mrf.mxu1 }
 0x54d   : > { %v7841_v26 = vmin.f32 %v7837_v44, %v7750_v23  ;;  %v7755_v42 = vadd.f32 %v7754_v9, %v7576_v22  ;;  %v7578_v13 = vadd.f32 %v7577_v58, %v14459_v31 }
 0x54e   : > { %v7582_v56 = vpop.f32.mrf.mxu0  ;;  %8918 = vmatmul.mubr.f32.gmra.mxu0 %v16206_v12  ;;  %v7761_v2 = vpop.f32.mrf.mxu1  ;;  %9097 = vmatmul.mubr.f32.gmra.mxu1 %v16206_v12 }
 0x54f   : > { %v7844_v20 = vmin.f32 %v7840_v54, %v7755_v42  ;;  %v7757_v51 = vadd.f32 %v7756_v10, %v7578_v13  ;;  %v7583_v32 = vadd.f32 %v7582_v56, %v14465_v8  ;;  %8923 = vmatprep.mubr.f32.mxu0 %v15833_v0  ;;  %9102 = vmatprep.mubr.f32.mxu1 %v15833_v0 }
 0x550   : > { %v7584_v45 = vpop.f32.mrf.mxu0  ;;  %v7763_v7 = vpop.f32.mrf.mxu1 }
 0x551   : > { %v7845_v36 = vmin.f32 %v7841_v26, %v7757_v51  ;;  %v7762_v17 = vadd.f32 %v7761_v2, %v7583_v32  ;;  %v7585_v31 = vadd.f32 %v7584_v45, %v14469_v46  ;;  %v16208_v26 = vld [vmem:[#allocation19_spill] sm:$0xff]  ;;  %v16209_v45 = vld [vmem:[#allocation37_spill] sm:$0xff] }
 0x552   : > { %v7589_v44 = vpop.f32.mrf.mxu0  ;;  %8925 = vmatmul.mubr.f32.gmra.mxu0 %v16207_v21  ;;  %v7768_v6 = vpop.f32.mrf.mxu1  ;;  %9104 = vmatmul.mubr.f32.gmra.mxu1 %v16207_v21 }
 0x553   : > { %v7848_v41 = vmin.f32 %v7844_v20, %v7762_v17  ;;  %v7764_v29 = vadd.f32 %v7763_v7, %v7585_v31  ;;  %v7590_v8 = vadd.f32 %v7589_v44, %v14475_v30  ;;  %8930 = vmatprep.mubr.f32.mxu0 %v15833_v0  ;;  %9109 = vmatprep.mubr.f32.mxu1 %v15833_v0 }
 0x554   : > { %v7591_v54 = vpop.f32.mrf.mxu0  ;;  %v7770_v9 = vpop.f32.mrf.mxu1 }
 0x555   : > { %v7849_v23 = vmin.f32 %v7845_v36, %v7764_v29  ;;  %v7769_v22 = vadd.f32 %v7768_v6, %v7590_v8  ;;  %v7592_v46 = vadd.f32 %v7591_v54, %v14479_v16  ;;  %v16210_v6 = vld [vmem:[#allocation27_spill] sm:$0xff] }
 0x556   : > { %v7596_v58 = vpop.f32.mrf.mxu0  ;;  %8932 = vmatmul.mubr.f32.gmra.mxu0 %v16208_v26  ;;  %v7775_v10 = vpop.f32.mrf.mxu1  ;;  %9111 = vmatmul.mubr.f32.gmra.mxu1 %v16208_v26 }
 0x557   : > { %v7852_v42 = vmin.f32 %v7848_v41, %v7769_v22  ;;  %v7771_v13 = vadd.f32 %v7770_v9, %v7592_v46  ;;  %v7597_v30 = vadd.f32 %v7596_v58, %v14485_v38  ;;  %8937 = vmatprep.mubr.f32.mxu0 %v15833_v0  ;;  %9116 = vmatprep.mubr.f32.mxu1 %v15833_v0 }
 0x558   : > { %v7598_v56 = vpop.f32.mrf.mxu0  ;;  %v7777_v32 = vpop.f32.mrf.mxu1 }
 0x559   : > { %v7853_v20 = vmin.f32 %v7849_v23, %v7771_v13  ;;  %v7776_v51 = vadd.f32 %v7775_v10, %v7597_v30  ;;  %v7599_v16 = vadd.f32 %v7598_v56, %v14489_v34  ;;  %v16211_v30 = vld [vmem:[#allocation78_spill] sm:$0xff] }
 0x55a   : > { %v7603_v2 = vpop.f32.mrf.mxu0  ;;  %8939 = vmatmul.mubr.f32.gmra.mxu0 %v16209_v45  ;;  %v7782_v31 = vpop.f32.mrf.mxu1  ;;  %9118 = vmatmul.mubr.f32.gmra.mxu1 %v16209_v45 }
 0x55b   : > { %v7856_v36 = vmin.f32 %v7852_v42, %v7776_v51  ;;  %v7778_v17 = vadd.f32 %v7777_v32, %v7599_v16  ;;  %v7604_v38 = vadd.f32 %v7603_v2, %v14495_v15  ;;  %8944 = vmatprep.mubr.f32.mxu0 %v15833_v0  ;;  %9123 = vmatprep.mubr.f32.mxu1 %v15833_v0 }
 0x55c   : > { %v7605_v7 = vpop.f32.mrf.mxu0  ;;  %v7784_v29 = vpop.f32.mrf.mxu1  ;;  %v7237_v51 = vadd.f32 %v14528_v35, %v14373_v5 }
 0x55d   : > { %v7857_v44 = vmin.f32 %v7853_v20, %v7778_v17  ;;  %v7783_v41 = vadd.f32 %v7782_v31, %v7604_v38  ;;  %v7606_v34 = vadd.f32 %v7605_v7, %v14499_v48  ;;  %v7239_v17 = vadd.f32 %v14537_v4, %v14376_v47  ;;  %v16212_v38 = vld [vmem:[#allocation14_spill] sm:$0xff] }
 0x55e   : > { %v7610_v8 = vpop.f32.mrf.mxu0  ;;  %8946 = vmatmul.mubr.f32.gmra.mxu0 %v16210_v6  ;;  %v7789_v22 = vpop.f32.mrf.mxu1  ;;  %9125 = vmatmul.mubr.f32.gmra.mxu1 %v16210_v6  ;;  %v7447_v5 = vadd.f32 %v14533_v1, %v7237_v51  ;;  %v7245_v47 = vadd.f32 %v14542_v14, %v14381_v57 }
 0x55f   : > { %v7860_v54 = vmin.f32 %v7856_v36, %v7783_v41  ;;  %v7785_v23 = vadd.f32 %v7784_v29, %v7606_v34  ;;  %v7611_v15 = vadd.f32 %v7610_v8, %v14505_v37  ;;  %8951 = vmatprep.mubr.f32.mxu0 %v15833_v0  ;;  %9130 = vmatprep.mubr.f32.mxu1 %v15833_v0 }
 0x560   : > { %v7612_v46 = vpop.f32.mrf.mxu0  ;;  %v7791_v42 = vpop.f32.mrf.mxu1  ;;  %v7247_v8 = vadd.f32 %v14549_v53, %v14384_v50 }
 0x561   : > { %v7861_v9 = vmin.f32 %v7857_v44, %v7785_v23  ;;  %v7790_v58 = vadd.f32 %v7789_v22, %v7611_v15  ;;  %v7613_v48 = vadd.f32 %v7612_v46, %v14509_v55  ;;  %v16213_v23 = vld [vmem:[#allocation60_spill] sm:$0xff] }
 0x562   : > { %v7617_v13 = vpop.f32.mrf.mxu0  ;;  %8953 = vmatmul.mubr.f32.gmra.mxu0 %v16211_v30  ;;  %v7796_v20 = vpop.f32.mrf.mxu1  ;;  %9132 = vmatmul.mubr.f32.gmra.mxu1 %v16211_v30  ;;  %v7458_v53 = vadd.f32 %v14552_v24, %v7247_v8  ;;  %v16215_v24 = vld [vmem:[#allocation13_spill] sm:$0xff] }
 0x563   : > { %v7864_v10 = vmin.f32 %v7860_v54, %v7790_v58  ;;  %v7792_v56 = vadd.f32 %v7791_v42, %v7613_v48  ;;  %v7618_v37 = vadd.f32 %v7617_v13, %v14515_v11  ;;  %8958 = vmatprep.mubr.f32.mxu0 %v15833_v0  ;;  %9137 = vmatprep.mubr.f32.mxu1 %v15833_v0  ;;  %v16214_v48 = vld [vmem:[#allocation76_spill] sm:$0xff] }
 0x564   : > { %v7619_v16 = vpop.f32.mrf.mxu0  ;;  %v7798_v36 = vpop.f32.mrf.mxu1 }
 0x565   : > { %v7865_v55 = vmin.f32 %v7861_v9, %v7792_v56  ;;  %v7797_v32 = vadd.f32 %v7796_v20, %v7618_v37  ;;  %v7620_v2 = vadd.f32 %v7619_v16, %v14519_v59 }
 0x566   : > { %v7624_v11 = vpop.f32.mrf.mxu0  ;;  %8960 = vmatmul.mubr.f32.gmra.mxu0 %v16212_v38  ;;  %v7803_v41 = vpop.f32.mrf.mxu1  ;;  %9139 = vmatmul.mubr.f32.gmra.mxu1 %v16212_v38 }
 0x567   : > { %v7868_v31 = vmin.f32 %v7864_v10, %v7797_v32  ;;  %v7799_v7 = vadd.f32 %v7798_v36, %v7620_v2  ;;  %v7625_v44 = vadd.f32 %v7624_v11, %v14525_v39  ;;  %8965 = vmatprep.mubr.f32.mxu0 %v15833_v0  ;;  %9144 = vmatprep.mubr.f32.mxu1 %v15833_v0  ;;  %v16216_v36 = vld [vmem:[#allocation56_spill] sm:$0xff]  ;;  %v7884_v11 = vld [vmem:[#allocation2 + $0x18] sm:$0xff] }
 0x568   : > { %v7626_v35 = vpop.f32.mrf.mxu0  ;;  %v7805_v29 = vpop.f32.mrf.mxu1  ;;  %v7449_v39 = vadd.f32 %v14540_v63, %v7239_v17 }
 0x569   : > { %v7869_v59 = vmin.f32 %v7865_v55, %v7799_v7  ;;  %v7804_v4 = vadd.f32 %v7803_v41, %v7625_v44  ;;  %v7627_v34 = vadd.f32 %v7626_v35, %v14531_v18  ;;  %v7456_v18 = vadd.f32 %v14545_v43, %v7245_v47  ;;  %v16217_v35 = vld [vmem:[#allocation53_spill] sm:$0xff]  ;;  %v7885_v47 = vld [vmem:[#allocation2 + $0x8] sm:$0xff] }
 0x56a   : > { %v7631_v54 = vpop.f32.mrf.mxu0  ;;  %8967 = vmatmul.mubr.f32.gmra.mxu0 %v16213_v23  ;;  %v7810_v46 = vpop.f32.mrf.mxu1  ;;  %9146 = vmatmul.mubr.f32.gmra.mxu1 %v16213_v23 }
 0x56b   : > { %v7872_v1 = vmin.f32 %v7868_v31, %v7804_v4  ;;  %v7806_v15 = vadd.f32 %v7805_v29, %v7627_v34  ;;  %v7632_v22 = vadd.f32 %v7631_v54, %v7447_v5  ;;  %8972 = vmatprep.mubr.f32.mxu0 %v15833_v0  ;;  %9151 = vmatprep.mubr.f32.mxu1 %v15833_v0  ;;  %v16218_v34 = vld [vmem:[#allocation59_spill] sm:$0xff] }
 0x56c   : > { %v7633_v57 = vpop.f32.mrf.mxu0  ;;  %v7812_v50 = vpop.f32.mrf.mxu1 }
 0x56d   : > { %v7873_v63 = vmin.f32 %v7869_v59, %v7806_v15  ;;  %v7811_v14 = vadd.f32 %v7810_v46, %v7632_v22  ;;  %v7634_v9 = vadd.f32 %v7633_v57, %v7449_v39  ;;  %v16219_v46 = vld [vmem:[#allocation42_spill] sm:$0xff] }
 0x56e   : > { %v7638_v58 = vpop.f32.mrf.mxu0  ;;  %8974 = vmatmul.mubr.f32.gmra.mxu0 %v16214_v48  ;;  %v7817_v56 = vpop.f32.mrf.mxu1  ;;  %9153 = vmatmul.mubr.f32.gmra.mxu1 %v16214_v48 }
 0x56f   : > { %v7876_v42 = vmin.f32 %v7872_v1, %v7811_v14  ;;  %v7813_v13 = vadd.f32 %v7812_v50, %v7634_v9  ;;  %v7639_v10 = vadd.f32 %v7638_v58, %v7456_v18  ;;  %9225 = vmatprep.mubr.f32.mxu0 %v15833_v0  ;;  %9476 = vmatprep.mubr.f32.mxu1 %v15833_v0  ;;  %v16220_v50 = vld [vmem:[#allocation47_spill] sm:$0xff] }
 0x570   : > { %v7640_v37 = vpop.f32.mrf.mxu0  ;;  %v7819_v16 = vpop.f32.mrf.mxu1 }
 0x571   : > { %v7877_v43 = vmin.f32 %v7873_v63, %v7813_v13  ;;  %v7818_v20 = vadd.f32 %v7817_v56, %v7639_v10  ;;  %v7641_v51 = vadd.f32 %v7640_v37, %v7458_v53  ;;  %v16221_v37 = vld [vmem:[#allocation32_spill] sm:$0xff] }
 0x572   : > { %v8032_v55 = vpop.f32.mrf.mxu0  ;;  %9231 = vmatmul.mubr.f32.vlgmr.msra.gmra.mxu0 %v16215_v24  ;;  %v8279_v17 = vpop.f32.mrf.mxu1  ;;  %9478 = vmatmul.mubr.f32.vlgmr.msra.gmra.mxu1 %v16196_v60 }
 0x573   : > { %v7880_v32 = vmin.f32 %v7876_v42, %v7818_v20  ;;  %v7820_v2 = vadd.f32 %v7819_v16, %v7641_v51  ;;  %9624 = vmatpush1.msra.mxu0 %v16216_v36  ;;  %v14665_v31 = vadd.f32 %v8279_v17, %v8032_v55  ;;  %9819 = vmatpush1.msra.mxu1 %v16197_v28 }
 0x574   : > { %v8034_v7 = vpop.f32.mrf.mxu0  ;;  %9236 = vmatprep.mubr.f32.mxu0 %v15833_v0  ;;  %v8281_v5 = vpop.f32.mrf.mxu1  ;;  %9483 = vmatprep.mubr.f32.mxu1 %v15833_v0 }
 0x575   : > { %v7888_v44 = vmin.f32 %v7884_v11, %v7880_v32  ;;  %v7881_v41 = vmin.f32 %v7877_v43, %v7820_v2  ;;  %10030 = vmatprep.subr.mxu0 %v16217_v35  ;;  %v14671_v59 = vadd.f32 %v8281_v5, %v8034_v7  ;;  %10211 = vmatprep.subr.mxu1 %v16183_v52  ;;  %v16222_v32 = vld [vmem:[#allocation10_spill] sm:$0xff] }
 0x576   : > { %v8043_v4 = vpop.f32.mrf.mxu0  ;;  %9242 = vmatmul.mubr.f32.gmra.mxu0 %v16218_v34  ;;  %v8286_v39 = vpop.f32.mrf.mxu1  ;;  %9485 = vmatmul.mubr.f32.gmra.mxu1 %v16200_v27 }
 0x577   : > { %7892 = vst [vmem:[#allocation2 + $0x18] sm:$0xff] %v7888_v44  ;;  %v7889_v29 = vmin.f32 %v7885_v47, %v7881_v41  ;;  %9247 = vmatprep.mubr.f32.mxu0 %v15833_v0  ;;  %v14677_v8 = vadd.f32 %v8286_v39, %v8043_v4  ;;  %9490 = vmatprep.mubr.f32.mxu1 %v15833_v0  ;;  %v16223_v41 = vld [vmem:[#allocation26_spill] sm:$0xff]  ;;  %v16224_v39 = vld [vmem:[#allocation24_spill] sm:$0xff] }
 0x578   : > { %v8045_v54 = vpop.f32.mrf.mxu0  ;;  %v8288_v1 = vpop.f32.mrf.mxu1 }
 0x579   : > { %7893 = vst [vmem:[#allocation2 + $0x8] sm:$0xff] %v7889_v29  ;;  %v14680_v15 = vadd.f32 %v8288_v1, %v8045_v54 }
 0x57a   : > { %v8054_v22 = vpop.f32.mrf.mxu0  ;;  %9253 = vmatmul.mubr.f32.gmra.mxu0 %v16219_v46  ;;  %v8293_v52 = vpop.f32.mrf.mxu1  ;;  %9492 = vmatmul.mubr.f32.gmra.mxu1 %v16201_v49 }
 0x57b   : > { %9258 = vmatprep.mubr.f32.mxu0 %v15833_v0  ;;  %v14685_v57 = vadd.f32 %v8293_v52, %v8054_v22  ;;  %9497 = vmatprep.mubr.f32.mxu1 %v15833_v0 }
 0x57c   : > { %v8056_v18 = vpop.f32.mrf.mxu0  ;;  %v8295_v63 = vpop.f32.mrf.mxu1 }
 0x57d   : > { %v14688_v14 = vadd.f32 %v8295_v63, %v8056_v18  ;;  %v16225_v63 = vld [vmem:[#allocation85_spill] sm:$0xff] }
 0x57e   : > { %v8065_v9 = vpop.f32.mrf.mxu0  ;;  %9264 = vmatmul.mubr.f32.gmra.mxu0 %v16220_v50  ;;  %v8300_v53 = vpop.f32.mrf.mxu1  ;;  %9499 = vmatmul.mubr.f32.gmra.mxu1 %v16202_v40 }
 0x57f   : > { %9269 = vmatprep.mubr.f32.mxu0 %v15833_v0  ;;  %v14693_v58 = vadd.f32 %v8300_v53, %v8065_v9  ;;  %9504 = vmatprep.mubr.f32.mxu1 %v15833_v0 }
 0x580   : > { %v8067_v42 = vpop.f32.mrf.mxu0  ;;  %v8302_v13 = vpop.f32.mrf.mxu1 }
 0x581   : > { %v14696_v10 = vadd.f32 %v8302_v13, %v8067_v42 }
 0x582   : > { %v8076_v56 = vpop.f32.mrf.mxu0  ;;  %9275 = vmatmul.mubr.f32.gmra.mxu0 %v16221_v37  ;;  %v8307_v43 = vpop.f32.mrf.mxu1  ;;  %9506 = vmatmul.mubr.f32.gmra.mxu1 %v16203_v3  ;;  %v16226_v37 = vld [vmem:[#allocation50_spill] sm:$0xff] }
 0x583   : > { %9280 = vmatprep.mubr.f32.mxu0 %v15833_v0  ;;  %v14701_v20 = vadd.f32 %v8307_v43, %v8076_v56  ;;  %9511 = vmatprep.mubr.f32.mxu1 %v15833_v0 }
 0x584   : > { %v8078_v51 = vpop.f32.mrf.mxu0  ;;  %v8309_v16 = vpop.f32.mrf.mxu1 }
 0x585   : > { %v14704_v55 = vadd.f32 %v8309_v16, %v8078_v51 }
 0x586   : > { %v8087_v24 = vpop.f32.mrf.mxu0  ;;  %9286 = vmatmul.mubr.f32.gmra.mxu0 %v16222_v32  ;;  %v8314_v2 = vpop.f32.mrf.mxu1  ;;  %9513 = vmatmul.mubr.f32.gmra.mxu1 %v16204_v62 }
 0x587   : > { %9291 = vmatprep.mubr.f32.mxu0 %v15833_v0  ;;  %v14709_v36 = vadd.f32 %v8314_v2, %v8087_v24  ;;  %9518 = vmatprep.mubr.f32.mxu1 %v15833_v0 }
 0x588   : > { %v8089_v17 = vpop.f32.mrf.mxu0  ;;  %v8316_v11 = vpop.f32.mrf.mxu1 }
 0x589   : > { %v14712_v7 = vadd.f32 %v8316_v11, %v8089_v17  ;;  %v16227_v17 = vld [vmem:[#allocation15_spill] sm:$0xff] }
 0x58a   : > { %v8098_v44 = vpop.f32.mrf.mxu0  ;;  %9297 = vmatmul.mubr.f32.gmra.mxu0 %v16223_v41  ;;  %v8321_v5 = vpop.f32.mrf.mxu1  ;;  %9520 = vmatmul.mubr.f32.gmra.mxu1 %v16205_v33 }
 0x58b   : > { %9302 = vmatprep.mubr.f32.mxu0 %v15833_v0  ;;  %v14717_v35 = vadd.f32 %v8321_v5, %v8098_v44  ;;  %9525 = vmatprep.mubr.f32.mxu1 %v15833_v0 }
 0x58c   : > { %v8100_v47 = vpop.f32.mrf.mxu0  ;;  %v8323_v4 = vpop.f32.mrf.mxu1 }
 0x58d   : > { %v14720_v34 = vadd.f32 %v8323_v4, %v8100_v47 }
 0x58e   : > { %v8109_v29 = vpop.f32.mrf.mxu0  ;;  %9308 = vmatmul.mubr.f32.gmra.mxu0 %v16224_v39  ;;  %v8328_v54 = vpop.f32.mrf.mxu1  ;;  %9527 = vmatmul.mubr.f32.gmra.mxu1 %v16206_v12 }
 0x58f   : > { %9313 = vmatprep.mubr.f32.mxu0 %v15833_v0  ;;  %v14725_v1 = vadd.f32 %v8328_v54, %v8109_v29  ;;  %9532 = vmatprep.mubr.f32.mxu1 %v15833_v0  ;;  %v16228_v29 = vld [vmem:[#allocation62_spill] sm:$0xff] }
 0x590   : > { %v8111_v22 = vpop.f32.mrf.mxu0  ;;  %v8330_v46 = vpop.f32.mrf.mxu1 }
 0x591   : > { %v14728_v52 = vadd.f32 %v8330_v46, %v8111_v22 }
 0x592   : > { %v8120_v18 = vpop.f32.mrf.mxu0  ;;  %9319 = vmatmul.mubr.f32.gmra.mxu0 %v16225_v63  ;;  %v8335_v9 = vpop.f32.mrf.mxu1  ;;  %9534 = vmatmul.mubr.f32.gmra.mxu1 %v16207_v21 }
 0x593   : > { %9324 = vmatprep.mubr.f32.mxu0 %v15833_v0  ;;  %v14733_v50 = vadd.f32 %v8335_v9, %v8120_v18  ;;  %9539 = vmatprep.mubr.f32.mxu1 %v15833_v0  ;;  %v16229_v9 = vld [vmem:[#allocation79_spill] sm:$0xff] }
 0x594   : > { %v8122_v53 = vpop.f32.mrf.mxu0  ;;  %v8337_v42 = vpop.f32.mrf.mxu1 }
 0x595   : > { %v14736_v13 = vadd.f32 %v8337_v42, %v8122_v53 }
 0x596   : > { %v8131_v56 = vpop.f32.mrf.mxu0  ;;  %9330 = vmatmul.mubr.f32.gmra.mxu0 %v16226_v37  ;;  %v8342_v43 = vpop.f32.mrf.mxu1  ;;  %9541 = vmatmul.mubr.f32.gmra.mxu1 %v16208_v26 }
 0x597   : > { %9335 = vmatprep.mubr.f32.mxu0 %v15833_v0  ;;  %v14741_v51 = vadd.f32 %v8342_v43, %v8131_v56  ;;  %9546 = vmatprep.mubr.f32.mxu1 %v15833_v0 }
 0x598   : > { %v8133_v16 = vpop.f32.mrf.mxu0  ;;  %v8344_v24 = vpop.f32.mrf.mxu1 }
 0x599   : > { %v14744_v32 = vadd.f32 %v8344_v24, %v8133_v16  ;;  %v16230_v24 = vld [vmem:[#allocation11_spill] sm:$0xff] }
 0x59a   : > { %v8142_v2 = vpop.f32.mrf.mxu0  ;;  %9341 = vmatmul.mubr.f32.gmra.mxu0 %v16227_v17  ;;  %v8349_v11 = vpop.f32.mrf.mxu1  ;;  %9548 = vmatmul.mubr.f32.gmra.mxu1 %v16209_v45 }
 0x59b   : > { %9346 = vmatprep.mubr.f32.mxu0 %v15833_v0  ;;  %v14749_v44 = vadd.f32 %v8349_v11, %v8142_v2  ;;  %9553 = vmatprep.mubr.f32.mxu1 %v15833_v0 }
 0x59c   : > { %v8144_v41 = vpop.f32.mrf.mxu0  ;;  %v8351_v5 = vpop.f32.mrf.mxu1 }
 0x59d   : > { %v14752_v47 = vadd.f32 %v8351_v5, %v8144_v41 }
 0x59e   : > { %v8153_v4 = vpop.f32.mrf.mxu0  ;;  %9352 = vmatmul.mubr.f32.gmra.mxu0 %v16228_v29  ;;  %v8356_v39 = vpop.f32.mrf.mxu1  ;;  %9555 = vmatmul.mubr.f32.gmra.mxu1 %v16210_v6  ;;  %v16231_v29 = vld [vmem:[#allocation34_spill] sm:$0xff] }
 0x59f   : > { %9357 = vmatprep.mubr.f32.mxu0 %v15833_v0  ;;  %v14757_v54 = vadd.f32 %v8356_v39, %v8153_v4  ;;  %9560 = vmatprep.mubr.f32.mxu1 %v15833_v0 }
 0x5a0   : > { %v8155_v22 = vpop.f32.mrf.mxu0  ;;  %v8358_v46 = vpop.f32.mrf.mxu1 }
 0x5a1   : > { %v14760_v18 = vadd.f32 %v8358_v46, %v8155_v22 }
 0x5a2   : > { %v8164_v63 = vpop.f32.mrf.mxu0  ;;  %9363 = vmatmul.mubr.f32.gmra.mxu0 %v16229_v9  ;;  %v8363_v53 = vpop.f32.mrf.mxu1  ;;  %9562 = vmatmul.mubr.f32.gmra.mxu1 %v16211_v30 }
 0x5a3   : > { %9368 = vmatprep.mubr.f32.mxu0 %v15833_v0  ;;  %v14765_v42 = vadd.f32 %v8363_v53, %v8164_v63  ;;  %9567 = vmatprep.mubr.f32.mxu1 %v15833_v0 }
 0x5a4   : > { %v8166_v56 = vpop.f32.mrf.mxu0  ;;  %v8365_v37 = vpop.f32.mrf.mxu1 }
 0x5a5   : > { %v14768_v43 = vadd.f32 %v8365_v37, %v8166_v56  ;;  %v16232_v56 = vld [vmem:[#allocation70_spill] sm:$0xff] }
 0x5a6   : > { %v8175_v16 = vpop.f32.mrf.mxu0  ;;  %9374 = vmatmul.mubr.f32.gmra.mxu0 %v16230_v24  ;;  %v8370_v2 = vpop.f32.mrf.mxu1  ;;  %9569 = vmatmul.mubr.f32.gmra.mxu1 %v16212_v38 }
 0x5a7   : > { %9379 = vmatprep.mubr.f32.mxu0 %v15833_v0  ;;  %v14773_v17 = vadd.f32 %v8370_v2, %v8175_v16  ;;  %9574 = vmatprep.mubr.f32.mxu1 %v15833_v0 }
 0x5a8   : > { %v8177_v11 = vpop.f32.mrf.mxu0  ;;  %v8372_v41 = vpop.f32.mrf.mxu1 }
 0x5a9   : > { %v14776_v5 = vadd.f32 %v8372_v41, %v8177_v11 }
 0x5aa   : > { %v8186_v4 = vpop.f32.mrf.mxu0  ;;  %9385 = vmatmul.mubr.f32.gmra.mxu0 %v16231_v29  ;;  %v8377_v39 = vpop.f32.mrf.mxu1  ;;  %9576 = vmatmul.mubr.f32.gmra.mxu1 %v16213_v23  ;;  %v16234_v29 = vld [vmem:[#allocation57_spill] sm:$0xff] }
 0x5ab   : > { %9390 = vmatprep.mubr.f32.mxu0 %v15833_v0  ;;  %v14781_v22 = vadd.f32 %v8377_v39, %v8186_v4  ;;  %9581 = vmatprep.mubr.f32.mxu1 %v15833_v0 }
 0x5ac   : > { %v8188_v46 = vpop.f32.mrf.mxu0  ;;  %v8379_v63 = vpop.f32.mrf.mxu1 }
 0x5ad   : > { %v14784_v9 = vadd.f32 %v8379_v63, %v8188_v46  ;;  %v16235_v46 = vld [vmem:[#allocation21_spill] sm:$0xff] }
 0x5ae   : > { %v8197_v53 = vpop.f32.mrf.mxu0  ;;  %9396 = vmatmul.mubr.f32.gmra.mxu0 %v16232_v56  ;;  %v8384_v37 = vpop.f32.mrf.mxu1  ;;  %9583 = vmatmul.mubr.f32.gmra.mxu1 %v16214_v48 }
 0x5af   : > { %9657 = vmatprep.mubr.f32.mxu0 %v15833_v0  ;;  %v14789_v16 = vadd.f32 %v8384_v37, %v8197_v53  ;;  %9852 = vmatprep.mubr.f32.mxu1 %v15833_v0 }
 0x5b0   : > { %v8199_v24 = vpop.f32.mrf.mxu0  ;;  %v8386_v2 = vpop.f32.mrf.mxu1 }
 0x5b1   : > { %v14792_v11 = vadd.f32 %v8386_v2, %v8199_v24  ;;  %v16236_v24 = vld [vmem:[#allocation68_spill] sm:$0xff] }
 0x5b2   : > { %v8461_v41 = vpop.f32.mrf.mxu0  ;;  %9660 = vmatmul.mubr.f32.vlgmr.msra.gmra.mxu0 %v14008_v25  ;;  %v8657_v39 = vpop.f32.mrf.mxu1  ;;  %9856 = vmatmul.mubr.f32.vlgmr.msra.gmra.mxu1 %v16235_v46 }
 0x5b3   : > { %16233 = vst [vmem:[#allocation43_spill] sm:$0xff] %v14792_v11  ;;  %v8462_v4 = vadd.f32 %v8461_v41, %v14665_v31  ;;  %10034 = vmatpush1.msra.mxu0 %v16234_v29  ;;  %10213 = vmatpush1.msra.mxu1 %v16197_v28 }
 0x5b4   : > { %v8463_v63 = vpop.f32.mrf.mxu0  ;;  %9665 = vmatprep.mubr.f32.mxu0 %v15833_v0  ;;  %v8659_v37 = vpop.f32.mrf.mxu1  ;;  %9861 = vmatprep.mubr.f32.mxu1 %v15833_v0 }
 0x5b5   : > { %v14800_v53 = vadd.f32 %v8657_v39, %v8462_v4  ;;  %v8464_v56 = vadd.f32 %v8463_v63, %v14671_v59 }
 0x5b6   : > { %v8469_v25 = vpop.f32.mrf.mxu0  ;;  %9668 = vmatmul.mubr.f32.gmra.mxu0 %v16236_v24  ;;  %v8666_v41 = vpop.f32.mrf.mxu1  ;;  %9865 = vmatmul.mubr.f32.gmra.mxu1 %v14053_v19 }
 0x5b7   : > { %v14805_v31 = vadd.f32 %v8659_v37, %v8464_v56  ;;  %v8470_v2 = vadd.f32 %v8469_v25, %v14677_v8  ;;  %9673 = vmatprep.mubr.f32.mxu0 %v15833_v0  ;;  %9870 = vmatprep.mubr.f32.mxu1 %v15833_v0  ;;  %v16237_v56 = vld [vmem:[#allocation46_spill] sm:$0xff] }
 0x5b8   : > { %v8471_v28 = vpop.f32.mrf.mxu0  ;;  %v8668_v29 = vpop.f32.mrf.mxu1 }
 0x5b9   : > { %v14811_v4 = vadd.f32 %v8666_v41, %v8470_v2  ;;  %v8472_v59 = vadd.f32 %v8471_v28, %v14680_v15  ;;  %v16238_v2 = vld [vmem:[#allocation45_spill] sm:$0xff] }
 0x5ba   : > { %v8477_v39 = vpop.f32.mrf.mxu0  ;;  %9676 = vmatmul.mubr.f32.gmra.mxu0 %v14038_v61  ;;  %v8675_v63 = vpop.f32.mrf.mxu1  ;;  %9874 = vmatmul.mubr.f32.gmra.mxu1 %v16237_v56  ;;  %v16239_v28 = vld [vmem:[#allocation65_spill] sm:$0xff] }
 0x5bb   : > { %v14815_v46 = vadd.f32 %v8668_v29, %v8472_v59  ;;  %v8478_v8 = vadd.f32 %v8477_v39, %v14685_v57  ;;  %9681 = vmatprep.mubr.f32.mxu0 %v15833_v0  ;;  %9879 = vmatprep.mubr.f32.mxu1 %v15833_v0 }
 0x5bc   : > { %v8479_v19 = vpop.f32.mrf.mxu0  ;;  %v8677_v25 = vpop.f32.mrf.mxu1 }
 0x5bd   : > { %v14821_v37 = vadd.f32 %v8675_v63, %v8478_v8  ;;  %v8480_v15 = vadd.f32 %v8479_v19, %v14688_v14  ;;  %v16240_v63 = vld [vmem:[#allocation33_spill] sm:$0xff] }
 0x5be   : > { %v8485_v24 = vpop.f32.mrf.mxu0  ;;  %9684 = vmatmul.mubr.f32.gmra.mxu0 %v16238_v2  ;;  %v8684_v41 = vpop.f32.mrf.mxu1  ;;  %9883 = vmatmul.mubr.f32.gmra.mxu1 %v16239_v28 }
 0x5bf   : > { %v14825_v61 = vadd.f32 %v8677_v25, %v8480_v15  ;;  %v8486_v57 = vadd.f32 %v8485_v24, %v14693_v58  ;;  %9689 = vmatprep.mubr.f32.mxu0 %v15833_v0  ;;  %9888 = vmatprep.mubr.f32.mxu1 %v15833_v0  ;;  %v16241_v15 = vld [vmem:[#allocation40_spill] sm:$0xff] }
 0x5c0   : > { %v8487_v59 = vpop.f32.mrf.mxu0  ;;  %v8686_v39 = vpop.f32.mrf.mxu1 }
 0x5c1   : > { %v14831_v29 = vadd.f32 %v8684_v41, %v8486_v57  ;;  %v8488_v14 = vadd.f32 %v8487_v59, %v14696_v10  ;;  %v16242_v41 = vld [vmem:[#allocation49_spill] sm:$0xff] }
 0x5c2   : > { %v8493_v8 = vpop.f32.mrf.mxu0  ;;  %9692 = vmatmul.mubr.f32.gmra.mxu0 %v16240_v63  ;;  %v8693_v19 = vpop.f32.mrf.mxu1  ;;  %9892 = vmatmul.mubr.f32.gmra.mxu1 %v16241_v15 }
 0x5c3   : > { %v14835_v56 = vadd.f32 %v8686_v39, %v8488_v14  ;;  %v8494_v58 = vadd.f32 %v8493_v8, %v14701_v20  ;;  %9697 = vmatprep.mubr.f32.mxu0 %v15833_v0  ;;  %9897 = vmatprep.mubr.f32.mxu1 %v15833_v0  ;;  %v16243_v14 = vld [vmem:[#allocation66_spill] sm:$0xff] }
 0x5c4   : > { %v8495_v25 = vpop.f32.mrf.mxu0  ;;  %v8695_v2 = vpop.f32.mrf.mxu1 }
 0x5c5   : > { %v14841_v24 = vadd.f32 %v8693_v19, %v8494_v58  ;;  %v8496_v10 = vadd.f32 %v8495_v25, %v14704_v55  ;;  %v16244_v19 = vld [vmem:[#allocation23_spill] sm:$0xff] }
 0x5c6   : > { %v8501_v57 = vpop.f32.mrf.mxu0  ;;  %9700 = vmatmul.mubr.f32.gmra.mxu0 %v16242_v41  ;;  %v8702_v59 = vpop.f32.mrf.mxu1  ;;  %9901 = vmatmul.mubr.f32.gmra.mxu1 %v16243_v14 }
 0x5c7   : > { %v14845_v28 = vadd.f32 %v8695_v2, %v8496_v10  ;;  %v8502_v20 = vadd.f32 %v8501_v57, %v14709_v36  ;;  %9705 = vmatprep.mubr.f32.mxu0 %v15833_v0  ;;  %9906 = vmatprep.mubr.f32.mxu1 %v15833_v0  ;;  %v16245_v10 = vld [vmem:[#allocation72_spill] sm:$0xff] }
 0x5c8   : > { %v8503_v39 = vpop.f32.mrf.mxu0  ;;  %v8704_v63 = vpop.f32.mrf.mxu1 }
 0x5c9   : > { %v14851_v8 = vadd.f32 %v8702_v59, %v8502_v20  ;;  %v8504_v55 = vadd.f32 %v8503_v39, %v14712_v7  ;;  %v16246_v59 = vld [vmem:[#allocation81_spill] sm:$0xff] }
 0x5ca   : > { %v8509_v58 = vpop.f32.mrf.mxu0  ;;  %9708 = vmatmul.mubr.f32.gmra.mxu0 %v16244_v19  ;;  %v8711_v25 = vpop.f32.mrf.mxu1  ;;  %9910 = vmatmul.mubr.f32.gmra.mxu1 %v16245_v10 }
 0x5cb   : > { %v14855_v15 = vadd.f32 %v8704_v63, %v8504_v55  ;;  %v8510_v36 = vadd.f32 %v8509_v58, %v14717_v35  ;;  %9713 = vmatprep.mubr.f32.mxu0 %v15833_v0  ;;  %9915 = vmatprep.mubr.f32.mxu1 %v15833_v0  ;;  %v16247_v55 = vld [vmem:[#allocation77_spill] sm:$0xff] }
 0x5cc   : > { %v8511_v2 = vpop.f32.mrf.mxu0  ;;  %v8713_v41 = vpop.f32.mrf.mxu1 }
 0x5cd   : > { %v14861_v57 = vadd.f32 %v8711_v25, %v8510_v36  ;;  %v8512_v7 = vadd.f32 %v8511_v2, %v14720_v34  ;;  %v16248_v25 = vld [vmem:[#allocation44_spill] sm:$0xff] }
 0x5ce   : > { %v8517_v20 = vpop.f32.mrf.mxu0  ;;  %9716 = vmatmul.mubr.f32.gmra.mxu0 %v16246_v59  ;;  %v8720_v39 = vpop.f32.mrf.mxu1  ;;  %9919 = vmatmul.mubr.f32.gmra.mxu1 %v16247_v55 }
 0x5cf   : > { %v14865_v14 = vadd.f32 %v8713_v41, %v8512_v7  ;;  %v8518_v35 = vadd.f32 %v8517_v20, %v14725_v1  ;;  %9721 = vmatprep.mubr.f32.mxu0 %v15833_v0  ;;  %9924 = vmatprep.mubr.f32.mxu1 %v15833_v0  ;;  %v16249_v7 = vld [vmem:[#allocation38_spill] sm:$0xff] }
 0x5d0   : > { %v8519_v63 = vpop.f32.mrf.mxu0  ;;  %v8722_v19 = vpop.f32.mrf.mxu1 }
 0x5d1   : > { %v14871_v58 = vadd.f32 %v8720_v39, %v8518_v35  ;;  %v8520_v34 = vadd.f32 %v8519_v63, %v14728_v52  ;;  %v16250_v39 = vld [vmem:[#allocation69_spill] sm:$0xff] }
 0x5d2   : > { %v8525_v36 = vpop.f32.mrf.mxu0  ;;  %9724 = vmatmul.mubr.f32.gmra.mxu0 %v16248_v25  ;;  %v8729_v2 = vpop.f32.mrf.mxu1  ;;  %9928 = vmatmul.mubr.f32.gmra.mxu1 %v16249_v7 }
 0x5d3   : > { %v14875_v10 = vadd.f32 %v8722_v19, %v8520_v34  ;;  %v8526_v1 = vadd.f32 %v8525_v36, %v14733_v50  ;;  %9729 = vmatprep.mubr.f32.mxu0 %v15833_v0  ;;  %9933 = vmatprep.mubr.f32.mxu1 %v15833_v0  ;;  %v16251_v34 = vld [vmem:[#allocation71_spill] sm:$0xff] }
 0x5d4   : > { %v8527_v41 = vpop.f32.mrf.mxu0  ;;  %v8731_v59 = vpop.f32.mrf.mxu1 }
 0x5d5   : > { %v14881_v20 = vadd.f32 %v8729_v2, %v8526_v1  ;;  %v8528_v52 = vadd.f32 %v8527_v41, %v14736_v13  ;;  %v16252_v2 = vld [vmem:[#allocation64_spill] sm:$0xff] }
 0x5d6   : > { %v8533_v35 = vpop.f32.mrf.mxu0  ;;  %9732 = vmatmul.mubr.f32.gmra.mxu0 %v16250_v39  ;;  %v8738_v63 = vpop.f32.mrf.mxu1  ;;  %9937 = vmatmul.mubr.f32.gmra.mxu1 %v16251_v34 }
 0x5d7   : > { %v14885_v55 = vadd.f32 %v8731_v59, %v8528_v52  ;;  %v8534_v50 = vadd.f32 %v8533_v35, %v14741_v51  ;;  %9737 = vmatprep.mubr.f32.mxu0 %v15833_v0  ;;  %9942 = vmatprep.mubr.f32.mxu1 %v15833_v0  ;;  %v16253_v52 = vld [vmem:[#allocation36_spill] sm:$0xff] }
 0x5d8   : > { %v8535_v19 = vpop.f32.mrf.mxu0  ;;  %v8740_v25 = vpop.f32.mrf.mxu1 }
 0x5d9   : > { %v14891_v36 = vadd.f32 %v8738_v63, %v8534_v50  ;;  %v8536_v13 = vadd.f32 %v8535_v19, %v14744_v32  ;;  %v16254_v63 = vld [vmem:[#allocation74_spill] sm:$0xff] }
 0x5da   : > { %v8541_v1 = vpop.f32.mrf.mxu0  ;;  %9740 = vmatmul.mubr.f32.gmra.mxu0 %v16252_v2  ;;  %v8747_v41 = vpop.f32.mrf.mxu1  ;;  %9946 = vmatmul.mubr.f32.gmra.mxu1 %v16253_v52 }
 0x5db   : > { %v14895_v7 = vadd.f32 %v8740_v25, %v8536_v13  ;;  %v8542_v51 = vadd.f32 %v8541_v1, %v14749_v44  ;;  %9745 = vmatprep.mubr.f32.mxu0 %v15833_v0  ;;  %9951 = vmatprep.mubr.f32.mxu1 %v15833_v0  ;;  %v16255_v13 = vld [vmem:[#allocation25_spill] sm:$0xff] }
 0x5dc   : > { %v8543_v59 = vpop.f32.mrf.mxu0  ;;  %v8749_v39 = vpop.f32.mrf.mxu1 }
 0x5dd   : > { %v14901_v35 = vadd.f32 %v8747_v41, %v8542_v51  ;;  %v8544_v32 = vadd.f32 %v8543_v59, %v14752_v47  ;;  %v16256_v41 = vld [vmem:[#allocation35_spill] sm:$0xff] }
 0x5de   : > { %v8549_v50 = vpop.f32.mrf.mxu0  ;;  %9748 = vmatmul.mubr.f32.gmra.mxu0 %v16254_v63  ;;  %v8756_v19 = vpop.f32.mrf.mxu1  ;;  %9955 = vmatmul.mubr.f32.gmra.mxu1 %v16255_v13 }
 0x5df   : > { %v14905_v34 = vadd.f32 %v8749_v39, %v8544_v32  ;;  %v8550_v44 = vadd.f32 %v8549_v50, %v14757_v54  ;;  %9753 = vmatprep.mubr.f32.mxu0 %v15833_v0  ;;  %9960 = vmatprep.mubr.f32.mxu1 %v15833_v0  ;;  %v16257_v32 = vld [vmem:[#allocation29_spill] sm:$0xff] }
 0x5e0   : > { %v8551_v25 = vpop.f32.mrf.mxu0  ;;  %v8758_v2 = vpop.f32.mrf.mxu1 }
 0x5e1   : > { %v14911_v1 = vadd.f32 %v8756_v19, %v8550_v44  ;;  %v8552_v47 = vadd.f32 %v8551_v25, %v14760_v18  ;;  %v16258_v19 = vld [vmem:[#allocation31_spill] sm:$0xff] }
 0x5e2   : > { %v8557_v51 = vpop.f32.mrf.mxu0  ;;  %9756 = vmatmul.mubr.f32.gmra.mxu0 %v16256_v41  ;;  %v8765_v59 = vpop.f32.mrf.mxu1  ;;  %9964 = vmatmul.mubr.f32.gmra.mxu1 %v16257_v32 }
 0x5e3   : > { %v14915_v52 = vadd.f32 %v8758_v2, %v8552_v47  ;;  %v8558_v54 = vadd.f32 %v8557_v51, %v14765_v42  ;;  %9761 = vmatprep.mubr.f32.mxu0 %v15833_v0  ;;  %9969 = vmatprep.mubr.f32.mxu1 %v15833_v0  ;;  %v16259_v47 = vld [vmem:[#allocation67_spill] sm:$0xff] }
 0x5e4   : > { %v8559_v39 = vpop.f32.mrf.mxu0  ;;  %v8767_v63 = vpop.f32.mrf.mxu1 }
 0x5e5   : > { %v14921_v50 = vadd.f32 %v8765_v59, %v8558_v54  ;;  %v8560_v18 = vadd.f32 %v8559_v39, %v14768_v43  ;;  %v16260_v59 = vld [vmem:[#allocation75_spill] sm:$0xff]  ;;  %v16261_v39 = vld [vmem:[#allocation28_spill] sm:$0xff] }
 0x5e6   : > { %v8565_v44 = vpop.f32.mrf.mxu0  ;;  %9764 = vmatmul.mubr.f32.gmra.mxu0 %v16258_v19  ;;  %v8774_v25 = vpop.f32.mrf.mxu1  ;;  %9973 = vmatmul.mubr.f32.gmra.mxu1 %v16259_v47 }
 0x5e7   : > { %v14925_v13 = vadd.f32 %v8767_v63, %v8560_v18  ;;  %v8566_v42 = vadd.f32 %v8565_v44, %v14773_v17  ;;  %9769 = vmatprep.mubr.f32.mxu0 %v15833_v0  ;;  %9978 = vmatprep.mubr.f32.mxu1 %v15833_v0  ;;  %v16262_v44 = vld [vmem:[#allocation20_spill] sm:$0xff] }
 0x5e8   : > { %v8567_v2 = vpop.f32.mrf.mxu0  ;;  %v8776_v41 = vpop.f32.mrf.mxu1 }
 0x5e9   : > { %v14931_v51 = vadd.f32 %v8774_v25, %v8566_v42  ;;  %v8568_v43 = vadd.f32 %v8567_v2, %v14776_v5  ;;  %v16264_v42 = vld [vmem:[#allocation83_spill] sm:$0xff] }
 0x5ea   : > { %v14934_v54 = vpop.f32.mrf.mxu0  ;;  %9772 = vmatmul.mubr.f32.gmra.mxu0 %v16260_v59  ;;  %v14939_v17 = vpop.f32.mrf.mxu1  ;;  %9982 = vmatmul.mubr.f32.gmra.mxu1 %v16261_v39 }
 0x5eb   : > { %v14937_v32 = vadd.f32 %v8776_v41, %v8568_v43  ;;  %9777 = vmatprep.mubr.f32.mxu0 %v15833_v0  ;;  %9987 = vmatprep.mubr.f32.mxu1 %v15833_v0 }
 0x5ec   : > { %v14943_v18 = vpop.f32.mrf.mxu0  ;;  %v14946_v63 = vpop.f32.mrf.mxu1 }
 0x5ee   : > { %v14948_v5 = vpop.f32.mrf.mxu0  ;;  %9780 = vmatmul.mubr.f32.gmra.mxu0 %v16262_v44  ;;  %v14951_v19 = vpop.f32.mrf.mxu1  ;;  %9991 = vmatmul.mubr.f32.gmra.mxu1 %v16264_v42 }
 0x5ef   : > { %16263 = vst [vmem:[#allocation39_spill] sm:$0xff] %v14951_v19  ;;  %10067 = vmatprep.mubr.f32.mxu0 %v15833_v0  ;;  %10246 = vmatprep.mubr.f32.mxu1 %v15833_v0 }
 0x5f0   : > { %v14955_v25 = vpop.f32.mrf.mxu0  ;;  %v14958_v47 = vpop.f32.mrf.mxu1 }
 0x5f1   : > { %16265 = vst [vmem:[#allocation80_spill] sm:$0xff] %v14955_v25  ;;  %16266 = vst [vmem:[#allocation12_spill] sm:$0xff] %v14958_v47 }
 0x5f2   : > { %v8870_v2 = vpop.f32.mrf.mxu0  ;;  %10069 = vmatmul.mubr.f32.vlgmr.msra.gmra.mxu0 %v16196_v60  ;;  %v9049_v43 = vpop.f32.mrf.mxu1  ;;  %10248 = vmatmul.mubr.f32.vlgmr.msra.gmra.mxu1 %v16196_v60 }
 0x5f3   : > { %10074 = vmatprep.mubr.f32.mxu0 %v15833_v0  ;;  %10253 = vmatprep.mubr.f32.mxu1 %v15833_v0  ;;  %v8871_v59 = vadd.f32 %v8870_v2, %v14800_v53 }
 0x5f4   : > { %v8872_v41 = vpop.f32.mrf.mxu0  ;;  %v9051_v39 = vpop.f32.mrf.mxu1 }
 0x5f5   : > { %v8873_v44 = vadd.f32 %v8872_v41, %v14805_v31  ;;  %v9050_v19 = vadd.f32 %v9049_v43, %v8871_v59 }
 0x5f6   : > { %v8877_v42 = vpop.f32.mrf.mxu0  ;;  %10076 = vmatmul.mubr.f32.gmra.mxu0 %v16200_v27  ;;  %v9056_v48 = vpop.f32.mrf.mxu1  ;;  %10255 = vmatmul.mubr.f32.gmra.mxu1 %v16200_v27 }
 0x5f7   : > { %v8878_v47 = vadd.f32 %v8877_v42, %v14811_v4  ;;  %10081 = vmatprep.mubr.f32.mxu0 %v15833_v0  ;;  %10260 = vmatprep.mubr.f32.mxu1 %v15833_v0  ;;  %v9052_v25 = vadd.f32 %v9051_v39, %v8873_v44 }
 0x5f8   : > { %v8879_v60 = vpop.f32.mrf.mxu0  ;;  %v9058_v2 = vpop.f32.mrf.mxu1 }
 0x5f9   : > { %v9057_v23 = vadd.f32 %v9056_v48, %v8878_v47  ;;  %v8880_v53 = vadd.f32 %v8879_v60, %v14815_v46 }
 0x5fa   : > { %v8884_v31 = vpop.f32.mrf.mxu0  ;;  %10083 = vmatmul.mubr.f32.gmra.mxu0 %v16201_v49  ;;  %v9063_v42 = vpop.f32.mrf.mxu1  ;;  %10262 = vmatmul.mubr.f32.gmra.mxu1 %v16201_v49 }
 0x5fb   : > { %v10359_v41 = vmin.f32 %v9050_v19, %v9057_v23  ;;  %v9059_v11 = vadd.f32 %v9058_v2, %v8880_v53  ;;  %v8885_v4 = vadd.f32 %v8884_v31, %v14821_v37  ;;  %10088 = vmatprep.mubr.f32.mxu0 %v15833_v0  ;;  %10267 = vmatprep.mubr.f32.mxu1 %v15833_v0 }
 0x5fc   : > { %v8886_v27 = vpop.f32.mrf.mxu0  ;;  %v9065_v43 = vpop.f32.mrf.mxu1 }
 0x5fd   : > { %v10360_v48 = vmin.f32 %v9052_v25, %v9059_v11  ;;  %v9064_v47 = vadd.f32 %v9063_v42, %v8885_v4  ;;  %v8887_v46 = vadd.f32 %v8886_v27, %v14825_v61 }
 0x5fe   : > { %v8891_v59 = vpop.f32.mrf.mxu0  ;;  %10090 = vmatmul.mubr.f32.gmra.mxu0 %v16202_v40  ;;  %v9070_v39 = vpop.f32.mrf.mxu1  ;;  %10269 = vmatmul.mubr.f32.gmra.mxu1 %v16202_v40 }
 0x5ff   : > { %v10363_v23 = vmin.f32 %v10359_v41, %v9064_v47  ;;  %v9066_v19 = vadd.f32 %v9065_v43, %v8887_v46  ;;  %v8892_v37 = vadd.f32 %v8891_v59, %v14831_v29  ;;  %10095 = vmatprep.mubr.f32.mxu0 %v15833_v0  ;;  %10274 = vmatprep.mubr.f32.mxu1 %v15833_v0 }
 0x600   : > { %v8893_v49 = vpop.f32.mrf.mxu0  ;;  %v9072_v44 = vpop.f32.mrf.mxu1 }
 0x601   : > { %v10364_v11 = vmin.f32 %v10360_v48, %v9066_v19  ;;  %v9071_v25 = vadd.f32 %v9070_v39, %v8892_v37  ;;  %v8894_v61 = vadd.f32 %v8893_v49, %v14835_v56 }
 0x602   : > { %v8898_v60 = vpop.f32.mrf.mxu0  ;;  %10097 = vmatmul.mubr.f32.gmra.mxu0 %v16203_v3  ;;  %v9077_v31 = vpop.f32.mrf.mxu1  ;;  %10276 = vmatmul.mubr.f32.gmra.mxu1 %v16203_v3 }
 0x603   : > { %v10367_v53 = vmin.f32 %v10363_v23, %v9071_v25  ;;  %v9073_v2 = vadd.f32 %v9072_v44, %v8894_v61  ;;  %v8899_v29 = vadd.f32 %v8898_v60, %v14841_v24  ;;  %10102 = vmatprep.mubr.f32.mxu0 %v15833_v0  ;;  %10281 = vmatprep.mubr.f32.mxu1 %v15833_v0 }
 0x604   : > { %v8900_v40 = vpop.f32.mrf.mxu0  ;;  %v9079_v42 = vpop.f32.mrf.mxu1 }
 0x605   : > { %v10368_v41 = vmin.f32 %v10364_v11, %v9073_v2  ;;  %v9078_v4 = vadd.f32 %v9077_v31, %v8899_v29  ;;  %v8901_v56 = vadd.f32 %v8900_v40, %v14845_v28 }
 0x606   : > { %v8905_v27 = vpop.f32.mrf.mxu0  ;;  %10104 = vmatmul.mubr.f32.gmra.mxu0 %v16204_v62  ;;  %v9084_v46 = vpop.f32.mrf.mxu1  ;;  %10283 = vmatmul.mubr.f32.gmra.mxu1 %v16204_v62 }
 0x607   : > { %v10371_v48 = vmin.f32 %v10367_v53, %v9078_v4  ;;  %v9080_v47 = vadd.f32 %v9079_v42, %v8901_v56  ;;  %v8906_v24 = vadd.f32 %v8905_v27, %v14851_v8  ;;  %10109 = vmatprep.mubr.f32.mxu0 %v15833_v0  ;;  %10288 = vmatprep.mubr.f32.mxu1 %v15833_v0 }
 0x608   : > { %v8907_v3 = vpop.f32.mrf.mxu0  ;;  %v9086_v23 = vpop.f32.mrf.mxu1 }
 0x609   : > { %v10372_v43 = vmin.f32 %v10368_v41, %v9080_v47  ;;  %v9085_v59 = vadd.f32 %v9084_v46, %v8906_v24  ;;  %v8908_v28 = vadd.f32 %v8907_v3, %v14855_v15 }
 0x60a   : > { %v8912_v19 = vpop.f32.mrf.mxu0  ;;  %10111 = vmatmul.mubr.f32.gmra.mxu0 %v16205_v33  ;;  %v9091_v49 = vpop.f32.mrf.mxu1  ;;  %10290 = vmatmul.mubr.f32.gmra.mxu1 %v16205_v33 }
 0x60b   : > { %v10375_v37 = vmin.f32 %v10371_v48, %v9085_v59  ;;  %v9087_v39 = vadd.f32 %v9086_v23, %v8908_v28  ;;  %v8913_v8 = vadd.f32 %v8912_v19, %v14861_v57  ;;  %10116 = vmatprep.mubr.f32.mxu0 %v15833_v0  ;;  %10295 = vmatprep.mubr.f32.mxu1 %v15833_v0 }
 0x60c   : > { %v8914_v62 = vpop.f32.mrf.mxu0  ;;  %v9093_v61 = vpop.f32.mrf.mxu1 }
 0x60d   : > { %v10376_v11 = vmin.f32 %v10372_v43, %v9087_v39  ;;  %v9092_v25 = vadd.f32 %v9091_v49, %v8913_v8  ;;  %v8915_v15 = vadd.f32 %v8914_v62, %v14865_v14 }
 0x60e   : > { %v8919_v44 = vpop.f32.mrf.mxu0  ;;  %10118 = vmatmul.mubr.f32.gmra.mxu0 %v16206_v12  ;;  %v9098_v2 = vpop.f32.mrf.mxu1  ;;  %10297 = vmatmul.mubr.f32.gmra.mxu1 %v16206_v12 }
 0x60f   : > { %v10379_v60 = vmin.f32 %v10375_v37, %v9092_v25  ;;  %v9094_v53 = vadd.f32 %v9093_v61, %v8915_v15  ;;  %v8920_v57 = vadd.f32 %v8919_v44, %v14871_v58  ;;  %10123 = vmatprep.mubr.f32.mxu0 %v15833_v0  ;;  %10302 = vmatprep.mubr.f32.mxu1 %v15833_v0 }
 0x610   : > { %v8921_v33 = vpop.f32.mrf.mxu0  ;;  %v9100_v40 = vpop.f32.mrf.mxu1 }
 0x611   : > { %v10380_v29 = vmin.f32 %v10376_v11, %v9094_v53  ;;  %v9099_v31 = vadd.f32 %v9098_v2, %v8920_v57  ;;  %v8922_v14 = vadd.f32 %v8921_v33, %v14875_v10 }
 0x612   : > { %v8926_v41 = vpop.f32.mrf.mxu0  ;;  %10125 = vmatmul.mubr.f32.gmra.mxu0 %v16207_v21  ;;  %v9105_v42 = vpop.f32.mrf.mxu1  ;;  %10304 = vmatmul.mubr.f32.gmra.mxu1 %v16207_v21 }
 0x613   : > { %v10383_v4 = vmin.f32 %v10379_v60, %v9099_v31  ;;  %v9101_v56 = vadd.f32 %v9100_v40, %v8922_v14  ;;  %v8927_v58 = vadd.f32 %v8926_v41, %v14881_v20  ;;  %10130 = vmatprep.mubr.f32.mxu0 %v15833_v0  ;;  %10309 = vmatprep.mubr.f32.mxu1 %v15833_v0 }
 0x614   : > { %v8928_v12 = vpop.f32.mrf.mxu0  ;;  %v9107_v47 = vpop.f32.mrf.mxu1 }
 0x615   : > { %v10384_v27 = vmin.f32 %v10380_v29, %v9101_v56  ;;  %v9106_v48 = vadd.f32 %v9105_v42, %v8927_v58  ;;  %v8929_v10 = vadd.f32 %v8928_v12, %v14885_v55  ;;  %v8576_v56 = vadd.f32 %v14943_v18, %v14784_v9 }
 0x616   : > { %v8933_v24 = vpop.f32.mrf.mxu0  ;;  %10132 = vmatmul.mubr.f32.gmra.mxu0 %v16208_v26  ;;  %v9112_v43 = vpop.f32.mrf.mxu1  ;;  %10311 = vmatmul.mubr.f32.gmra.mxu1 %v16208_v26  ;;  %v8582_v9 = vadd.f32 %v14948_v5, %v14789_v16 }
 0x617   : > { %v10387_v46 = vmin.f32 %v10383_v4, %v9106_v48  ;;  %v9108_v3 = vadd.f32 %v9107_v47, %v8929_v10  ;;  %v8934_v20 = vadd.f32 %v8933_v24, %v14891_v36  ;;  %10137 = vmatprep.mubr.f32.mxu0 %v15833_v0  ;;  %10316 = vmatprep.mubr.f32.mxu1 %v15833_v0  ;;  %v16267_v10 = vld [vmem:[#allocation43_spill] sm:$0xff]  ;;  %v16268_v47 = vld [vmem:[#allocation80_spill] sm:$0xff] }
 0x618   : > { %v8935_v21 = vpop.f32.mrf.mxu0  ;;  %v9114_v23 = vpop.f32.mrf.mxu1 }
 0x619   : > { %v10388_v59 = vmin.f32 %v10384_v27, %v9108_v3  ;;  %v9113_v28 = vadd.f32 %v9112_v43, %v8934_v20  ;;  %v8936_v55 = vadd.f32 %v8935_v21, %v14895_v7 }
 0x61a   : > { %v8940_v19 = vpop.f32.mrf.mxu0  ;;  %10139 = vmatmul.mubr.f32.gmra.mxu0 %v16209_v45  ;;  %v9119_v8 = vpop.f32.mrf.mxu1  ;;  %10318 = vmatmul.mubr.f32.gmra.mxu1 %v16209_v45 }
 0x61b   : > { %v10391_v37 = vmin.f32 %v10387_v46, %v9113_v28  ;;  %v9115_v39 = vadd.f32 %v9114_v23, %v8936_v55  ;;  %v8941_v36 = vadd.f32 %v8940_v19, %v14901_v35  ;;  %10144 = vmatprep.mubr.f32.mxu0 %v15833_v0  ;;  %10323 = vmatprep.mubr.f32.mxu1 %v15833_v0  ;;  %v16269_v46 = vld [vmem:[#allocation60_spill] sm:$0xff] }
 0x61c   : > { %v8942_v26 = vpop.f32.mrf.mxu0  ;;  %v9121_v11 = vpop.f32.mrf.mxu1  ;;  %v16271_v23 = vld [vmem:[#allocation76_spill] sm:$0xff] }
 0x61d   : > { %v10392_v49 = vmin.f32 %v10388_v59, %v9115_v39  ;;  %v9120_v62 = vadd.f32 %v9119_v8, %v8941_v36  ;;  %v8943_v7 = vadd.f32 %v8942_v26, %v14905_v34  ;;  %v16272_v19 = vld [vmem:[#allocation12_spill] sm:$0xff] }
 0x61e   : > { %v8947_v25 = vpop.f32.mrf.mxu0  ;;  %10146 = vmatmul.mubr.f32.gmra.mxu0 %v16210_v6  ;;  %v9126_v44 = vpop.f32.mrf.mxu1  ;;  %10325 = vmatmul.mubr.f32.gmra.mxu1 %v16210_v6  ;;  %v8574_v6 = vadd.f32 %v14934_v54, %v14781_v22 }
 0x61f   : > { %v10395_v15 = vmin.f32 %v10391_v37, %v9120_v62  ;;  %v9122_v61 = vadd.f32 %v9121_v11, %v8943_v7  ;;  %v8948_v35 = vadd.f32 %v8947_v25, %v14911_v1  ;;  %10151 = vmatprep.mubr.f32.mxu0 %v15833_v0  ;;  %10330 = vmatprep.mubr.f32.mxu1 %v15833_v0 }
 0x620   : > { %v8949_v45 = vpop.f32.mrf.mxu0  ;;  %v9128_v57 = vpop.f32.mrf.mxu1  ;;  %v8784_v22 = vadd.f32 %v14939_v17, %v8574_v6 }
 0x621   : > { %v10396_v60 = vmin.f32 %v10392_v49, %v9122_v61  ;;  %v9127_v53 = vadd.f32 %v9126_v44, %v8948_v35  ;;  %v8950_v34 = vadd.f32 %v8949_v45, %v14915_v52  ;;  %v10419_v44 = vld [vmem:[#allocation2 + $0x10] sm:$0xff] }
 0x622   : > { %v8954_v2 = vpop.f32.mrf.mxu0  ;;  %10153 = vmatmul.mubr.f32.gmra.mxu0 %v16211_v30  ;;  %v9133_v31 = vpop.f32.mrf.mxu1  ;;  %10332 = vmatmul.mubr.f32.gmra.mxu1 %v16211_v30 }
 0x623   : > { %v10399_v33 = vmin.f32 %v10395_v15, %v9127_v53  ;;  %v9129_v29 = vadd.f32 %v9128_v57, %v8950_v34  ;;  %v8955_v1 = vadd.f32 %v8954_v2, %v14921_v50  ;;  %10158 = vmatprep.mubr.f32.mxu0 %v15833_v0  ;;  %10337 = vmatprep.mubr.f32.mxu1 %v15833_v0  ;;  %v10420_v2 = vld [vmem:[#allocation2] sm:$0xff] }
 0x624   : > { %v8956_v14 = vpop.f32.mrf.mxu0  ;;  %v9135_v4 = vpop.f32.mrf.mxu1 }
 0x625   : > { %v10400_v52 = vmin.f32 %v10396_v60, %v9129_v29  ;;  %v9134_v40 = vadd.f32 %v9133_v31, %v8955_v1  ;;  %v8957_v41 = vadd.f32 %v8956_v14, %v14925_v13 }
 0x626   : > { %v8961_v50 = vpop.f32.mrf.mxu0  ;;  %10160 = vmatmul.mubr.f32.gmra.mxu0 %v16212_v38  ;;  %v9140_v12 = vpop.f32.mrf.mxu1  ;;  %10339 = vmatmul.mubr.f32.gmra.mxu1 %v16212_v38  ;;  %v8584_v38 = vadd.f32 %v16268_v47, %v16267_v10 }
 0x627   : > { %v10403_v30 = vmin.f32 %v10399_v33, %v9134_v40  ;;  %v9136_v58 = vadd.f32 %v9135_v4, %v8957_v41  ;;  %v8962_v42 = vadd.f32 %v8961_v50, %v14931_v51  ;;  %10165 = vmatprep.mubr.f32.mxu0 %v15833_v0  ;;  %10344 = vmatprep.mubr.f32.mxu1 %v15833_v0 }
 0x628   : > { %v8963_v54 = vpop.f32.mrf.mxu0  ;;  %v9142_v48 = vpop.f32.mrf.mxu1  ;;  %v8786_v51 = vadd.f32 %v14946_v63, %v8576_v56  ;;  %v8795_v37 = vadd.f32 %v16272_v19, %v8584_v38 }
 0x629   : > { %v10404_v13 = vmin.f32 %v10400_v52, %v9136_v58  ;;  %v9141_v18 = vadd.f32 %v9140_v12, %v8962_v42  ;;  %v8964_v27 = vadd.f32 %v8963_v54, %v14937_v32  ;;  %v16270_v32 = vld [vmem:[#allocation39_spill] sm:$0xff] }
 0x62a   : > { %v8968_v24 = vpop.f32.mrf.mxu0  ;;  %10167 = vmatmul.mubr.f32.gmra.mxu0 %v16269_v46  ;;  %v9147_v43 = vpop.f32.mrf.mxu1  ;;  %10346 = vmatmul.mubr.f32.gmra.mxu1 %v16269_v46  ;;  %v8793_v5 = vadd.f32 %v16270_v32, %v8582_v9 }
 0x62b   : > { %v10407_v17 = vmin.f32 %v10403_v30, %v9141_v18  ;;  %v9143_v3 = vadd.f32 %v9142_v48, %v8964_v27  ;;  %v8969_v20 = vadd.f32 %v8968_v24, %v8784_v22  ;;  %10172 = vmatprep.mubr.f32.mxu0 %v15833_v0  ;;  %10351 = vmatprep.mubr.f32.mxu1 %v15833_v0 }
 0x62c   : > { %v8970_v16 = vpop.f32.mrf.mxu0  ;;  %v9149_v28 = vpop.f32.mrf.mxu1 }
 0x62d   : > { %v10408_v63 = vmin.f32 %v10404_v13, %v9143_v3  ;;  %v9148_v21 = vadd.f32 %v9147_v43, %v8969_v20  ;;  %v8971_v59 = vadd.f32 %v8970_v16, %v8786_v51 }
 0x62e   : > { %v8975_v55 = vpop.f32.mrf.mxu0  ;;  %10174 = vmatmul.mubr.f32.gmra.mxu0 %v16271_v23  ;;  %v9154_v26 = vpop.f32.mrf.mxu1  ;;  %10353 = vmatmul.mubr.f32.gmra.mxu1 %v16271_v23 }
 0x62f   : > { %v10411_v39 = vmin.f32 %v10407_v17, %v9148_v21  ;;  %v9150_v36 = vadd.f32 %v9149_v28, %v8971_v59  ;;  %v8976_v8 = vadd.f32 %v8975_v55, %v8793_v5 }
 0x630   : > { %v8977_v49 = vpop.f32.mrf.mxu0  ;;  %v9156_v11 = vpop.f32.mrf.mxu1 }
 0x631   : > { %v10412_v62 = vmin.f32 %v10408_v63, %v9150_v36  ;;  %v9155_v0 = vadd.f32 %v9154_v26, %v8976_v8  ;;  %v8978_v7 = vadd.f32 %v8977_v49, %v8795_v37 }
 0x632   : > { %v9232_v25 = vpop.f32.mrf.mxu0  ;;  %v9479_v35 = vpop.f32.mrf.mxu1 }
 0x633   : > { %v10415_v15 = vmin.f32 %v10411_v39, %v9155_v0  ;;  %v9157_v61 = vadd.f32 %v9156_v11, %v8978_v7  ;;  %v15062_v45 = vadd.f32 %v9479_v35, %v9232_v25 }
 0x634   : > { %v9234_v60 = vpop.f32.mrf.mxu0  ;;  %v9481_v57 = vpop.f32.mrf.mxu1 }
 0x635   : > { %v10423_v53 = vmin.f32 %v10419_v44, %v10415_v15  ;;  %v10416_v34 = vmin.f32 %v10412_v62, %v9157_v61  ;;  %v15064_v33 = vadd.f32 %v9481_v57, %v9234_v60 }
 0x636   : > { %v9243_v29 = vpop.f32.mrf.mxu0  ;;  %v9486_v31 = vpop.f32.mrf.mxu1 }
 0x637   : > { %10427 = vst [vmem:[#allocation2 + $0x10] sm:$0xff] %v10423_v53  ;;  %v10424_v1 = vmin.f32 %v10420_v2, %v10416_v34  ;;  %v15066_v6 = vadd.f32 %v9486_v31, %v9243_v29 }
 0x638   : > { %v9245_v14 = vpop.f32.mrf.mxu0  ;;  %v9488_v52 = vpop.f32.mrf.mxu1 }
 0x639   : > { %10428 = vst [vmem:[#allocation2] sm:$0xff] %v10424_v1  ;;  %v15068_v40 = vadd.f32 %v9488_v52, %v9245_v14 }
 0x63a   : > { %v9254_v41 = vpop.f32.mrf.mxu0  ;;  %v9493_v4 = vpop.f32.mrf.mxu1 }
 0x63b   : > { %v15070_v56 = vadd.f32 %v9493_v4, %v9254_v41 }
 0x63c   : > { %v9256_v50 = vpop.f32.mrf.mxu0  ;;  %v9495_v30 = vpop.f32.mrf.mxu1 }
 0x63d   : > { %v15072_v58 = vadd.f32 %v9495_v30, %v9256_v50 }
 0x63e   : > { %v9265_v42 = vpop.f32.mrf.mxu0  ;;  %v9500_v12 = vpop.f32.mrf.mxu1 }
 0x63f   : > { %v15074_v22 = vadd.f32 %v9500_v12, %v9265_v42 }
 0x640   : > { %v9267_v54 = vpop.f32.mrf.mxu0  ;;  %v9502_v9 = vpop.f32.mrf.mxu1 }
 0x641   : > { %v15076_v13 = vadd.f32 %v9502_v9, %v9267_v54 }
 0x642   : > { %v9276_v18 = vpop.f32.mrf.mxu0  ;;  %v9507_v27 = vpop.f32.mrf.mxu1 }
 0x643   : > { %v15078_v48 = vadd.f32 %v9507_v27, %v9276_v18 }
 0x644   : > { %v9278_v51 = vpop.f32.mrf.mxu0  ;;  %v9509_v10 = vpop.f32.mrf.mxu1 }
 0x645   : > { %v15080_v47 = vadd.f32 %v9509_v10, %v9278_v51 }
 0x646   : > { %v9287_v38 = vpop.f32.mrf.mxu0  ;;  %v9514_v24 = vpop.f32.mrf.mxu1 }
 0x647   : > { %v15082_v46 = vadd.f32 %v9514_v24, %v9287_v38 }
 0x648   : > { %v9289_v17 = vpop.f32.mrf.mxu0  ;;  %v9516_v3 = vpop.f32.mrf.mxu1 }
 0x649   : > { %v15084_v20 = vadd.f32 %v9516_v3, %v9289_v17 }
 0x64a   : > { %v9298_v43 = vpop.f32.mrf.mxu0  ;;  %v9521_v16 = vpop.f32.mrf.mxu1 }
 0x64b   : > { %v15086_v32 = vadd.f32 %v9521_v16, %v9298_v43 }
 0x64c   : > { %v9300_v5 = vpop.f32.mrf.mxu0  ;;  %v9523_v63 = vpop.f32.mrf.mxu1 }
 0x64d   : > { %v15088_v21 = vadd.f32 %v9523_v63, %v9300_v5 }
 0x64e   : > { %v9309_v59 = vpop.f32.mrf.mxu0  ;;  %v9528_v28 = vpop.f32.mrf.mxu1 }
 0x64f   : > { %v15090_v55 = vadd.f32 %v9528_v28, %v9309_v59 }
 0x650   : > { %v9311_v23 = vpop.f32.mrf.mxu0  ;;  %v9530_v19 = vpop.f32.mrf.mxu1 }
 0x651   : > { %v15092_v37 = vadd.f32 %v9530_v19, %v9311_v23 }
 0x652   : > { %v9320_v39 = vpop.f32.mrf.mxu0  ;;  %v9535_v36 = vpop.f32.mrf.mxu1 }
 0x653   : > { %v15094_v8 = vadd.f32 %v9535_v36, %v9320_v39 }
 0x654   : > { %v9322_v26 = vpop.f32.mrf.mxu0  ;;  %v9537_v49 = vpop.f32.mrf.mxu1 }
 0x655   : > { %v15096_v62 = vadd.f32 %v9537_v49, %v9322_v26 }
 0x656   : > { %v9331_v0 = vpop.f32.mrf.mxu0  ;;  %v9542_v7 = vpop.f32.mrf.mxu1 }
 0x657   : > { %v15098_v11 = vadd.f32 %v9542_v7, %v9331_v0 }
 0x658   : > { %v9333_v25 = vpop.f32.mrf.mxu0  ;;  %v9544_v15 = vpop.f32.mrf.mxu1 }
 0x659   : > { %v15100_v61 = vadd.f32 %v9544_v15, %v9333_v25 }
 0x65a   : > { %v9342_v35 = vpop.f32.mrf.mxu0  ;;  %v9549_v44 = vpop.f32.mrf.mxu1 }
 0x65b   : > { %v15102_v60 = vadd.f32 %v9549_v44, %v9342_v35 }
 0x65c   : > { %v9344_v53 = vpop.f32.mrf.mxu0  ;;  %v9551_v34 = vpop.f32.mrf.mxu1 }
 0x65d   : > { %v15104_v57 = vadd.f32 %v9551_v34, %v9344_v53 }
 0x65e   : > { %v9353_v2 = vpop.f32.mrf.mxu0  ;;  %v9556_v29 = vpop.f32.mrf.mxu1 }
 0x65f   : > { %v15106_v1 = vadd.f32 %v9556_v29, %v9353_v2 }
 0x660   : > { %v9355_v31 = vpop.f32.mrf.mxu0  ;;  %v9558_v14 = vpop.f32.mrf.mxu1 }
 0x661   : > { %v15108_v52 = vadd.f32 %v9558_v14, %v9355_v31 }
 0x662   : > { %v9364_v41 = vpop.f32.mrf.mxu0  ;;  %v9563_v4 = vpop.f32.mrf.mxu1 }
 0x663   : > { %v15110_v50 = vadd.f32 %v9563_v4, %v9364_v41 }
 0x664   : > { %v9366_v30 = vpop.f32.mrf.mxu0  ;;  %v9565_v42 = vpop.f32.mrf.mxu1 }
 0x665   : > { %v15112_v12 = vadd.f32 %v9565_v42, %v9366_v30 }
 0x666   : > { %v9375_v54 = vpop.f32.mrf.mxu0  ;;  %v9570_v9 = vpop.f32.mrf.mxu1 }
 0x667   : > { %v15114_v18 = vadd.f32 %v9570_v9, %v9375_v54 }
 0x668   : > { %v9377_v27 = vpop.f32.mrf.mxu0  ;;  %v9572_v51 = vpop.f32.mrf.mxu1 }
 0x669   : > { %v15116_v10 = vadd.f32 %v9572_v51, %v9377_v27 }
 0x66a   : > { %v9386_v38 = vpop.f32.mrf.mxu0  ;;  %v9577_v24 = vpop.f32.mrf.mxu1 }
 0x66b   : > { %v15118_v17 = vadd.f32 %v9577_v24, %v9386_v38 }
 0x66c   : > { %v9388_v3 = vpop.f32.mrf.mxu0  ;;  %v9579_v43 = vpop.f32.mrf.mxu1 }
 0x66d   : > { %v15120_v16 = vadd.f32 %v9579_v43, %v9388_v3 }
 0x66e   : > { %v9397_v5 = vpop.f32.mrf.mxu0  ;;  %v9584_v63 = vpop.f32.mrf.mxu1 }
 0x66f   : > { %v15122_v59 = vadd.f32 %v9584_v63, %v9397_v5 }
 0x670   : > { %v9399_v28 = vpop.f32.mrf.mxu0  ;;  %v9586_v23 = vpop.f32.mrf.mxu1 }
 0x671   : > { %v15124_v19 = vadd.f32 %v9586_v23, %v9399_v28 }
 0x672   : > { %v9661_v39 = vpop.f32.mrf.mxu0  ;;  %v9857_v26 = vpop.f32.mrf.mxu1 }
 0x673   : > { %v9662_v36 = vadd.f32 %v9661_v39, %v15062_v45 }
 0x674   : > { %v9663_v49 = vpop.f32.mrf.mxu0  ;;  %v9859_v25 = vpop.f32.mrf.mxu1 }
 0x675   : > { %v15127_v0 = vadd.f32 %v9857_v26, %v9662_v36  ;;  %v9664_v7 = vadd.f32 %v9663_v49, %v15064_v33 }
 0x676   : > { %v9669_v15 = vpop.f32.mrf.mxu0  ;;  %v9866_v53 = vpop.f32.mrf.mxu1 }
 0x677   : > { %v15130_v35 = vadd.f32 %v9859_v25, %v9664_v7  ;;  %v9670_v44 = vadd.f32 %v9669_v15, %v15066_v6 }
 0x678   : > { %v9671_v34 = vpop.f32.mrf.mxu0  ;;  %v9868_v31 = vpop.f32.mrf.mxu1 }
 0x679   : > { %v15133_v2 = vadd.f32 %v9866_v53, %v9670_v44  ;;  %v9672_v29 = vadd.f32 %v9671_v34, %v15068_v40 }
 0x67a   : > { %v9677_v45 = vpop.f32.mrf.mxu0  ;;  %v9875_v4 = vpop.f32.mrf.mxu1 }
 0x67b   : > { %v15136_v14 = vadd.f32 %v9868_v31, %v9672_v29  ;;  %v9678_v41 = vadd.f32 %v9677_v45, %v15070_v56 }
 0x67c   : > { %v9679_v33 = vpop.f32.mrf.mxu0  ;;  %v9877_v54 = vpop.f32.mrf.mxu1 }
 0x67d   : > { %v15139_v30 = vadd.f32 %v9875_v4, %v9678_v41  ;;  %v9680_v42 = vadd.f32 %v9679_v33, %v15072_v58 }
 0x67e   : > { %v9685_v6 = vpop.f32.mrf.mxu0  ;;  %v9884_v51 = vpop.f32.mrf.mxu1 }
 0x67f   : > { %v15142_v9 = vadd.f32 %v9877_v54, %v9680_v42  ;;  %v9686_v27 = vadd.f32 %v9685_v6, %v15074_v22 }
 0x680   : > { %v9687_v40 = vpop.f32.mrf.mxu0  ;;  %v9886_v3 = vpop.f32.mrf.mxu1 }
 0x681   : > { %v15145_v38 = vadd.f32 %v9884_v51, %v9686_v27  ;;  %v9688_v24 = vadd.f32 %v9687_v40, %v15076_v13 }
 0x682   : > { %v9693_v56 = vpop.f32.mrf.mxu0  ;;  %v9893_v63 = vpop.f32.mrf.mxu1 }
 0x683   : > { %v15148_v43 = vadd.f32 %v9886_v3, %v9688_v24  ;;  %v9694_v5 = vadd.f32 %v9693_v56, %v15078_v48 }
 0x684   : > { %v9695_v58 = vpop.f32.mrf.mxu0  ;;  %v9895_v39 = vpop.f32.mrf.mxu1 }
 0x685   : > { %v15151_v28 = vadd.f32 %v9893_v63, %v9694_v5  ;;  %v9696_v23 = vadd.f32 %v9695_v58, %v15080_v47 }
 0x686   : > { %v9701_v22 = vpop.f32.mrf.mxu0  ;;  %v9902_v49 = vpop.f32.mrf.mxu1 }
 0x687   : > { %v15154_v36 = vadd.f32 %v9895_v39, %v9696_v23  ;;  %v9702_v26 = vadd.f32 %v9701_v22, %v15082_v46 }
 0x688   : > { %v9703_v13 = vpop.f32.mrf.mxu0  ;;  %v9904_v15 = vpop.f32.mrf.mxu1 }
 0x689   : > { %v15157_v7 = vadd.f32 %v9902_v49, %v9702_v26  ;;  %v9704_v25 = vadd.f32 %v9703_v13, %v15084_v20 }
 0x68a   : > { %v9709_v48 = vpop.f32.mrf.mxu0  ;;  %v9911_v34 = vpop.f32.mrf.mxu1 }
 0x68b   : > { %v15160_v44 = vadd.f32 %v9904_v15, %v9704_v25  ;;  %v9710_v53 = vadd.f32 %v9709_v48, %v15086_v32 }
 0x68c   : > { %v9711_v47 = vpop.f32.mrf.mxu0  ;;  %v9913_v45 = vpop.f32.mrf.mxu1 }
 0x68d   : > { %v15163_v29 = vadd.f32 %v9911_v34, %v9710_v53  ;;  %v9712_v31 = vadd.f32 %v9711_v47, %v15088_v21 }
 0x68e   : > { %v9717_v46 = vpop.f32.mrf.mxu0  ;;  %v9920_v33 = vpop.f32.mrf.mxu1 }
 0x68f   : > { %v15166_v41 = vadd.f32 %v9913_v45, %v9712_v31  ;;  %v9718_v4 = vadd.f32 %v9717_v46, %v15090_v55 }
 0x690   : > { %v9719_v20 = vpop.f32.mrf.mxu0  ;;  %v9922_v6 = vpop.f32.mrf.mxu1 }
 0x691   : > { %v15169_v42 = vadd.f32 %v9920_v33, %v9718_v4  ;;  %v9720_v54 = vadd.f32 %v9719_v20, %v15092_v37 }
 0x692   : > { %v9725_v32 = vpop.f32.mrf.mxu0  ;;  %v9929_v40 = vpop.f32.mrf.mxu1 }
 0x693   : > { %v15172_v27 = vadd.f32 %v9922_v6, %v9720_v54  ;;  %v9726_v51 = vadd.f32 %v9725_v32, %v15094_v8 }
 0x694   : > { %v9727_v21 = vpop.f32.mrf.mxu0  ;;  %v9931_v56 = vpop.f32.mrf.mxu1 }
 0x695   : > { %v15175_v24 = vadd.f32 %v9929_v40, %v9726_v51  ;;  %v9728_v3 = vadd.f32 %v9727_v21, %v15096_v62 }
 0x696   : > { %v9733_v55 = vpop.f32.mrf.mxu0  ;;  %v9938_v58 = vpop.f32.mrf.mxu1 }
 0x697   : > { %v15178_v5 = vadd.f32 %v9931_v56, %v9728_v3  ;;  %v9734_v63 = vadd.f32 %v9733_v55, %v15098_v11 }
 0x698   : > { %v9735_v37 = vpop.f32.mrf.mxu0  ;;  %v9940_v22 = vpop.f32.mrf.mxu1 }
 0x699   : > { %v15181_v23 = vadd.f32 %v9938_v58, %v9734_v63  ;;  %v9736_v39 = vadd.f32 %v9735_v37, %v15100_v61 }
 0x69a   : > { %v9741_v8 = vpop.f32.mrf.mxu0  ;;  %v9947_v13 = vpop.f32.mrf.mxu1 }
 0x69b   : > { %v15184_v26 = vadd.f32 %v9940_v22, %v9736_v39  ;;  %v9742_v49 = vadd.f32 %v9741_v8, %v15102_v60 }
 0x69c   : > { %v9743_v62 = vpop.f32.mrf.mxu0  ;;  %v9949_v48 = vpop.f32.mrf.mxu1 }
 0x69d   : > { %v15187_v25 = vadd.f32 %v9947_v13, %v9742_v49  ;;  %v9744_v15 = vadd.f32 %v9743_v62, %v15104_v57 }
 0x69e   : > { %v9749_v11 = vpop.f32.mrf.mxu0  ;;  %v9956_v47 = vpop.f32.mrf.mxu1 }
 0x69f   : > { %v15190_v53 = vadd.f32 %v9949_v48, %v9744_v15  ;;  %v9750_v34 = vadd.f32 %v9749_v11, %v15106_v1 }
 0x6a0   : > { %v9751_v61 = vpop.f32.mrf.mxu0  ;;  %v9958_v46 = vpop.f32.mrf.mxu1 }
 0x6a1   : > { %v15193_v31 = vadd.f32 %v9956_v47, %v9750_v34  ;;  %v9752_v45 = vadd.f32 %v9751_v61, %v15108_v52 }
 0x6a2   : > { %v9757_v60 = vpop.f32.mrf.mxu0  ;;  %v9965_v20 = vpop.f32.mrf.mxu1 }
 0x6a3   : > { %v15196_v4 = vadd.f32 %v9958_v46, %v9752_v45  ;;  %v9758_v33 = vadd.f32 %v9757_v60, %v15110_v50 }
 0x6a4   : > { %v9759_v57 = vpop.f32.mrf.mxu0  ;;  %v9967_v32 = vpop.f32.mrf.mxu1 }
 0x6a5   : > { %v15199_v54 = vadd.f32 %v9965_v20, %v9758_v33  ;;  %v9760_v6 = vadd.f32 %v9759_v57, %v15112_v12 }
 0x6a6   : > { %v9765_v1 = vpop.f32.mrf.mxu0  ;;  %v9974_v21 = vpop.f32.mrf.mxu1 }
 0x6a7   : > { %v15202_v51 = vadd.f32 %v9967_v32, %v9760_v6  ;;  %v9766_v40 = vadd.f32 %v9765_v1, %v15114_v18 }
 0x6a8   : > { %v9767_v52 = vpop.f32.mrf.mxu0  ;;  %v9976_v55 = vpop.f32.mrf.mxu1 }
 0x6a9   : > { %v15205_v3 = vadd.f32 %v9974_v21, %v9766_v40  ;;  %v9768_v56 = vadd.f32 %v9767_v52, %v15116_v10 }
 0x6aa   : > { %v15208_v50 = vpop.f32.mrf.mxu0  ;;  %v15212_v58 = vpop.f32.mrf.mxu1 }
 0x6ab   : > { %v15210_v63 = vadd.f32 %v9976_v55, %v9768_v56 }
 0x6ac   : > { %v15214_v12 = vpop.f32.mrf.mxu0  ;;  %v15216_v37 = vpop.f32.mrf.mxu1 }
 0x6ae   : > { %v15218_v39 = vpop.f32.mrf.mxu0  ;;  %v15220_v18 = vpop.f32.mrf.mxu1 }
 0x6b0   : > { %v15222_v22 = vpop.f32.mrf.mxu0  ;;  %v15224_v8 = vpop.f32.mrf.mxu1 }
 0x6b2   : > { %v10070_v10 = vpop.f32.mrf.mxu0  ;;  %v10249_v49 = vpop.f32.mrf.mxu1 }
 0x6b3   : > { %v10071_v62 = vadd.f32 %v10070_v10, %v15127_v0 }
 0x6b4   : > { %v10072_v13 = vpop.f32.mrf.mxu0  ;;  %v10251_v15 = vpop.f32.mrf.mxu1 }
 0x6b5   : > { %v10073_v11 = vadd.f32 %v10072_v13, %v15130_v35  ;;  %v10250_v45 = vadd.f32 %v10249_v49, %v10071_v62 }
 0x6b6   : > { %v10077_v48 = vpop.f32.mrf.mxu0  ;;  %v10256_v47 = vpop.f32.mrf.mxu1 }
 0x6b7   : > { %v10078_v34 = vadd.f32 %v10077_v48, %v15133_v2  ;;  %v10252_v57 = vadd.f32 %v10251_v15, %v10073_v11 }
 0x6b8   : > { %v10079_v61 = vpop.f32.mrf.mxu0  ;;  %v10258_v33 = vpop.f32.mrf.mxu1 }
 0x6b9   : > { %v10257_v46 = vadd.f32 %v10256_v47, %v10078_v34  ;;  %v10080_v60 = vadd.f32 %v10079_v61, %v15136_v14 }
 0x6ba   : > { %v10084_v20 = vpop.f32.mrf.mxu0  ;;  %v10263_v0 = vpop.f32.mrf.mxu1 }
 0x6bb   : > { %v10361_v6 = vmin.f32 %v10250_v45, %v10257_v46  ;;  %v10259_v32 = vadd.f32 %v10258_v33, %v10080_v60  ;;  %v10085_v1 = vadd.f32 %v10084_v20, %v15139_v30 }
 0x6bc   : > { %v10086_v40 = vpop.f32.mrf.mxu0  ;;  %v10265_v2 = vpop.f32.mrf.mxu1 }
 0x6bd   : > { %v10362_v21 = vmin.f32 %v10252_v57, %v10259_v32  ;;  %v10264_v52 = vadd.f32 %v10263_v0, %v10085_v1  ;;  %v10087_v35 = vadd.f32 %v10086_v40, %v15142_v9 }
 0x6be   : > { %v10091_v56 = vpop.f32.mrf.mxu0  ;;  %v10270_v14 = vpop.f32.mrf.mxu1 }
 0x6bf   : > { %v10365_v55 = vmin.f32 %v10361_v6, %v10264_v52  ;;  %v10266_v10 = vadd.f32 %v10265_v2, %v10087_v35  ;;  %v10092_v49 = vadd.f32 %v10091_v56, %v15145_v38 }
 0x6c0   : > { %v10093_v13 = vpop.f32.mrf.mxu0  ;;  %v10272_v11 = vpop.f32.mrf.mxu1 }
 0x6c1   : > { %v10366_v62 = vmin.f32 %v10362_v21, %v10266_v10  ;;  %v10271_v15 = vadd.f32 %v10270_v14, %v10092_v49  ;;  %v10094_v48 = vadd.f32 %v10093_v13, %v15148_v43 }
 0x6c2   : > { %v10098_v30 = vpop.f32.mrf.mxu0  ;;  %v10277_v45 = vpop.f32.mrf.mxu1 }
 0x6c3   : > { %v10369_v34 = vmin.f32 %v10365_v55, %v10271_v15  ;;  %v10273_v47 = vadd.f32 %v10272_v11, %v10094_v48  ;;  %v10099_v61 = vadd.f32 %v10098_v30, %v15151_v28 }
 0x6c4   : > { %v10100_v9 = vpop.f32.mrf.mxu0  ;;  %v10279_v20 = vpop.f32.mrf.mxu1 }
 0x6c5   : > { %v10370_v46 = vmin.f32 %v10366_v62, %v10273_v47  ;;  %v10278_v60 = vadd.f32 %v10277_v45, %v10099_v61  ;;  %v10101_v33 = vadd.f32 %v10100_v9, %v15154_v36 }
 0x6c6   : > { %v10105_v38 = vpop.f32.mrf.mxu0  ;;  %v10284_v1 = vpop.f32.mrf.mxu1 }
 0x6c7   : > { %v10373_v57 = vmin.f32 %v10369_v34, %v10278_v60  ;;  %v10280_v6 = vadd.f32 %v10279_v20, %v10101_v33  ;;  %v10106_v32 = vadd.f32 %v10105_v38, %v15157_v7 }
 0x6c8   : > { %v10107_v43 = vpop.f32.mrf.mxu0  ;;  %v10286_v52 = vpop.f32.mrf.mxu1 }
 0x6c9   : > { %v10374_v0 = vmin.f32 %v10370_v46, %v10280_v6  ;;  %v10285_v40 = vadd.f32 %v10284_v1, %v10106_v32  ;;  %v10108_v21 = vadd.f32 %v10107_v43, %v15160_v44 }
 0x6ca   : > { %v10112_v28 = vpop.f32.mrf.mxu0  ;;  %v10291_v55 = vpop.f32.mrf.mxu1 }
 0x6cb   : > { %v10377_v35 = vmin.f32 %v10373_v57, %v10285_v40  ;;  %v10287_v2 = vadd.f32 %v10286_v52, %v10108_v21  ;;  %v10113_v56 = vadd.f32 %v10112_v28, %v15163_v29 }
 0x6cc   : > { %v10114_v36 = vpop.f32.mrf.mxu0  ;;  %v10293_v13 = vpop.f32.mrf.mxu1 }
 0x6cd   : > { %v10378_v10 = vmin.f32 %v10374_v0, %v10287_v2  ;;  %v10292_v49 = vadd.f32 %v10291_v55, %v10113_v56  ;;  %v10115_v14 = vadd.f32 %v10114_v36, %v15166_v41 }
 0x6ce   : > { %v10119_v7 = vpop.f32.mrf.mxu0  ;;  %v10298_v11 = vpop.f32.mrf.mxu1 }
 0x6cf   : > { %v10381_v62 = vmin.f32 %v10377_v35, %v10292_v49  ;;  %v10294_v15 = vadd.f32 %v10293_v13, %v10115_v14  ;;  %v10120_v48 = vadd.f32 %v10119_v7, %v15169_v42 }
 0x6d0   : > { %v10121_v44 = vpop.f32.mrf.mxu0  ;;  %v10300_v61 = vpop.f32.mrf.mxu1 }
 0x6d1   : > { %v10382_v30 = vmin.f32 %v10378_v10, %v10294_v15  ;;  %v10299_v34 = vadd.f32 %v10298_v11, %v10120_v48  ;;  %v10122_v47 = vadd.f32 %v10121_v44, %v15172_v27 }
 0x6d2   : > { %v10126_v29 = vpop.f32.mrf.mxu0  ;;  %v10305_v60 = vpop.f32.mrf.mxu1 }
 0x6d3   : > { %v10385_v45 = vmin.f32 %v10381_v62, %v10299_v34  ;;  %v10301_v9 = vadd.f32 %v10300_v61, %v10122_v47  ;;  %v10127_v46 = vadd.f32 %v10126_v29, %v15175_v24 }
 0x6d4   : > { %v10128_v41 = vpop.f32.mrf.mxu0  ;;  %v10307_v57 = vpop.f32.mrf.mxu1 }
 0x6d5   : > { %v10386_v33 = vmin.f32 %v10382_v30, %v10301_v9  ;;  %v10306_v20 = vadd.f32 %v10305_v60, %v10127_v46  ;;  %v10129_v38 = vadd.f32 %v10128_v41, %v15178_v5  ;;  %v9776_v60 = vadd.f32 %v15214_v12, %v15120_v16 }
 0x6d6   : > { %v10133_v42 = vpop.f32.mrf.mxu0  ;;  %v10312_v43 = vpop.f32.mrf.mxu1  ;;  %v9784_v12 = vadd.f32 %v15222_v22, %v15124_v19 }
 0x6d7   : > { %v10389_v6 = vmin.f32 %v10385_v45, %v10306_v20  ;;  %v10308_v32 = vadd.f32 %v10307_v57, %v10129_v38  ;;  %v10134_v1 = vadd.f32 %v10133_v42, %v15181_v23 }
 0x6d8   : > { %v10135_v27 = vpop.f32.mrf.mxu0  ;;  %v10314_v52 = vpop.f32.mrf.mxu1 }
 0x6d9   : > { %v10390_v0 = vmin.f32 %v10386_v33, %v10308_v32  ;;  %v10313_v40 = vadd.f32 %v10312_v43, %v10134_v1  ;;  %v10136_v21 = vadd.f32 %v10135_v27, %v15184_v26  ;;  %v9986_v32 = vadd.f32 %v15216_v37, %v9776_v60 }
 0x6da   : > { %v10140_v24 = vpop.f32.mrf.mxu0  ;;  %v10319_v56 = vpop.f32.mrf.mxu1 }
 0x6db   : > { %v10393_v28 = vmin.f32 %v10389_v6, %v10313_v40  ;;  %v10315_v35 = vadd.f32 %v10314_v52, %v10136_v21  ;;  %v10141_v2 = vadd.f32 %v10140_v24, %v15187_v25 }
 0x6dc   : > { %v10142_v5 = vpop.f32.mrf.mxu0  ;;  %v10321_v49 = vpop.f32.mrf.mxu1 }
 0x6dd   : > { %v10394_v55 = vmin.f32 %v10390_v0, %v10315_v35  ;;  %v10320_v36 = vadd.f32 %v10319_v56, %v10141_v2  ;;  %v10143_v10 = vadd.f32 %v10142_v5, %v15190_v53  ;;  %v9774_v53 = vadd.f32 %v15208_v50, %v15118_v17 }
 0x6de   : > { %v10147_v23 = vpop.f32.mrf.mxu0  ;;  %v10326_v62 = vpop.f32.mrf.mxu1  ;;  %v9782_v17 = vadd.f32 %v15218_v39, %v15122_v59 }
 0x6df   : > { %v10397_v14 = vmin.f32 %v10393_v28, %v10320_v36  ;;  %v10322_v13 = vadd.f32 %v10321_v49, %v10143_v10  ;;  %v10148_v7 = vadd.f32 %v10147_v23, %v15193_v31  ;;  %v10421_v10 = vld [vmem:[#allocation2 + $0x18] sm:$0xff]  ;;  %v10422_v23 = vld [vmem:[#allocation2 + $0x8] sm:$0xff] }
 0x6e0   : > { %v10149_v26 = vpop.f32.mrf.mxu0  ;;  %v10328_v44 = vpop.f32.mrf.mxu1  ;;  %v9993_v0 = vadd.f32 %v15220_v18, %v9782_v17 }
 0x6e1   : > { %v10398_v15 = vmin.f32 %v10394_v55, %v10322_v13  ;;  %v10327_v48 = vadd.f32 %v10326_v62, %v10148_v7  ;;  %v10150_v11 = vadd.f32 %v10149_v26, %v15196_v4 }
 0x6e2   : > { %v10154_v25 = vpop.f32.mrf.mxu0  ;;  %v10333_v61 = vpop.f32.mrf.mxu1 }
 0x6e3   : > { %v10401_v30 = vmin.f32 %v10397_v14, %v10327_v48  ;;  %v10329_v34 = vadd.f32 %v10328_v44, %v10150_v11  ;;  %v10155_v47 = vadd.f32 %v10154_v25, %v15199_v54  ;;  %v9984_v54 = vadd.f32 %v15212_v58, %v9774_v53 }
 0x6e4   : > { %v10156_v29 = vpop.f32.mrf.mxu0  ;;  %v10335_v46 = vpop.f32.mrf.mxu1 }
 0x6e5   : > { %v10402_v45 = vmin.f32 %v10398_v15, %v10329_v34  ;;  %v10334_v9 = vadd.f32 %v10333_v61, %v10155_v47  ;;  %v10157_v31 = vadd.f32 %v10156_v29, %v15202_v51 }
 0x6e6   : > { %v10161_v4 = vpop.f32.mrf.mxu0  ;;  %v10340_v38 = vpop.f32.mrf.mxu1 }
 0x6e7   : > { %v10405_v41 = vmin.f32 %v10401_v30, %v10334_v9  ;;  %v10336_v33 = vadd.f32 %v10335_v46, %v10157_v31  ;;  %v10162_v20 = vadd.f32 %v10161_v4, %v15205_v3 }
 0x6e8   : > { %v10163_v57 = vpop.f32.mrf.mxu0  ;;  %v10342_v6 = vpop.f32.mrf.mxu1 }
 0x6e9   : > { %v10406_v50 = vmin.f32 %v10402_v45, %v10336_v33  ;;  %v10341_v42 = vadd.f32 %v10340_v38, %v10162_v20  ;;  %v10164_v51 = vadd.f32 %v10163_v57, %v15210_v63  ;;  %v9995_v63 = vadd.f32 %v15224_v8, %v9784_v12 }
 0x6ea   : > { %v10168_v16 = vpop.f32.mrf.mxu0  ;;  %v10347_v27 = vpop.f32.mrf.mxu1 }
 0x6eb   : > { %v10409_v1 = vmin.f32 %v10405_v41, %v10341_v42  ;;  %v10343_v3 = vadd.f32 %v10342_v6, %v10164_v51  ;;  %v10169_v43 = vadd.f32 %v10168_v16, %v9984_v54 }
 0x6ec   : > { %v10170_v58 = vpop.f32.mrf.mxu0  ;;  %v10349_v21 = vpop.f32.mrf.mxu1 }
 0x6ed   : > { %v10410_v40 = vmin.f32 %v10406_v50, %v10343_v3  ;;  %v10348_v59 = vadd.f32 %v10347_v27, %v10169_v43  ;;  %v10171_v39 = vadd.f32 %v10170_v58, %v9986_v32 }
 0x6ee   : > { %v10175_v52 = vpop.f32.mrf.mxu0  ;;  %v10354_v35 = vpop.f32.mrf.mxu1 }
 0x6ef   : > { %v10413_v24 = vmin.f32 %v10409_v1, %v10348_v59  ;;  %v10350_v37 = vadd.f32 %v10349_v21, %v10171_v39  ;;  %v10176_v28 = vadd.f32 %v10175_v52, %v9993_v0 }
 0x6f0   : > { %v10177_v2 = vpop.f32.mrf.mxu0  ;;  %v10356_v5 = vpop.f32.mrf.mxu1 }
 0x6f1   : > { %v10414_v19 = vmin.f32 %v10410_v40, %v10350_v37  ;;  %v10355_v22 = vadd.f32 %v10354_v35, %v10176_v28  ;;  %v10178_v56 = vadd.f32 %v10177_v2, %v9995_v63 }
 0x6f3   : > { %v10417_v55 = vmin.f32 %v10413_v24, %v10355_v22  ;;  %v10357_v36 = vadd.f32 %v10356_v5, %v10178_v56 }
 0x6f5   : > { %v10425_v18 = vmin.f32 %v10421_v10, %v10417_v55  ;;  %v10418_v49 = vmin.f32 %v10414_v19, %v10357_v36  ;;  %10434 = sbr.rel (%p10743_p1) target bundleno = 1839 (0x72f), region = 44 }
 0x6f7   : > { %10429 = vst [vmem:[#allocation2 + $0x18] sm:$0xff] %v10425_v18  ;;  %v10426_v14 = vmin.f32 %v10422_v23, %v10418_v49 }
 0x6f9   : > { %10430 = vst [vmem:[#allocation2 + $0x8] sm:$0xff] %v10426_v14 }
 0x6fa   : > { %v10435_v8 = vld [vmem:[#allocation2 + $0x10] sm:$0xff]  ;;  %v10436_v13 = vld [vmem:[#allocation2] sm:$0xff]  ;;  %v10928_v6 = vmov 1966171168   ;;  %v10510_v16 = vlaneseq }
 0x6fb   : > { %v10439_v26 = vrot.slane %v10435_v8, 4  ;;  %v10445_v15 = vrot.slane %v10436_v13, 4  ;;  %v10508_v32 = vunpack.c.l.s4 %v10928_v6 }
 0x6fc   : > { %v10511_v1 = vshrl.u32 %v10510_v16, 7  ;;  %vm10564_vm10 = vcmp.lt.s32.totalorder %v10510_v16, 512 }
 0x6fd   : > { %v10440_v44 = vmin.f32 %v10435_v8, %v10439_v26  ;;  %v10446_v25 = vmin.f32 %v10436_v13, %v10445_v15  ;;  %v10509_v12 = vunpack.c.0.s8 %v10508_v32  ;;  %v10495_v15 = vld [vmem:[%s263_s29] sm:$0xf] }
 0x6fe   : > { %v10437_v7 = vld [vmem:[#allocation2 + $0x18] sm:$0xff]  ;;  %vm10496_vm9 = vcmp.ne.f32.partialorder %v10495_v15, 0.0 }
 0x6ff   : > { %v10451_v48 = vrot.slane %v10437_v7, 4  ;;  %v10441_v47 = vrot.slane %v10440_v44, 2  ;;  %v10447_v61 = vrot.slane %v10446_v25, 2  ;;  %v10512_v27 = vsub.s32 %v10509_v12, %v10511_v1 }
 0x700   : > { %v10438_v62 = vld [vmem:[#allocation2 + $0x8] sm:$0xff] }
 0x701   : > { %v10457_v11 = vrot.slane %v10438_v62, 4  ;;  %v10452_v30 = vmin.f32 %v10437_v7, %v10451_v48  ;;  %v10442_v45 = vmin.f32 %v10440_v44, %v10441_v47  ;;  %v10448_v9 = vmin.f32 %v10446_v25, %v10447_v61 }
 0x703   : > { %v10458_v34 = vmin.f32 %v10438_v62, %v10457_v11  ;;  %v10453_v53 = vrot.slane %v10452_v30, 2  ;;  %v10443_v60 = vrot.slane %v10442_v45, 1  ;;  %v10449_v4 = vrot.slane %v10448_v9, 1 }
 0x705   : > { %v10459_v29 = vrot.slane %v10458_v34, 2  ;;  %v10454_v31 = vmin.f32 %v10452_v30, %v10453_v53  ;;  %v10444_v20 = vmin.f32 %v10442_v45, %v10443_v60  ;;  %v10450_v38 = vmin.f32 %v10448_v9, %v10449_v4 }
 0x707   : > { %v10460_v46 = vmin.f32 %v10458_v34, %v10459_v29  ;;  %v10455_v41 = vrot.slane %v10454_v31, 1  ;;  %v10463_v17 = vmax.f32 %v10444_v20, 0.0  ;;  %v10464_v50 = vmax.f32 %v10450_v38, 0.0  ;;  %v10560_v34 = vld [vmem:[%s268_s10] sm:$0xf] }
 0x709   : > { %v10461_v33 = vrot.slane %v10460_v46, 1  ;;  %v10456_v54 = vmin.f32 %v10454_v31, %v10455_v41  ;;  %10824 = vrsqrt.f32 %v10463_v17  ;;  %vm10469_vm1 = vcmp.eq.f32.partialorder %v10463_v17, inf }
 0x70a   : > { %10826 = vrsqrt.f32 %v10464_v50  ;;  %vm10471_vm2 = vcmp.eq.f32.partialorder %v10463_v17, 0.0  ;;  %v10472_v43 = vand.u32 2147483648, %v10463_v17  ;;  %vm10476_vm3 = vcmp.eq.f32.partialorder %v10464_v50, inf }
 0x70b   : > { %v10462_v57 = vmin.f32 %v10460_v46, %v10461_v33  ;;  %v10465_v42 = vmax.f32 %v10456_v54, 0.0  ;;  %vm10478_vm4 = vcmp.eq.f32.partialorder %v10464_v50, 0.0  ;;  %v10479_v40 = vand.u32 2147483648, %v10464_v50 }
 0x70d   : > { %v10466_v51 = vmax.f32 %v10462_v57, 0.0  ;;  %10828 = vrsqrt.f32 %v10465_v42  ;;  %vm10483_vm5 = vcmp.eq.f32.partialorder %v10465_v42, inf  ;;  %vm10485_vm6 = vcmp.eq.f32.partialorder %v10465_v42, 0.0 }
 0x70e   : > { %v10486_v21 = vand.u32 2147483648, %v10465_v42 }
 0x70f   : > { %10830 = vrsqrt.f32 %v10466_v51  ;;  %vm10490_vm7 = vcmp.eq.f32.partialorder %v10466_v51, inf  ;;  %v10493_v37 = vand.u32 2147483648, %v10466_v51  ;;  %vm10492_vm8 = vcmp.eq.f32.partialorder %v10466_v51, 0.0 }
 0x716   : > { %v10825_v3 = vpop.eup %10824 }
 0x717   : > { %v10827_v58 = vpop.eup %10826  ;;  %v10468_v0 = vmul.f32 %v10825_v3, %v10463_v17 }
 0x718   : > { %v10475_v39 = vmul.f32 %v10827_v58, %v10464_v50 }
 0x719   : > { %v10470_v63 = vsel %vm10469_vm1, %v10463_v17, %v10468_v0 }
 0x71a   : > { %v10829_v59 = vpop.eup %10828  ;;  %v10473_v28 = vsel %vm10471_vm2, %v10472_v43, %v10470_v63  ;;  %v10477_v35 = vsel %vm10476_vm3, %v10464_v50, %v10475_v39 }
 0x71b   : > { %v10482_v24 = vmul.f32 %v10829_v59, %v10465_v42  ;;  %v10480_v19 = vsel %vm10478_vm4, %v10479_v40, %v10477_v35  ;;  %v10497_v56 = vsub.f32 1.0, %v10473_v28 }
 0x71c   : > { %v10831_v52 = vpop.eup %10830  ;;  %v10498_v36 = vsub.f32 1.0, %v10480_v19  ;;  %v10534_v10 = vcombine.low %v10473_v28, %v10480_v19 }
 0x71d   : > { %v10489_v2 = vmul.f32 %v10831_v52, %v10466_v51  ;;  %v10484_v22 = vsel %vm10483_vm5, %v10465_v42, %v10482_v24 }
 0x71e   : > { %v10487_v5 = vsel %vm10485_vm6, %v10486_v21, %v10484_v22  ;;  %v10505_v14 = vcombine.low %v10497_v56, %v10498_v36  ;;  %v10542_v13 = vrot.slane %v10534_v10, %v10512_v27 }
 0x71f   : > { %v10491_v55 = vsel %vm10490_vm7, %v10466_v51, %v10489_v2  ;;  %v10499_v49 = vsub.f32 1.0, %v10487_v5 }
 0x720   : > { %v10494_v18 = vsel %vm10492_vm8, %v10493_v37, %v10491_v55  ;;  %v10513_v62 = vrot.slane %v10505_v14, %v10512_v27 }
 0x721   : > { %v10500_v23 = vsub.f32 1.0, %v10494_v18  ;;  %v10535_v8 = vcombine.low %v10487_v5, %v10494_v18 }
 0x723   : > { %v10506_v7 = vcombine.low %v10499_v49, %v10500_v23  ;;  %v10549_v26 = vrot.slane %v10535_v8, %v10512_v27 }
 0x725   : > { %v10520_v48 = vrot.slane %v10506_v7, %v10512_v27  ;;  %v10550_v11 = vcombine.low %v10542_v13, %v10549_v26 }
 0x727   : > { %v10521_v44 = vcombine.low %v10513_v62, %v10520_v48  ;;  %v10557_v25 = vrot.slane %v10550_v11, %v10512_v27 }
 0x729   : > { %v10528_v30 = vrot.slane %v10521_v44, %v10512_v27 }
 0x72b   : > { %v10559_v47 = vsel %vm10496_vm9, %v10528_v30, %v10557_v25 }
 0x72c   : > { %v10561_v61 = vmul.f32 %v10560_v34, %v10559_v47 }
 0x72e   : > { %10566 = vst.msk [vmem:[%s247_s11] sm:$0xf] %vm10564_vm10, %v10561_v61 }
 0x72f PF: > { %s10749_s12 = sshll.u32 %s10912_s19, 6  ;;  %s10582_s24 = sshll.u32 %s247_s11, 4  ;;  %s10583_s24 = int_to_ptr.vmem [resolvable:$true] %s10582_s24 }
 0x730   : > { %s10580_s23 = scalar_lea.hbm %s15333_s4, %s10749_s12  ;;  %s16273_s9 = sand.u32 1, %s10900_s16  }
 0x731   : > { %s10568_s29 = scalar_lea.sflag [#allocation4], %s16273_s9  ;;  %s10832_s30 = scalar_lea.vmem %s10583_s24, 64 }
 0x732   : > { %p10833_p2 = scmp.ne.s32.totalorder %s10583_s24, %s10832_s30  ;;  %s10929_s7 = smov [#allocation3]  }
 0x733   : > { %s10836_s10 = sshll.u32 %s10929_s7, 4  ;;  %s10837_s10 = int_to_ptr.vmem [resolvable:$false] %s10836_s10 }
 0x734   : > { %p10834_p4 = pnand %p10833_p2, %p11004_p3  ;;  %s10838_s18 = scalar_lea.vmem %s10837_s10, 128 }
 0x735   : > { %p10839_p6 = scmp.lt.s32.totalorder %s10583_s24, %s10837_s10  ;;  %p10840_p7 = scmp.lt.s32.totalorder %s10838_s18, %s10832_s30 }
 0x736   : > { %p10835_p5 = pneg %p10834_p4 }
 0x737   : > { %p10841_p8 = por %p10840_p7, %p10839_p6 }
 0x739   : > { %p10842_p10 = pnand %p10841_p8, %p10835_p5 }
 0x73b   : > { %10845 = shalt.err (!%p10842_p10)
}
 0x73c   : > { %s10846_s19 = scalar_lea.hbm %s10580_s23, 64  ;;  %s10850_s25 = scalar_lea.hbm %s15333_s4, 192 }
 0x73d   : > { %p10847_p11 = scmp.ne.s32.totalorder %s10580_s23, %s10846_s19  ;;  %p10851_p0 = scmp.lt.s32.totalorder %s10580_s23, %s15333_s4 }
 0x73e   : > { %p10852_p1 = scmp.lt.s32.totalorder %s10850_s25, %s10846_s19 }
 0x73f   : > { %p10848_p12 = pnand %p10847_p11, %p11004_p3 }
 0x740   : > { %p10853_p2 = por %p10852_p1, %p10851_p0 }
 0x741   : > { %p10849_p13 = pneg %p10848_p12 }
 0x743   : > { %p10854_p4 = pnand %p10853_p2, %p10849_p13 }
 0x745   : > { %10857 = shalt.err (!%p10854_p4)
}
 0x746   : > { %10750 = dma.vmem_to_hbm [thread:$0]  (%p11004_p3), %s10583_s24, 64, %s10580_s23, %s10568_s29  }
 0x747 PF: > { %p10756_p5 = scmp.ge.s32.totalorder %s10924_s22, 2  ;;  %s10594_s12 = sand.u32 1, %s10896_s15  }
 0x748   : > { %s10595_s13 = scalar_lea.sflag [#allocation4], %s10594_s12 }
 0x749   : > { %p10753_p6 = pnand %p10756_p5, %p11014_p9 }
 0x74b   : > { %p10754_p7 = pneg %p10753_p6 }
 0x74d   : > { %10891 = dma.done.wait (%p10754_p7), %s10595_s13, 64  }
 0x74e   : > { %10893 = vsyncadd (%p10754_p7), %s10595_s13, 4294967232  ;;  %s17_s22 = sadd.s32 1, %s10924_s22   ;;  %s16274_s27 = sld [smem:[#allocation6_spill]] }
 0x74f   : > { %p14_p8 = scmp.ge.s32.totalorder %s17_s22, 11   ;;  %s16275_s14 = sld [smem:[#allocation7_spill]] }
 0x750   : > { %s16276_s15 = smov %s10900_s16  ;;  %s16277_s16 = smov %s10904_s17 }
 0x751   : > { %s16278_s17 = smov %s11022_s5  ;;  %s16279_s18 = smov %s10916_s20 }
 0x752   : > { %s16280_s19 = smov %s10920_s21  ;;  %16 = sbr.rel (!%p14_p8) target bundleno = 5 (0x5), region = 91 }
 0x754   : > { %s16281_s20 = smov %s16274_s27 }
 0x755   : > { %s16282_s21 = smov %s16275_s14 }
 0x757   :  { %10600 = vsyncpa [#allocation4], 1 }
 0x758   :  { %10602 = vsyncpa [#allocation4 + $0x1], 1 }

</bundles_post_ra>
